<compile_context>
chip_gen: v6e
topology: v6e:2x2x1
jax: 0.10.0
libtpu: 0.0.40
codegen_flags: <defaults>
</compile_context>

<pallas_src>
import jax
import jax.numpy as jnp
import numpy as np
from jax.experimental import pallas as pl
from jax.experimental.pallas import tpu as pltpu

LRELU_SLOPE = 0.2
BN_EPS = 1e-5
PAD_CIN = 8                       # conv1 input channels padded 3 -> 8 (K = 8*16 = 128)
VMEM_LIMIT = 32 * 1024 * 1024     # safe on v5e/v6e/v7x; working sets are << this


# ----------------------------- Pallas kernels ------------------------------

def _conv_lrelu_kernel(p_ref, w_ref, o_ref):
    # conv-as-matmul (bf16 in, f32 accum) + LeakyReLU(0.2); one M tile per step.
    y = jnp.dot(p_ref[...], w_ref[...], preferred_element_type=jnp.float32)
    o_ref[...] = jnp.where(y >= 0, y, LRELU_SLOPE * y).astype(o_ref.dtype)


def _conv_bn_lrelu_kernel(p_ref, w_ref, o_ref, y_ref, s_ref, ss_ref):
    # conv-as-matmul + BatchNorm (global batch stats, affine=False) + LeakyReLU.
    # Two-pass-safe under M tiling: raw conv output is staged in VMEM scratch,
    # sum/sumsq accumulated per channel, normalization done on the last step.
    i = pl.program_id(0)
    tm = p_ref.shape[0]

    @pl.when(i == 0)
    def _():
        s_ref[...] = jnp.zeros_like(s_ref)
        ss_ref[...] = jnp.zeros_like(ss_ref)

    y = jnp.dot(p_ref[...], w_ref[...], preferred_element_type=jnp.float32)
    row0 = pl.multiple_of(i * tm, tm)
    y_ref[pl.ds(row0, tm), :] = y
    s_ref[...] += jnp.sum(y, axis=0, keepdims=True)
    ss_ref[...] += jnp.sum(y * y, axis=0, keepdims=True)

    @pl.when(i == pl.num_programs(0) - 1)
    def _():
        m_total = y_ref.shape[0]
        inv_m = 1.0 / m_total
        mean = s_ref[...] * inv_m
        var = jnp.maximum(ss_ref[...] * inv_m - mean * mean, 0.0)   # biased (PyTorch BN)
        yn = (y_ref[...] - mean) * jax.lax.rsqrt(var + BN_EPS)
        o_ref[...] = jnp.where(yn >= 0, yn, LRELU_SLOPE * yn).astype(o_ref.dtype)


def _final_conv_kernel(p_ref, w_ref, o_ref):
    # conv5: Cout = 1 -> VPU multiply + cross-lane reduction instead of an MXU
    # matmul with lane width 1.
    prod = p_ref[...].astype(jnp.float32) * w_ref[...].astype(jnp.float32)
    o_ref[...] = jnp.sum(prod, axis=1, keepdims=True)


# ------------------------------ JAX glue -----------------------------------

def _pick_tile(m, target):
    tm = min(m, target)
    while m % tm != 0:
        tm //= 2
    return max(tm, 1)


def _im2col_nhwc(x, k, stride, pad):
    """x: (B, H, W, C) bf16 -> patches (B*Ho*Wo, k*k*C), row order (kh, kw, C)
    matching the precomputed (k*k*C, Cout) weight matrices."""
    B, H, W, C = x.shape
    xp = jnp.pad(x, ((0, 0), (pad, pad), (pad, pad), (0, 0)))
    Ho = (H + 2 * pad - k) // stride + 1
    Wo = (W + 2 * pad - k) // stride + 1
    cols = []
    for ki in range(k):
        for kj in range(k):
            cols.append(xp[:, ki:ki + stride * Ho:stride, kj:kj + stride * Wo:stride, :])
    p = jnp.stack(cols, axis=3)                       # (B, Ho, Wo, k*k, C)
    p = p.reshape(B * Ho * Wo, k * k * C)
    return p, Ho, Wo


def _conv_lrelu(x, wm, stride, pad):
    B = x.shape[0]
    p, Ho, Wo = _im2col_nhwc(x, 4, stride, pad)
    K, Cout = wm.shape
    M = p.shape[0]
    tm = _pick_tile(M, 512)
    y = pl.pallas_call(
        _conv_lrelu_kernel,
        out_shape=jax.ShapeDtypeStruct((M, Cout), jnp.bfloat16),
        grid=(M // tm,),
        in_specs=[pl.BlockSpec((tm, K), lambda i: (i, 0)),
                  pl.BlockSpec((K, Cout), lambda i: (0, 0))],
        out_specs=pl.BlockSpec((tm, Cout), lambda i: (i, 0)),
        compiler_params=pltpu.CompilerParams(
            dimension_semantics=("parallel",),
            vmem_limit_bytes=VMEM_LIMIT),
    )(p, wm)
    return y.reshape(B, Ho, Wo, Cout)


def _conv_bn_lrelu(x, wm, stride, pad):
    B = x.shape[0]
    p, Ho, Wo = _im2col_nhwc(x, 4, stride, pad)
    K, Cout = wm.shape
    M = p.shape[0]
    tm = _pick_tile(M, 256)
    y = pl.pallas_call(
        _conv_bn_lrelu_kernel,
        out_shape=jax.ShapeDtypeStruct((M, Cout), jnp.bfloat16),
        grid=(M // tm,),
        in_specs=[pl.BlockSpec((tm, K), lambda i: (i, 0)),
                  pl.BlockSpec((K, Cout), lambda i: (0, 0))],
        out_specs=pl.BlockSpec((M, Cout), lambda i: (0, 0)),   # resident; written on last step
        scratch_shapes=[pltpu.VMEM((M, Cout), jnp.float32),    # raw conv output
                        pltpu.VMEM((1, Cout), jnp.float32),    # per-channel sum
                        pltpu.VMEM((1, Cout), jnp.float32)],   # per-channel sum of squares
        compiler_params=pltpu.CompilerParams(
            dimension_semantics=("arbitrary",),                # sequential: BN accumulation
            vmem_limit_bytes=VMEM_LIMIT),
    )(p, wm)
    return y.reshape(B, Ho, Wo, Cout)


def _final_conv(x, w_row):
    # x: (B, 4, 4, 256) NHWC; conv5 (k=4, s=1, p=0) consumes the whole window,
    # so patches == flattened activations in (h, w, c) order.
    B = x.shape[0]
    p = x.reshape(B, -1)
    out = pl.pallas_call(
        _final_conv_kernel,
        out_shape=jax.ShapeDtypeStruct((B, 1), jnp.float32),
        in_specs=[pl.BlockSpec(memory_space=pltpu.MemorySpace.VMEM),
                  pl.BlockSpec(memory_space=pltpu.MemorySpace.VMEM)],
        out_specs=pl.BlockSpec(memory_space=pltpu.MemorySpace.VMEM),
        compiler_params=pltpu.CompilerParams(vmem_limit_bytes=VMEM_LIMIT),
    )(p, w_row)
    return jnp.squeeze(out)


def netd_forward(x_nchw, params):
    # one-time layout change NCHW -> NHWC (bf16) + zero-pad input channels 3 -> 8
    x = jnp.transpose(x_nchw, (0, 2, 3, 1)).astype(jnp.bfloat16)
    x = jnp.pad(x, ((0, 0), (0, 0), (0, 0), (0, PAD_CIN - x.shape[-1])))
    x = _conv_lrelu(x, params["w1"], stride=2, pad=1)      # (B, 32, 32, 64)
    x = _conv_bn_lrelu(x, params["w2"], stride=2, pad=1)   # (B, 16, 16, 128)
    x = _conv_bn_lrelu(x, params["w3"], stride=2, pad=1)   # (B,  8,  8, 256)
    x = _conv_bn_lrelu(x, params["w4"], stride=2, pad=1)   # (B,  4,  4, 256)
    return _final_conv(x, params["w5"])                    # (B,)


def prepare_params(torch_params):
    """Torch-layout OIHW f32 weights -> precomputed bf16 (K, Cout) matmul matrices."""
    def to_mat(w, pad_cin=None):
        Cout, Cin, k, _ = w.shape
        if pad_cin is not None and pad_cin > Cin:
            w = jnp.pad(w, ((0, 0), (0, pad_cin - Cin), (0, 0), (0, 0)))
        wm = jnp.transpose(w, (2, 3, 1, 0)).reshape(k * k * w.shape[1], Cout)
        return wm.astype(jnp.bfloat16)
    return {
        "w1": to_mat(torch_params["conv1"], pad_cin=PAD_CIN),   # (128,   64)
        "w2": to_mat(torch_params["conv2"]),                    # (1024, 128)
        "w3": to_mat(torch_params["conv3"]),                    # (2048, 256)
        "w4": to_mat(torch_params["conv4"]),                    # (4096, 256)
        "w5": to_mat(torch_params["conv5"]).reshape(1, -1),     # (1,   4096)
    }


# --------------------------- pure-JAX reference -----------------------------

def _ref_conv(x, w, stride, pad):
    return jax.lax.conv_general_dilated(
        x, w, window_strides=(stride, stride),
        padding=((pad, pad), (pad, pad)),
        dimension_numbers=("NCHW", "OIHW", "NCHW"))


def _ref_bn(x):
    mean = jnp.mean(x, axis=(0, 2, 3), keepdims=True)
    var = jnp.var(x, axis=(0, 2, 3), keepdims=True)
    return (x - mean) * jax.lax.rsqrt(var + BN_EPS)


def _lrelu(x):
    return jnp.where(x >= 0, x, LRELU_SLOPE * x)


def netd_reference(x, p):
    x = _lrelu(_ref_conv(x, p["conv1"], 2, 1))
    x = _lrelu(_ref_bn(_ref_conv(x, p["conv2"], 2, 1)))
    x = _lrelu(_ref_bn(_ref_conv(x, p["conv3"], 2, 1)))
    x = _lrelu(_ref_bn(_ref_conv(x, p["conv4"], 2, 1)))
    x = _ref_conv(x, p["conv5"], 1, 0)
    return jnp.squeeze(x)


# -------------------------------- main --------------------------------------

def init_params(key):
    shapes = {
        "conv1": (64, 3, 4, 4),
        "conv2": (128, 64, 4, 4),
        "conv3": (256, 128, 4, 4),
        "conv4": (256, 256, 4, 4),
        "conv5": (1, 256, 4, 4),
    }
    params = {}
    for name, shape in shapes.items():
        key, sub = jax.random.split(key)
        params[name] = 0.02 * jax.random.normal(sub, shape, dtype=jnp.float32)
    return params


if __name__ == "__main__":
    key = jax.random.PRNGKey(0)
    pkey, xkey = jax.random.split(key)
    torch_params = init_params(pkey)           # PyTorch-layout OIHW f32 weights
    params = prepare_params(torch_params)      # precomputed bf16 (K, Cout) matrices
    # input must be 64x64 so conv5 (k=4, s=1, p=0) yields a 1x1 spatial output
    x = jax.random.normal(xkey, (2, 3, 64, 64), dtype=jnp.float32)

    out = jax.block_until_ready(jax.jit(netd_forward)(x, params))
    ref = jax.block_until_ready(netd_reference(x, torch_params))

    assert out.shape == (2,), f"unexpected output shape {out.shape}"
    assert np.allclose(np.asarray(out, dtype=np.float32), np.asarray(ref),
                       rtol=5e-2, atol=5e-2), \
        "Pallas output does not match JAX reference"
    print("KERNEL_OK")
</pallas_src>

<mosaic_0001>
module attributes {stable_mosaic.version = 11 : i64} {
  func.func @_conv_lrelu_kernel(%arg0: i32, %arg1: memref<512x128xbf16, #tpu.memory_space<vmem>>, %arg2: memref<128x64xbf16, #tpu.memory_space<vmem>>, %arg3: memref<512x64xbf16, #tpu.memory_space<vmem>>) attributes {dimension_semantics = [#tpu.dimension_semantics<parallel>], iteration_bounds = array<i64: 4>, scalar_prefetch = 0 : i64, scratch_operands = 0 : i64, tpu.core_type = #tpu.core_type<tc>, window_params = [{transform_indices = @transform_0, window_bounds = array<i64: 512, 128>}, {pipeline_mode = #tpu.pipeline_mode<synchronous>, transform_indices = @transform_1, window_bounds = array<i64: 128, 64>}, {transform_indices = @transform_2, window_bounds = array<i64: 512, 64>}]} {
    %c0 = arith.constant 0 : index
    %c0_0 = arith.constant 0 : index
    %0 = vector.load %arg1[%c0, %c0_0] : memref<512x128xbf16, #tpu.memory_space<vmem>>, vector<512x128xbf16>
    %c0_1 = arith.constant 0 : index
    %c0_2 = arith.constant 0 : index
    %1 = vector.load %arg2[%c0_1, %c0_2] : memref<128x64xbf16, #tpu.memory_space<vmem>>, vector<128x64xbf16>
    %cst = arith.constant dense<0.000000e+00> : vector<512x64xf32>
    %2 = tpu.matmul %0, %1, %cst {dimension_numbers = #tpu.dot_dimension_numbers<[1], [0], [0], [1], [0, 0, 1, 1], [], []>} : vector<512x128xbf16>, vector<128x64xbf16>, vector<512x64xf32> -> vector<512x64xf32>
    %cst_3 = arith.constant 0.000000e+00 : f32
    %3 = vector.broadcast %cst_3 : f32 to vector<512x64xf32>
    %4 = arith.cmpf oge, %2, %3 : vector<512x64xf32>
    %cst_4 = arith.constant 2.000000e-01 : f32
    %5 = vector.broadcast %cst_4 : f32 to vector<512x64xf32>
    %6 = arith.mulf %5, %2 : vector<512x64xf32>
    %7 = arith.select %4, %2, %6 : vector<512x64xi1>, vector<512x64xf32>
    %8 = arith.truncf %7 : vector<512x64xf32> to vector<512x64xbf16>
    %c0_5 = arith.constant 0 : index
    %c0_6 = arith.constant 0 : index
    %9 = vector.load %arg3[%c0_5, %c0_6] : memref<512x64xbf16, #tpu.memory_space<vmem>>, vector<512x64xbf16>
    tpu.vector_store %arg3[%c0_5, %c0_6], %8 {strides = array<i32>} : memref<512x64xbf16, #tpu.memory_space<vmem>>, vector<512x64xbf16>,
    return
  }
  func.func @transform_0(%arg0: i32) -> (i32, i32) {
    %c0_i32 = arith.constant 0 : i32
    %c0_i32_0 = arith.constant 0 : i32
    return %arg0, %c0_i32 : i32, i32
  }
  func.func @transform_1(%arg0: i32) -> (i32, i32) {
    %c0_i32 = arith.constant 0 : i32
    %c0_i32_0 = arith.constant 0 : i32
    %c0_i32_1 = arith.constant 0 : i32
    return %c0_i32, %c0_i32_0 : i32, i32
  }
  func.func @transform_2(%arg0: i32) -> (i32, i32) {
    %c0_i32 = arith.constant 0 : i32
    %c0_i32_0 = arith.constant 0 : i32
    return %arg0, %c0_i32 : i32, i32
  }
}

module attributes {stable_mosaic.version = 11 : i64} {
  func.func @_conv_bn_lrelu_kernel(%arg0: i32, %arg1: memref<256x1024xbf16, #tpu.memory_space<vmem>>, %arg2: memref<1024x128xbf16, #tpu.memory_space<vmem>>, %arg3: memref<512x128xbf16, #tpu.memory_space<vmem>>, %arg4: memref<512x128xf32, #tpu.memory_space<vmem>>, %arg5: memref<1x128xf32, #tpu.memory_space<vmem>>, %arg6: memref<1x128xf32, #tpu.memory_space<vmem>>) attributes {dimension_semantics = [#tpu.dimension_semantics<arbitrary>], iteration_bounds = array<i64: 2>, scalar_prefetch = 0 : i64, scratch_operands = 3 : i64, tpu.core_type = #tpu.core_type<tc>, window_params = [{transform_indices = @transform_0, window_bounds = array<i64: 256, 1024>}, {pipeline_mode = #tpu.pipeline_mode<synchronous>, transform_indices = @transform_1, window_bounds = array<i64: 1024, 128>}, {pipeline_mode = #tpu.pipeline_mode<synchronous>, transform_indices = @transform_2, window_bounds = array<i64: 512, 128>}]} {
    %c0_i32 = arith.constant 0 : i32
    %0 = arith.cmpi eq, %arg0, %c0_i32 : i32
    %1 = arith.extui %0 : i1 to i32
    %c0_i32_0 = arith.constant 0 : i32
    %2 = arith.cmpi ne, %1, %c0_i32_0 : i32
    scf.if %2 {
      %cst_16 = arith.constant 0.000000e+00 : f32
      %24 = vector.broadcast %cst_16 : f32 to vector<1x128xf32>
      %c0_17 = arith.constant 0 : index
      %c0_18 = arith.constant 0 : index
      %25 = vector.load %arg5[%c0_17, %c0_18] : memref<1x128xf32, #tpu.memory_space<vmem>>, vector<1x128xf32>
      tpu.vector_store %arg5[%c0_17, %c0_18], %24 {strides = array<i32>} : memref<1x128xf32, #tpu.memory_space<vmem>>, vector<1x128xf32>,
      %cst_19 = arith.constant 0.000000e+00 : f32
      %26 = vector.broadcast %cst_19 : f32 to vector<1x128xf32>
      %c0_20 = arith.constant 0 : index
      %c0_21 = arith.constant 0 : index
      %27 = vector.load %arg6[%c0_20, %c0_21] : memref<1x128xf32, #tpu.memory_space<vmem>>, vector<1x128xf32>
      tpu.vector_store %arg6[%c0_20, %c0_21], %26 {strides = array<i32>} : memref<1x128xf32, #tpu.memory_space<vmem>>, vector<1x128xf32>,
    } else {
    }
    %c0 = arith.constant 0 : index
    %c0_1 = arith.constant 0 : index
    %3 = vector.load %arg1[%c0, %c0_1] : memref<256x1024xbf16, #tpu.memory_space<vmem>>, vector<256x1024xbf16>
    %c0_2 = arith.constant 0 : index
    %c0_3 = arith.constant 0 : index
    %4 = vector.load %arg2[%c0_2, %c0_3] : memref<1024x128xbf16, #tpu.memory_space<vmem>>, vector<1024x128xbf16>
    %cst = arith.constant dense<0.000000e+00> : vector<256x128xf32>
    %5 = tpu.matmul %3, %4, %cst {dimension_numbers = #tpu.dot_dimension_numbers<[1], [0], [0], [1], [0, 0, 1, 1], [], []>} : vector<256x1024xbf16>, vector<1024x128xbf16>, vector<256x128xf32> -> vector<256x128xf32>
    %c256_i32 = arith.constant 256 : i32
    %6 = arith.muli %arg0, %c256_i32 : i32
    %7 = tpu.assume_multiple %6, 256 : i32
    %8 = arith.index_cast %7 : i32 to index
    %c0_4 = arith.constant 0 : index
    %9 = vector.load %arg4[%8, %c0_4] : memref<512x128xf32, #tpu.memory_space<vmem>>, vector<256x128xf32>
    tpu.vector_store %arg4[%8, %c0_4], %5 {strides = array<i32>} : memref<512x128xf32, #tpu.memory_space<vmem>>, vector<256x128xf32>,
    %c0_5 = arith.constant 0 : index
    %c0_6 = arith.constant 0 : index
    %10 = vector.load %arg5[%c0_5, %c0_6] : memref<1x128xf32, #tpu.memory_space<vmem>>, vector<1x128xf32>
    %cst_7 = arith.constant dense<0.000000e+00> : vector<128xf32>
    %11 = vector.multi_reduction <add>, %5, %cst_7 [0] : vector<256x128xf32> to vector<128xf32>
    %12 = vector.shape_cast %11 : vector<128xf32> to vector<1x128xf32>
    %13 = arith.addf %10, %12 : vector<1x128xf32>
    %c0_8 = arith.constant 0 : index
    %c0_9 = arith.constant 0 : index
    %14 = vector.load %arg5[%c0_8, %c0_9] : memref<1x128xf32, #tpu.memory_space<vmem>>, vector<1x128xf32>
    tpu.vector_store %arg5[%c0_8, %c0_9], %13 {strides = array<i32>} : memref<1x128xf32, #tpu.memory_space<vmem>>, vector<1x128xf32>,
    %c0_10 = arith.constant 0 : index
    %c0_11 = arith.constant 0 : index
    %15 = vector.load %arg6[%c0_10, %c0_11] : memref<1x128xf32, #tpu.memory_space<vmem>>, vector<1x128xf32>
    %16 = arith.mulf %5, %5 : vector<256x128xf32>
    %cst_12 = arith.constant dense<0.000000e+00> : vector<128xf32>
    %17 = vector.multi_reduction <add>, %16, %cst_12 [0] : vector<256x128xf32> to vector<128xf32>
    %18 = vector.shape_cast %17 : vector<128xf32> to vector<1x128xf32>
    %19 = arith.addf %15, %18 : vector<1x128xf32>
    %c0_13 = arith.constant 0 : index
    %c0_14 = arith.constant 0 : index
    %20 = vector.load %arg6[%c0_13, %c0_14] : memref<1x128xf32, #tpu.memory_space<vmem>>, vector<1x128xf32>
    tpu.vector_store %arg6[%c0_13, %c0_14], %19 {strides = array<i32>} : memref<1x128xf32, #tpu.memory_space<vmem>>, vector<1x128xf32>,
    %c1_i32 = arith.constant 1 : i32
    %21 = arith.cmpi eq, %arg0, %c1_i32 : i32
    %22 = arith.extui %21 : i1 to i32
    %c0_i32_15 = arith.constant 0 : i32
    %23 = arith.cmpi ne, %22, %c0_i32_15 : i32
    scf.if %23 {
      %c0_16 = arith.constant 0 : index
      %c0_17 = arith.constant 0 : index
      %24 = vector.load %arg5[%c0_16, %c0_17] : memref<1x128xf32, #tpu.memory_space<vmem>>, vector<1x128xf32>
      %cst_18 = arith.constant 0.001953125 : f32
      %25 = vector.broadcast %cst_18 : f32 to vector<1x128xf32>
      %26 = arith.mulf %24, %25 : vector<1x128xf32>
      %c0_19 = arith.constant 0 : index
      %c0_20 = arith.constant 0 : index
      %27 = vector.load %arg6[%c0_19, %c0_20] : memref<1x128xf32, #tpu.memory_space<vmem>>, vector<1x128xf32>
      %cst_21 = arith.constant 0.001953125 : f32
      %28 = vector.broadcast %cst_21 : f32 to vector<1x128xf32>
      %29 = arith.mulf %27, %28 : vector<1x128xf32>
      %30 = arith.mulf %26, %26 : vector<1x128xf32>
      %31 = arith.subf %29, %30 : vector<1x128xf32>
      %cst_22 = arith.constant 0.000000e+00 : f32
      %32 = vector.broadcast %cst_22 : f32 to vector<1x128xf32>
      %33 = arith.maximumf %31, %32 : vector<1x128xf32>
      %c0_23 = arith.constant 0 : index
      %c0_24 = arith.constant 0 : index
      %34 = vector.load %arg4[%c0_23, %c0_24] : memref<512x128xf32, #tpu.memory_space<vmem>>, vector<512x128xf32>
      %35 = vector.broadcast %26 : vector<1x128xf32> to vector<512x128xf32>
      %36 = arith.subf %34, %35 : vector<512x128xf32>
      %cst_25 = arith.constant 9.99999974E-6 : f32
      %37 = vector.broadcast %cst_25 : f32 to vector<1x128xf32>
      %38 = arith.addf %33, %37 : vector<1x128xf32>
      %39 = math.rsqrt %38 : vector<1x128xf32>
      %40 = vector.broadcast %39 : vector<1x128xf32> to vector<512x128xf32>
      %41 = arith.mulf %36, %40 : vector<512x128xf32>
      %cst_26 = arith.constant 0.000000e+00 : f32
      %42 = vector.broadcast %cst_26 : f32 to vector<512x128xf32>
      %43 = arith.cmpf oge, %41, %42 : vector<512x128xf32>
      %cst_27 = arith.constant 2.000000e-01 : f32
      %44 = vector.broadcast %cst_27 : f32 to vector<512x128xf32>
      %45 = arith.mulf %44, %41 : vector<512x128xf32>
      %46 = arith.select %43, %41, %45 : vector<512x128xi1>, vector<512x128xf32>
      %47 = arith.truncf %46 : vector<512x128xf32> to vector<512x128xbf16>
      %c0_28 = arith.constant 0 : index
      %c0_29 = arith.constant 0 : index
      %48 = vector.load %arg3[%c0_28, %c0_29] : memref<512x128xbf16, #tpu.memory_space<vmem>>, vector<512x128xbf16>
      tpu.vector_store %arg3[%c0_28, %c0_29], %47 {strides = array<i32>} : memref<512x128xbf16, #tpu.memory_space<vmem>>, vector<512x128xbf16>,
    } else {
    }
    return
  }
  func.func @transform_0(%arg0: i32) -> (i32, i32) {
    %c0_i32 = arith.constant 0 : i32
    %c0_i32_0 = arith.constant 0 : i32
    return %arg0, %c0_i32 : i32, i32
  }
  func.func @transform_1(%arg0: i32) -> (i32, i32) {
    %c0_i32 = arith.constant 0 : i32
    %c0_i32_0 = arith.constant 0 : i32
    %c0_i32_1 = arith.constant 0 : i32
    return %c0_i32, %c0_i32_0 : i32, i32
  }
  func.func @transform_2(%arg0: i32) -> (i32, i32) {
    %c0_i32 = arith.constant 0 : i32
    %c0_i32_0 = arith.constant 0 : i32
    %c0_i32_1 = arith.constant 0 : i32
    return %c0_i32, %c0_i32_0 : i32, i32
  }
}

module attributes {stable_mosaic.version = 11 : i64} {
  func.func @_conv_bn_lrelu_kernel(%arg0: i32, %arg1: memref<128x2048xbf16, #tpu.memory_space<vmem>>, %arg2: memref<2048x256xbf16, #tpu.memory_space<vmem>>, %arg3: memref<128x256xbf16, #tpu.memory_space<vmem>>, %arg4: memref<128x256xf32, #tpu.memory_space<vmem>>, %arg5: memref<1x256xf32, #tpu.memory_space<vmem>>, %arg6: memref<1x256xf32, #tpu.memory_space<vmem>>) attributes {dimension_semantics = [#tpu.dimension_semantics<arbitrary>], iteration_bounds = array<i64: 1>, scalar_prefetch = 0 : i64, scratch_operands = 3 : i64, tpu.core_type = #tpu.core_type<tc>, window_params = [{transform_indices = @transform_0, window_bounds = array<i64: 128, 2048>}, {pipeline_mode = #tpu.pipeline_mode<synchronous>, transform_indices = @transform_1, window_bounds = array<i64: 2048, 256>}, {pipeline_mode = #tpu.pipeline_mode<synchronous>, transform_indices = @transform_2, window_bounds = array<i64: 128, 256>}]} {
    %c0_i32 = arith.constant 0 : i32
    %0 = arith.cmpi eq, %arg0, %c0_i32 : i32
    %1 = arith.extui %0 : i1 to i32
    %c0_i32_0 = arith.constant 0 : i32
    %2 = arith.cmpi ne, %1, %c0_i32_0 : i32
    scf.if %2 {
      %cst_17 = arith.constant 0.000000e+00 : f32
      %24 = vector.broadcast %cst_17 : f32 to vector<1x256xf32>
      %c0_18 = arith.constant 0 : index
      %c0_19 = arith.constant 0 : index
      %25 = vector.load %arg5[%c0_18, %c0_19] : memref<1x256xf32, #tpu.memory_space<vmem>>, vector<1x256xf32>
      tpu.vector_store %arg5[%c0_18, %c0_19], %24 {strides = array<i32>} : memref<1x256xf32, #tpu.memory_space<vmem>>, vector<1x256xf32>,
      %cst_20 = arith.constant 0.000000e+00 : f32
      %26 = vector.broadcast %cst_20 : f32 to vector<1x256xf32>
      %c0_21 = arith.constant 0 : index
      %c0_22 = arith.constant 0 : index
      %27 = vector.load %arg6[%c0_21, %c0_22] : memref<1x256xf32, #tpu.memory_space<vmem>>, vector<1x256xf32>
      tpu.vector_store %arg6[%c0_21, %c0_22], %26 {strides = array<i32>} : memref<1x256xf32, #tpu.memory_space<vmem>>, vector<1x256xf32>,
    } else {
    }
    %c0 = arith.constant 0 : index
    %c0_1 = arith.constant 0 : index
    %3 = vector.load %arg1[%c0, %c0_1] : memref<128x2048xbf16, #tpu.memory_space<vmem>>, vector<128x2048xbf16>
    %c0_2 = arith.constant 0 : index
    %c0_3 = arith.constant 0 : index
    %4 = vector.load %arg2[%c0_2, %c0_3] : memref<2048x256xbf16, #tpu.memory_space<vmem>>, vector<2048x256xbf16>
    %cst = arith.constant dense<0.000000e+00> : vector<128x256xf32>
    %5 = tpu.matmul %3, %4, %cst {dimension_numbers = #tpu.dot_dimension_numbers<[1], [0], [0], [1], [0, 0, 1, 1], [], []>} : vector<128x2048xbf16>, vector<2048x256xbf16>, vector<128x256xf32> -> vector<128x256xf32>
    %c128_i32 = arith.constant 128 : i32
    %6 = arith.muli %arg0, %c128_i32 : i32
    %7 = tpu.assume_multiple %6, 128 : i32
    %8 = arith.index_cast %7 : i32 to index
    %c0_4 = arith.constant 0 : index
    %9 = vector.load %arg4[%8, %c0_4] : memref<128x256xf32, #tpu.memory_space<vmem>>, vector<128x256xf32>
    tpu.vector_store %arg4[%8, %c0_4], %5 {strides = array<i32>} : memref<128x256xf32, #tpu.memory_space<vmem>>, vector<128x256xf32>,
    %c0_5 = arith.constant 0 : index
    %c0_6 = arith.constant 0 : index
    %10 = vector.load %arg5[%c0_5, %c0_6] : memref<1x256xf32, #tpu.memory_space<vmem>>, vector<1x256xf32>
    %cst_7 = arith.constant dense<0.000000e+00> : vector<256xf32>
    %11 = vector.multi_reduction <add>, %5, %cst_7 [0] : vector<128x256xf32> to vector<256xf32>
    %12 = vector.shape_cast %11 : vector<256xf32> to vector<1x256xf32>
    %13 = arith.addf %10, %12 : vector<1x256xf32>
    %c0_8 = arith.constant 0 : index
    %c0_9 = arith.constant 0 : index
    %14 = vector.load %arg5[%c0_8, %c0_9] : memref<1x256xf32, #tpu.memory_space<vmem>>, vector<1x256xf32>
    tpu.vector_store %arg5[%c0_8, %c0_9], %13 {strides = array<i32>} : memref<1x256xf32, #tpu.memory_space<vmem>>, vector<1x256xf32>,
    %c0_10 = arith.constant 0 : index
    %c0_11 = arith.constant 0 : index
    %15 = vector.load %arg6[%c0_10, %c0_11] : memref<1x256xf32, #tpu.memory_space<vmem>>, vector<1x256xf32>
    %16 = arith.mulf %5, %5 : vector<128x256xf32>
    %cst_12 = arith.constant dense<0.000000e+00> : vector<256xf32>
    %17 = vector.multi_reduction <add>, %16, %cst_12 [0] : vector<128x256xf32> to vector<256xf32>
    %18 = vector.shape_cast %17 : vector<256xf32> to vector<1x256xf32>
    %19 = arith.addf %15, %18 : vector<1x256xf32>
    %c0_13 = arith.constant 0 : index
    %c0_14 = arith.constant 0 : index
    %20 = vector.load %arg6[%c0_13, %c0_14] : memref<1x256xf32, #tpu.memory_space<vmem>>, vector<1x256xf32>
    tpu.vector_store %arg6[%c0_13, %c0_14], %19 {strides = array<i32>} : memref<1x256xf32, #tpu.memory_space<vmem>>, vector<1x256xf32>,
    %c0_i32_15 = arith.constant 0 : i32
    %21 = arith.cmpi eq, %arg0, %c0_i32_15 : i32
    %22 = arith.extui %21 : i1 to i32
    %c0_i32_16 = arith.constant 0 : i32
    %23 = arith.cmpi ne, %22, %c0_i32_16 : i32
    scf.if %23 {
      %c0_17 = arith.constant 0 : index
      %c0_18 = arith.constant 0 : index
      %24 = vector.load %arg5[%c0_17, %c0_18] : memref<1x256xf32, #tpu.memory_space<vmem>>, vector<1x256xf32>
      %cst_19 = arith.constant 7.812500e-03 : f32
      %25 = vector.broadcast %cst_19 : f32 to vector<1x256xf32>
      %26 = arith.mulf %24, %25 : vector<1x256xf32>
      %c0_20 = arith.constant 0 : index
      %c0_21 = arith.constant 0 : index
      %27 = vector.load %arg6[%c0_20, %c0_21] : memref<1x256xf32, #tpu.memory_space<vmem>>, vector<1x256xf32>
      %cst_22 = arith.constant 7.812500e-03 : f32
      %28 = vector.broadcast %cst_22 : f32 to vector<1x256xf32>
      %29 = arith.mulf %27, %28 : vector<1x256xf32>
      %30 = arith.mulf %26, %26 : vector<1x256xf32>
      %31 = arith.subf %29, %30 : vector<1x256xf32>
      %cst_23 = arith.constant 0.000000e+00 : f32
      %32 = vector.broadcast %cst_23 : f32 to vector<1x256xf32>
      %33 = arith.maximumf %31, %32 : vector<1x256xf32>
      %c0_24 = arith.constant 0 : index
      %c0_25 = arith.constant 0 : index
      %34 = vector.load %arg4[%c0_24, %c0_25] : memref<128x256xf32, #tpu.memory_space<vmem>>, vector<128x256xf32>
      %35 = vector.broadcast %26 : vector<1x256xf32> to vector<128x256xf32>
      %36 = arith.subf %34, %35 : vector<128x256xf32>
      %cst_26 = arith.constant 9.99999974E-6 : f32
      %37 = vector.broadcast %cst_26 : f32 to vector<1x256xf32>
      %38 = arith.addf %33, %37 : vector<1x256xf32>
      %39 = math.rsqrt %38 : vector<1x256xf32>
      %40 = vector.broadcast %39 : vector<1x256xf32> to vector<128x256xf32>
      %41 = arith.mulf %36, %40 : vector<128x256xf32>
      %cst_27 = arith.constant 0.000000e+00 : f32
      %42 = vector.broadcast %cst_27 : f32 to vector<128x256xf32>
      %43 = arith.cmpf oge, %41, %42 : vector<128x256xf32>
      %cst_28 = arith.constant 2.000000e-01 : f32
      %44 = vector.broadcast %cst_28 : f32 to vector<128x256xf32>
      %45 = arith.mulf %44, %41 : vector<128x256xf32>
      %46 = arith.select %43, %41, %45 : vector<128x256xi1>, vector<128x256xf32>
      %47 = arith.truncf %46 : vector<128x256xf32> to vector<128x256xbf16>
      %c0_29 = arith.constant 0 : index
      %c0_30 = arith.constant 0 : index
      %48 = vector.load %arg3[%c0_29, %c0_30] : memref<128x256xbf16, #tpu.memory_space<vmem>>, vector<128x256xbf16>
      tpu.vector_store %arg3[%c0_29, %c0_30], %47 {strides = array<i32>} : memref<128x256xbf16, #tpu.memory_space<vmem>>, vector<128x256xbf16>,
    } else {
    }
    return
  }
  func.func @transform_0(%arg0: i32) -> (i32, i32) {
    %c0_i32 = arith.constant 0 : i32
    %c0_i32_0 = arith.constant 0 : i32
    return %arg0, %c0_i32 : i32, i32
  }
  func.func @transform_1(%arg0: i32) -> (i32, i32) {
    %c0_i32 = arith.constant 0 : i32
    %c0_i32_0 = arith.constant 0 : i32
    %c0_i32_1 = arith.constant 0 : i32
    return %c0_i32, %c0_i32_0 : i32, i32
  }
  func.func @transform_2(%arg0: i32) -> (i32, i32) {
    %c0_i32 = arith.constant 0 : i32
    %c0_i32_0 = arith.constant 0 : i32
    %c0_i32_1 = arith.constant 0 : i32
    return %c0_i32, %c0_i32_0 : i32, i32
  }
}

module attributes {stable_mosaic.version = 11 : i64} {
  func.func @_conv_bn_lrelu_kernel(%arg0: i32, %arg1: memref<32x4096xbf16, #tpu.memory_space<vmem>>, %arg2: memref<4096x256xbf16, #tpu.memory_space<vmem>>, %arg3: memref<32x256xbf16, #tpu.memory_space<vmem>>, %arg4: memref<32x256xf32, #tpu.memory_space<vmem>>, %arg5: memref<1x256xf32, #tpu.memory_space<vmem>>, %arg6: memref<1x256xf32, #tpu.memory_space<vmem>>) attributes {dimension_semantics = [#tpu.dimension_semantics<arbitrary>], iteration_bounds = array<i64: 1>, scalar_prefetch = 0 : i64, scratch_operands = 3 : i64, tpu.core_type = #tpu.core_type<tc>, window_params = [{transform_indices = @transform_0, window_bounds = array<i64: 32, 4096>}, {pipeline_mode = #tpu.pipeline_mode<synchronous>, transform_indices = @transform_1, window_bounds = array<i64: 4096, 256>}, {pipeline_mode = #tpu.pipeline_mode<synchronous>, transform_indices = @transform_2, window_bounds = array<i64: 32, 256>}]} {
    %c0_i32 = arith.constant 0 : i32
    %0 = arith.cmpi eq, %arg0, %c0_i32 : i32
    %1 = arith.extui %0 : i1 to i32
    %c0_i32_0 = arith.constant 0 : i32
    %2 = arith.cmpi ne, %1, %c0_i32_0 : i32
    scf.if %2 {
      %cst_17 = arith.constant 0.000000e+00 : f32
      %24 = vector.broadcast %cst_17 : f32 to vector<1x256xf32>
      %c0_18 = arith.constant 0 : index
      %c0_19 = arith.constant 0 : index
      %25 = vector.load %arg5[%c0_18, %c0_19] : memref<1x256xf32, #tpu.memory_space<vmem>>, vector<1x256xf32>
      tpu.vector_store %arg5[%c0_18, %c0_19], %24 {strides = array<i32>} : memref<1x256xf32, #tpu.memory_space<vmem>>, vector<1x256xf32>,
      %cst_20 = arith.constant 0.000000e+00 : f32
      %26 = vector.broadcast %cst_20 : f32 to vector<1x256xf32>
      %c0_21 = arith.constant 0 : index
      %c0_22 = arith.constant 0 : index
      %27 = vector.load %arg6[%c0_21, %c0_22] : memref<1x256xf32, #tpu.memory_space<vmem>>, vector<1x256xf32>
      tpu.vector_store %arg6[%c0_21, %c0_22], %26 {strides = array<i32>} : memref<1x256xf32, #tpu.memory_space<vmem>>, vector<1x256xf32>,
    } else {
    }
    %c0 = arith.constant 0 : index
    %c0_1 = arith.constant 0 : index
    %3 = vector.load %arg1[%c0, %c0_1] : memref<32x4096xbf16, #tpu.memory_space<vmem>>, vector<32x4096xbf16>
    %c0_2 = arith.constant 0 : index
    %c0_3 = arith.constant 0 : index
    %4 = vector.load %arg2[%c0_2, %c0_3] : memref<4096x256xbf16, #tpu.memory_space<vmem>>, vector<4096x256xbf16>
    %cst = arith.constant dense<0.000000e+00> : vector<32x256xf32>
    %5 = tpu.matmul %3, %4, %cst {dimension_numbers = #tpu.dot_dimension_numbers<[1], [0], [0], [1], [0, 0, 1, 1], [], []>} : vector<32x4096xbf16>, vector<4096x256xbf16>, vector<32x256xf32> -> vector<32x256xf32>
    %c32_i32 = arith.constant 32 : i32
    %6 = arith.muli %arg0, %c32_i32 : i32
    %7 = tpu.assume_multiple %6, 32 : i32
    %8 = arith.index_cast %7 : i32 to index
    %c0_4 = arith.constant 0 : index
    %9 = vector.load %arg4[%8, %c0_4] : memref<32x256xf32, #tpu.memory_space<vmem>>, vector<32x256xf32>
    tpu.vector_store %arg4[%8, %c0_4], %5 {strides = array<i32>} : memref<32x256xf32, #tpu.memory_space<vmem>>, vector<32x256xf32>,
    %c0_5 = arith.constant 0 : index
    %c0_6 = arith.constant 0 : index
    %10 = vector.load %arg5[%c0_5, %c0_6] : memref<1x256xf32, #tpu.memory_space<vmem>>, vector<1x256xf32>
    %cst_7 = arith.constant dense<0.000000e+00> : vector<256xf32>
    %11 = vector.multi_reduction <add>, %5, %cst_7 [0] : vector<32x256xf32> to vector<256xf32>
    %12 = vector.shape_cast %11 : vector<256xf32> to vector<1x256xf32>
    %13 = arith.addf %10, %12 : vector<1x256xf32>
    %c0_8 = arith.constant 0 : index
    %c0_9 = arith.constant 0 : index
    %14 = vector.load %arg5[%c0_8, %c0_9] : memref<1x256xf32, #tpu.memory_space<vmem>>, vector<1x256xf32>
    tpu.vector_store %arg5[%c0_8, %c0_9], %13 {strides = array<i32>} : memref<1x256xf32, #tpu.memory_space<vmem>>, vector<1x256xf32>,
    %c0_10 = arith.constant 0 : index
    %c0_11 = arith.constant 0 : index
    %15 = vector.load %arg6[%c0_10, %c0_11] : memref<1x256xf32, #tpu.memory_space<vmem>>, vector<1x256xf32>
    %16 = arith.mulf %5, %5 : vector<32x256xf32>
    %cst_12 = arith.constant dense<0.000000e+00> : vector<256xf32>
    %17 = vector.multi_reduction <add>, %16, %cst_12 [0] : vector<32x256xf32> to vector<256xf32>
    %18 = vector.shape_cast %17 : vector<256xf32> to vector<1x256xf32>
    %19 = arith.addf %15, %18 : vector<1x256xf32>
    %c0_13 = arith.constant 0 : index
    %c0_14 = arith.constant 0 : index
    %20 = vector.load %arg6[%c0_13, %c0_14] : memref<1x256xf32, #tpu.memory_space<vmem>>, vector<1x256xf32>
    tpu.vector_store %arg6[%c0_13, %c0_14], %19 {strides = array<i32>} : memref<1x256xf32, #tpu.memory_space<vmem>>, vector<1x256xf32>,
    %c0_i32_15 = arith.constant 0 : i32
    %21 = arith.cmpi eq, %arg0, %c0_i32_15 : i32
    %22 = arith.extui %21 : i1 to i32
    %c0_i32_16 = arith.constant 0 : i32
    %23 = arith.cmpi ne, %22, %c0_i32_16 : i32
    scf.if %23 {
      %c0_17 = arith.constant 0 : index
      %c0_18 = arith.constant 0 : index
      %24 = vector.load %arg5[%c0_17, %c0_18] : memref<1x256xf32, #tpu.memory_space<vmem>>, vector<1x256xf32>
      %cst_19 = arith.constant 3.125000e-02 : f32
      %25 = vector.broadcast %cst_19 : f32 to vector<1x256xf32>
      %26 = arith.mulf %24, %25 : vector<1x256xf32>
      %c0_20 = arith.constant 0 : index
      %c0_21 = arith.constant 0 : index
      %27 = vector.load %arg6[%c0_20, %c0_21] : memref<1x256xf32, #tpu.memory_space<vmem>>, vector<1x256xf32>
      %cst_22 = arith.constant 3.125000e-02 : f32
      %28 = vector.broadcast %cst_22 : f32 to vector<1x256xf32>
      %29 = arith.mulf %27, %28 : vector<1x256xf32>
      %30 = arith.mulf %26, %26 : vector<1x256xf32>
      %31 = arith.subf %29, %30 : vector<1x256xf32>
      %cst_23 = arith.constant 0.000000e+00 : f32
      %32 = vector.broadcast %cst_23 : f32 to vector<1x256xf32>
      %33 = arith.maximumf %31, %32 : vector<1x256xf32>
      %c0_24 = arith.constant 0 : index
      %c0_25 = arith.constant 0 : index
      %34 = vector.load %arg4[%c0_24, %c0_25] : memref<32x256xf32, #tpu.memory_space<vmem>>, vector<32x256xf32>
      %35 = vector.broadcast %26 : vector<1x256xf32> to vector<32x256xf32>
      %36 = arith.subf %34, %35 : vector<32x256xf32>
      %cst_26 = arith.constant 9.99999974E-6 : f32
      %37 = vector.broadcast %cst_26 : f32 to vector<1x256xf32>
      %38 = arith.addf %33, %37 : vector<1x256xf32>
      %39 = math.rsqrt %38 : vector<1x256xf32>
      %40 = vector.broadcast %39 : vector<1x256xf32> to vector<32x256xf32>
      %41 = arith.mulf %36, %40 : vector<32x256xf32>
      %cst_27 = arith.constant 0.000000e+00 : f32
      %42 = vector.broadcast %cst_27 : f32 to vector<32x256xf32>
      %43 = arith.cmpf oge, %41, %42 : vector<32x256xf32>
      %cst_28 = arith.constant 2.000000e-01 : f32
      %44 = vector.broadcast %cst_28 : f32 to vector<32x256xf32>
      %45 = arith.mulf %44, %41 : vector<32x256xf32>
      %46 = arith.select %43, %41, %45 : vector<32x256xi1>, vector<32x256xf32>
      %47 = arith.truncf %46 : vector<32x256xf32> to vector<32x256xbf16>
      %c0_29 = arith.constant 0 : index
      %c0_30 = arith.constant 0 : index
      %48 = vector.load %arg3[%c0_29, %c0_30] : memref<32x256xbf16, #tpu.memory_space<vmem>>, vector<32x256xbf16>
      tpu.vector_store %arg3[%c0_29, %c0_30], %47 {strides = array<i32>} : memref<32x256xbf16, #tpu.memory_space<vmem>>, vector<32x256xbf16>,
    } else {
    }
    return
  }
  func.func @transform_0(%arg0: i32) -> (i32, i32) {
    %c0_i32 = arith.constant 0 : i32
    %c0_i32_0 = arith.constant 0 : i32
    return %arg0, %c0_i32 : i32, i32
  }
  func.func @transform_1(%arg0: i32) -> (i32, i32) {
    %c0_i32 = arith.constant 0 : i32
    %c0_i32_0 = arith.constant 0 : i32
    %c0_i32_1 = arith.constant 0 : i32
    return %c0_i32, %c0_i32_0 : i32, i32
  }
  func.func @transform_2(%arg0: i32) -> (i32, i32) {
    %c0_i32 = arith.constant 0 : i32
    %c0_i32_0 = arith.constant 0 : i32
    %c0_i32_1 = arith.constant 0 : i32
    return %c0_i32, %c0_i32_0 : i32, i32
  }
}

module attributes {stable_mosaic.version = 11 : i64} {
  func.func @_final_conv_kernel(%arg0: memref<2x4096xbf16, #tpu.memory_space<vmem>>, %arg1: memref<1x4096xbf16, #tpu.memory_space<vmem>>, %arg2: memref<2x1xf32, #tpu.memory_space<vmem>>) attributes {dimension_semantics = [], scalar_prefetch = 0 : i64, scratch_operands = 0 : i64, tpu.core_type = #tpu.core_type<tc>} {
    %c0 = arith.constant 0 : index
    %c0_0 = arith.constant 0 : index
    %0 = vector.load %arg0[%c0, %c0_0] : memref<2x4096xbf16, #tpu.memory_space<vmem>>, vector<2x4096xbf16>
    %1 = arith.extf %0 : vector<2x4096xbf16> to vector<2x4096xf32>
    %c0_1 = arith.constant 0 : index
    %c0_2 = arith.constant 0 : index
    %2 = vector.load %arg1[%c0_1, %c0_2] : memref<1x4096xbf16, #tpu.memory_space<vmem>>, vector<1x4096xbf16>
    %3 = arith.extf %2 : vector<1x4096xbf16> to vector<1x4096xf32>
    %4 = vector.broadcast %3 : vector<1x4096xf32> to vector<2x4096xf32>
    %5 = arith.mulf %1, %4 : vector<2x4096xf32>
    %cst = arith.constant dense<0.000000e+00> : vector<2xf32>
    %6 = vector.multi_reduction <add>, %5, %cst [1] : vector<2x4096xf32> to vector<2xf32>
    %7 = vector.shape_cast %6 : vector<2xf32> to vector<2x1xf32>
    %c0_3 = arith.constant 0 : index
    %c0_4 = arith.constant 0 : index
    %8 = vector.load %arg2[%c0_3, %c0_4] : memref<2x1xf32, #tpu.memory_space<vmem>>, vector<2x1xf32>
    tpu.vector_store %arg2[%c0_3, %c0_4], %7 {strides = array<i32>} : memref<2x1xf32, #tpu.memory_space<vmem>>, vector<2x1xf32>,
    return
  }
}

</mosaic_0001>

<bundles_post_ra>
// kernel: netd_forward.5
= control target key start
LH: loop header
LB: loop body
LE: loop exit
PB: predicated region body
PF: predicated region fallthrough
CT: control target
= control target key end

     0   :  { %s1712_s9 = smov 0   ;;  %s1924_s0 = inlined_call_operand.vmem [shape: bf16[2048,128], index: 0, kind: input, shape index: {}]   ;;  %s1925_s1 = inlined_call_operand.vmem [shape: bf16[128,64], index: 1, kind: input, shape index: {}]   ;;  %s1926_s2 = inlined_call_operand.vmem [shape: bf16[2048,64], index: 2, kind: output, shape index: {}]  }
   0x1 LB: > { %s1326_s10 = sadd.s32 4294967295, %s1695_s9   ;;  %p1330_p0 = scmp.ge.s32.totalorder %s1695_s9, 1  ;;  %s1695_s9 = sphi %s1712_s9, %s12_s9  }
   0x2   : > { %p113_p1 = scmp.lt.s32.totalorder %s1695_s9, 5 }
   0x4   : > { %p114_p2 = pnand %p1330_p0, %p113_p1 }
   0x5   : > { %s1331_s13 = sshll.u32 (!%p114_p2), %s1326_s10, 6 }
   0x6   : > { %117 = sbr.rel (%p114_p2) target bundleno = 306 (0x132), region = 28  ;;  %p136_p3 = scmp.lt.s32.totalorder (!%p114_p2), %s1331_s13, 255 }
   0xb   : > { %v1649_v0 = vld [vmem:[%s1925_s1 + $0x38] sm:$0xff]   ;;  %v1650_v1 = vld [vmem:[%s1925_s1 + $0x30] sm:$0xff]   ;;  %s1928_s13 = smov (!%p136_p3, %s1331_s13), 255  ;;  %v1651_v2 = vld [vmem:[%s1925_s1 + $0x28] sm:$0xff]   ;;  %vm1205_vm2 = vcmask 519168  }
   0xc   : > { %1545 = vmatprep.subr.bf16.mxu0 %v1649_v0  ;;  %1625 = vmatprep.subr.bf16.mxu1 %v1649_v0  ;;  %s1332_s18 = sshll.u32 %s1928_s13, 2  ;;  %v1652_v3 = vld [vmem:[%s1925_s1 + $0x20] sm:$0xff]   ;;  %v1653_v6 = vld [vmem:[%s1925_s1 + $0x18] sm:$0xff]   ;;  %v1654_v7 = vld [vmem:[%s1925_s1 + $0x10] sm:$0xff]  }
   0xd   : > { %1546 = vmatpush3.bf16.msra.mxu0 %v1649_v0  ;;  %1633 = vmatpush3.bf16.msra.mxu1 %v1649_v0  ;;  %s1737_s21 = scalar_lea.vmem %s1924_s0, %s1332_s18  ;;  %v1655_v8 = vld [vmem:[%s1925_s1 + $0x8] sm:$0xff]   ;;  %v1656_v9 = vld [vmem:[%s1925_s1] sm:$0xff]   ;;  %s1791_s6 = scalar_lea.vmem %s1926_s2, %s1332_s18 }
   0xe   : > { %1547 = vmatprep.subr.bf16.mxu0 %v1650_v1  ;;  %1626 = vmatprep.subr.bf16.mxu1 %v1650_v1  ;;  %v1657_v4 = vld [vmem:[%s1737_s21] sm:$0xff]   ;;  %v1659_v10 = vld [vmem:[%s1737_s21 + $0x8] sm:$0xff]   ;;  %v1661_v12 = vld [vmem:[%s1737_s21 + $0x10] sm:$0xff]  }
   0xf   : > { %v1658_v5 = vld [vmem:[%s1737_s21 + $0x80] sm:$0xff]   ;;  %1561 = vmatprep.mubr.bf16.mxu0 %v1657_v4  ;;  %v1660_v11 = vld [vmem:[%s1737_s21 + $0x88] sm:$0xff]   ;;  %v1662_v13 = vld [vmem:[%s1737_s21 + $0x90] sm:$0xff]  }
  0x10   : > { %1593 = vmatprep.mubr.bf16.mxu1 %v1658_v5  ;;  %v1663_v14 = vld [vmem:[%s1737_s21 + $0x18] sm:$0xff]   ;;  %v1665_v16 = vld [vmem:[%s1737_s21 + $0x20] sm:$0xff]   ;;  %v1667_v18 = vld [vmem:[%s1737_s21 + $0x28] sm:$0xff]  }
  0x11   : > { %1548 = vmatpush3.bf16.msra.mxu0 %v1650_v1  ;;  %1634 = vmatpush3.bf16.msra.mxu1 %v1650_v1  ;;  %v1664_v15 = vld [vmem:[%s1737_s21 + $0x98] sm:$0xff]   ;;  %v1666_v17 = vld [vmem:[%s1737_s21 + $0xa0] sm:$0xff]   ;;  %v1668_v19 = vld [vmem:[%s1737_s21 + $0xa8] sm:$0xff]  }
  0x12   : > { %1549 = vmatprep.subr.bf16.mxu0 %v1651_v2  ;;  %1627 = vmatprep.subr.bf16.mxu1 %v1651_v2  ;;  %v1669_v20 = vld [vmem:[%s1737_s21 + $0x30] sm:$0xff]   ;;  %v1671_v22 = vld [vmem:[%s1737_s21 + $0x38] sm:$0xff]   ;;  %v1673_v24 = vld [vmem:[%s1737_s21 + $0x40] sm:$0xff]  }
  0x13   : > { %v1670_v21 = vld [vmem:[%s1737_s21 + $0xb0] sm:$0xff]   ;;  %v1672_v23 = vld [vmem:[%s1737_s21 + $0xb8] sm:$0xff]   ;;  %v1674_v25 = vld [vmem:[%s1737_s21 + $0xc0] sm:$0xff]  }
  0x14   : > { %v1675_v26 = vld [vmem:[%s1737_s21 + $0x48] sm:$0xff]   ;;  %v1677_v28 = vld [vmem:[%s1737_s21 + $0x50] sm:$0xff]   ;;  %v1679_v30 = vld [vmem:[%s1737_s21 + $0x58] sm:$0xff]  }
  0x15   : > { %1550 = vmatpush3.bf16.msra.mxu0 %v1651_v2  ;;  %1635 = vmatpush3.bf16.msra.mxu1 %v1651_v2  ;;  %v1676_v27 = vld [vmem:[%s1737_s21 + $0xc8] sm:$0xff]   ;;  %v1678_v29 = vld [vmem:[%s1737_s21 + $0xd0] sm:$0xff]   ;;  %v1680_v31 = vld [vmem:[%s1737_s21 + $0xd8] sm:$0xff]  }
  0x16   : > { %1551 = vmatprep.subr.bf16.mxu0 %v1652_v3  ;;  %1628 = vmatprep.subr.bf16.mxu1 %v1652_v3  ;;  %v1681_v32 = vld [vmem:[%s1737_s21 + $0x60] sm:$0xff]   ;;  %v1683_v34 = vld [vmem:[%s1737_s21 + $0x68] sm:$0xff]   ;;  %v1685_v36 = vld [vmem:[%s1737_s21 + $0x70] sm:$0xff]  }
  0x17   : > { %v1682_v33 = vld [vmem:[%s1737_s21 + $0xe0] sm:$0xff]   ;;  %v1684_v35 = vld [vmem:[%s1737_s21 + $0xe8] sm:$0xff]   ;;  %v1686_v37 = vld [vmem:[%s1737_s21 + $0xf0] sm:$0xff]  }
  0x18   : > { %v1687_v38 = vld [vmem:[%s1737_s21 + $0x78] sm:$0xff]  }
  0x19   : > { %1552 = vmatpush3.bf16.msra.mxu0 %v1652_v3  ;;  %1636 = vmatpush3.bf16.msra.mxu1 %v1652_v3  ;;  %v1688_v39 = vld [vmem:[%s1737_s21 + $0xf8] sm:$0xff]  }
  0x1a   : > { %1553 = vmatprep.subr.bf16.mxu0 %v1653_v6  ;;  %1629 = vmatprep.subr.bf16.mxu1 %v1653_v6 }
  0x1d   : > { %1554 = vmatpush3.bf16.msra.mxu0 %v1653_v6  ;;  %1637 = vmatpush3.bf16.msra.mxu1 %v1653_v6 }
  0x1e   : > { %1555 = vmatprep.subr.bf16.mxu0 %v1654_v7  ;;  %1630 = vmatprep.subr.bf16.mxu1 %v1654_v7 }
  0x21   : > { %1556 = vmatpush3.bf16.msra.mxu0 %v1654_v7  ;;  %1638 = vmatpush3.bf16.msra.mxu1 %v1654_v7 }
  0x22   : > { %1557 = vmatprep.subr.bf16.mxu0 %v1655_v8  ;;  %1631 = vmatprep.subr.bf16.mxu1 %v1655_v8 }
  0x25   : > { %1558 = vmatpush3.bf16.msra.mxu0 %v1655_v8  ;;  %1639 = vmatpush3.bf16.msra.mxu1 %v1655_v8 }
  0x26   : > { %1559 = vmatprep.subr.bf16.mxu0 %v1656_v9  ;;  %1632 = vmatprep.subr.bf16.mxu1 %v1656_v9 }
  0x29   : > { %1560 = vmatpush3.bf16.msra.mxu0 %v1656_v9  ;;  %1640 = vmatpush3.bf16.msra.mxu1 %v1656_v9 }
  0x2c   : > { %1562 = vmatmul.mubr.bf16.vlgmr.msra.gmra.mxu0 %v1659_v10  ;;  %1594 = vmatmul.mubr.bf16.vlgmr.msra.gmra.mxu1 %v1660_v11 }
  0x2d   : > { %1565 = vmatprep.mubr.bf16.mxu0 %v1661_v12  ;;  %1597 = vmatprep.mubr.bf16.mxu1 %v1662_v13 }
  0x34   : > { %1566 = vmatmul.mubr.bf16.gmra.mxu0 %v1663_v14  ;;  %1598 = vmatmul.mubr.bf16.gmra.mxu1 %v1664_v15 }
  0x35   : > { %1569 = vmatprep.mubr.bf16.mxu0 %v1665_v16  ;;  %1601 = vmatprep.mubr.bf16.mxu1 %v1666_v17 }
  0x3c   : > { %1570 = vmatmul.mubr.bf16.gmra.mxu0 %v1667_v18  ;;  %1602 = vmatmul.mubr.bf16.gmra.mxu1 %v1668_v19 }
  0x3d   : > { %1573 = vmatprep.mubr.bf16.mxu0 %v1669_v20  ;;  %1605 = vmatprep.mubr.bf16.mxu1 %v1670_v21 }
  0x44   : > { %1574 = vmatmul.mubr.bf16.gmra.mxu0 %v1671_v22  ;;  %1606 = vmatmul.mubr.bf16.gmra.mxu1 %v1672_v23 }
  0x45   : > { %1577 = vmatprep.mubr.bf16.mxu0 %v1673_v24  ;;  %1609 = vmatprep.mubr.bf16.mxu1 %v1674_v25 }
  0x4c   : > { %1578 = vmatmul.mubr.bf16.gmra.mxu0 %v1675_v26  ;;  %1610 = vmatmul.mubr.bf16.gmra.mxu1 %v1676_v27 }
  0x4d   : > { %1581 = vmatprep.mubr.bf16.mxu0 %v1677_v28  ;;  %1613 = vmatprep.mubr.bf16.mxu1 %v1678_v29 }
  0x54   : > { %1582 = vmatmul.mubr.bf16.gmra.mxu0 %v1679_v30  ;;  %1614 = vmatmul.mubr.bf16.gmra.mxu1 %v1680_v31 }
  0x55   : > { %1585 = vmatprep.mubr.bf16.mxu0 %v1681_v32  ;;  %1617 = vmatprep.mubr.bf16.mxu1 %v1682_v33 }
  0x5c   : > { %1586 = vmatmul.mubr.bf16.gmra.mxu0 %v1683_v34  ;;  %1618 = vmatmul.mubr.bf16.gmra.mxu1 %v1684_v35 }
  0x5d   : > { %1589 = vmatprep.mubr.bf16.mxu0 %v1685_v36  ;;  %1621 = vmatprep.mubr.bf16.mxu1 %v1686_v37 }
  0x64   : > { %1590 = vmatmul.mubr.bf16.gmra.mxu0 %v1687_v38  ;;  %1622 = vmatmul.mubr.bf16.gmra.mxu1 %v1688_v39 }
  0xec   : > { %v1563_v40 = vpop.f32.mrf.mxu0  ;;  %v1595_v41 = vpop.f32.mrf.mxu1 }
  0xed   : > { %vm759_vm0 = vcmp.ge.f32.partialorder %v1563_v40, 0.0  ;;  %v823_v42 = vmul.f32 0.2, %v1563_v40  ;;  %vm791_vm1 = vcmp.ge.f32.partialorder %v1595_v41, 0.0  ;;  %v855_v43 = vmul.f32 0.2, %v1595_v41 }
  0xee   : > { %v502_v44 = vpop.f32.mrf.mxu0  ;;  %v630_v45 = vpop.f32.mrf.mxu1 }
  0xef   : > { %v887_v46 = vsel %vm759_vm0, %v1563_v40, %v823_v42  ;;  %v919_v47 = vsel %vm791_vm1, %v1595_v41, %v855_v43  ;;  %vm757_vm3 = vcmp.ge.f32.partialorder %v502_v44, 0.0  ;;  %v821_v48 = vmul.f32 0.2, %v502_v44 }
  0xf0   : > { %v1443_v49 = vpack.c.bf16 %v887_v46, %v887_v46  ;;  %v1475_v50 = vpack.c.bf16 %v919_v47, %v919_v47  ;;  %vm789_vm4 = vcmp.ge.f32.partialorder %v630_v45, 0.0  ;;  %v853_v51 = vmul.f32 0.2, %v630_v45  ;;  %v1564_v52 = vpop.f32.mrf.mxu0  ;;  %v1596_v53 = vpop.f32.mrf.mxu1 }
  0xf1   : > { %v885_v54 = vsel %vm757_vm3, %v502_v44, %v821_v48  ;;  %vm760_vm5 = vcmp.ge.f32.partialorder %v1564_v52, 0.0  ;;  %v824_v55 = vmul.f32 0.2, %v1564_v52  ;;  %vm792_vm6 = vcmp.ge.f32.partialorder %v1596_v53, 0.0 }
  0xf2   : > { %1208 = vst.msk [vmem:[%s1791_s6 + $0x8] sm:$0xf] %vm1205_vm2, %v1443_v49  ;;  %1240 = vst.msk [vmem:[%s1791_s6 + $0x88] sm:$0xf] %vm1205_vm2, %v1475_v50  ;;  %v1441_v56 = vpack.c.bf16 %v885_v54, %v885_v54  ;;  %v917_v57 = vsel %vm789_vm4, %v630_v45, %v853_v51  ;;  %v856_v58 = vmul.f32 0.2, %v1596_v53  ;;  %v505_v59 = vpop.f32.mrf.mxu0  ;;  %v633_v60 = vpop.f32.mrf.mxu1 }
  0xf3   : > { %v1473_v61 = vpack.c.bf16 %v917_v57, %v917_v57  ;;  %v888_v62 = vsel %vm760_vm5, %v1564_v52, %v824_v55  ;;  %vm758_vm7 = vcmp.ge.f32.partialorder %v505_v59, 0.0  ;;  %v822_v63 = vmul.f32 0.2, %v505_v59 }
  0xf4   : > { %1206 = vst.msk [vmem:[%s1791_s6] sm:$0xf] %vm1205_vm2, %v1441_v56  ;;  %v1444_v0 = vpack.c.bf16 %v888_v62, %v888_v62  ;;  %v920_v1 = vsel %vm792_vm6, %v1596_v53, %v856_v58  ;;  %vm790_vm8 = vcmp.ge.f32.partialorder %v633_v60, 0.0  ;;  %v854_v2 = vmul.f32 0.2, %v633_v60  ;;  %v1567_v3 = vpop.f32.mrf.mxu0  ;;  %v1599_v4 = vpop.f32.mrf.mxu1 }
  0xf5   : > { %1238 = vst.msk [vmem:[%s1791_s6 + $0x80] sm:$0xf] %vm1205_vm2, %v1473_v61  ;;  %v1476_v5 = vpack.c.bf16 %v920_v1, %v920_v1  ;;  %v886_v6 = vsel %vm758_vm7, %v505_v59, %v822_v63  ;;  %vm763_vm9 = vcmp.ge.f32.partialorder %v1567_v3, 0.0  ;;  %v827_v7 = vmul.f32 0.2, %v1567_v3 }
  0xf6   : > { %1209 = vst.msk [vmem:[%s1791_s6 + $0xc] sm:$0xf] %vm1205_vm2, %v1444_v0  ;;  %v1442_v8 = vpack.c.bf16 %v886_v6, %v886_v6  ;;  %v918_v9 = vsel %vm790_vm8, %v633_v60, %v854_v2  ;;  %vm795_vm10 = vcmp.ge.f32.partialorder %v1599_v4, 0.0  ;;  %v859_v10 = vmul.f32 0.2, %v1599_v4  ;;  %v518_v11 = vpop.f32.mrf.mxu0  ;;  %v646_v12 = vpop.f32.mrf.mxu1 }
  0xf7   : > { %1241 = vst.msk [vmem:[%s1791_s6 + $0x8c] sm:$0xf] %vm1205_vm2, %v1476_v5  ;;  %v1474_v13 = vpack.c.bf16 %v918_v9, %v918_v9  ;;  %v891_v14 = vsel %vm763_vm9, %v1567_v3, %v827_v7  ;;  %vm761_vm11 = vcmp.ge.f32.partialorder %v518_v11, 0.0  ;;  %v825_v15 = vmul.f32 0.2, %v518_v11 }
  0xf8   : > { %1207 = vst.msk [vmem:[%s1791_s6 + $0x4] sm:$0xf] %vm1205_vm2, %v1442_v8  ;;  %v1447_v16 = vpack.c.bf16 %v891_v14, %v891_v14  ;;  %v923_v17 = vsel %vm795_vm10, %v1599_v4, %v859_v10  ;;  %vm793_vm12 = vcmp.ge.f32.partialorder %v646_v12, 0.0  ;;  %v857_v18 = vmul.f32 0.2, %v646_v12  ;;  %v1568_v19 = vpop.f32.mrf.mxu0  ;;  %v1600_v20 = vpop.f32.mrf.mxu1 }
  0xf9   : > { %1239 = vst.msk [vmem:[%s1791_s6 + $0x84] sm:$0xf] %vm1205_vm2, %v1474_v13  ;;  %v1479_v21 = vpack.c.bf16 %v923_v17, %v923_v17  ;;  %v889_v22 = vsel %vm761_vm11, %v518_v11, %v825_v15  ;;  %vm764_vm13 = vcmp.ge.f32.partialorder %v1568_v19, 0.0  ;;  %v828_v23 = vmul.f32 0.2, %v1568_v19 }
  0xfa   : > { %1212 = vst.msk [vmem:[%s1791_s6 + $0x18] sm:$0xf] %vm1205_vm2, %v1447_v16  ;;  %v1445_v24 = vpack.c.bf16 %v889_v22, %v889_v22  ;;  %v921_v25 = vsel %vm793_vm12, %v646_v12, %v857_v18  ;;  %vm796_vm14 = vcmp.ge.f32.partialorder %v1600_v20, 0.0  ;;  %v860_v26 = vmul.f32 0.2, %v1600_v20  ;;  %v521_v27 = vpop.f32.mrf.mxu0  ;;  %v649_v28 = vpop.f32.mrf.mxu1 }
  0xfb   : > { %1244 = vst.msk [vmem:[%s1791_s6 + $0x98] sm:$0xf] %vm1205_vm2, %v1479_v21  ;;  %v1477_v29 = vpack.c.bf16 %v921_v25, %v921_v25  ;;  %v892_v30 = vsel %vm764_vm13, %v1568_v19, %v828_v23  ;;  %vm762_vm15 = vcmp.ge.f32.partialorder %v521_v27, 0.0  ;;  %v826_v31 = vmul.f32 0.2, %v521_v27 }
  0xfc   : > { %1210 = vst.msk [vmem:[%s1791_s6 + $0x10] sm:$0xf] %vm1205_vm2, %v1445_v24  ;;  %v1448_v32 = vpack.c.bf16 %v892_v30, %v892_v30  ;;  %v924_v33 = vsel %vm796_vm14, %v1600_v20, %v860_v26  ;;  %vm794_vm0 = vcmp.ge.f32.partialorder %v649_v28, 0.0  ;;  %v858_v34 = vmul.f32 0.2, %v649_v28  ;;  %v1571_v35 = vpop.f32.mrf.mxu0  ;;  %v1603_v36 = vpop.f32.mrf.mxu1 }
  0xfd   : > { %1242 = vst.msk [vmem:[%s1791_s6 + $0x90] sm:$0xf] %vm1205_vm2, %v1477_v29  ;;  %v1480_v37 = vpack.c.bf16 %v924_v33, %v924_v33  ;;  %v890_v38 = vsel %vm762_vm15, %v521_v27, %v826_v31  ;;  %vm767_vm1 = vcmp.ge.f32.partialorder %v1571_v35, 0.0  ;;  %v831_v39 = vmul.f32 0.2, %v1571_v35 }
  0xfe   : > { %1213 = vst.msk [vmem:[%s1791_s6 + $0x1c] sm:$0xf] %vm1205_vm2, %v1448_v32  ;;  %v1446_v40 = vpack.c.bf16 %v890_v38, %v890_v38  ;;  %v922_v41 = vsel %vm794_vm0, %v649_v28, %v858_v34  ;;  %vm799_vm3 = vcmp.ge.f32.partialorder %v1603_v36, 0.0  ;;  %v863_v42 = vmul.f32 0.2, %v1603_v36  ;;  %v534_v43 = vpop.f32.mrf.mxu0  ;;  %v662_v44 = vpop.f32.mrf.mxu1 }
  0xff   : > { %1245 = vst.msk [vmem:[%s1791_s6 + $0x9c] sm:$0xf] %vm1205_vm2, %v1480_v37  ;;  %v1478_v45 = vpack.c.bf16 %v922_v41, %v922_v41  ;;  %v895_v46 = vsel %vm767_vm1, %v1571_v35, %v831_v39  ;;  %vm765_vm4 = vcmp.ge.f32.partialorder %v534_v43, 0.0  ;;  %v829_v47 = vmul.f32 0.2, %v534_v43 }
 0x100   : > { %1211 = vst.msk [vmem:[%s1791_s6 + $0x14] sm:$0xf] %vm1205_vm2, %v1446_v40  ;;  %v1451_v48 = vpack.c.bf16 %v895_v46, %v895_v46  ;;  %v927_v49 = vsel %vm799_vm3, %v1603_v36, %v863_v42  ;;  %vm797_vm5 = vcmp.ge.f32.partialorder %v662_v44, 0.0  ;;  %v861_v50 = vmul.f32 0.2, %v662_v44  ;;  %v1572_v51 = vpop.f32.mrf.mxu0  ;;  %v1604_v52 = vpop.f32.mrf.mxu1 }
 0x101   : > { %1243 = vst.msk [vmem:[%s1791_s6 + $0x94] sm:$0xf] %vm1205_vm2, %v1478_v45  ;;  %v1483_v53 = vpack.c.bf16 %v927_v49, %v927_v49  ;;  %v893_v54 = vsel %vm765_vm4, %v534_v43, %v829_v47  ;;  %vm768_vm6 = vcmp.ge.f32.partialorder %v1572_v51, 0.0  ;;  %v832_v55 = vmul.f32 0.2, %v1572_v51 }
 0x102   : > { %1216 = vst.msk [vmem:[%s1791_s6 + $0x28] sm:$0xf] %vm1205_vm2, %v1451_v48  ;;  %v1449_v56 = vpack.c.bf16 %v893_v54, %v893_v54  ;;  %v925_v57 = vsel %vm797_vm5, %v662_v44, %v861_v50  ;;  %vm800_vm7 = vcmp.ge.f32.partialorder %v1604_v52, 0.0  ;;  %v864_v58 = vmul.f32 0.2, %v1604_v52  ;;  %v537_v59 = vpop.f32.mrf.mxu0  ;;  %v665_v60 = vpop.f32.mrf.mxu1 }
 0x103   : > { %1248 = vst.msk [vmem:[%s1791_s6 + $0xa8] sm:$0xf] %vm1205_vm2, %v1483_v53  ;;  %v1481_v61 = vpack.c.bf16 %v925_v57, %v925_v57  ;;  %v896_v62 = vsel %vm768_vm6, %v1572_v51, %v832_v55  ;;  %vm766_vm8 = vcmp.ge.f32.partialorder %v537_v59, 0.0  ;;  %v830_v63 = vmul.f32 0.2, %v537_v59 }
 0x104   : > { %1214 = vst.msk [vmem:[%s1791_s6 + $0x20] sm:$0xf] %vm1205_vm2, %v1449_v56  ;;  %v1452_v0 = vpack.c.bf16 %v896_v62, %v896_v62  ;;  %v928_v1 = vsel %vm800_vm7, %v1604_v52, %v864_v58  ;;  %vm798_vm9 = vcmp.ge.f32.partialorder %v665_v60, 0.0  ;;  %v862_v2 = vmul.f32 0.2, %v665_v60  ;;  %v1575_v3 = vpop.f32.mrf.mxu0  ;;  %v1607_v4 = vpop.f32.mrf.mxu1 }
 0x105   : > { %1246 = vst.msk [vmem:[%s1791_s6 + $0xa0] sm:$0xf] %vm1205_vm2, %v1481_v61  ;;  %v1484_v5 = vpack.c.bf16 %v928_v1, %v928_v1  ;;  %v894_v6 = vsel %vm766_vm8, %v537_v59, %v830_v63  ;;  %vm771_vm10 = vcmp.ge.f32.partialorder %v1575_v3, 0.0  ;;  %v835_v7 = vmul.f32 0.2, %v1575_v3 }
 0x106   : > { %1217 = vst.msk [vmem:[%s1791_s6 + $0x2c] sm:$0xf] %vm1205_vm2, %v1452_v0  ;;  %v1450_v8 = vpack.c.bf16 %v894_v6, %v894_v6  ;;  %v926_v9 = vsel %vm798_vm9, %v665_v60, %v862_v2  ;;  %vm803_vm11 = vcmp.ge.f32.partialorder %v1607_v4, 0.0  ;;  %v867_v10 = vmul.f32 0.2, %v1607_v4  ;;  %v550_v11 = vpop.f32.mrf.mxu0  ;;  %v678_v12 = vpop.f32.mrf.mxu1 }
 0x107   : > { %1249 = vst.msk [vmem:[%s1791_s6 + $0xac] sm:$0xf] %vm1205_vm2, %v1484_v5  ;;  %v1482_v13 = vpack.c.bf16 %v926_v9, %v926_v9  ;;  %v899_v14 = vsel %vm771_vm10, %v1575_v3, %v835_v7  ;;  %vm769_vm12 = vcmp.ge.f32.partialorder %v550_v11, 0.0  ;;  %v833_v15 = vmul.f32 0.2, %v550_v11 }
 0x108   : > { %1215 = vst.msk [vmem:[%s1791_s6 + $0x24] sm:$0xf] %vm1205_vm2, %v1450_v8  ;;  %v1455_v16 = vpack.c.bf16 %v899_v14, %v899_v14  ;;  %v931_v17 = vsel %vm803_vm11, %v1607_v4, %v867_v10  ;;  %vm801_vm13 = vcmp.ge.f32.partialorder %v678_v12, 0.0  ;;  %v865_v18 = vmul.f32 0.2, %v678_v12  ;;  %v1576_v19 = vpop.f32.mrf.mxu0  ;;  %v1608_v20 = vpop.f32.mrf.mxu1 }
 0x109   : > { %1247 = vst.msk [vmem:[%s1791_s6 + $0xa4] sm:$0xf] %vm1205_vm2, %v1482_v13  ;;  %v1487_v21 = vpack.c.bf16 %v931_v17, %v931_v17  ;;  %v897_v22 = vsel %vm769_vm12, %v550_v11, %v833_v15  ;;  %vm772_vm14 = vcmp.ge.f32.partialorder %v1576_v19, 0.0  ;;  %v836_v23 = vmul.f32 0.2, %v1576_v19 }
 0x10a   : > { %1220 = vst.msk [vmem:[%s1791_s6 + $0x38] sm:$0xf] %vm1205_vm2, %v1455_v16  ;;  %v1453_v24 = vpack.c.bf16 %v897_v22, %v897_v22  ;;  %v929_v25 = vsel %vm801_vm13, %v678_v12, %v865_v18  ;;  %vm804_vm15 = vcmp.ge.f32.partialorder %v1608_v20, 0.0  ;;  %v868_v26 = vmul.f32 0.2, %v1608_v20  ;;  %v553_v27 = vpop.f32.mrf.mxu0  ;;  %v681_v28 = vpop.f32.mrf.mxu1 }
 0x10b   : > { %1252 = vst.msk [vmem:[%s1791_s6 + $0xb8] sm:$0xf] %vm1205_vm2, %v1487_v21  ;;  %v1485_v29 = vpack.c.bf16 %v929_v25, %v929_v25  ;;  %v900_v30 = vsel %vm772_vm14, %v1576_v19, %v836_v23  ;;  %vm770_vm0 = vcmp.ge.f32.partialorder %v553_v27, 0.0  ;;  %v834_v31 = vmul.f32 0.2, %v553_v27 }
 0x10c   : > { %1218 = vst.msk [vmem:[%s1791_s6 + $0x30] sm:$0xf] %vm1205_vm2, %v1453_v24  ;;  %v1456_v32 = vpack.c.bf16 %v900_v30, %v900_v30  ;;  %v932_v33 = vsel %vm804_vm15, %v1608_v20, %v868_v26  ;;  %vm802_vm1 = vcmp.ge.f32.partialorder %v681_v28, 0.0  ;;  %v866_v34 = vmul.f32 0.2, %v681_v28  ;;  %v1579_v35 = vpop.f32.mrf.mxu0  ;;  %v1611_v36 = vpop.f32.mrf.mxu1 }
 0x10d   : > { %1250 = vst.msk [vmem:[%s1791_s6 + $0xb0] sm:$0xf] %vm1205_vm2, %v1485_v29  ;;  %v1488_v37 = vpack.c.bf16 %v932_v33, %v932_v33  ;;  %v898_v38 = vsel %vm770_vm0, %v553_v27, %v834_v31  ;;  %vm775_vm3 = vcmp.ge.f32.partialorder %v1579_v35, 0.0  ;;  %v839_v39 = vmul.f32 0.2, %v1579_v35 }
 0x10e   : > { %1221 = vst.msk [vmem:[%s1791_s6 + $0x3c] sm:$0xf] %vm1205_vm2, %v1456_v32  ;;  %v1454_v40 = vpack.c.bf16 %v898_v38, %v898_v38  ;;  %v930_v41 = vsel %vm802_vm1, %v681_v28, %v866_v34  ;;  %vm807_vm4 = vcmp.ge.f32.partialorder %v1611_v36, 0.0  ;;  %v871_v42 = vmul.f32 0.2, %v1611_v36  ;;  %v566_v43 = vpop.f32.mrf.mxu0  ;;  %v694_v44 = vpop.f32.mrf.mxu1 }
 0x10f   : > { %1253 = vst.msk [vmem:[%s1791_s6 + $0xbc] sm:$0xf] %vm1205_vm2, %v1488_v37  ;;  %v1486_v45 = vpack.c.bf16 %v930_v41, %v930_v41  ;;  %v903_v46 = vsel %vm775_vm3, %v1579_v35, %v839_v39  ;;  %vm773_vm5 = vcmp.ge.f32.partialorder %v566_v43, 0.0  ;;  %v837_v47 = vmul.f32 0.2, %v566_v43 }
 0x110   : > { %1219 = vst.msk [vmem:[%s1791_s6 + $0x34] sm:$0xf] %vm1205_vm2, %v1454_v40  ;;  %v1459_v48 = vpack.c.bf16 %v903_v46, %v903_v46  ;;  %v935_v49 = vsel %vm807_vm4, %v1611_v36, %v871_v42  ;;  %vm805_vm6 = vcmp.ge.f32.partialorder %v694_v44, 0.0  ;;  %v869_v50 = vmul.f32 0.2, %v694_v44  ;;  %v1580_v51 = vpop.f32.mrf.mxu0  ;;  %v1612_v52 = vpop.f32.mrf.mxu1 }
 0x111   : > { %1251 = vst.msk [vmem:[%s1791_s6 + $0xb4] sm:$0xf] %vm1205_vm2, %v1486_v45  ;;  %v1491_v53 = vpack.c.bf16 %v935_v49, %v935_v49  ;;  %v901_v54 = vsel %vm773_vm5, %v566_v43, %v837_v47  ;;  %vm776_vm7 = vcmp.ge.f32.partialorder %v1580_v51, 0.0  ;;  %v840_v55 = vmul.f32 0.2, %v1580_v51 }
 0x112   : > { %1224 = vst.msk [vmem:[%s1791_s6 + $0x48] sm:$0xf] %vm1205_vm2, %v1459_v48  ;;  %v1457_v56 = vpack.c.bf16 %v901_v54, %v901_v54  ;;  %v933_v57 = vsel %vm805_vm6, %v694_v44, %v869_v50  ;;  %vm808_vm8 = vcmp.ge.f32.partialorder %v1612_v52, 0.0  ;;  %v872_v58 = vmul.f32 0.2, %v1612_v52  ;;  %v569_v59 = vpop.f32.mrf.mxu0  ;;  %v697_v60 = vpop.f32.mrf.mxu1 }
 0x113   : > { %1256 = vst.msk [vmem:[%s1791_s6 + $0xc8] sm:$0xf] %vm1205_vm2, %v1491_v53  ;;  %v1489_v61 = vpack.c.bf16 %v933_v57, %v933_v57  ;;  %v904_v62 = vsel %vm776_vm7, %v1580_v51, %v840_v55  ;;  %vm774_vm9 = vcmp.ge.f32.partialorder %v569_v59, 0.0  ;;  %v838_v63 = vmul.f32 0.2, %v569_v59 }
 0x114   : > { %1222 = vst.msk [vmem:[%s1791_s6 + $0x40] sm:$0xf] %vm1205_vm2, %v1457_v56  ;;  %v1460_v0 = vpack.c.bf16 %v904_v62, %v904_v62  ;;  %v936_v1 = vsel %vm808_vm8, %v1612_v52, %v872_v58  ;;  %vm806_vm10 = vcmp.ge.f32.partialorder %v697_v60, 0.0  ;;  %v870_v2 = vmul.f32 0.2, %v697_v60  ;;  %v1583_v3 = vpop.f32.mrf.mxu0  ;;  %v1615_v4 = vpop.f32.mrf.mxu1 }
 0x115   : > { %1254 = vst.msk [vmem:[%s1791_s6 + $0xc0] sm:$0xf] %vm1205_vm2, %v1489_v61  ;;  %v1492_v5 = vpack.c.bf16 %v936_v1, %v936_v1  ;;  %v902_v6 = vsel %vm774_vm9, %v569_v59, %v838_v63  ;;  %vm779_vm11 = vcmp.ge.f32.partialorder %v1583_v3, 0.0  ;;  %v843_v7 = vmul.f32 0.2, %v1583_v3 }
 0x116   : > { %1225 = vst.msk [vmem:[%s1791_s6 + $0x4c] sm:$0xf] %vm1205_vm2, %v1460_v0  ;;  %v1458_v8 = vpack.c.bf16 %v902_v6, %v902_v6  ;;  %v934_v9 = vsel %vm806_vm10, %v697_v60, %v870_v2  ;;  %vm811_vm12 = vcmp.ge.f32.partialorder %v1615_v4, 0.0  ;;  %v875_v10 = vmul.f32 0.2, %v1615_v4  ;;  %v582_v11 = vpop.f32.mrf.mxu0  ;;  %v710_v12 = vpop.f32.mrf.mxu1 }
 0x117   : > { %1257 = vst.msk [vmem:[%s1791_s6 + $0xcc] sm:$0xf] %vm1205_vm2, %v1492_v5  ;;  %v1490_v13 = vpack.c.bf16 %v934_v9, %v934_v9  ;;  %v907_v14 = vsel %vm779_vm11, %v1583_v3, %v843_v7  ;;  %vm777_vm13 = vcmp.ge.f32.partialorder %v582_v11, 0.0  ;;  %v841_v15 = vmul.f32 0.2, %v582_v11 }
 0x118   : > { %1223 = vst.msk [vmem:[%s1791_s6 + $0x44] sm:$0xf] %vm1205_vm2, %v1458_v8  ;;  %v1463_v16 = vpack.c.bf16 %v907_v14, %v907_v14  ;;  %v939_v17 = vsel %vm811_vm12, %v1615_v4, %v875_v10  ;;  %vm809_vm14 = vcmp.ge.f32.partialorder %v710_v12, 0.0  ;;  %v873_v18 = vmul.f32 0.2, %v710_v12  ;;  %v1584_v19 = vpop.f32.mrf.mxu0  ;;  %v1616_v20 = vpop.f32.mrf.mxu1 }
 0x119   : > { %1255 = vst.msk [vmem:[%s1791_s6 + $0xc4] sm:$0xf] %vm1205_vm2, %v1490_v13  ;;  %v1495_v21 = vpack.c.bf16 %v939_v17, %v939_v17  ;;  %v905_v22 = vsel %vm777_vm13, %v582_v11, %v841_v15  ;;  %vm780_vm15 = vcmp.ge.f32.partialorder %v1584_v19, 0.0  ;;  %v844_v23 = vmul.f32 0.2, %v1584_v19 }
 0x11a   : > { %1228 = vst.msk [vmem:[%s1791_s6 + $0x58] sm:$0xf] %vm1205_vm2, %v1463_v16  ;;  %v1461_v24 = vpack.c.bf16 %v905_v22, %v905_v22  ;;  %v937_v25 = vsel %vm809_vm14, %v710_v12, %v873_v18  ;;  %vm812_vm0 = vcmp.ge.f32.partialorder %v1616_v20, 0.0  ;;  %v876_v26 = vmul.f32 0.2, %v1616_v20  ;;  %v585_v27 = vpop.f32.mrf.mxu0  ;;  %v713_v28 = vpop.f32.mrf.mxu1 }
 0x11b   : > { %1260 = vst.msk [vmem:[%s1791_s6 + $0xd8] sm:$0xf] %vm1205_vm2, %v1495_v21  ;;  %v1493_v29 = vpack.c.bf16 %v937_v25, %v937_v25  ;;  %v908_v30 = vsel %vm780_vm15, %v1584_v19, %v844_v23  ;;  %vm778_vm1 = vcmp.ge.f32.partialorder %v585_v27, 0.0  ;;  %v842_v31 = vmul.f32 0.2, %v585_v27 }
 0x11c   : > { %1226 = vst.msk [vmem:[%s1791_s6 + $0x50] sm:$0xf] %vm1205_vm2, %v1461_v24  ;;  %v1464_v32 = vpack.c.bf16 %v908_v30, %v908_v30  ;;  %v940_v33 = vsel %vm812_vm0, %v1616_v20, %v876_v26  ;;  %vm810_vm3 = vcmp.ge.f32.partialorder %v713_v28, 0.0  ;;  %v874_v34 = vmul.f32 0.2, %v713_v28  ;;  %v1587_v35 = vpop.f32.mrf.mxu0  ;;  %v1619_v36 = vpop.f32.mrf.mxu1 }
 0x11d   : > { %1258 = vst.msk [vmem:[%s1791_s6 + $0xd0] sm:$0xf] %vm1205_vm2, %v1493_v29  ;;  %v1496_v37 = vpack.c.bf16 %v940_v33, %v940_v33  ;;  %v906_v38 = vsel %vm778_vm1, %v585_v27, %v842_v31  ;;  %vm783_vm4 = vcmp.ge.f32.partialorder %v1587_v35, 0.0  ;;  %v847_v39 = vmul.f32 0.2, %v1587_v35 }
 0x11e   : > { %1229 = vst.msk [vmem:[%s1791_s6 + $0x5c] sm:$0xf] %vm1205_vm2, %v1464_v32  ;;  %v1462_v40 = vpack.c.bf16 %v906_v38, %v906_v38  ;;  %v938_v41 = vsel %vm810_vm3, %v713_v28, %v874_v34  ;;  %vm815_vm5 = vcmp.ge.f32.partialorder %v1619_v36, 0.0  ;;  %v879_v42 = vmul.f32 0.2, %v1619_v36  ;;  %v598_v43 = vpop.f32.mrf.mxu0  ;;  %v726_v44 = vpop.f32.mrf.mxu1 }
 0x11f   : > { %1261 = vst.msk [vmem:[%s1791_s6 + $0xdc] sm:$0xf] %vm1205_vm2, %v1496_v37  ;;  %v1494_v45 = vpack.c.bf16 %v938_v41, %v938_v41  ;;  %v911_v46 = vsel %vm783_vm4, %v1587_v35, %v847_v39  ;;  %vm781_vm6 = vcmp.ge.f32.partialorder %v598_v43, 0.0  ;;  %v845_v47 = vmul.f32 0.2, %v598_v43 }
 0x120   : > { %1227 = vst.msk [vmem:[%s1791_s6 + $0x54] sm:$0xf] %vm1205_vm2, %v1462_v40  ;;  %v1467_v48 = vpack.c.bf16 %v911_v46, %v911_v46  ;;  %v943_v49 = vsel %vm815_vm5, %v1619_v36, %v879_v42  ;;  %vm813_vm7 = vcmp.ge.f32.partialorder %v726_v44, 0.0  ;;  %v877_v50 = vmul.f32 0.2, %v726_v44  ;;  %v1588_v51 = vpop.f32.mrf.mxu0  ;;  %v1620_v52 = vpop.f32.mrf.mxu1 }
 0x121   : > { %1259 = vst.msk [vmem:[%s1791_s6 + $0xd4] sm:$0xf] %vm1205_vm2, %v1494_v45  ;;  %v1499_v53 = vpack.c.bf16 %v943_v49, %v943_v49  ;;  %v909_v54 = vsel %vm781_vm6, %v598_v43, %v845_v47  ;;  %vm784_vm8 = vcmp.ge.f32.partialorder %v1588_v51, 0.0  ;;  %v848_v55 = vmul.f32 0.2, %v1588_v51 }
 0x122   : > { %1232 = vst.msk [vmem:[%s1791_s6 + $0x68] sm:$0xf] %vm1205_vm2, %v1467_v48  ;;  %v1465_v56 = vpack.c.bf16 %v909_v54, %v909_v54  ;;  %v941_v57 = vsel %vm813_vm7, %v726_v44, %v877_v50  ;;  %vm816_vm9 = vcmp.ge.f32.partialorder %v1620_v52, 0.0  ;;  %v880_v58 = vmul.f32 0.2, %v1620_v52  ;;  %v601_v59 = vpop.f32.mrf.mxu0  ;;  %v729_v60 = vpop.f32.mrf.mxu1 }
 0x123   : > { %1264 = vst.msk [vmem:[%s1791_s6 + $0xe8] sm:$0xf] %vm1205_vm2, %v1499_v53  ;;  %v1497_v61 = vpack.c.bf16 %v941_v57, %v941_v57  ;;  %v912_v62 = vsel %vm784_vm8, %v1588_v51, %v848_v55  ;;  %vm782_vm10 = vcmp.ge.f32.partialorder %v601_v59, 0.0  ;;  %v846_v63 = vmul.f32 0.2, %v601_v59 }
 0x124   : > { %1230 = vst.msk [vmem:[%s1791_s6 + $0x60] sm:$0xf] %vm1205_vm2, %v1465_v56  ;;  %v1468_v0 = vpack.c.bf16 %v912_v62, %v912_v62  ;;  %v944_v1 = vsel %vm816_vm9, %v1620_v52, %v880_v58  ;;  %vm814_vm11 = vcmp.ge.f32.partialorder %v729_v60, 0.0  ;;  %v878_v2 = vmul.f32 0.2, %v729_v60  ;;  %v1591_v3 = vpop.f32.mrf.mxu0  ;;  %v1623_v4 = vpop.f32.mrf.mxu1 }
 0x125   : > { %1262 = vst.msk [vmem:[%s1791_s6 + $0xe0] sm:$0xf] %vm1205_vm2, %v1497_v61  ;;  %v1500_v5 = vpack.c.bf16 %v944_v1, %v944_v1  ;;  %v910_v6 = vsel %vm782_vm10, %v601_v59, %v846_v63  ;;  %vm787_vm12 = vcmp.ge.f32.partialorder %v1591_v3, 0.0  ;;  %v851_v7 = vmul.f32 0.2, %v1591_v3 }
 0x126   : > { %1233 = vst.msk [vmem:[%s1791_s6 + $0x6c] sm:$0xf] %vm1205_vm2, %v1468_v0  ;;  %v1466_v8 = vpack.c.bf16 %v910_v6, %v910_v6  ;;  %v942_v9 = vsel %vm814_vm11, %v729_v60, %v878_v2  ;;  %vm819_vm13 = vcmp.ge.f32.partialorder %v1623_v4, 0.0  ;;  %v883_v10 = vmul.f32 0.2, %v1623_v4  ;;  %v614_v11 = vpop.f32.mrf.mxu0  ;;  %v742_v12 = vpop.f32.mrf.mxu1 }
 0x127   : > { %1265 = vst.msk [vmem:[%s1791_s6 + $0xec] sm:$0xf] %vm1205_vm2, %v1500_v5  ;;  %v1498_v13 = vpack.c.bf16 %v942_v9, %v942_v9  ;;  %v915_v14 = vsel %vm787_vm12, %v1591_v3, %v851_v7  ;;  %vm785_vm14 = vcmp.ge.f32.partialorder %v614_v11, 0.0  ;;  %v849_v15 = vmul.f32 0.2, %v614_v11 }
 0x128   : > { %1231 = vst.msk [vmem:[%s1791_s6 + $0x64] sm:$0xf] %vm1205_vm2, %v1466_v8  ;;  %v1471_v16 = vpack.c.bf16 %v915_v14, %v915_v14  ;;  %v947_v17 = vsel %vm819_vm13, %v1623_v4, %v883_v10  ;;  %vm817_vm15 = vcmp.ge.f32.partialorder %v742_v12, 0.0  ;;  %v881_v18 = vmul.f32 0.2, %v742_v12  ;;  %v1592_v19 = vpop.f32.mrf.mxu0  ;;  %v1624_v20 = vpop.f32.mrf.mxu1 }
 0x129   : > { %1263 = vst.msk [vmem:[%s1791_s6 + $0xe4] sm:$0xf] %vm1205_vm2, %v1498_v13  ;;  %v1503_v21 = vpack.c.bf16 %v947_v17, %v947_v17  ;;  %v913_v22 = vsel %vm785_vm14, %v614_v11, %v849_v15  ;;  %vm788_vm0 = vcmp.ge.f32.partialorder %v1592_v19, 0.0  ;;  %v852_v23 = vmul.f32 0.2, %v1592_v19 }
 0x12a   : > { %1236 = vst.msk [vmem:[%s1791_s6 + $0x78] sm:$0xf] %vm1205_vm2, %v1471_v16  ;;  %v1469_v24 = vpack.c.bf16 %v913_v22, %v913_v22  ;;  %v945_v25 = vsel %vm817_vm15, %v742_v12, %v881_v18  ;;  %vm820_vm1 = vcmp.ge.f32.partialorder %v1624_v20, 0.0  ;;  %v884_v26 = vmul.f32 0.2, %v1624_v20  ;;  %v617_v27 = vpop.f32.mrf.mxu0  ;;  %v745_v28 = vpop.f32.mrf.mxu1 }
 0x12b   : > { %1268 = vst.msk [vmem:[%s1791_s6 + $0xf8] sm:$0xf] %vm1205_vm2, %v1503_v21  ;;  %v1501_v29 = vpack.c.bf16 %v945_v25, %v945_v25  ;;  %v916_v30 = vsel %vm788_vm0, %v1592_v19, %v852_v23  ;;  %vm786_vm3 = vcmp.ge.f32.partialorder %v617_v27, 0.0  ;;  %v850_v31 = vmul.f32 0.2, %v617_v27 }
 0x12c   : > { %1234 = vst.msk [vmem:[%s1791_s6 + $0x70] sm:$0xf] %vm1205_vm2, %v1469_v24  ;;  %v1472_v32 = vpack.c.bf16 %v916_v30, %v916_v30  ;;  %v948_v33 = vsel %vm820_vm1, %v1624_v20, %v884_v26  ;;  %vm818_vm4 = vcmp.ge.f32.partialorder %v745_v28, 0.0  ;;  %v882_v34 = vmul.f32 0.2, %v745_v28 }
 0x12d   : > { %1266 = vst.msk [vmem:[%s1791_s6 + $0xf0] sm:$0xf] %vm1205_vm2, %v1501_v29  ;;  %v1504_v35 = vpack.c.bf16 %v948_v33, %v948_v33  ;;  %v914_v36 = vsel %vm786_vm3, %v617_v27, %v850_v31 }
 0x12e   : > { %1237 = vst.msk [vmem:[%s1791_s6 + $0x7c] sm:$0xf] %vm1205_vm2, %v1472_v32  ;;  %v1470_v37 = vpack.c.bf16 %v914_v36, %v914_v36  ;;  %v946_v38 = vsel %vm818_vm4, %v745_v28, %v882_v34 }
 0x12f   : > { %1269 = vst.msk [vmem:[%s1791_s6 + $0xfc] sm:$0xf] %vm1205_vm2, %v1504_v35  ;;  %v1502_v39 = vpack.c.bf16 %v946_v38, %v946_v38 }
 0x130   : > { %1235 = vst.msk [vmem:[%s1791_s6 + $0x74] sm:$0xf] %vm1205_vm2, %v1470_v37 }
 0x131   : > { %1267 = vst.msk [vmem:[%s1791_s6 + $0xf4] sm:$0xf] %vm1205_vm2, %v1502_v39 }
 0x132 PF: > { %s12_s9 = sadd.s32 1, %s1695_s9  }
 0x133   : > { %p9_p4 = scmp.ge.s32.totalorder %s12_s9, 6  }
 0x135   :  { %11 = sbr.rel (!%p9_p4) target bundleno = 1 (0x1), region = 58 }

// kernel: netd_forward.6
= control target key start
LH: loop header
LB: loop body
LE: loop exit
PB: predicated region body
PF: predicated region fallthrough
CT: control target
= control target key end

     0   :  { %s4041_s9 = smov 0   ;;  %s5132_s0 = inlined_call_operand.vmem [shape: bf16[512,1024], index: 0, kind: input, shape index: {}]   ;;  %s5133_s1 = inlined_call_operand.vmem [shape: bf16[1024,128], index: 1, kind: input, shape index: {}]   ;;  %s5134_s2 = inlined_call_operand.vmem [shape: bf16[512,128], index: 2, kind: output, shape index: {}]  }
   0x1 LB: > { %s4047_s10 = sadd.s32 4294967295, %s4023_s9   ;;  %p2973_p0 = scmp.ge.s32.totalorder %s4023_s9, 1  ;;  %s4023_s9 = sphi %s4041_s9, %s12_s9  }
   0x2   : > { %p109_p1 = scmp.lt.s32.totalorder %s4023_s9, 3 }
   0x4   : > { %p110_p2 = pnand %p2973_p0, %p109_p1 }
   0x5   : > { %s2974_s11 = sshll.u32 (!%p110_p2), %s4047_s10, 5  ;;  %p2977_p4 = scmp.ne.s32.totalorder (!%p110_p2), %s4047_s10, 0 }
   0x6   : > { %113 = sbr.rel (%p110_p2) target bundleno = 648 (0x288), region = 28  ;;  %p128_p3 = scmp.lt.s32.totalorder (!%p110_p2), %s2974_s11, 63 }
   0xb   : > { %s5253_s11 = smov (!%p128_p3, %s2974_s11), 63  ;;  %138 = sbr.rel (%p2977_p4) target bundleno = 18 (0x12), region = 32 }
   0xc   : > { %s3238_s12 = sshll.u32 %s5253_s11, 5 }
   0xd   : > { %s4055_s15 = scalar_lea.vmem %s5132_s0, %s3238_s12 }
  0x10   : > { %v4025_v0 = vmov 0.0  }
  0x11   : > { %139 = vst [vmem:[#allocation3] sm:$0x1] %v4025_v0  ;;  %140 = vst [vmem:[#allocation4] sm:$0x1] %v4025_v0 }
  0x12 PF: > { %v3951_v1 = vld [vmem:[%s5133_s1 + $0x78] sm:$0xff]   ;;  %v3955_v5 = vld [vmem:[%s5133_s1 + $0x70] sm:$0xff]   ;;  %v3959_v9 = vld [vmem:[%s5133_s1 + $0x68] sm:$0xff]   ;;  %p3171_p5 = scmp.ne.s32.totalorder %s4047_s10, 1 }
  0x13   : > { %v3952_v2 = vld [vmem:[%s5133_s1 + $0xf8] sm:$0xff]   ;;  %3494 = vmatprep.subr.bf16.mxu0 %v3951_v1  ;;  %v3956_v6 = vld [vmem:[%s5133_s1 + $0xf0] sm:$0xff]   ;;  %v3960_v10 = vld [vmem:[%s5133_s1 + $0xe8] sm:$0xff]  }
  0x14   : > { %v3953_v3 = vld [vmem:[%s5133_s1 + $0x38] sm:$0xff]   ;;  %3606 = vmatprep.subr.bf16.mxu1 %v3952_v2  ;;  %v3957_v7 = vld [vmem:[%s5133_s1 + $0x30] sm:$0xff]   ;;  %v3961_v11 = vld [vmem:[%s5133_s1 + $0x28] sm:$0xff]  }
  0x15   : > { %v3954_v4 = vld [vmem:[%s5133_s1 + $0xb8] sm:$0xff]   ;;  %3495 = vmatpush3.bf16.msra.mxu0 %v3953_v3  ;;  %v3958_v8 = vld [vmem:[%s5133_s1 + $0xb0] sm:$0xff]   ;;  %v3962_v12 = vld [vmem:[%s5133_s1 + $0xa8] sm:$0xff]  }
  0x16   : > { %3607 = vmatpush3.bf16.msra.mxu1 %v3954_v4  ;;  %3496 = vmatprep.subr.bf16.mxu0 %v3955_v5  ;;  %v3963_v13 = vld [vmem:[%s5133_s1 + $0x60] sm:$0xff]   ;;  %v3967_v17 = vld [vmem:[%s5133_s1 + $0x58] sm:$0xff]   ;;  %v3971_v21 = vld [vmem:[%s5133_s1 + $0x50] sm:$0xff]  }
  0x17   : > { %3608 = vmatprep.subr.bf16.mxu1 %v3956_v6  ;;  %v3964_v14 = vld [vmem:[%s5133_s1 + $0xe0] sm:$0xff]   ;;  %v3968_v18 = vld [vmem:[%s5133_s1 + $0xd8] sm:$0xff]   ;;  %v3972_v22 = vld [vmem:[%s5133_s1 + $0xd0] sm:$0xff]  }
  0x18   : > { %v3965_v15 = vld [vmem:[%s5133_s1 + $0x20] sm:$0xff]   ;;  %v3969_v19 = vld [vmem:[%s5133_s1 + $0x18] sm:$0xff]   ;;  %v3973_v23 = vld [vmem:[%s5133_s1 + $0x10] sm:$0xff]  }
  0x19   : > { %3497 = vmatpush3.bf16.msra.mxu0 %v3957_v7  ;;  %v3966_v16 = vld [vmem:[%s5133_s1 + $0xa0] sm:$0xff]   ;;  %v3970_v20 = vld [vmem:[%s5133_s1 + $0x98] sm:$0xff]   ;;  %v3974_v24 = vld [vmem:[%s5133_s1 + $0x90] sm:$0xff]  }
  0x1a   : > { %3609 = vmatpush3.bf16.msra.mxu1 %v3958_v8  ;;  %3498 = vmatprep.subr.bf16.mxu0 %v3959_v9  ;;  %v3975_v25 = vld [vmem:[%s5133_s1 + $0x48] sm:$0xff]   ;;  %v3979_v29 = vld [vmem:[%s5133_s1 + $0x40] sm:$0xff]   ;;  %v3983_v41 = vld [vmem:[%s5133_s1 + $0x178] sm:$0xff]  }
  0x1b   : > { %3610 = vmatprep.subr.bf16.mxu1 %v3960_v10  ;;  %v3976_v26 = vld [vmem:[%s5133_s1 + $0xc8] sm:$0xff]   ;;  %v3980_v30 = vld [vmem:[%s5133_s1 + $0xc0] sm:$0xff]   ;;  %v3984_v42 = vld [vmem:[%s5133_s1 + $0x138] sm:$0xff]  }
  0x1c   : > { %v3977_v27 = vld [vmem:[%s5133_s1 + $0x8] sm:$0xff]   ;;  %v3981_v31 = vld [vmem:[%s5133_s1] sm:$0xff]   ;;  %v3985_v43 = vld [vmem:[%s5133_s1 + $0x1f8] sm:$0xff]  }
  0x1d   : > { %3499 = vmatpush3.bf16.msra.mxu0 %v3961_v11  ;;  %v3978_v28 = vld [vmem:[%s5133_s1 + $0x88] sm:$0xff]   ;;  %v3982_v32 = vld [vmem:[%s5133_s1 + $0x80] sm:$0xff]   ;;  %v3986_v44 = vld [vmem:[%s5133_s1 + $0x1b8] sm:$0xff]  }
  0x1e   : > { %3611 = vmatpush3.bf16.msra.mxu1 %v3962_v12  ;;  %3500 = vmatprep.subr.bf16.mxu0 %v3963_v13  ;;  %v141_v33 = vld [vmem:[%s4055_s15] sm:$0xff]  ;;  %v142_v35 = vld [vmem:[%s4055_s15 + $0x8] sm:$0xff]  ;;  %v3987_v56 = vld [vmem:[%s5133_s1 + $0x170] sm:$0xff]  }
  0x1f   : > { %3612 = vmatprep.subr.bf16.mxu1 %v3964_v14  ;;  %v145_v34 = vld [vmem:[%s4055_s15 + $0x20] sm:$0xff]  ;;  %v146_v38 = vld [vmem:[%s4055_s15 + $0x28] sm:$0xff]  ;;  %v3988_v59 = vld [vmem:[%s5133_s1 + $0x130] sm:$0xff]  }
  0x20   : > { %v2978_v36 = vcombine.low %v141_v33, %v145_v34  ;;  %v2979_v37 = vcombine.high %v141_v33, %v145_v34  ;;  %v2980_v39 = vcombine.low %v142_v35, %v146_v38  ;;  %v2981_v40 = vcombine.high %v142_v35, %v146_v38  ;;  %v149_v45 = vld [vmem:[%s4055_s15 + $0x40] sm:$0xff]  ;;  %v150_v48 = vld [vmem:[%s4055_s15 + $0x48] sm:$0xff]  ;;  %v3989_v61 = vld [vmem:[%s5133_s1 + $0x1f0] sm:$0xff]  }
  0x21   : > { %3501 = vmatpush3.bf16.msra.mxu0 %v3965_v15  ;;  %v153_v46 = vld [vmem:[%s4055_s15 + $0x60] sm:$0xff]  ;;  %v154_v49 = vld [vmem:[%s4055_s15 + $0x68] sm:$0xff]  ;;  %v3990_v62 = vld [vmem:[%s5133_s1 + $0x1b0] sm:$0xff]  }
  0x22   : > { %3613 = vmatpush3.bf16.msra.mxu1 %v3966_v16  ;;  %3502 = vmatprep.subr.bf16.mxu0 %v3967_v17  ;;  %v2987_v47 = vcombine.high %v149_v45, %v153_v46  ;;  %v157_v50 = vld [vmem:[%s4055_s15 + $0x80] sm:$0xff]  ;;  %v2989_v51 = vcombine.high %v150_v48, %v154_v49  ;;  %v158_v53 = vld [vmem:[%s4055_s15 + $0x88] sm:$0xff]  ;;  %v2986_v55 = vcombine.low %v149_v45, %v153_v46  ;;  %v4003_v35 = vld [vmem:[%s5133_s1 + $0x150] sm:$0xff]  }
  0x23   : > { %3614 = vmatprep.subr.bf16.mxu1 %v3968_v18  ;;  %1453 = vmatprep.mubr.bf16.mxu0 %v2979_v37  ;;  %v161_v52 = vld [vmem:[%s4055_s15 + $0xa0] sm:$0xff]  ;;  %v162_v54 = vld [vmem:[%s4055_s15 + $0xa8] sm:$0xff]  ;;  %v2988_v57 = vcombine.low %v150_v48, %v154_v49  ;;  %v4004_v37 = vld [vmem:[%s5133_s1 + $0x110] sm:$0xff]  }
  0x24   : > { %1614 = vmatprep.mubr.bf16.mxu1 %v2981_v40  ;;  %v2995_v58 = vcombine.high %v157_v50, %v161_v52  ;;  %v2997_v60 = vcombine.high %v158_v53, %v162_v54  ;;  %v165_v63 = vld [vmem:[%s4055_s15 + $0xc0] sm:$0xff]  ;;  %v166_v1 = vld [vmem:[%s4055_s15 + $0xc8] sm:$0xff]  ;;  %v2994_v4 = vcombine.low %v157_v50, %v161_v52  ;;  %v2996_v6 = vcombine.low %v158_v53, %v162_v54  ;;  %v4005_v38 = vld [vmem:[%s5133_s1 + $0x1d0] sm:$0xff]  }
  0x25   : > { %3503 = vmatpush3.bf16.msra.mxu0 %v3969_v19  ;;  %v169_v0 = vld [vmem:[%s4055_s15 + $0xe0] sm:$0xff]  ;;  %v170_v2 = vld [vmem:[%s4055_s15 + $0xe8] sm:$0xff]  ;;  %v4006_v40 = vld [vmem:[%s5133_s1 + $0x190] sm:$0xff]  }
  0x26   : > { %3615 = vmatpush3.bf16.msra.mxu1 %v3970_v20  ;;  %3504 = vmatprep.subr.bf16.mxu0 %v3971_v21  ;;  %v3991_v3 = vld [vmem:[%s5133_s1 + $0x168] sm:$0xff]   ;;  %v3003_v7 = vcombine.high %v165_v63, %v169_v0  ;;  %v3005_v9 = vcombine.high %v166_v1, %v170_v2  ;;  %v173_v11 = vld [vmem:[%s4055_s15 + $0x100] sm:$0xff]  ;;  %v3002_v17 = vcombine.low %v165_v63, %v169_v0 }
  0x27   : > { %3616 = vmatprep.subr.bf16.mxu1 %v3972_v22  ;;  %v3992_v5 = vld [vmem:[%s5133_s1 + $0x128] sm:$0xff]   ;;  %v177_v12 = vld [vmem:[%s4055_s15 + $0x120] sm:$0xff]  ;;  %v3004_v19 = vcombine.low %v166_v1, %v170_v2 }
  0x28   : > { %v3993_v8 = vld [vmem:[%s5133_s1 + $0x1e8] sm:$0xff]   ;;  %v3995_v15 = vld [vmem:[%s5133_s1 + $0x160] sm:$0xff]   ;;  %v3011_v20 = vcombine.high %v173_v11, %v177_v12 }
  0x29   : > { %3505 = vmatpush3.bf16.msra.mxu0 %v3973_v23  ;;  %v3994_v10 = vld [vmem:[%s5133_s1 + $0x1a8] sm:$0xff]   ;;  %v3996_v16 = vld [vmem:[%s5133_s1 + $0x120] sm:$0xff]  }
  0x2a   : > { %3617 = vmatpush3.bf16.msra.mxu1 %v3974_v24  ;;  %3506 = vmatprep.subr.bf16.mxu0 %v3975_v25  ;;  %v174_v13 = vld [vmem:[%s4055_s15 + $0x108] sm:$0xff]  ;;  %v3997_v18 = vld [vmem:[%s5133_s1 + $0x1e0] sm:$0xff]   ;;  %v3999_v25 = vld [vmem:[%s5133_s1 + $0x158] sm:$0xff]  }
  0x2b   : > { %3618 = vmatprep.subr.bf16.mxu1 %v3976_v26  ;;  %v178_v14 = vld [vmem:[%s4055_s15 + $0x128] sm:$0xff]  ;;  %v3998_v21 = vld [vmem:[%s5133_s1 + $0x1a0] sm:$0xff]  }
  0x2c   : > { %v3013_v22 = vcombine.high %v174_v13, %v178_v14  ;;  %v181_v23 = vld [vmem:[%s4055_s15 + $0x140] sm:$0xff]  ;;  %v182_v26 = vld [vmem:[%s4055_s15 + $0x148] sm:$0xff] }
  0x2d   : > { %3507 = vmatpush3.bf16.msra.mxu0 %v3977_v27  ;;  %v185_v24 = vld [vmem:[%s4055_s15 + $0x160] sm:$0xff]  ;;  %v186_v27 = vld [vmem:[%s4055_s15 + $0x168] sm:$0xff] }
  0x2e   : > { %3619 = vmatpush3.bf16.msra.mxu1 %v3978_v28  ;;  %3508 = vmatprep.subr.bf16.mxu0 %v3979_v29  ;;  %v4000_v28 = vld [vmem:[%s5133_s1 + $0x118] sm:$0xff]   ;;  %v3019_v33 = vcombine.high %v181_v23, %v185_v24  ;;  %v3021_v34 = vcombine.high %v182_v26, %v186_v27  ;;  %v4008_v48 = vld [vmem:[%s5133_s1 + $0x108] sm:$0xff]   ;;  %v201_v52 = vld [vmem:[%s4055_s15 + $0x1e0] sm:$0xff] }
  0x2f   : > { %3620 = vmatprep.subr.bf16.mxu1 %v3980_v30  ;;  %v4001_v29 = vld [vmem:[%s5133_s1 + $0x1d8] sm:$0xff]   ;;  %v4009_v49 = vld [vmem:[%s5133_s1 + $0x1c8] sm:$0xff]   ;;  %v205_v63 = vld [vmem:[%s4055_s15 + $0x200] sm:$0xff] }
  0x30   : > { %v4002_v30 = vld [vmem:[%s5133_s1 + $0x198] sm:$0xff]   ;;  %v4010_v50 = vld [vmem:[%s5133_s1 + $0x188] sm:$0xff]   ;;  %v209_v0 = vld [vmem:[%s4055_s15 + $0x220] sm:$0xff] }
  0x31   : > { %3509 = vmatpush3.bf16.msra.mxu0 %v3981_v31  ;;  %v3010_v31 = vcombine.low %v173_v11, %v177_v12  ;;  %v198_v53 = vld [vmem:[%s4055_s15 + $0x1c8] sm:$0xff]  ;;  %v3042_v11 = vcombine.low %v205_v63, %v209_v0 }
  0x32   : > { %3621 = vmatpush3.bf16.msra.mxu1 %v3982_v32  ;;  %3718 = vmatprep.subr.bf16.mxu0 %v3983_v41  ;;  %v3012_v32 = vcombine.low %v174_v13, %v178_v14  ;;  %v190_v41 = vld [vmem:[%s4055_s15 + $0x188] sm:$0xff] }
  0x33   : > { %3830 = vmatprep.subr.bf16.mxu1 %v3985_v43  ;;  %v3018_v43 = vcombine.low %v181_v23, %v185_v24  ;;  %v202_v54 = vld [vmem:[%s4055_s15 + $0x1e8] sm:$0xff]  ;;  %v229_v23 = vld [vmem:[%s4055_s15 + $0x2c0] sm:$0xff] }
  0x34   : > { %1454 = vmatmul.mubr.bf16.vlgmr.msra.gmra.mxu0 %v2978_v36  ;;  %v189_v36 = vld [vmem:[%s4055_s15 + $0x180] sm:$0xff]  ;;  %v206_v1 = vld [vmem:[%s4055_s15 + $0x208] sm:$0xff] }
  0x35   : > { %1615 = vmatmul.mubr.bf16.vlgmr.msra.gmra.mxu1 %v2980_v39  ;;  %3719 = vmatpush3.bf16.msra.mxu0 %v3984_v42  ;;  %v193_v39 = vld [vmem:[%s4055_s15 + $0x1a0] sm:$0xff]  ;;  %v194_v42 = vld [vmem:[%s4055_s15 + $0x1a8] sm:$0xff] }
  0x36   : > { %3831 = vmatpush3.bf16.msra.mxu1 %v3986_v44  ;;  %1461 = vmatprep.mubr.bf16.mxu0 %v2987_v47  ;;  %v3020_v44 = vcombine.low %v182_v26, %v186_v27  ;;  %v3027_v45 = vcombine.high %v189_v36, %v193_v39  ;;  %v3029_v46 = vcombine.high %v190_v41, %v194_v42  ;;  %v4007_v47 = vld [vmem:[%s5133_s1 + $0x148] sm:$0xff]   ;;  %v233_v24 = vld [vmem:[%s4055_s15 + $0x2e0] sm:$0xff] }
  0x37   : > { %1622 = vmatprep.mubr.bf16.mxu1 %v2989_v51  ;;  %3720 = vmatprep.subr.bf16.mxu0 %v3987_v56  ;;  %v197_v51 = vld [vmem:[%s4055_s15 + $0x1c0] sm:$0xff]  ;;  %v210_v2 = vld [vmem:[%s4055_s15 + $0x228] sm:$0xff] }
  0x38   : > { %3832 = vmatprep.subr.bf16.mxu1 %v3989_v61  ;;  %v4011_v56 = vld [vmem:[%s5133_s1 + $0x140] sm:$0xff]   ;;  %v3044_v12 = vcombine.low %v206_v1, %v210_v2  ;;  %v234_v26 = vld [vmem:[%s4055_s15 + $0x2e8] sm:$0xff] }
  0x39   : > { %3721 = vmatpush3.bf16.msra.mxu0 %v3988_v59  ;;  %v4012_v59 = vld [vmem:[%s5133_s1 + $0x100] sm:$0xff]  }
  0x3a   : > { %3833 = vmatpush3.bf16.msra.mxu1 %v3990_v62  ;;  %3722 = vmatprep.subr.bf16.mxu0 %v3991_v3  ;;  %v4013_v61 = vld [vmem:[%s5133_s1 + $0x1c0] sm:$0xff]   ;;  %v3034_v3 = vcombine.low %v197_v51, %v201_v52 }
  0x3b   : > { %3834 = vmatprep.subr.bf16.mxu1 %v3993_v8  ;;  %v4014_v62 = vld [vmem:[%s5133_s1 + $0x180] sm:$0xff]  }
  0x3c   : > { %1462 = vmatmul.mubr.bf16.gmra.mxu0 %v2986_v55  ;;  %v3026_v55 = vcombine.low %v189_v36, %v193_v39  ;;  %v217_v8 = vld [vmem:[%s4055_s15 + $0x260] sm:$0xff] }
  0x3d   : > { %1623 = vmatmul.mubr.bf16.gmra.mxu1 %v2988_v57  ;;  %1469 = vmatprep.mubr.bf16.mxu0 %v2995_v58  ;;  %v3028_v57 = vcombine.low %v190_v41, %v194_v42  ;;  %v3035_v58 = vcombine.high %v197_v51, %v201_v52  ;;  %v245_v39 = vld [vmem:[%s4055_s15 + $0x340] sm:$0xff]  ;;  %v246_v41 = vld [vmem:[%s4055_s15 + $0x348] sm:$0xff] }
  0x3e   : > { %1630 = vmatprep.mubr.bf16.mxu1 %v2997_v60  ;;  %3723 = vmatpush3.bf16.msra.mxu0 %v3992_v5  ;;  %v3037_v60 = vcombine.high %v198_v53, %v202_v54  ;;  %v3043_v5 = vcombine.high %v205_v63, %v209_v0  ;;  %v250_v42 = vld [vmem:[%s4055_s15 + $0x368] sm:$0xff]  ;;  %v143_v63 = vld [vmem:[%s4055_s15 + $0x10] sm:$0xff] }
  0x3f   : > { %3835 = vmatpush3.bf16.msra.mxu1 %v3994_v10  ;;  %3724 = vmatprep.subr.bf16.mxu0 %v3995_v15  ;;  %v218_v10 = vld [vmem:[%s4055_s15 + $0x268] sm:$0xff]  ;;  %v221_v15 = vld [vmem:[%s4055_s15 + $0x280] sm:$0xff]  ;;  %v3084_v52 = vcombine.low %v246_v41, %v250_v42  ;;  %v147_v0 = vld [vmem:[%s4055_s15 + $0x30] sm:$0xff] }
  0x40   : > { %3836 = vmatprep.subr.bf16.mxu1 %v3997_v18  ;;  %v226_v18 = vld [vmem:[%s4055_s15 + $0x2a8] sm:$0xff] }
  0x42   : > { %3725 = vmatpush3.bf16.msra.mxu0 %v3996_v16  ;;  %v225_v16 = vld [vmem:[%s4055_s15 + $0x2a0] sm:$0xff] }
  0x43   : > { %3837 = vmatpush3.bf16.msra.mxu1 %v3998_v21  ;;  %3726 = vmatprep.subr.bf16.mxu0 %v3999_v25  ;;  %v3059_v21 = vcombine.high %v221_v15, %v225_v16  ;;  %v230_v25 = vld [vmem:[%s4055_s15 + $0x2c8] sm:$0xff]  ;;  %v3058_v27 = vcombine.low %v221_v15, %v225_v16  ;;  %v159_v15 = vld [vmem:[%s4055_s15 + $0x90] sm:$0xff] }
  0x44   : > { %1470 = vmatmul.mubr.bf16.gmra.mxu0 %v2994_v4  ;;  %3838 = vmatprep.subr.bf16.mxu1 %v4001_v29  ;;  %v3036_v4 = vcombine.low %v198_v53, %v202_v54  ;;  %v3067_v29 = vcombine.high %v229_v23, %v233_v24  ;;  %v3068_v36 = vcombine.low %v230_v25, %v234_v26  ;;  %v163_v16 = vld [vmem:[%s4055_s15 + $0xb0] sm:$0xff] }
  0x45   : > { %1631 = vmatmul.mubr.bf16.gmra.mxu1 %v2996_v6  ;;  %1477 = vmatprep.mubr.bf16.mxu0 %v3003_v7  ;;  %v3045_v6 = vcombine.high %v206_v1, %v210_v2  ;;  %v213_v7 = vld [vmem:[%s4055_s15 + $0x240] sm:$0xff]  ;;  %v144_v1 = vld [vmem:[%s4055_s15 + $0x18] sm:$0xff] }
  0x46   : > { %1638 = vmatprep.mubr.bf16.mxu1 %v3005_v9  ;;  %3727 = vmatpush3.bf16.msra.mxu0 %v4000_v28  ;;  %v214_v9 = vld [vmem:[%s4055_s15 + $0x248] sm:$0xff]  ;;  %v3051_v13 = vcombine.high %v213_v7, %v217_v8  ;;  %v148_v2 = vld [vmem:[%s4055_s15 + $0x38] sm:$0xff] }
  0x47   : > { %3839 = vmatpush3.bf16.msra.mxu1 %v4002_v30  ;;  %3728 = vmatprep.subr.bf16.mxu0 %v4003_v35  ;;  %v3053_v14 = vcombine.high %v214_v9, %v218_v10  ;;  %v3069_v30 = vcombine.high %v230_v25, %v234_v26  ;;  %v3066_v35 = vcombine.low %v229_v23, %v233_v24  ;;  %v167_v23 = vld [vmem:[%s4055_s15 + $0xd0] sm:$0xff]  ;;  %v168_v25 = vld [vmem:[%s4055_s15 + $0xd8] sm:$0xff] }
  0x48   : > { %3840 = vmatprep.subr.bf16.mxu1 %v4005_v38  ;;  %v171_v24 = vld [vmem:[%s4055_s15 + $0xf0] sm:$0xff]  ;;  %v172_v26 = vld [vmem:[%s4055_s15 + $0xf8] sm:$0xff] }
  0x4a   : > { %3729 = vmatpush3.bf16.msra.mxu0 %v4004_v37 }
  0x4b   : > { %3841 = vmatpush3.bf16.msra.mxu1 %v4006_v40  ;;  %3730 = vmatprep.subr.bf16.mxu0 %v4007_v47  ;;  %v249_v40 = vld [vmem:[%s4055_s15 + $0x360] sm:$0xff] }
  0x4c   : > { %1478 = vmatmul.mubr.bf16.gmra.mxu0 %v3002_v17  ;;  %3842 = vmatprep.subr.bf16.mxu1 %v4009_v49  ;;  %v222_v17 = vld [vmem:[%s4055_s15 + $0x288] sm:$0xff]  ;;  %v253_v47 = vld [vmem:[%s4055_s15 + $0x380] sm:$0xff]  ;;  %v3082_v51 = vcombine.low %v245_v39, %v249_v40 }
  0x4d   : > { %1639 = vmatmul.mubr.bf16.gmra.mxu1 %v3004_v19  ;;  %1485 = vmatprep.mubr.bf16.mxu0 %v3011_v20  ;;  %v3050_v19 = vcombine.low %v213_v7, %v217_v8  ;;  %v3052_v20 = vcombine.low %v214_v9, %v218_v10  ;;  %v3060_v28 = vcombine.low %v222_v17, %v226_v18  ;;  %v254_v49 = vld [vmem:[%s4055_s15 + $0x388] sm:$0xff]  ;;  %v151_v7 = vld [vmem:[%s4055_s15 + $0x50] sm:$0xff]  ;;  %v152_v9 = vld [vmem:[%s4055_s15 + $0x58] sm:$0xff] }
  0x4e   : > { %1646 = vmatprep.mubr.bf16.mxu1 %v3013_v22  ;;  %3731 = vmatpush3.bf16.msra.mxu0 %v4008_v48  ;;  %v3061_v22 = vcombine.high %v222_v17, %v226_v18  ;;  %v257_v48 = vld [vmem:[%s4055_s15 + $0x3a0] sm:$0xff]  ;;  %v155_v8 = vld [vmem:[%s4055_s15 + $0x70] sm:$0xff]  ;;  %v156_v10 = vld [vmem:[%s4055_s15 + $0x78] sm:$0xff] }
  0x4f   : > { %3843 = vmatpush3.bf16.msra.mxu1 %v4010_v50  ;;  %3732 = vmatprep.subr.bf16.mxu0 %v4011_v56  ;;  %v258_v50 = vld [vmem:[%s4055_s15 + $0x3a8] sm:$0xff]  ;;  %v3091_v53 = vcombine.high %v253_v47, %v257_v48  ;;  %v265_v56 = vld [vmem:[%s4055_s15 + $0x3e0] sm:$0xff]  ;;  %v160_v17 = vld [vmem:[%s4055_s15 + $0x98] sm:$0xff] }
  0x50   : > { %3844 = vmatprep.subr.bf16.mxu1 %v4013_v61  ;;  %v3093_v54 = vcombine.high %v254_v49, %v258_v50  ;;  %v164_v18 = vld [vmem:[%s4055_s15 + $0xb8] sm:$0xff] }
  0x52   : > { %3733 = vmatpush3.bf16.msra.mxu0 %v4012_v59  ;;  %v3090_v59 = vcombine.low %v253_v47, %v257_v48  ;;  %v191_v47 = vld [vmem:[%s4055_s15 + $0x190] sm:$0xff] }
  0x53   : > { %3845 = vmatpush3.bf16.msra.mxu1 %v4014_v62  ;;  %v195_v48 = vld [vmem:[%s4055_s15 + $0x1b0] sm:$0xff] }
  0x54   : > { %1486 = vmatmul.mubr.bf16.gmra.mxu0 %v3010_v31  ;;  %v237_v31 = vld [vmem:[%s4055_s15 + $0x300] sm:$0xff] }
  0x55   : > { %1647 = vmatmul.mubr.bf16.gmra.mxu1 %v3012_v32  ;;  %1493 = vmatprep.mubr.bf16.mxu0 %v3019_v33  ;;  %v241_v32 = vld [vmem:[%s4055_s15 + $0x320] sm:$0xff]  ;;  %v238_v33 = vld [vmem:[%s4055_s15 + $0x308] sm:$0xff] }
  0x56   : > { %1654 = vmatprep.mubr.bf16.mxu1 %v3021_v34  ;;  %v242_v34 = vld [vmem:[%s4055_s15 + $0x328] sm:$0xff]  ;;  %v3075_v37 = vcombine.high %v237_v31, %v241_v32 }
  0x57   : > { %v3077_v38 = vcombine.high %v238_v33, %v242_v34 }
  0x5c   : > { %1494 = vmatmul.mubr.bf16.gmra.mxu0 %v3018_v43  ;;  %v3074_v43 = vcombine.low %v237_v31, %v241_v32  ;;  %v175_v31 = vld [vmem:[%s4055_s15 + $0x110] sm:$0xff] }
  0x5d   : > { %1655 = vmatmul.mubr.bf16.gmra.mxu1 %v3020_v44  ;;  %1501 = vmatprep.mubr.bf16.mxu0 %v3027_v45  ;;  %v3076_v44 = vcombine.low %v238_v33, %v242_v34  ;;  %v3083_v45 = vcombine.high %v245_v39, %v249_v40  ;;  %v179_v32 = vld [vmem:[%s4055_s15 + $0x130] sm:$0xff]  ;;  %v176_v33 = vld [vmem:[%s4055_s15 + $0x118] sm:$0xff] }
  0x5e   : > { %1662 = vmatprep.mubr.bf16.mxu1 %v3029_v46  ;;  %v3085_v46 = vcombine.high %v246_v41, %v250_v42  ;;  %v180_v34 = vld [vmem:[%s4055_s15 + $0x138] sm:$0xff]  ;;  %v183_v39 = vld [vmem:[%s4055_s15 + $0x150] sm:$0xff] }
  0x5f   : > { %v187_v40 = vld [vmem:[%s4055_s15 + $0x170] sm:$0xff]  ;;  %v184_v41 = vld [vmem:[%s4055_s15 + $0x158] sm:$0xff] }
  0x60   : > { %v188_v42 = vld [vmem:[%s4055_s15 + $0x178] sm:$0xff] }
  0x64   : > { %1502 = vmatmul.mubr.bf16.gmra.mxu0 %v3026_v55  ;;  %v261_v55 = vld [vmem:[%s4055_s15 + $0x3c0] sm:$0xff] }
  0x65   : > { %1663 = vmatmul.mubr.bf16.gmra.mxu1 %v3028_v57  ;;  %1509 = vmatprep.mubr.bf16.mxu0 %v3035_v58  ;;  %v262_v57 = vld [vmem:[%s4055_s15 + $0x3c8] sm:$0xff]  ;;  %v3099_v61 = vcombine.high %v261_v55, %v265_v56 }
  0x66   : > { %1670 = vmatprep.mubr.bf16.mxu1 %v3037_v60  ;;  %v266_v58 = vld [vmem:[%s4055_s15 + $0x3e8] sm:$0xff]  ;;  %v3092_v60 = vcombine.low %v254_v49, %v258_v50  ;;  %v192_v49 = vld [vmem:[%s4055_s15 + $0x198] sm:$0xff] }
  0x67   : > { %v3101_v62 = vcombine.high %v262_v57, %v266_v58  ;;  %v196_v50 = vld [vmem:[%s4055_s15 + $0x1b8] sm:$0xff] }
  0x6c   : > { %1510 = vmatmul.mubr.bf16.gmra.mxu0 %v3034_v3  ;;  %v3098_v3 = vcombine.low %v261_v55, %v265_v56  ;;  %v199_v55 = vld [vmem:[%s4055_s15 + $0x1d0] sm:$0xff] }
  0x6d   : > { %1671 = vmatmul.mubr.bf16.gmra.mxu1 %v3036_v4  ;;  %1517 = vmatprep.mubr.bf16.mxu0 %v3043_v5  ;;  %v3100_v4 = vcombine.low %v262_v57, %v266_v58  ;;  %v2983_v5 = vcombine.high %v143_v63, %v147_v0  ;;  %v203_v56 = vld [vmem:[%s4055_s15 + $0x1f0] sm:$0xff]  ;;  %v200_v57 = vld [vmem:[%s4055_s15 + $0x1d8] sm:$0xff] }
  0x6e   : > { %1678 = vmatprep.mubr.bf16.mxu1 %v3045_v6  ;;  %v2985_v6 = vcombine.high %v144_v1, %v148_v2  ;;  %v204_v58 = vld [vmem:[%s4055_s15 + $0x1f8] sm:$0xff] }
  0x74   : > { %1518 = vmatmul.mubr.bf16.gmra.mxu0 %v3042_v11  ;;  %v2982_v11 = vcombine.low %v143_v63, %v147_v0  ;;  %v207_v63 = vld [vmem:[%s4055_s15 + $0x210] sm:$0xff] }
  0x75   : > { %1679 = vmatmul.mubr.bf16.gmra.mxu1 %v3044_v12  ;;  %1525 = vmatprep.mubr.bf16.mxu0 %v3051_v13  ;;  %v2984_v12 = vcombine.low %v144_v1, %v148_v2  ;;  %v2991_v13 = vcombine.high %v151_v7, %v155_v8  ;;  %v211_v0 = vld [vmem:[%s4055_s15 + $0x230] sm:$0xff]  ;;  %v208_v1 = vld [vmem:[%s4055_s15 + $0x218] sm:$0xff] }
  0x76   : > { %1686 = vmatprep.mubr.bf16.mxu1 %v3053_v14  ;;  %v2993_v14 = vcombine.high %v152_v9, %v156_v10  ;;  %v212_v2 = vld [vmem:[%s4055_s15 + $0x238] sm:$0xff] }
  0x7c   : > { %1526 = vmatmul.mubr.bf16.gmra.mxu0 %v3050_v19  ;;  %v2990_v19 = vcombine.low %v151_v7, %v155_v8  ;;  %v215_v7 = vld [vmem:[%s4055_s15 + $0x250] sm:$0xff] }
  0x7d   : > { %1687 = vmatmul.mubr.bf16.gmra.mxu1 %v3052_v20  ;;  %1533 = vmatprep.mubr.bf16.mxu0 %v3059_v21  ;;  %v2992_v20 = vcombine.low %v152_v9, %v156_v10  ;;  %v2999_v21 = vcombine.high %v159_v15, %v163_v16  ;;  %v219_v8 = vld [vmem:[%s4055_s15 + $0x270] sm:$0xff]  ;;  %v216_v9 = vld [vmem:[%s4055_s15 + $0x258] sm:$0xff] }
  0x7e   : > { %1694 = vmatprep.mubr.bf16.mxu1 %v3061_v22  ;;  %v3001_v22 = vcombine.high %v160_v17, %v164_v18  ;;  %v220_v10 = vld [vmem:[%s4055_s15 + $0x278] sm:$0xff] }
  0x84   : > { %1534 = vmatmul.mubr.bf16.gmra.mxu0 %v3058_v27  ;;  %v2998_v27 = vcombine.low %v159_v15, %v163_v16 }
  0x85   : > { %1695 = vmatmul.mubr.bf16.gmra.mxu1 %v3060_v28  ;;  %1541 = vmatprep.mubr.bf16.mxu0 %v3067_v29  ;;  %v3000_v28 = vcombine.low %v160_v17, %v164_v18  ;;  %v3007_v29 = vcombine.high %v167_v23, %v171_v24  ;;  %v223_v18 = vld [vmem:[%s4055_s15 + $0x290] sm:$0xff] }
  0x86   : > { %1702 = vmatprep.mubr.bf16.mxu1 %v3069_v30  ;;  %v3009_v30 = vcombine.high %v168_v25, %v172_v26 }
  0x8c   : > { %1542 = vmatmul.mubr.bf16.gmra.mxu0 %v3066_v35  ;;  %v3006_v35 = vcombine.low %v167_v23, %v171_v24  ;;  %v228_v23 = vld [vmem:[%s4055_s15 + $0x2b8] sm:$0xff] }
  0x8d   : > { %1703 = vmatmul.mubr.bf16.gmra.mxu1 %v3068_v36  ;;  %1549 = vmatprep.mubr.bf16.mxu0 %v3075_v37  ;;  %v3008_v36 = vcombine.low %v168_v25, %v172_v26  ;;  %v3015_v37 = vcombine.high %v175_v31, %v179_v32  ;;  %v3054_v26 = vcombine.low %v215_v7, %v219_v8 }
  0x8e   : > { %1710 = vmatprep.mubr.bf16.mxu1 %v3077_v38  ;;  %v3017_v38 = vcombine.high %v176_v33, %v180_v34 }
  0x94   : > { %1550 = vmatmul.mubr.bf16.gmra.mxu0 %v3074_v43  ;;  %v3014_v43 = vcombine.low %v175_v31, %v179_v32 }
  0x95   : > { %1711 = vmatmul.mubr.bf16.gmra.mxu1 %v3076_v44  ;;  %1557 = vmatprep.mubr.bf16.mxu0 %v3083_v45  ;;  %v3016_v44 = vcombine.low %v176_v33, %v180_v34  ;;  %v3023_v45 = vcombine.high %v183_v39, %v187_v40 }
  0x96   : > { %1718 = vmatprep.mubr.bf16.mxu1 %v3085_v46  ;;  %v3025_v46 = vcombine.high %v184_v41, %v188_v42 }
  0x9c   : > { %1558 = vmatmul.mubr.bf16.gmra.mxu0 %v3082_v51  ;;  %v3022_v51 = vcombine.low %v183_v39, %v187_v40  ;;  %v231_v40 = vld [vmem:[%s4055_s15 + $0x2d0] sm:$0xff] }
  0x9d   : > { %1719 = vmatmul.mubr.bf16.gmra.mxu1 %v3084_v52  ;;  %1565 = vmatprep.mubr.bf16.mxu0 %v3091_v53  ;;  %v3024_v52 = vcombine.low %v184_v41, %v188_v42  ;;  %v3031_v53 = vcombine.high %v191_v47, %v195_v48  ;;  %v235_v41 = vld [vmem:[%s4055_s15 + $0x2f0] sm:$0xff] }
  0x9e   : > { %1726 = vmatprep.mubr.bf16.mxu1 %v3093_v54  ;;  %v3033_v54 = vcombine.high %v192_v49, %v196_v50 }
  0xa4   : > { %1566 = vmatmul.mubr.bf16.gmra.mxu0 %v3090_v59  ;;  %v3030_v59 = vcombine.low %v191_v47, %v195_v48 }
  0xa5   : > { %1727 = vmatmul.mubr.bf16.gmra.mxu1 %v3092_v60  ;;  %1573 = vmatprep.mubr.bf16.mxu0 %v3099_v61  ;;  %v3032_v60 = vcombine.low %v192_v49, %v196_v50  ;;  %v3039_v61 = vcombine.high %v199_v55, %v203_v56 }
  0xa6   : > { %1734 = vmatprep.mubr.bf16.mxu1 %v3101_v62  ;;  %v3041_v62 = vcombine.high %v200_v57, %v204_v58 }
  0xac   : > { %1574 = vmatmul.mubr.bf16.gmra.mxu0 %v3098_v3  ;;  %v3038_v3 = vcombine.low %v199_v55, %v203_v56 }
  0xad   : > { %1735 = vmatmul.mubr.bf16.gmra.mxu1 %v3100_v4  ;;  %1775 = vmatprep.mubr.bf16.mxu0 %v2983_v5  ;;  %v3040_v4 = vcombine.low %v200_v57, %v204_v58  ;;  %v3047_v5 = vcombine.high %v207_v63, %v211_v0 }
  0xae   : > { %1936 = vmatprep.mubr.bf16.mxu1 %v2985_v6  ;;  %v3049_v6 = vcombine.high %v208_v1, %v212_v2 }
  0xb4   : > { %1776 = vmatmul.mubr.bf16.vlgmr.msra.gmra.mxu0 %v2982_v11  ;;  %v3046_v11 = vcombine.low %v207_v63, %v211_v0  ;;  %v243_v63 = vld [vmem:[%s4055_s15 + $0x330] sm:$0xff] }
  0xb5   : > { %1937 = vmatmul.mubr.bf16.vlgmr.msra.gmra.mxu1 %v2984_v12  ;;  %1783 = vmatprep.mubr.bf16.mxu0 %v2991_v13  ;;  %v3048_v12 = vcombine.low %v208_v1, %v212_v2  ;;  %v3055_v13 = vcombine.high %v215_v7, %v219_v8  ;;  %v240_v2 = vld [vmem:[%s4055_s15 + $0x318] sm:$0xff] }
  0xb6   : > { %1944 = vmatprep.mubr.bf16.mxu1 %v2993_v14  ;;  %v3057_v14 = vcombine.high %v216_v9, %v220_v10 }
  0xbc   : > { %1784 = vmatmul.mubr.bf16.gmra.mxu0 %v2990_v19  ;;  %v227_v19 = vld [vmem:[%s4055_s15 + $0x2b0] sm:$0xff] }
  0xbd   : > { %1945 = vmatmul.mubr.bf16.gmra.mxu1 %v2992_v20  ;;  %1791 = vmatprep.mubr.bf16.mxu0 %v2999_v21  ;;  %v3062_v48 = vcombine.low %v223_v18, %v227_v19 }
  0xbe   : > { %1952 = vmatprep.mubr.bf16.mxu1 %v3001_v22  ;;  %v224_v22 = vld [vmem:[%s4055_s15 + $0x298] sm:$0xff] }
  0xbf   : > { %v3065_v32 = vcombine.high %v224_v22, %v228_v23  ;;  %v3064_v50 = vcombine.low %v224_v22, %v228_v23 }
  0xc4   : > { %1792 = vmatmul.mubr.bf16.gmra.mxu0 %v2998_v27 }
  0xc5   : > { %1953 = vmatmul.mubr.bf16.gmra.mxu1 %v3000_v28  ;;  %1799 = vmatprep.mubr.bf16.mxu0 %v3007_v29  ;;  %v3056_v28 = vcombine.low %v216_v9, %v220_v10  ;;  %v3063_v29 = vcombine.high %v223_v18, %v227_v19 }
  0xc6   : > { %1960 = vmatprep.mubr.bf16.mxu1 %v3009_v30 }
  0xcc   : > { %1800 = vmatmul.mubr.bf16.gmra.mxu0 %v3006_v35 }
  0xcd   : > { %1961 = vmatmul.mubr.bf16.gmra.mxu1 %v3008_v36  ;;  %1807 = vmatprep.mubr.bf16.mxu0 %v3015_v37 }
  0xce   : > { %1968 = vmatprep.mubr.bf16.mxu1 %v3017_v38 }
  0xd4   : > { %1808 = vmatmul.mubr.bf16.gmra.mxu0 %v3014_v43 }
  0xd5   : > { %1969 = vmatmul.mubr.bf16.gmra.mxu1 %v3016_v44  ;;  %1815 = vmatprep.mubr.bf16.mxu0 %v3023_v45  ;;  %v232_v44 = vld [vmem:[%s4055_s15 + $0x2d8] sm:$0xff] }
  0xd6   : > { %1976 = vmatprep.mubr.bf16.mxu1 %v3025_v46  ;;  %v236_v45 = vld [vmem:[%s4055_s15 + $0x2f8] sm:$0xff] }
  0xd7   : > { %v3072_v8 = vcombine.low %v232_v44, %v236_v45 }
  0xdc   : > { %1816 = vmatmul.mubr.bf16.gmra.mxu0 %v3022_v51  ;;  %v3071_v51 = vcombine.high %v231_v40, %v235_v41 }
  0xdd   : > { %1977 = vmatmul.mubr.bf16.gmra.mxu1 %v3024_v52  ;;  %1823 = vmatprep.mubr.bf16.mxu0 %v3031_v53 }
  0xde   : > { %1984 = vmatprep.mubr.bf16.mxu1 %v3033_v54  ;;  %v3073_v54 = vcombine.high %v232_v44, %v236_v45  ;;  %v255_v44 = vld [vmem:[%s4055_s15 + $0x390] sm:$0xff] }
  0xdf   : > { %v259_v45 = vld [vmem:[%s4055_s15 + $0x3b0] sm:$0xff] }
  0xe4   : > { %1824 = vmatmul.mubr.bf16.gmra.mxu0 %v3030_v59 }
  0xe5   : > { %1985 = vmatmul.mubr.bf16.gmra.mxu1 %v3032_v60  ;;  %1831 = vmatprep.mubr.bf16.mxu0 %v3039_v61 }
  0xe6   : > { %1992 = vmatprep.mubr.bf16.mxu1 %v3041_v62  ;;  %v239_v62 = vld [vmem:[%s4055_s15 + $0x310] sm:$0xff] }
  0xe7   : > { %v3079_v9 = vcombine.high %v239_v62, %v243_v63 }
  0xec   : > { %1832 = vmatmul.mubr.bf16.gmra.mxu0 %v3038_v3  ;;  %v244_v3 = vld [vmem:[%s4055_s15 + $0x338] sm:$0xff] }
  0xed   : > { %1993 = vmatmul.mubr.bf16.gmra.mxu1 %v3040_v4  ;;  %1839 = vmatprep.mubr.bf16.mxu0 %v3047_v5 }
  0xee   : > { %2000 = vmatprep.mubr.bf16.mxu1 %v3049_v6  ;;  %v3070_v6 = vcombine.low %v231_v40, %v235_v41 }
  0xf4   : > { %v3510_v15 = vpop.f32.mrf.mxu0  ;;  %1840 = vmatmul.mubr.bf16.gmra.mxu0 %v3046_v11 }
  0xf5   : > { %v3622_v16 = vpop.f32.mrf.mxu1  ;;  %2001 = vmatmul.mubr.bf16.gmra.mxu1 %v3048_v12  ;;  %1847 = vmatprep.mubr.bf16.mxu0 %v3055_v13  ;;  %v3081_v12 = vcombine.high %v240_v2, %v244_v3 }
  0xf6   : > { %v3511_v17 = vpop.f32.mrf.mxu0  ;;  %2008 = vmatprep.mubr.bf16.mxu1 %v3057_v14 }
  0xf7   : > { %v3512_v20 = vadd.f32 %v3511_v17, %v3510_v15  ;;  %v3623_v21 = vpop.f32.mrf.mxu1 }
  0xf8   : > { %v3624_v24 = vadd.f32 %v3623_v21, %v3622_v16  ;;  %v3513_v25 = vpop.f32.mrf.mxu0  ;;  %v251_v21 = vld [vmem:[%s4055_s15 + $0x370] sm:$0xff] }
  0xf9   : > { %v3625_v27 = vpop.f32.mrf.mxu1 }
  0xfa   : > { %v4358_v30 = vadd.f32 %v3624_v24, %v3512_v20  ;;  %v3514_v31 = vpop.f32.mrf.mxu0  ;;  %v247_v20 = vld [vmem:[%s4055_s15 + $0x350] sm:$0xff]  ;;  %v248_v24 = vld [vmem:[%s4055_s15 + $0x358] sm:$0xff] }
  0xfb   : > { %v3515_v33 = vadd.f32 %v3514_v31, %v3513_v25  ;;  %v3626_v34 = vpop.f32.mrf.mxu1  ;;  %v252_v25 = vld [vmem:[%s4055_s15 + $0x378] sm:$0xff]  ;;  %v3080_v31 = vcombine.low %v240_v2, %v244_v3 }
  0xfc   : > { %v3627_v35 = vadd.f32 %v3626_v34, %v3625_v27  ;;  %v3516_v36 = vpop.f32.mrf.mxu0  ;;  %1848 = vmatmul.mubr.bf16.gmra.mxu0 %v3054_v26 }
  0xfd   : > { %v3628_v37 = vpop.f32.mrf.mxu1  ;;  %2009 = vmatmul.mubr.bf16.gmra.mxu1 %v3056_v28  ;;  %1855 = vmatprep.mubr.bf16.mxu0 %v3063_v29  ;;  %v3078_v28 = vcombine.low %v239_v62, %v243_v63 }
  0xfe   : > { %v4360_v38 = vadd.f32 %v3627_v35, %v3515_v33  ;;  %v3517_v39 = vpop.f32.mrf.mxu0  ;;  %2016 = vmatprep.mubr.bf16.mxu1 %v3065_v32  ;;  %v3087_v32 = vcombine.high %v247_v20, %v251_v21  ;;  %v3089_v35 = vcombine.high %v248_v24, %v252_v25 }
  0xff   : > { %v3518_v42 = vadd.f32 %v3517_v39, %v3516_v36  ;;  %v3629_v43 = vpop.f32.mrf.mxu1 }
 0x100   : > { %v3630_v46 = vadd.f32 %v3629_v43, %v3628_v37  ;;  %v3519_v47 = vpop.f32.mrf.mxu0 }
 0x101   : > { %v3631_v49 = vpop.f32.mrf.mxu1 }
 0x102   : > { %v4366_v52 = vadd.f32 %v3630_v46, %v3518_v42  ;;  %v3520_v53 = vpop.f32.mrf.mxu0 }
 0x103   : > { %v3521_v55 = vadd.f32 %v3520_v53, %v3519_v47  ;;  %v3632_v56 = vpop.f32.mrf.mxu1  ;;  %v3086_v53 = vcombine.low %v247_v20, %v251_v21 }
 0x104   : > { %v3633_v57 = vadd.f32 %v3632_v56, %v3631_v49  ;;  %v3522_v58 = vpop.f32.mrf.mxu0  ;;  %1856 = vmatmul.mubr.bf16.gmra.mxu0 %v3062_v48  ;;  %v256_v48 = vld [vmem:[%s4055_s15 + $0x398] sm:$0xff]  ;;  %v3095_v56 = vcombine.high %v255_v44, %v259_v45 }
 0x105   : > { %v3634_v59 = vpop.f32.mrf.mxu1  ;;  %2017 = vmatmul.mubr.bf16.gmra.mxu1 %v3064_v50  ;;  %1863 = vmatprep.mubr.bf16.mxu0 %v3071_v51  ;;  %v260_v49 = vld [vmem:[%s4055_s15 + $0x3b8] sm:$0xff] }
 0x106   : > { %v4368_v60 = vadd.f32 %v3633_v57, %v3521_v55  ;;  %v3523_v61 = vpop.f32.mrf.mxu0  ;;  %2024 = vmatprep.mubr.bf16.mxu1 %v3073_v54  ;;  %v3088_v55 = vcombine.low %v248_v24, %v252_v25 }
 0x107   : > { %v3524_v0 = vadd.f32 %v3523_v61, %v3522_v58  ;;  %v3635_v1 = vpop.f32.mrf.mxu1 }
 0x108   : > { %v3636_v4 = vadd.f32 %v3635_v1, %v3634_v59  ;;  %v3525_v5 = vpop.f32.mrf.mxu0  ;;  %v3097_v59 = vcombine.high %v256_v48, %v260_v49 }
 0x109   : > { %v3637_v7 = vpop.f32.mrf.mxu1 }
 0x10a   : > { %v4374_v10 = vadd.f32 %v3636_v4, %v3524_v0  ;;  %v3526_v11 = vpop.f32.mrf.mxu0  ;;  %v263_v4 = vld [vmem:[%s4055_s15 + $0x3d0] sm:$0xff] }
 0x10b   : > { %v3527_v13 = vadd.f32 %v3526_v11, %v3525_v5  ;;  %v3638_v14 = vpop.f32.mrf.mxu1  ;;  %v267_v5 = vld [vmem:[%s4055_s15 + $0x3f0] sm:$0xff] }
 0x10c   : > { %v3639_v15 = vadd.f32 %v3638_v14, %v3637_v7  ;;  %v3528_v16 = vpop.f32.mrf.mxu0  ;;  %1864 = vmatmul.mubr.bf16.gmra.mxu0 %v3070_v6 }
 0x10d   : > { %v3640_v17 = vpop.f32.mrf.mxu1  ;;  %2025 = vmatmul.mubr.bf16.gmra.mxu1 %v3072_v8  ;;  %1871 = vmatprep.mubr.bf16.mxu0 %v3079_v9  ;;  %v264_v8 = vld [vmem:[%s4055_s15 + $0x3d8] sm:$0xff] }
 0x10e   : > { %v4376_v18 = vadd.f32 %v3639_v15, %v3527_v13  ;;  %v3529_v19 = vpop.f32.mrf.mxu0  ;;  %2032 = vmatprep.mubr.bf16.mxu1 %v3081_v12  ;;  %v268_v9 = vld [vmem:[%s4055_s15 + $0x3f8] sm:$0xff]  ;;  %v3094_v13 = vcombine.low %v255_v44, %v259_v45  ;;  %v3096_v15 = vcombine.low %v256_v48, %v260_v49  ;;  %s3170_s15 = sshll.u32 %s4047_s10, 8 }
 0x10f   : > { %v3530_v22 = vadd.f32 %v3529_v19, %v3528_v16  ;;  %v3641_v23 = vpop.f32.mrf.mxu1  ;;  %v3103_v16 = vcombine.high %v263_v4, %v267_v5  ;;  %v3105_v20 = vcombine.high %v264_v8, %v268_v9  ;;  %s4444_s19 = scalar_lea.vmem [#allocation2], %s3170_s15 }
 0x110   : > { %v3642_v26 = vadd.f32 %v3641_v23, %v3640_v17  ;;  %v3531_v27 = vpop.f32.mrf.mxu0 }
 0x111   : > { %v3643_v29 = vpop.f32.mrf.mxu1 }
 0x112   : > { %v4382_v33 = vadd.f32 %v3642_v26, %v3530_v22  ;;  %v3532_v34 = vpop.f32.mrf.mxu0 }
 0x113   : > { %v3533_v36 = vadd.f32 %v3532_v34, %v3531_v27  ;;  %v3644_v37 = vpop.f32.mrf.mxu1  ;;  %v3102_v34 = vcombine.low %v263_v4, %v267_v5 }
 0x114   : > { %v3645_v39 = vadd.f32 %v3644_v37, %v3643_v29  ;;  %v3534_v40 = vpop.f32.mrf.mxu0  ;;  %1872 = vmatmul.mubr.bf16.gmra.mxu0 %v3078_v28 }
 0x115   : > { %v3646_v41 = vpop.f32.mrf.mxu1  ;;  %2033 = vmatmul.mubr.bf16.gmra.mxu1 %v3080_v31  ;;  %1879 = vmatprep.mubr.bf16.mxu0 %v3087_v32 }
 0x116   : > { %v4384_v42 = vadd.f32 %v3645_v39, %v3533_v36  ;;  %v3535_v43 = vpop.f32.mrf.mxu0  ;;  %2040 = vmatprep.mubr.bf16.mxu1 %v3089_v35  ;;  %v3104_v36 = vcombine.low %v264_v8, %v268_v9 }
 0x117   : > { %v3536_v46 = vadd.f32 %v3535_v43, %v3534_v40  ;;  %v3647_v47 = vpop.f32.mrf.mxu1 }
 0x118   : > { %v3648_v50 = vadd.f32 %v3647_v47, %v3646_v41  ;;  %v3537_v51 = vpop.f32.mrf.mxu0 }
 0x119   : > { %v3649_v54 = vpop.f32.mrf.mxu1 }
 0x11a   : > { %v4390_v57 = vadd.f32 %v3648_v50, %v3536_v46  ;;  %v3538_v58 = vpop.f32.mrf.mxu0 }
 0x11b   : > { %v3539_v61 = vadd.f32 %v3538_v58, %v3537_v51  ;;  %v3650_v62 = vpop.f32.mrf.mxu1 }
 0x11c   : > { %v3651_v63 = vadd.f32 %v3650_v62, %v3649_v54  ;;  %v3540_v0 = vpop.f32.mrf.mxu0  ;;  %1880 = vmatmul.mubr.bf16.gmra.mxu0 %v3086_v53 }
 0x11d   : > { %v3652_v1 = vpop.f32.mrf.mxu1  ;;  %2041 = vmatmul.mubr.bf16.gmra.mxu1 %v3088_v55  ;;  %1887 = vmatprep.mubr.bf16.mxu0 %v3095_v56 }
 0x11e   : > { %v4392_v2 = vadd.f32 %v3651_v63, %v3539_v61  ;;  %v3541_v3 = vpop.f32.mrf.mxu0  ;;  %2048 = vmatprep.mubr.bf16.mxu1 %v3097_v59 }
 0x11f   : > { %v3542_v6 = vadd.f32 %v3541_v3, %v3540_v0  ;;  %v3653_v7 = vpop.f32.mrf.mxu1 }
 0x120   : > { %v3654_v11 = vadd.f32 %v3653_v7, %v3652_v1  ;;  %v3543_v12 = vpop.f32.mrf.mxu0 }
 0x121   : > { %v3655_v14 = vpop.f32.mrf.mxu1 }
 0x122   : > { %v4398_v17 = vadd.f32 %v3654_v11, %v3542_v6  ;;  %v3544_v19 = vpop.f32.mrf.mxu0 }
 0x123   : > { %v3545_v21 = vadd.f32 %v3544_v19, %v3543_v12  ;;  %v3656_v22 = vpop.f32.mrf.mxu1 }
 0x124   : > { %v3657_v23 = vadd.f32 %v3656_v22, %v3655_v14  ;;  %v3546_v24 = vpop.f32.mrf.mxu0  ;;  %1888 = vmatmul.mubr.bf16.gmra.mxu0 %v3094_v13 }
 0x125   : > { %v3658_v25 = vpop.f32.mrf.mxu1  ;;  %2049 = vmatmul.mubr.bf16.gmra.mxu1 %v3096_v15  ;;  %1895 = vmatprep.mubr.bf16.mxu0 %v3103_v16 }
 0x126   : > { %v4400_v26 = vadd.f32 %v3657_v23, %v3545_v21  ;;  %v3547_v27 = vpop.f32.mrf.mxu0  ;;  %2056 = vmatprep.mubr.bf16.mxu1 %v3105_v20 }
 0x127   : > { %v3548_v28 = vadd.f32 %v3547_v27, %v3546_v24  ;;  %v3659_v29 = vpop.f32.mrf.mxu1 }
 0x128   : > { %v3660_v31 = vadd.f32 %v3659_v29, %v3658_v25  ;;  %v3549_v32 = vpop.f32.mrf.mxu0 }
 0x129   : > { %v3661_v35 = vpop.f32.mrf.mxu1 }
 0x12a   : > { %v4402_v37 = vadd.f32 %v3660_v31, %v3548_v28  ;;  %v3550_v39 = vpop.f32.mrf.mxu0 }
 0x12b   : > { %v3551_v40 = vadd.f32 %v3550_v39, %v3549_v32  ;;  %v3662_v41 = vpop.f32.mrf.mxu1 }
 0x12c   : > { %v3663_v43 = vadd.f32 %v3662_v41, %v3661_v35  ;;  %v3552_v44 = vpop.f32.mrf.mxu0  ;;  %1896 = vmatmul.mubr.bf16.gmra.mxu0 %v3102_v34 }
 0x12d   : > { %v3664_v45 = vpop.f32.mrf.mxu1  ;;  %2057 = vmatmul.mubr.bf16.gmra.mxu1 %v3104_v36 }
 0x12e   : > { %v4404_v46 = vadd.f32 %v3663_v43, %v3551_v40  ;;  %v3553_v47 = vpop.f32.mrf.mxu0 }
 0x12f   : > { %v3554_v48 = vadd.f32 %v3553_v47, %v3552_v44  ;;  %v3665_v49 = vpop.f32.mrf.mxu1 }
 0x130   : > { %v3666_v50 = vadd.f32 %v3665_v49, %v3664_v45  ;;  %v3555_v51 = vpop.f32.mrf.mxu0 }
 0x131   : > { %v3667_v53 = vpop.f32.mrf.mxu1 }
 0x132   : > { %v4406_v54 = vadd.f32 %v3666_v50, %v3554_v48  ;;  %v3556_v55 = vpop.f32.mrf.mxu0 }
 0x133   : > { %v3557_v56 = vadd.f32 %v3556_v55, %v3555_v51  ;;  %v3668_v58 = vpop.f32.mrf.mxu1 }
 0x134   : > { %v3669_v59 = vadd.f32 %v3668_v58, %v3667_v53  ;;  %v3558_v61 = vpop.f32.mrf.mxu0 }
 0x135   : > { %v3670_v62 = vpop.f32.mrf.mxu1 }
 0x136   : > { %v4408_v63 = vadd.f32 %v3669_v59, %v3557_v56  ;;  %v3559_v0 = vpop.f32.mrf.mxu0 }
 0x137   : > { %v3560_v1 = vadd.f32 %v3559_v0, %v3558_v61  ;;  %v3671_v3 = vpop.f32.mrf.mxu1 }
 0x138   : > { %v3672_v4 = vadd.f32 %v3671_v3, %v3670_v62  ;;  %v3561_v5 = vpop.f32.mrf.mxu0 }
 0x139   : > { %v3673_v6 = vpop.f32.mrf.mxu1 }
 0x13a   : > { %v4410_v7 = vadd.f32 %v3672_v4, %v3560_v1  ;;  %v3562_v8 = vpop.f32.mrf.mxu0 }
 0x13b   : > { %v3563_v9 = vadd.f32 %v3562_v8, %v3561_v5  ;;  %v3674_v11 = vpop.f32.mrf.mxu1 }
 0x13c   : > { %v3675_v12 = vadd.f32 %v3674_v11, %v3673_v6  ;;  %v3564_v13 = vpop.f32.mrf.mxu0 }
 0x13d   : > { %v3676_v14 = vpop.f32.mrf.mxu1 }
 0x13e   : > { %v4412_v15 = vadd.f32 %v3675_v12, %v3563_v9  ;;  %v3565_v16 = vpop.f32.mrf.mxu0 }
 0x13f   : > { %v3566_v19 = vadd.f32 %v3565_v16, %v3564_v13  ;;  %v3677_v20 = vpop.f32.mrf.mxu1 }
 0x140   : > { %v3678_v21 = vadd.f32 %v3677_v20, %v3676_v14  ;;  %v3567_v22 = vpop.f32.mrf.mxu0 }
 0x141   : > { %v3679_v23 = vpop.f32.mrf.mxu1 }
 0x142   : > { %v4414_v24 = vadd.f32 %v3678_v21, %v3566_v19  ;;  %v3568_v25 = vpop.f32.mrf.mxu0 }
 0x143   : > { %v3569_v27 = vadd.f32 %v3568_v25, %v3567_v22  ;;  %v3680_v28 = vpop.f32.mrf.mxu1 }
 0x144   : > { %v3681_v29 = vadd.f32 %v3680_v28, %v3679_v23  ;;  %v3570_v31 = vpop.f32.mrf.mxu0 }
 0x145   : > { %v3682_v32 = vpop.f32.mrf.mxu1 }
 0x146   : > { %v4416_v34 = vadd.f32 %v3681_v29, %v3569_v27  ;;  %v3571_v35 = vpop.f32.mrf.mxu0 }
 0x147   : > { %v3572_v36 = vadd.f32 %v3571_v35, %v3570_v31  ;;  %v3683_v39 = vpop.f32.mrf.mxu1 }
 0x148   : > { %v3684_v40 = vadd.f32 %v3683_v39, %v3682_v32  ;;  %v3573_v41 = vpop.f32.mrf.mxu0 }
 0x149   : > { %v3685_v43 = vpop.f32.mrf.mxu1 }
 0x14a   : > { %v4418_v44 = vadd.f32 %v3684_v40, %v3572_v36  ;;  %v3574_v45 = vpop.f32.mrf.mxu0 }
 0x14b   : > { %v3575_v47 = vadd.f32 %v3574_v45, %v3573_v41  ;;  %v3686_v48 = vpop.f32.mrf.mxu1 }
 0x14c   : > { %v3687_v49 = vadd.f32 %v3686_v48, %v3685_v43  ;;  %v3576_v50 = vpop.f32.mrf.mxu0 }
 0x14d   : > { %v3688_v51 = vpop.f32.mrf.mxu1 }
 0x14e   : > { %v4420_v53 = vadd.f32 %v3687_v49, %v3575_v47  ;;  %v3577_v55 = vpop.f32.mrf.mxu0 }
 0x14f   : > { %v3578_v56 = vadd.f32 %v3577_v55, %v3576_v50  ;;  %v3689_v58 = vpop.f32.mrf.mxu1 }
 0x150   : > { %v3690_v59 = vadd.f32 %v3689_v58, %v3688_v51  ;;  %v3579_v61 = vpop.f32.mrf.mxu0 }
 0x151   : > { %v3691_v62 = vpop.f32.mrf.mxu1 }
 0x152   : > { %v4422_v0 = vadd.f32 %v3690_v59, %v3578_v56  ;;  %v3580_v1 = vpop.f32.mrf.mxu0 }
 0x153   : > { %v3581_v3 = vadd.f32 %v3580_v1, %v3579_v61  ;;  %v3692_v4 = vpop.f32.mrf.mxu1 }
 0x154   : > { %v3693_v5 = vadd.f32 %v3692_v4, %v3691_v62  ;;  %v3582_v6 = vpop.f32.mrf.mxu0 }
 0x155   : > { %v3694_v8 = vpop.f32.mrf.mxu1 }
 0x156   : > { %v4424_v9 = vadd.f32 %v3693_v5, %v3581_v3  ;;  %v3583_v11 = vpop.f32.mrf.mxu0 }
 0x157   : > { %v3584_v12 = vadd.f32 %v3583_v11, %v3582_v6  ;;  %v3695_v13 = vpop.f32.mrf.mxu1 }
 0x158   : > { %v3696_v14 = vadd.f32 %v3695_v13, %v3694_v8  ;;  %v3585_v16 = vpop.f32.mrf.mxu0 }
 0x159   : > { %v3697_v19 = vpop.f32.mrf.mxu1 }
 0x15a   : > { %v4426_v20 = vadd.f32 %v3696_v14, %v3584_v12  ;;  %v3586_v21 = vpop.f32.mrf.mxu0 }
 0x15b   : > { %v3587_v22 = vadd.f32 %v3586_v21, %v3585_v16  ;;  %v3698_v23 = vpop.f32.mrf.mxu1 }
 0x15c   : > { %v3699_v25 = vadd.f32 %v3698_v23, %v3697_v19  ;;  %v3588_v27 = vpop.f32.mrf.mxu0 }
 0x15d   : > { %v3700_v28 = vpop.f32.mrf.mxu1 }
 0x15e   : > { %v4428_v29 = vadd.f32 %v3699_v25, %v3587_v22  ;;  %v3589_v31 = vpop.f32.mrf.mxu0 }
 0x15f   : > { %v3590_v32 = vadd.f32 %v3589_v31, %v3588_v27  ;;  %v3701_v35 = vpop.f32.mrf.mxu1 }
 0x160   : > { %v3702_v36 = vadd.f32 %v3701_v35, %v3700_v28  ;;  %v3591_v39 = vpop.f32.mrf.mxu0 }
 0x161   : > { %v3703_v40 = vpop.f32.mrf.mxu1 }
 0x162   : > { %v4430_v41 = vadd.f32 %v3702_v36, %v3590_v32  ;;  %v3592_v43 = vpop.f32.mrf.mxu0 }
 0x163   : > { %v3593_v45 = vadd.f32 %v3592_v43, %v3591_v39  ;;  %v3704_v47 = vpop.f32.mrf.mxu1 }
 0x164   : > { %v3705_v48 = vadd.f32 %v3704_v47, %v3703_v40  ;;  %v3594_v49 = vpop.f32.mrf.mxu0 }
 0x165   : > { %v3706_v50 = vpop.f32.mrf.mxu1 }
 0x166   : > { %v4432_v51 = vadd.f32 %v3705_v48, %v3593_v45  ;;  %v3595_v55 = vpop.f32.mrf.mxu0 }
 0x167   : > { %v3596_v56 = vadd.f32 %v3595_v55, %v3594_v49  ;;  %v3707_v58 = vpop.f32.mrf.mxu1 }
 0x168   : > { %v3708_v59 = vadd.f32 %v3707_v58, %v3706_v50  ;;  %v3597_v61 = vpop.f32.mrf.mxu0 }
 0x169   : > { %v3709_v62 = vpop.f32.mrf.mxu1 }
 0x16a   : > { %v4434_v1 = vadd.f32 %v3708_v59, %v3596_v56  ;;  %v3598_v3 = vpop.f32.mrf.mxu0 }
 0x16b   : > { %v3599_v4 = vadd.f32 %v3598_v3, %v3597_v61  ;;  %v3710_v5 = vpop.f32.mrf.mxu1 }
 0x16c   : > { %v3711_v6 = vadd.f32 %v3710_v5, %v3709_v62  ;;  %v3600_v8 = vpop.f32.mrf.mxu0 }
 0x16d   : > { %v3712_v11 = vpop.f32.mrf.mxu1 }
 0x16e   : > { %v4436_v12 = vadd.f32 %v3711_v6, %v3599_v4  ;;  %v3601_v13 = vpop.f32.mrf.mxu0 }
 0x16f   : > { %v3602_v14 = vadd.f32 %v3601_v13, %v3600_v8  ;;  %v3713_v16 = vpop.f32.mrf.mxu1 }
 0x170   : > { %v3714_v19 = vadd.f32 %v3713_v16, %v3712_v11  ;;  %v3603_v21 = vpop.f32.mrf.mxu0 }
 0x171   : > { %v3715_v22 = vpop.f32.mrf.mxu1 }
 0x172   : > { %v4438_v23 = vadd.f32 %v3714_v19, %v3602_v14  ;;  %v3604_v25 = vpop.f32.mrf.mxu0 }
 0x173   : > { %v3605_v27 = vadd.f32 %v3604_v25, %v3603_v21  ;;  %v3716_v28 = vpop.f32.mrf.mxu1 }
 0x174   : > { %v3717_v31 = vadd.f32 %v3716_v28, %v3715_v22  ;;  %v3734_v32 = vpop.f32.mrf.mxu0 }
 0x175   : > { %v3846_v35 = vpop.f32.mrf.mxu1 }
 0x176   : > { %v4440_v36 = vadd.f32 %v3717_v31, %v3605_v27  ;;  %v3735_v39 = vpop.f32.mrf.mxu0 }
 0x177   : > { %v3736_v40 = vadd.f32 %v3735_v39, %v3734_v32  ;;  %v3847_v43 = vpop.f32.mrf.mxu1 }
 0x178   : > { %v3737_v45 = vpop.f32.mrf.mxu0  ;;  %v3848_v48 = vadd.f32 %v3847_v43, %v3846_v35 }
 0x179   : > { %v1778_v47 = vadd.f32 %v3736_v40, %v4358_v30  ;;  %v3849_v49 = vpop.f32.mrf.mxu1 }
 0x17a   : > { %v3738_v50 = vpop.f32.mrf.mxu0 }
 0x17b   : > { %v1939_v55 = vadd.f32 %v3848_v48, %v1778_v47  ;;  %v3739_v56 = vadd.f32 %v3738_v50, %v3737_v45  ;;  %v3850_v58 = vpop.f32.mrf.mxu1 }
 0x17c   : > { %v3740_v59 = vpop.f32.mrf.mxu0  ;;  %v3851_v62 = vadd.f32 %v3850_v58, %v3849_v49 }
 0x17d   : > { %2067 = vst [vmem:[%s4444_s19] sm:$0xff] %v1939_v55  ;;  %v1781_v61 = vadd.f32 %v3739_v56, %v4360_v38  ;;  %v3852_v3 = vpop.f32.mrf.mxu1  ;;  %v2140_v8 = vmul.f32 %v1939_v55, %v1939_v55 }
 0x17e   : > { %v3741_v4 = vpop.f32.mrf.mxu0 }
 0x17f   : > { %v1942_v5 = vadd.f32 %v3851_v62, %v1781_v61  ;;  %v3742_v6 = vadd.f32 %v3741_v4, %v3740_v59  ;;  %v3853_v30 = vpop.f32.mrf.mxu1 }
 0x180   : > { %v3743_v11 = vpop.f32.mrf.mxu0  ;;  %v3854_v19 = vadd.f32 %v3853_v30, %v3852_v3 }
 0x181   : > { %2068 = vst [vmem:[%s4444_s19 + $0x8] sm:$0xff] %v1942_v5  ;;  %v2100_v13 = vadd.f32 %v1942_v5, %v1939_v55  ;;  %v2141_v14 = vmul.f32 %v1942_v5, %v1942_v5  ;;  %v1786_v16 = vadd.f32 %v3742_v6, %v4366_v52  ;;  %v3855_v21 = vpop.f32.mrf.mxu1 }
 0x182   : > { %v3744_v22 = vpop.f32.mrf.mxu0 }
 0x183   : > { %v2172_v25 = vadd.f32 %v2141_v14, %v2140_v8  ;;  %v1947_v27 = vadd.f32 %v3854_v19, %v1786_v16  ;;  %v3745_v38 = vadd.f32 %v3744_v22, %v3743_v11  ;;  %v3856_v28 = vpop.f32.mrf.mxu1 }
 0x184   : > { %v3746_v31 = vpop.f32.mrf.mxu0  ;;  %v3857_v40 = vadd.f32 %v3856_v28, %v3855_v21 }
 0x185   : > { %2069 = vst [vmem:[%s4444_s19 + $0x10] sm:$0xff] %v1947_v27  ;;  %v2101_v32 = vadd.f32 %v2100_v13, %v1947_v27  ;;  %v2142_v35 = vmul.f32 %v1947_v27, %v1947_v27  ;;  %v1789_v39 = vadd.f32 %v3745_v38, %v4368_v60  ;;  %v3858_v43 = vpop.f32.mrf.mxu1 }
 0x186   : > { %v3747_v45 = vpop.f32.mrf.mxu0 }
 0x187   : > { %v2173_v47 = vadd.f32 %v2172_v25, %v2142_v35  ;;  %v1950_v48 = vadd.f32 %v3857_v40, %v1789_v39  ;;  %v3748_v52 = vadd.f32 %v3747_v45, %v3746_v31  ;;  %v3859_v49 = vpop.f32.mrf.mxu1 }
 0x188   : > { %v3749_v50 = vpop.f32.mrf.mxu0  ;;  %v3860_v59 = vadd.f32 %v3859_v49, %v3858_v43 }
 0x189   : > { %2070 = vst [vmem:[%s4444_s19 + $0x18] sm:$0xff] %v1950_v48  ;;  %v2102_v55 = vadd.f32 %v2101_v32, %v1950_v48  ;;  %v2143_v56 = vmul.f32 %v1950_v48, %v1950_v48  ;;  %v1794_v58 = vadd.f32 %v3748_v52, %v4374_v10  ;;  %v3861_v61 = vpop.f32.mrf.mxu1 }
 0x18a   : > { %v3750_v62 = vpop.f32.mrf.mxu0 }
 0x18b   : > { %v2174_v3 = vadd.f32 %v2173_v47, %v2143_v56  ;;  %v1955_v4 = vadd.f32 %v3860_v59, %v1794_v58  ;;  %v3751_v60 = vadd.f32 %v3750_v62, %v3749_v50  ;;  %v3862_v5 = vpop.f32.mrf.mxu1 }
 0x18c   : > { %v3752_v6 = vpop.f32.mrf.mxu0  ;;  %v3863_v13 = vadd.f32 %v3862_v5, %v3861_v61 }
 0x18d   : > { %2071 = vst [vmem:[%s4444_s19 + $0x20] sm:$0xff] %v1955_v4  ;;  %v2103_v30 = vadd.f32 %v2102_v55, %v1955_v4  ;;  %v2144_v8 = vmul.f32 %v1955_v4, %v1955_v4  ;;  %v1797_v11 = vadd.f32 %v3751_v60, %v4376_v18  ;;  %v3864_v14 = vpop.f32.mrf.mxu1 }
 0x18e   : > { %v3753_v16 = vpop.f32.mrf.mxu0 }
 0x18f   : > { %v2175_v19 = vadd.f32 %v2174_v3, %v2144_v8  ;;  %v1958_v21 = vadd.f32 %v3863_v13, %v1797_v11  ;;  %v3754_v10 = vadd.f32 %v3753_v16, %v3752_v6  ;;  %v3865_v22 = vpop.f32.mrf.mxu1 }
 0x190   : > { %v3755_v25 = vpop.f32.mrf.mxu0  ;;  %v3866_v31 = vadd.f32 %v3865_v22, %v3864_v14 }
 0x191   : > { %2072 = vst [vmem:[%s4444_s19 + $0x28] sm:$0xff] %v1958_v21  ;;  %v2104_v27 = vadd.f32 %v2103_v30, %v1958_v21  ;;  %v2145_v38 = vmul.f32 %v1958_v21, %v1958_v21  ;;  %v1802_v28 = vadd.f32 %v3754_v10, %v4382_v33  ;;  %v3867_v32 = vpop.f32.mrf.mxu1 }
 0x192   : > { %v3756_v35 = vpop.f32.mrf.mxu0 }
 0x193   : > { %v2176_v39 = vadd.f32 %v2175_v19, %v2145_v38  ;;  %v1963_v40 = vadd.f32 %v3866_v31, %v1802_v28  ;;  %v3757_v18 = vadd.f32 %v3756_v35, %v3755_v25  ;;  %v3868_v43 = vpop.f32.mrf.mxu1 }
 0x194   : > { %v3758_v45 = vpop.f32.mrf.mxu0  ;;  %v3869_v49 = vadd.f32 %v3868_v43, %v3867_v32 }
 0x195   : > { %2073 = vst [vmem:[%s4444_s19 + $0x30] sm:$0xff] %v1963_v40  ;;  %v2105_v47 = vadd.f32 %v2104_v27, %v1963_v40  ;;  %v2146_v48 = vmul.f32 %v1963_v40, %v1963_v40  ;;  %v1805_v52 = vadd.f32 %v3757_v18, %v4384_v42  ;;  %v3870_v50 = vpop.f32.mrf.mxu1 }
 0x196   : > { %v3759_v55 = vpop.f32.mrf.mxu0 }
 0x197   : > { %v2177_v56 = vadd.f32 %v2176_v39, %v2146_v48  ;;  %v1966_v58 = vadd.f32 %v3869_v49, %v1805_v52  ;;  %v3760_v33 = vadd.f32 %v3759_v55, %v3758_v45  ;;  %v3871_v59 = vpop.f32.mrf.mxu1 }
 0x198   : > { %v3761_v61 = vpop.f32.mrf.mxu0  ;;  %v3872_v60 = vadd.f32 %v3871_v59, %v3870_v50 }
 0x199   : > { %2074 = vst [vmem:[%s4444_s19 + $0x38] sm:$0xff] %v1966_v58  ;;  %v2106_v62 = vadd.f32 %v2105_v47, %v1966_v58  ;;  %v2147_v3 = vmul.f32 %v1966_v58, %v1966_v58  ;;  %v1810_v4 = vadd.f32 %v3760_v33, %v4390_v57  ;;  %v3873_v5 = vpop.f32.mrf.mxu1 }
 0x19a   : > { %v3762_v6 = vpop.f32.mrf.mxu0 }
 0x19b   : > { %v2178_v30 = vadd.f32 %v2177_v56, %v2147_v3  ;;  %v1971_v8 = vadd.f32 %v3872_v60, %v1810_v4  ;;  %v3763_v42 = vadd.f32 %v3762_v6, %v3761_v61  ;;  %v3874_v11 = vpop.f32.mrf.mxu1 }
 0x19c   : > { %v3764_v13 = vpop.f32.mrf.mxu0  ;;  %v3875_v21 = vadd.f32 %v3874_v11, %v3873_v5 }
 0x19d   : > { %2075 = vst [vmem:[%s4444_s19 + $0x40] sm:$0xff] %v1971_v8  ;;  %v2107_v14 = vadd.f32 %v2106_v62, %v1971_v8  ;;  %v2148_v16 = vmul.f32 %v1971_v8, %v1971_v8  ;;  %v1813_v19 = vadd.f32 %v3763_v42, %v4392_v2  ;;  %v3876_v10 = vpop.f32.mrf.mxu1 }
 0x19e   : > { %v3765_v22 = vpop.f32.mrf.mxu0 }
 0x19f   : > { %v2179_v25 = vadd.f32 %v2178_v30, %v2148_v16  ;;  %v1974_v27 = vadd.f32 %v3875_v21, %v1813_v19  ;;  %v3766_v57 = vadd.f32 %v3765_v22, %v3764_v13  ;;  %v3877_v38 = vpop.f32.mrf.mxu1 }
 0x1a0   : > { %v3767_v28 = vpop.f32.mrf.mxu0  ;;  %v3878_v39 = vadd.f32 %v3877_v38, %v3876_v10 }
 0x1a1   : > { %2076 = vst [vmem:[%s4444_s19 + $0x48] sm:$0xff] %v1974_v27  ;;  %v2108_v31 = vadd.f32 %v2107_v14, %v1974_v27  ;;  %v2149_v32 = vmul.f32 %v1974_v27, %v1974_v27  ;;  %v1818_v35 = vadd.f32 %v3766_v57, %v4398_v17  ;;  %v3879_v40 = vpop.f32.mrf.mxu1 }
 0x1a2   : > { %v3768_v18 = vpop.f32.mrf.mxu0 }
 0x1a3   : > { %v2180_v43 = vadd.f32 %v2179_v25, %v2149_v32  ;;  %v1979_v45 = vadd.f32 %v3878_v39, %v1818_v35  ;;  %v3769_v2 = vadd.f32 %v3768_v18, %v3767_v28  ;;  %v3880_v47 = vpop.f32.mrf.mxu1 }
 0x1a4   : > { %v3770_v48 = vpop.f32.mrf.mxu0  ;;  %v3881_v55 = vadd.f32 %v3880_v47, %v3879_v40 }
 0x1a5   : > { %2077 = vst [vmem:[%s4444_s19 + $0x50] sm:$0xff] %v1979_v45  ;;  %v2109_v52 = vadd.f32 %v2108_v31, %v1979_v45  ;;  %v2150_v49 = vmul.f32 %v1979_v45, %v1979_v45  ;;  %v1821_v50 = vadd.f32 %v3769_v2, %v4400_v26  ;;  %v3882_v56 = vpop.f32.mrf.mxu1 }
 0x1a6   : > { %v3771_v58 = vpop.f32.mrf.mxu0 }
 0x1a7   : > { %v2181_v33 = vadd.f32 %v2180_v43, %v2150_v49  ;;  %v1982_v59 = vadd.f32 %v3881_v55, %v1821_v50  ;;  %v3772_v17 = vadd.f32 %v3771_v58, %v3770_v48  ;;  %v3883_v61 = vpop.f32.mrf.mxu1 }
 0x1a8   : > { %v3773_v62 = vpop.f32.mrf.mxu0  ;;  %v3884_v5 = vadd.f32 %v3883_v61, %v3882_v56 }
 0x1a9   : > { %2078 = vst [vmem:[%s4444_s19 + $0x58] sm:$0xff] %v1982_v59  ;;  %v2110_v3 = vadd.f32 %v2109_v52, %v1982_v59  ;;  %v2151_v4 = vmul.f32 %v1982_v59, %v1982_v59  ;;  %v1826_v60 = vadd.f32 %v3772_v17, %v4402_v37  ;;  %v3885_v6 = vpop.f32.mrf.mxu1 }
 0x1aa   : > { %v3774_v30 = vpop.f32.mrf.mxu0 }
 0x1ab   : > { %v2182_v8 = vadd.f32 %v2181_v33, %v2151_v4  ;;  %v1987_v42 = vadd.f32 %v3884_v5, %v1826_v60  ;;  %v3775_v26 = vadd.f32 %v3774_v30, %v3773_v62  ;;  %v3886_v11 = vpop.f32.mrf.mxu1 }
 0x1ac   : > { %v3776_v13 = vpop.f32.mrf.mxu0  ;;  %v3887_v21 = vadd.f32 %v3886_v11, %v3885_v6 }
 0x1ad   : > { %2079 = vst [vmem:[%s4444_s19 + $0x60] sm:$0xff] %v1987_v42  ;;  %v2111_v14 = vadd.f32 %v2110_v3, %v1987_v42  ;;  %v2152_v16 = vmul.f32 %v1987_v42, %v1987_v42  ;;  %v1829_v19 = vadd.f32 %v3775_v26, %v4404_v46  ;;  %v3888_v10 = vpop.f32.mrf.mxu1 }
 0x1ae   : > { %v3777_v22 = vpop.f32.mrf.mxu0 }
 0x1af   : > { %v2183_v25 = vadd.f32 %v2182_v8, %v2152_v16  ;;  %v1990_v27 = vadd.f32 %v3887_v21, %v1829_v19  ;;  %v3778_v37 = vadd.f32 %v3777_v22, %v3776_v13  ;;  %v3889_v57 = vpop.f32.mrf.mxu1 }
 0x1b0   : > { %v3779_v38 = vpop.f32.mrf.mxu0  ;;  %v3890_v35 = vadd.f32 %v3889_v57, %v3888_v10 }
 0x1b1   : > { %2080 = vst [vmem:[%s4444_s19 + $0x68] sm:$0xff] %v1990_v27  ;;  %v2112_v28 = vadd.f32 %v2111_v14, %v1990_v27  ;;  %v2153_v31 = vmul.f32 %v1990_v27, %v1990_v27  ;;  %v1834_v32 = vadd.f32 %v3778_v37, %v4406_v54  ;;  %v3891_v39 = vpop.f32.mrf.mxu1 }
 0x1b2   : > { %v3780_v40 = vpop.f32.mrf.mxu0 }
 0x1b3   : > { %v2184_v18 = vadd.f32 %v2183_v25, %v2153_v31  ;;  %v1995_v43 = vadd.f32 %v3890_v35, %v1834_v32  ;;  %v3781_v46 = vadd.f32 %v3780_v40, %v3779_v38  ;;  %v3892_v45 = vpop.f32.mrf.mxu1 }
 0x1b4   : > { %v3782_v2 = vpop.f32.mrf.mxu0  ;;  %v3893_v49 = vadd.f32 %v3892_v45, %v3891_v39 }
 0x1b5   : > { %2081 = vst [vmem:[%s4444_s19 + $0x70] sm:$0xff] %v1995_v43  ;;  %v2113_v47 = vadd.f32 %v2112_v28, %v1995_v43  ;;  %v2154_v48 = vmul.f32 %v1995_v43, %v1995_v43  ;;  %v1837_v52 = vadd.f32 %v3781_v46, %v4408_v63  ;;  %v3894_v50 = vpop.f32.mrf.mxu1 }
 0x1b6   : > { %v3783_v55 = vpop.f32.mrf.mxu0 }
 0x1b7   : > { %v2185_v56 = vadd.f32 %v2184_v18, %v2154_v48  ;;  %v1998_v58 = vadd.f32 %v3893_v49, %v1837_v52  ;;  %v3784_v54 = vadd.f32 %v3783_v55, %v3782_v2  ;;  %v3895_v33 = vpop.f32.mrf.mxu1 }
 0x1b8   : > { %v3785_v59 = vpop.f32.mrf.mxu0  ;;  %v3896_v3 = vadd.f32 %v3895_v33, %v3894_v50 }
 0x1b9   : > { %2082 = vst [vmem:[%s4444_s19 + $0x78] sm:$0xff] %v1998_v58  ;;  %v2114_v17 = vadd.f32 %v2113_v47, %v1998_v58  ;;  %v2155_v61 = vmul.f32 %v1998_v58, %v1998_v58  ;;  %v1842_v62 = vadd.f32 %v3784_v54, %v4410_v7  ;;  %v3897_v4 = vpop.f32.mrf.mxu1 }
 0x1ba   : > { %v3786_v60 = vpop.f32.mrf.mxu0 }
 0x1bb   : > { %v2186_v5 = vadd.f32 %v2185_v56, %v2155_v61  ;;  %v2003_v6 = vadd.f32 %v3896_v3, %v1842_v62  ;;  %v3787_v63 = vadd.f32 %v3786_v60, %v3785_v59  ;;  %v3898_v30 = vpop.f32.mrf.mxu1 }
 0x1bc   : > { %v3788_v8 = vpop.f32.mrf.mxu0  ;;  %v3899_v13 = vadd.f32 %v3898_v30, %v3897_v4 }
 0x1bd   : > { %2083 = vst [vmem:[%s4444_s19 + $0x80] sm:$0xff] %v2003_v6  ;;  %v2115_v42 = vadd.f32 %v2114_v17, %v2003_v6  ;;  %v2156_v26 = vmul.f32 %v2003_v6, %v2003_v6  ;;  %v1845_v11 = vadd.f32 %v3787_v63, %v4412_v15  ;;  %v3900_v14 = vpop.f32.mrf.mxu1 }
 0x1be   : > { %v3789_v16 = vpop.f32.mrf.mxu0 }
 0x1bf   : > { %v2187_v19 = vadd.f32 %v2186_v5, %v2156_v26  ;;  %v2006_v21 = vadd.f32 %v3899_v13, %v1845_v11  ;;  %v3790_v7 = vadd.f32 %v3789_v16, %v3788_v8  ;;  %v3901_v10 = vpop.f32.mrf.mxu1 }
 0x1c0   : > { %v3791_v22 = vpop.f32.mrf.mxu0  ;;  %v3902_v57 = vadd.f32 %v3901_v10, %v3900_v14 }
 0x1c1   : > { %2084 = vst [vmem:[%s4444_s19 + $0x88] sm:$0xff] %v2006_v21  ;;  %v2116_v25 = vadd.f32 %v2115_v42, %v2006_v21  ;;  %v2157_v27 = vmul.f32 %v2006_v21, %v2006_v21  ;;  %v1850_v37 = vadd.f32 %v3790_v7, %v4414_v24  ;;  %v3903_v38 = vpop.f32.mrf.mxu1 }
 0x1c2   : > { %v3792_v28 = vpop.f32.mrf.mxu0 }
 0x1c3   : > { %v2188_v31 = vadd.f32 %v2187_v19, %v2157_v27  ;;  %v2011_v32 = vadd.f32 %v3902_v57, %v1850_v37  ;;  %v3793_v15 = vadd.f32 %v3792_v28, %v3791_v22  ;;  %v3904_v35 = vpop.f32.mrf.mxu1 }
 0x1c4   : > { %v3794_v39 = vpop.f32.mrf.mxu0  ;;  %v3905_v46 = vadd.f32 %v3904_v35, %v3903_v38 }
 0x1c5   : > { %2085 = vst [vmem:[%s4444_s19 + $0x90] sm:$0xff] %v2011_v32  ;;  %v2117_v40 = vadd.f32 %v2116_v25, %v2011_v32  ;;  %v2158_v18 = vmul.f32 %v2011_v32, %v2011_v32  ;;  %v1853_v43 = vadd.f32 %v3793_v15, %v4416_v34  ;;  %v3906_v45 = vpop.f32.mrf.mxu1 }
 0x1c6   : > { %v3795_v2 = vpop.f32.mrf.mxu0 }
 0x1c7   : > { %v2189_v47 = vadd.f32 %v2188_v31, %v2158_v18  ;;  %v2014_v48 = vadd.f32 %v3905_v46, %v1853_v43  ;;  %v3796_v24 = vadd.f32 %v3795_v2, %v3794_v39  ;;  %v3907_v52 = vpop.f32.mrf.mxu1 }
 0x1c8   : > { %v3797_v49 = vpop.f32.mrf.mxu0  ;;  %v3908_v58 = vadd.f32 %v3907_v52, %v3906_v45 }
 0x1c9   : > { %2086 = vst [vmem:[%s4444_s19 + $0x98] sm:$0xff] %v2014_v48  ;;  %v2118_v50 = vadd.f32 %v2117_v40, %v2014_v48  ;;  %v2159_v55 = vmul.f32 %v2014_v48, %v2014_v48  ;;  %v1858_v56 = vadd.f32 %v3796_v24, %v4418_v44  ;;  %v3909_v54 = vpop.f32.mrf.mxu1 }
 0x1ca   : > { %v3798_v33 = vpop.f32.mrf.mxu0 }
 0x1cb   : > { %v2190_v59 = vadd.f32 %v2189_v47, %v2159_v55  ;;  %v2019_v17 = vadd.f32 %v3908_v58, %v1858_v56  ;;  %v3799_v34 = vadd.f32 %v3798_v33, %v3797_v49  ;;  %v3910_v61 = vpop.f32.mrf.mxu1 }
 0x1cc   : > { %v3800_v62 = vpop.f32.mrf.mxu0  ;;  %v3911_v5 = vadd.f32 %v3910_v61, %v3909_v54 }
 0x1cd   : > { %2087 = vst [vmem:[%s4444_s19 + $0xa0] sm:$0xff] %v2019_v17  ;;  %v2119_v3 = vadd.f32 %v2118_v50, %v2019_v17  ;;  %v2160_v4 = vmul.f32 %v2019_v17, %v2019_v17  ;;  %v1861_v60 = vadd.f32 %v3799_v34, %v4420_v53  ;;  %v3912_v6 = vpop.f32.mrf.mxu1 }
 0x1ce   : > { %v3801_v63 = vpop.f32.mrf.mxu0 }
 0x1cf   : > { %v2191_v30 = vadd.f32 %v2190_v59, %v2160_v4  ;;  %v2022_v8 = vadd.f32 %v3911_v5, %v1861_v60  ;;  %v3802_v44 = vadd.f32 %v3801_v63, %v3800_v62  ;;  %v3913_v42 = vpop.f32.mrf.mxu1 }
 0x1d0   : > { %v3803_v26 = vpop.f32.mrf.mxu0  ;;  %v3914_v16 = vadd.f32 %v3913_v42, %v3912_v6 }
 0x1d1   : > { %2088 = vst [vmem:[%s4444_s19 + $0xa8] sm:$0xff] %v2022_v8  ;;  %v2120_v11 = vadd.f32 %v2119_v3, %v2022_v8  ;;  %v2161_v13 = vmul.f32 %v2022_v8, %v2022_v8  ;;  %v1866_v14 = vadd.f32 %v3802_v44, %v4422_v0  ;;  %v3915_v19 = vpop.f32.mrf.mxu1 }
 0x1d2   : > { %v3804_v21 = vpop.f32.mrf.mxu0 }
 0x1d3   : > { %v2192_v7 = vadd.f32 %v2191_v30, %v2161_v13  ;;  %v2027_v10 = vadd.f32 %v3914_v16, %v1866_v14  ;;  %v3805_v53 = vadd.f32 %v3804_v21, %v3803_v26  ;;  %v3916_v22 = vpop.f32.mrf.mxu1 }
 0x1d4   : > { %v3806_v25 = vpop.f32.mrf.mxu0  ;;  %v3917_v38 = vadd.f32 %v3916_v22, %v3915_v19 }
 0x1d5   : > { %2089 = vst [vmem:[%s4444_s19 + $0xb0] sm:$0xff] %v2027_v10  ;;  %v2121_v27 = vadd.f32 %v2120_v11, %v2027_v10  ;;  %v2162_v37 = vmul.f32 %v2027_v10, %v2027_v10  ;;  %v1869_v57 = vadd.f32 %v3805_v53, %v4424_v9  ;;  %v3918_v28 = vpop.f32.mrf.mxu1 }
 0x1d6   : > { %v3807_v31 = vpop.f32.mrf.mxu0 }
 0x1d7   : > { %v2193_v32 = vadd.f32 %v2192_v7, %v2162_v37  ;;  %v2030_v15 = vadd.f32 %v3917_v38, %v1869_v57  ;;  %v3808_v0 = vadd.f32 %v3807_v31, %v3806_v25  ;;  %v3919_v35 = vpop.f32.mrf.mxu1 }
 0x1d8   : > { %v3809_v39 = vpop.f32.mrf.mxu0  ;;  %v3920_v46 = vadd.f32 %v3919_v35, %v3918_v28 }
 0x1d9   : > { %2090 = vst [vmem:[%s4444_s19 + $0xb8] sm:$0xff] %v2030_v15  ;;  %v2122_v40 = vadd.f32 %v2121_v27, %v2030_v15  ;;  %v2163_v18 = vmul.f32 %v2030_v15, %v2030_v15  ;;  %v1874_v43 = vadd.f32 %v3808_v0, %v4426_v20  ;;  %v3921_v45 = vpop.f32.mrf.mxu1 }
 0x1da   : > { %v3810_v2 = vpop.f32.mrf.mxu0 }
 0x1db   : > { %v2194_v47 = vadd.f32 %v2193_v32, %v2163_v18  ;;  %v2035_v48 = vadd.f32 %v3920_v46, %v1874_v43  ;;  %v3811_v9 = vadd.f32 %v3810_v2, %v3809_v39  ;;  %v3922_v24 = vpop.f32.mrf.mxu1 }
 0x1dc   : > { %v3812_v52 = vpop.f32.mrf.mxu0  ;;  %v3923_v56 = vadd.f32 %v3922_v24, %v3921_v45 }
 0x1dd   : > { %2091 = vst [vmem:[%s4444_s19 + $0xc0] sm:$0xff] %v2035_v48  ;;  %v2123_v49 = vadd.f32 %v2122_v40, %v2035_v48  ;;  %v2164_v50 = vmul.f32 %v2035_v48, %v2035_v48  ;;  %v1877_v55 = vadd.f32 %v3811_v9, %v4428_v29  ;;  %v3924_v58 = vpop.f32.mrf.mxu1 }
 0x1de   : > { %v3813_v54 = vpop.f32.mrf.mxu0 }
 0x1df   : > { %v2195_v33 = vadd.f32 %v2194_v47, %v2164_v50  ;;  %v2038_v59 = vadd.f32 %v3923_v56, %v1877_v55  ;;  %v3814_v20 = vadd.f32 %v3813_v54, %v3812_v52  ;;  %v3925_v17 = vpop.f32.mrf.mxu1 }
 0x1e0   : > { %v3815_v34 = vpop.f32.mrf.mxu0  ;;  %v3926_v4 = vadd.f32 %v3925_v17, %v3924_v58 }
 0x1e1   : > { %2092 = vst [vmem:[%s4444_s19 + $0xc8] sm:$0xff] %v2038_v59  ;;  %v2124_v61 = vadd.f32 %v2123_v49, %v2038_v59  ;;  %v2165_v62 = vmul.f32 %v2038_v59, %v2038_v59  ;;  %v1882_v3 = vadd.f32 %v3814_v20, %v4430_v41  ;;  %v3927_v60 = vpop.f32.mrf.mxu1 }
 0x1e2   : > { %v3816_v5 = vpop.f32.mrf.mxu0 }
 0x1e3   : > { %v2196_v6 = vadd.f32 %v2195_v33, %v2165_v62  ;;  %v2043_v63 = vadd.f32 %v3926_v4, %v1882_v3  ;;  %v3817_v29 = vadd.f32 %v3816_v5, %v3815_v34  ;;  %v3928_v30 = vpop.f32.mrf.mxu1 }
 0x1e4   : > { %v3818_v8 = vpop.f32.mrf.mxu0  ;;  %v3929_v11 = vadd.f32 %v3928_v30, %v3927_v60  ;;  %v2099_v30 = vld [vmem:[#allocation3] sm:$0x1] }
 0x1e5   : > { %2093 = vst [vmem:[%s4444_s19 + $0xd0] sm:$0xff] %v2043_v63  ;;  %v2125_v44 = vadd.f32 %v2124_v61, %v2043_v63  ;;  %v2166_v42 = vmul.f32 %v2043_v63, %v2043_v63  ;;  %v1885_v26 = vadd.f32 %v3817_v29, %v4432_v51  ;;  %v3930_v13 = vpop.f32.mrf.mxu1 }
 0x1e6   : > { %v3819_v14 = vpop.f32.mrf.mxu0 }
 0x1e7   : > { %v2197_v16 = vadd.f32 %v2196_v6, %v2166_v42  ;;  %v2046_v19 = vadd.f32 %v3929_v11, %v1885_v26  ;;  %v3820_v41 = vadd.f32 %v3819_v14, %v3818_v8  ;;  %v3931_v21 = vpop.f32.mrf.mxu1 }
 0x1e8   : > { %v3821_v7 = vpop.f32.mrf.mxu0  ;;  %v3932_v25 = vadd.f32 %v3931_v21, %v3930_v13 }
 0x1e9   : > { %2094 = vst [vmem:[%s4444_s19 + $0xd8] sm:$0xff] %v2046_v19  ;;  %v2126_v10 = vadd.f32 %v2125_v44, %v2046_v19  ;;  %v2167_v53 = vmul.f32 %v2046_v19, %v2046_v19  ;;  %v1890_v22 = vadd.f32 %v3820_v41, %v4434_v1  ;;  %v3933_v27 = vpop.f32.mrf.mxu1 }
 0x1ea   : > { %v3822_v37 = vpop.f32.mrf.mxu0 }
 0x1eb   : > { %v2198_v57 = vadd.f32 %v2197_v16, %v2167_v53  ;;  %v2051_v38 = vadd.f32 %v3932_v25, %v1890_v22  ;;  %v3823_v51 = vadd.f32 %v3822_v37, %v3821_v7  ;;  %v3934_v28 = vpop.f32.mrf.mxu1 }
 0x1ec   : > { %v3824_v31 = vpop.f32.mrf.mxu0  ;;  %v3935_v35 = vadd.f32 %v3934_v28, %v3933_v27 }
 0x1ed   : > { %2095 = vst [vmem:[%s4444_s19 + $0xe0] sm:$0xff] %v2051_v38  ;;  %v2127_v32 = vadd.f32 %v2126_v10, %v2051_v38  ;;  %v2168_v15 = vmul.f32 %v2051_v38, %v2051_v38  ;;  %v1893_v0 = vadd.f32 %v3823_v51, %v4436_v12  ;;  %v3936_v39 = vpop.f32.mrf.mxu1 }
 0x1ee   : > { %v3825_v40 = vpop.f32.mrf.mxu0 }
 0x1ef   : > { %v2199_v18 = vadd.f32 %v2198_v57, %v2168_v15  ;;  %v2054_v1 = vadd.f32 %v3935_v35, %v1893_v0  ;;  %v3826_v43 = vadd.f32 %v3825_v40, %v3824_v31  ;;  %v3937_v46 = vpop.f32.mrf.mxu1 }
 0x1f0   : > { %v3827_v45 = vpop.f32.mrf.mxu0  ;;  %v3938_v9 = vadd.f32 %v3937_v46, %v3936_v39 }
 0x1f1   : > { %2096 = vst [vmem:[%s4444_s19 + $0xe8] sm:$0xff] %v2054_v1  ;;  %v2128_v2 = vadd.f32 %v2127_v32, %v2054_v1  ;;  %v2169_v47 = vmul.f32 %v2054_v1, %v2054_v1  ;;  %v1898_v48 = vadd.f32 %v3826_v43, %v4438_v23  ;;  %v3939_v24 = vpop.f32.mrf.mxu1 }
 0x1f2   : > { %v3828_v52 = vpop.f32.mrf.mxu0 }
 0x1f3   : > { %v2200_v49 = vadd.f32 %v2199_v18, %v2169_v47  ;;  %v2059_v12 = vadd.f32 %v3938_v9, %v1898_v48  ;;  %v3829_v50 = vadd.f32 %v3828_v52, %v3827_v45  ;;  %v3940_v55 = vpop.f32.mrf.mxu1 }
 0x1f4   : > { %v3941_v33 = vadd.f32 %v3940_v55, %v3939_v24 }
 0x1f5   : > { %2097 = vst [vmem:[%s4444_s19 + $0xf0] sm:$0xff] %v2059_v12  ;;  %v2129_v56 = vadd.f32 %v2128_v2, %v2059_v12  ;;  %v2170_v58 = vmul.f32 %v2059_v12, %v2059_v12  ;;  %v1901_v54 = vadd.f32 %v3829_v50, %v4440_v36  ;;  %v2139_v36 = vld [vmem:[#allocation4] sm:$0x1] }
 0x1f7   : > { %v2201_v59 = vadd.f32 %v2200_v49, %v2170_v58  ;;  %v2062_v20 = vadd.f32 %v3941_v33, %v1901_v54 }
 0x1f9   : > { %2098 = vst [vmem:[%s4444_s19 + $0xf8] sm:$0xff] %v2062_v20  ;;  %v2130_v17 = vadd.f32 %v2129_v56, %v2062_v20  ;;  %v2171_v34 = vmul.f32 %v2062_v20, %v2062_v20 }
 0x1fb   : > { %v2131_v61 = vrot.slane %v2130_v17, 4  ;;  %v2202_v23 = vadd.f32 %v2201_v59, %v2171_v34 }
 0x1fd   : > { %v2132_v62 = vadd.f32 %v2131_v61, %v2130_v17  ;;  %v2203_v3 = vrot.slane %v2202_v23, 4 }
 0x1ff   : > { %v2133_v4 = vrot.slane %v2132_v62, 2  ;;  %v2204_v60 = vadd.f32 %v2203_v3, %v2202_v23 }
 0x201   : > { %v2134_v5 = vadd.f32 %v2133_v4, %v2132_v62  ;;  %v2205_v6 = vrot.slane %v2204_v60, 2 }
 0x203   : > { %v2135_v63 = vrot.slane %v2134_v5, 1  ;;  %v2206_v29 = vadd.f32 %v2205_v6, %v2204_v60 }
 0x205   : > { %v2136_v8 = vadd.f32 %v2135_v63, %v2134_v5  ;;  %v2207_v44 = vrot.slane %v2206_v29, 1 }
 0x207   : > { %v2137_v42 = vadd.f32 %v2136_v8, %v2099_v30  ;;  %v2208_v26 = vadd.f32 %v2207_v44, %v2206_v29  ;;  %2214 = sbr.rel (%p3171_p5) target bundleno = 648 (0x288), region = 36 }
 0x209   : > { %2138 = vst [vmem:[#allocation3] sm:$0x1] %v2137_v42  ;;  %v2209_v11 = vadd.f32 %v2208_v26, %v2139_v36 }
 0x20b   : > { %2210 = vst [vmem:[#allocation4] sm:$0x1] %v2209_v11 }
 0x20c   : > { %v2287_v16 = vlaneseq  ;;  %v4513_v22 = vld [vmem:[#allocation2] sm:$0xff]  ;;  %v4515_v25 = vld [vmem:[#allocation2 + $0x8] sm:$0xff]  ;;  %v4521_v37 = vld [vmem:[#allocation2 + $0x10] sm:$0xff] }
 0x20d   : > { %v4523_v57 = vld [vmem:[#allocation2 + $0x18] sm:$0xff]  ;;  %v4525_v38 = vld [vmem:[#allocation2 + $0x20] sm:$0xff]  ;;  %v4527_v28 = vld [vmem:[#allocation2 + $0x28] sm:$0xff] }
 0x20e   : > { %v4510_v21 = vshrl.u32 %v2287_v16, 7  ;;  %v4529_v31 = vld [vmem:[#allocation2 + $0x30] sm:$0xff]  ;;  %v4531_v32 = vld [vmem:[#allocation2 + $0x38] sm:$0xff]  ;;  %v4533_v15 = vld [vmem:[#allocation2 + $0x40] sm:$0xff] }
 0x20f   : > { %v4535_v0 = vld [vmem:[#allocation2 + $0x48] sm:$0xff]  ;;  %v4537_v35 = vld [vmem:[#allocation2 + $0x50] sm:$0xff]  ;;  %v4539_v39 = vld [vmem:[#allocation2 + $0x58] sm:$0xff] }
 0x210   : > { %v2215_v13 = vld [vmem:[#allocation3] sm:$0x1]  ;;  %v5135_v10 = vsub.s32 0, %v4510_v21  ;;  %v4543_v1 = vld [vmem:[#allocation2 + $0x68] sm:$0xff]  ;;  %v4545_v43 = vld [vmem:[#allocation2 + $0x70] sm:$0xff]  ;;  %v5170_v50 = vsub.s32 0, %v4510_v21 }
 0x211   : > { %v2216_v19 = vmul.f32 0.001953125, %v2215_v13  ;;  %v4541_v40 = vld [vmem:[#allocation2 + $0x60] sm:$0xff]  ;;  %v4547_v46 = vld [vmem:[#allocation2 + $0x78] sm:$0xff]  ;;  %v4555_v48 = vld [vmem:[#allocation2 + $0x88] sm:$0xff] }
 0x212   : > { %v2217_v14 = vld [vmem:[#allocation4] sm:$0x1]  ;;  %v4557_v9 = vld [vmem:[#allocation2 + $0x90] sm:$0xff]  ;;  %v4559_v24 = vld [vmem:[#allocation2 + $0x98] sm:$0xff] }
 0x213   : > { %v2218_v41 = vmul.f32 0.001953125, %v2217_v14  ;;  %v2219_v7 = vmul.f32 %v2216_v19, %v2216_v19  ;;  %v4519_v27 = vrot.slane %v2216_v19, %v5135_v10  ;;  %v4549_v45 = vld [vmem:[#allocation2 + $0x80] sm:$0xff]  ;;  %v4569_v55 = vld [vmem:[#allocation2 + $0xa8] sm:$0xff]  ;;  %v4571_v56 = vld [vmem:[#allocation2 + $0xb0] sm:$0xff] }
 0x214   : > { %v4561_v52 = vld [vmem:[#allocation2 + $0xa0] sm:$0xff]  ;;  %v4573_v58 = vld [vmem:[#allocation2 + $0xb8] sm:$0xff]  ;;  %v4585_v34 = vld [vmem:[#allocation2 + $0xc8] sm:$0xff] }
 0x215   : > { %v2220_v53 = vsub.f32 %v2218_v41, %v2219_v7  ;;  %v4575_v54 = vld [vmem:[#allocation2 + $0xc0] sm:$0xff]  ;;  %v4587_v61 = vld [vmem:[#allocation2 + $0xd0] sm:$0xff]  ;;  %v4589_v23 = vld [vmem:[#allocation2 + $0xd8] sm:$0xff]  ;;  %v5174_v21 = vsub.f32 %v4523_v57, %v4519_v27  ;;  %v5178_v57 = vsub.f32 %v4531_v32, %v4519_v27 }
 0x216   : > { %v4591_v62 = vld [vmem:[#allocation2 + $0xe0] sm:$0xff]  ;;  %v4601_v6 = vld [vmem:[#allocation2 + $0xe8] sm:$0xff]  ;;  %v4603_v63 = vld [vmem:[#allocation2 + $0xf0] sm:$0xff] }
 0x217   : > { %v2221_v51 = vmax.f32 %v2220_v53, 0.0  ;;  %v4605_v29 = vld [vmem:[#allocation2 + $0xf8] sm:$0xff]  ;;  %v4607_v30 = vld [vmem:[#allocation2 + $0x100] sm:$0xff]  ;;  %v4617_v26 = vld [vmem:[#allocation2 + $0x108] sm:$0xff] }
 0x218   : > { %v4619_v11 = vld [vmem:[#allocation2 + $0x110] sm:$0xff]  ;;  %v4621_v13 = vld [vmem:[#allocation2 + $0x118] sm:$0xff]  ;;  %v4623_v14 = vld [vmem:[#allocation2 + $0x120] sm:$0xff] }
 0x219   : > { %v2356_v18 = vadd.f32 1e-05, %v2221_v51  ;;  %v4633_v53 = vld [vmem:[#allocation2 + $0x128] sm:$0xff]  ;;  %v4635_v51 = vld [vmem:[#allocation2 + $0x130] sm:$0xff]  ;;  %v4647_v36 = vld [vmem:[#allocation2 + $0x140] sm:$0xff] }
 0x21a   : > { %5153 = vst [vmem:[#allocation5_spill] sm:$0xff] %v4647_v36  ;;  %v4649_v7 = vld [vmem:[#allocation2 + $0x148] sm:$0xff]  ;;  %v4651_v44 = vld [vmem:[#allocation2 + $0x150] sm:$0xff]  ;;  %v4661_v5 = vld [vmem:[#allocation2 + $0x158] sm:$0xff] }
 0x21b   : > { %4015 = vrsqrt.f32 %v2356_v18  ;;  %v4637_v18 = vld [vmem:[#allocation2 + $0x138] sm:$0xff]  ;;  %5154 = vst [vmem:[#allocation6_spill] sm:$0xff] %v4651_v44  ;;  %5155 = vst [vmem:[#allocation7_spill] sm:$0xff] %v4661_v5  ;;  %v4663_v41 = vld [vmem:[#allocation2 + $0x160] sm:$0xff]  ;;  %v5173_v44 = vsub.f32 %v4521_v37, %v4519_v27  ;;  %v5177_v37 = vsub.f32 %v4529_v31, %v4519_v27 }
 0x21c   : > { %5156 = vst [vmem:[#allocation8_spill] sm:$0xff] %v4663_v41  ;;  %v4665_v60 = vld [vmem:[#allocation2 + $0x168] sm:$0xff]  ;;  %v4675_v3 = vld [vmem:[#allocation2 + $0x170] sm:$0xff]  ;;  %v4677_v19 = vld [vmem:[#allocation2 + $0x178] sm:$0xff] }
 0x21d   : > { %5157 = vst [vmem:[#allocation9_spill] sm:$0xff] %v4665_v60  ;;  %5158 = vst [vmem:[#allocation10_spill] sm:$0xff] %v4675_v3  ;;  %v4679_v17 = vld [vmem:[#allocation2 + $0x180] sm:$0xff]  ;;  %v4689_v59 = vld [vmem:[#allocation2 + $0x188] sm:$0xff]  ;;  %v5172_v60 = vsub.f32 %v4515_v25, %v4519_v27  ;;  %v5176_v25 = vsub.f32 %v4527_v28, %v4519_v27 }
 0x21e   : > { %5159 = vst [vmem:[#allocation11_spill] sm:$0xff] %v4677_v19  ;;  %5160 = vst [vmem:[#allocation12_spill] sm:$0xff] %v4679_v17  ;;  %v4691_v16 = vld [vmem:[#allocation2 + $0x190] sm:$0xff]  ;;  %v4693_v33 = vld [vmem:[#allocation2 + $0x198] sm:$0xff] }
 0x21f   : > { %5161 = vst [vmem:[#allocation13_spill] sm:$0xff] %v4691_v16  ;;  %5162 = vst [vmem:[#allocation14_spill] sm:$0xff] %v4693_v33  ;;  %v4703_v12 = vld [vmem:[#allocation2 + $0x1a0] sm:$0xff]  ;;  %v4705_v42 = vld [vmem:[#allocation2 + $0x1a8] sm:$0xff] }
 0x220   : > { %5163 = vst [vmem:[#allocation15_spill] sm:$0xff] %v4703_v12  ;;  %v4707_v49 = vld [vmem:[#allocation2 + $0x1b0] sm:$0xff]  ;;  %v4717_v2 = vld [vmem:[#allocation2 + $0x1b8] sm:$0xff]  ;;  %v4719_v8 = vld [vmem:[#allocation2 + $0x1c0] sm:$0xff] }
 0x221   : > { %v4721_v10 = vld [vmem:[#allocation2 + $0x1c8] sm:$0xff]  ;;  %v4731_v5 = vld [vmem:[#allocation2 + $0x1d0] sm:$0xff]  ;;  %v4733_v4 = vld [vmem:[#allocation2 + $0x1d8] sm:$0xff] }
 0x222   : > { %5164 = vst [vmem:[#allocation16_spill] sm:$0xff] %v4731_v5  ;;  %5165 = vst [vmem:[#allocation17_spill] sm:$0xff] %v4733_v4  ;;  %v4735_v41 = vld [vmem:[#allocation2 + $0x1e0] sm:$0xff]  ;;  %v4745_v19 = vld [vmem:[#allocation2 + $0x1e8] sm:$0xff] }
 0x223   : > { %5166 = vst [vmem:[#allocation18_spill] sm:$0xff] %v4735_v41  ;;  %5167 = vst [vmem:[#allocation19_spill] sm:$0xff] %v4745_v19  ;;  %v4747_v20 = vld [vmem:[#allocation2 + $0x1f0] sm:$0xff]  ;;  %v4749_v17 = vld [vmem:[#allocation2 + $0x1f8] sm:$0xff] }
 0x224   : > { %5168 = vst [vmem:[#allocation20_spill] sm:$0xff] %v4747_v20  ;;  %5169 = vst [vmem:[#allocation21_spill] sm:$0xff] %v4749_v17 }
 0x228   : > { %v4016_v3 = vpop.eup %4015 }
 0x229   : > { %v4761_v12 = vrot.slane %v4016_v3, %v5170_v50  ;;  %v5171_v3 = vsub.f32 %v4513_v22, %v4519_v27  ;;  %v5175_v22 = vsub.f32 %v4525_v38, %v4519_v27 }
 0x22b   : > { %v2364_v16 = vmul.f32 %v4761_v12, %v5171_v3  ;;  %v2365_v33 = vmul.f32 %v4761_v12, %v5172_v60  ;;  %v2366_v36 = vmul.f32 %v4761_v12, %v5173_v44  ;;  %v2367_v50 = vmul.f32 %v4761_v12, %v5174_v21 }
 0x22c   : > { %v2368_v3 = vmul.f32 %v4761_v12, %v5175_v22  ;;  %v2369_v60 = vmul.f32 %v4761_v12, %v5176_v25  ;;  %v2370_v44 = vmul.f32 %v4761_v12, %v5177_v37  ;;  %v2371_v21 = vmul.f32 %v4761_v12, %v5178_v57 }
 0x22d   : > { %vm2428_vm0 = vcmp.ge.f32.partialorder %v2364_v16, 0.0  ;;  %vm2429_vm1 = vcmp.ge.f32.partialorder %v2365_v33, 0.0  ;;  %v2492_v38 = vmul.f32 0.2, %v2364_v16  ;;  %v2493_v47 = vmul.f32 0.2, %v2365_v33 }
 0x22e   : > { %vm2430_vm2 = vcmp.ge.f32.partialorder %v2366_v36, 0.0  ;;  %vm2431_vm3 = vcmp.ge.f32.partialorder %v2367_v50, 0.0  ;;  %v2494_v22 = vmul.f32 0.2, %v2366_v36  ;;  %v2495_v28 = vmul.f32 0.2, %v2367_v50 }
 0x22f   : > { %v2556_v17 = vsel %vm2428_vm0, %v2364_v16, %v2492_v38  ;;  %v2557_v25 = vsel %vm2429_vm1, %v2365_v33, %v2493_v47  ;;  %vm2432_vm4 = vcmp.ge.f32.partialorder %v2368_v3, 0.0  ;;  %vm2433_vm5 = vcmp.ge.f32.partialorder %v2369_v60, 0.0 }
 0x230   : > { %v3306_v31 = vpack.c.bf16 %v2557_v25, %v2556_v17  ;;  %v2558_v20 = vsel %vm2430_vm2, %v2366_v36, %v2494_v22  ;;  %v2559_v37 = vsel %vm2431_vm3, %v2367_v50, %v2495_v28  ;;  %v2496_v19 = vmul.f32 0.2, %v2368_v3 }
 0x231   : > { %v3311_v41 = vpack.c.bf16 %v2559_v37, %v2558_v20  ;;  %v2497_v32 = vmul.f32 0.2, %v2369_v60  ;;  %vm2434_vm6 = vcmp.ge.f32.partialorder %v2370_v44, 0.0  ;;  %vm2435_vm7 = vcmp.ge.f32.partialorder %v2371_v21, 0.0 }
 0x232   : > { %3307 = vst [vmem:[%s5134_s2] sm:$0xff] %v3306_v31   ;;  %v2560_v57 = vsel %vm2432_vm4, %v2368_v3, %v2496_v19  ;;  %v2498_v4 = vmul.f32 0.2, %v2370_v44  ;;  %v2499_v5 = vmul.f32 0.2, %v2371_v21  ;;  %v5179_v47 = vsub.f32 %v4533_v15, %v4519_v27 }
 0x233   : > { %3463 = vst [vmem:[%s5134_s2 + $0x8] sm:$0xff] %v3311_v41   ;;  %v2561_v20 = vsel %vm2433_vm5, %v2369_v60, %v2497_v32  ;;  %v5180_v17 = vsub.f32 %v4535_v0, %v4519_v27  ;;  %v5181_v16 = vsub.f32 %v4537_v35, %v4519_v27  ;;  %v5182_v15 = vsub.f32 %v4539_v39, %v4519_v27 }
 0x234   : > { %v2372_v33 = vmul.f32 %v4761_v12, %v5179_v47  ;;  %v3316_v3 = vpack.c.bf16 %v2561_v20, %v2560_v57  ;;  %v2562_v38 = vsel %vm2434_vm6, %v2370_v44, %v2498_v4  ;;  %v2563_v22 = vsel %vm2435_vm7, %v2371_v21, %v2499_v5 }
 0x235   : > { %v2373_v36 = vmul.f32 %v4761_v12, %v5180_v17  ;;  %v2374_v19 = vmul.f32 %v4761_v12, %v5181_v16  ;;  %v2375_v50 = vmul.f32 %v4761_v12, %v5182_v15  ;;  %v3321_v41 = vpack.c.bf16 %v2563_v22, %v2562_v38 }
 0x236   : > { %vm2436_vm8 = vcmp.ge.f32.partialorder %v2372_v33, 0.0  ;;  %v2500_v60 = vmul.f32 0.2, %v2372_v33  ;;  %3464 = vst [vmem:[%s5134_s2 + $0x10] sm:$0xff] %v3316_v3   ;;  %v5183_v5 = vsub.f32 %v4541_v40, %v4519_v27  ;;  %v5184_v21 = vsub.f32 %v4543_v1, %v4519_v27 }
 0x237   : > { %vm2437_vm9 = vcmp.ge.f32.partialorder %v2373_v36, 0.0  ;;  %v2501_v0 = vmul.f32 0.2, %v2373_v36  ;;  %vm2438_vm10 = vcmp.ge.f32.partialorder %v2374_v19, 0.0  ;;  %vm2439_vm11 = vcmp.ge.f32.partialorder %v2375_v50, 0.0  ;;  %3465 = vst [vmem:[%s5134_s2 + $0x18] sm:$0xff] %v3321_v41  }
 0x238   : > { %v2502_v35 = vmul.f32 0.2, %v2374_v19  ;;  %v2503_v28 = vmul.f32 0.2, %v2375_v50  ;;  %v2564_v39 = vsel %vm2436_vm8, %v2372_v33, %v2500_v60  ;;  %v2376_v44 = vmul.f32 %v4761_v12, %v5183_v5 }
 0x239   : > { %v2565_v4 = vsel %vm2437_vm9, %v2373_v36, %v2501_v0  ;;  %v2377_v25 = vmul.f32 %v4761_v12, %v5184_v21  ;;  %v5185_v57 = vsub.f32 %v4545_v43, %v4519_v27  ;;  %v5186_v1 = vsub.f32 %v4547_v46, %v4519_v27 }
 0x23a   : > { %v3326_v31 = vpack.c.bf16 %v2565_v4, %v2564_v39  ;;  %v2566_v37 = vsel %vm2438_vm10, %v2374_v19, %v2502_v35  ;;  %v2567_v32 = vsel %vm2439_vm11, %v2375_v50, %v2503_v28  ;;  %vm2440_vm12 = vcmp.ge.f32.partialorder %v2376_v44, 0.0 }
 0x23b   : > { %v2378_v47 = vmul.f32 %v4761_v12, %v5185_v57  ;;  %v3331_v33 = vpack.c.bf16 %v2567_v32, %v2566_v37  ;;  %vm2441_vm13 = vcmp.ge.f32.partialorder %v2377_v25, 0.0  ;;  %v2504_v20 = vmul.f32 0.2, %v2376_v44 }
 0x23c   : > { %3466 = vst [vmem:[%s5134_s2 + $0x20] sm:$0xff] %v3326_v31   ;;  %v2505_v40 = vmul.f32 0.2, %v2377_v25  ;;  %v2379_v17 = vmul.f32 %v4761_v12, %v5186_v1  ;;  %v5187_v16 = vsub.f32 %v4549_v45, %v4519_v27  ;;  %v5188_v15 = vsub.f32 %v4555_v48, %v4519_v27 }
 0x23d   : > { %vm2442_vm14 = vcmp.ge.f32.partialorder %v2378_v47, 0.0  ;;  %v2506_v36 = vmul.f32 0.2, %v2378_v47  ;;  %3467 = vst [vmem:[%s5134_s2 + $0x28] sm:$0xff] %v3331_v33   ;;  %v2568_v43 = vsel %vm2440_vm12, %v2376_v44, %v2504_v20  ;;  %v5189_v46 = vsub.f32 %v4557_v9, %v4519_v27 }
 0x23e   : > { %v2380_v19 = vmul.f32 %v4761_v12, %v5187_v16  ;;  %v2381_v50 = vmul.f32 %v4761_v12, %v5188_v15  ;;  %v2569_v38 = vsel %vm2441_vm13, %v2377_v25, %v2505_v40  ;;  %vm2443_vm15 = vcmp.ge.f32.partialorder %v2379_v17, 0.0 }
 0x23f   : > { %v2382_v3 = vmul.f32 %v4761_v12, %v5189_v46  ;;  %v2507_v22 = vmul.f32 0.2, %v2379_v17  ;;  %v2570_v41 = vsel %vm2442_vm14, %v2378_v47, %v2506_v36  ;;  %v3336_v60 = vpack.c.bf16 %v2569_v38, %v2568_v43 }
 0x240   : > { %vm2444_vm0 = vcmp.ge.f32.partialorder %v2380_v19, 0.0  ;;  %vm2445_vm1 = vcmp.ge.f32.partialorder %v2381_v50, 0.0  ;;  %v2508_v45 = vmul.f32 0.2, %v2380_v19  ;;  %v2509_v35 = vmul.f32 0.2, %v2381_v50 }
 0x241   : > { %v2571_v0 = vsel %vm2443_vm15, %v2379_v17, %v2507_v22  ;;  %v5190_v48 = vsub.f32 %v4559_v24, %v4519_v27  ;;  %vm2446_vm2 = vcmp.ge.f32.partialorder %v2382_v3, 0.0  ;;  %3468 = vst [vmem:[%s5134_s2 + $0x30] sm:$0xff] %v3336_v60   ;;  %v2510_v4 = vmul.f32 0.2, %v2382_v3 }
 0x242   : > { %v3341_v9 = vpack.c.bf16 %v2571_v0, %v2570_v41  ;;  %v2572_v39 = vsel %vm2444_vm0, %v2380_v19, %v2508_v45  ;;  %v5191_v5 = vsub.f32 %v4561_v52, %v4519_v27  ;;  %v2573_v21 = vsel %vm2445_vm1, %v2381_v50, %v2509_v35 }
 0x243   : > { %v2383_v28 = vmul.f32 %v4761_v12, %v5190_v48  ;;  %v5192_v24 = vsub.f32 %v4569_v55, %v4519_v27  ;;  %v3346_v37 = vpack.c.bf16 %v2573_v21, %v2572_v39  ;;  %v2574_v32 = vsel %vm2446_vm2, %v2382_v3, %v2510_v4 }
 0x244   : > { %v2384_v44 = vmul.f32 %v4761_v12, %v5191_v5  ;;  %3469 = vst [vmem:[%s5134_s2 + $0x38] sm:$0xff] %v3341_v9   ;;  %v5193_v33 = vsub.f32 %v4571_v56, %v4519_v27  ;;  %v5194_v1 = vsub.f32 %v4573_v58, %v4519_v27  ;;  %v5195_v36 = vsub.f32 %v4575_v54, %v4519_v27 }
 0x245   : > { %vm2447_vm3 = vcmp.ge.f32.partialorder %v2383_v28, 0.0  ;;  %v2511_v25 = vmul.f32 0.2, %v2383_v28  ;;  %v2385_v31 = vmul.f32 %v4761_v12, %v5192_v24  ;;  %3470 = vst [vmem:[%s5134_s2 + $0x40] sm:$0xff] %v3346_v37   ;;  %v5196_v19 = vsub.f32 %v4585_v34, %v4519_v27 }
 0x246   : > { %vm2448_vm4 = vcmp.ge.f32.partialorder %v2384_v44, 0.0  ;;  %v2512_v57 = vmul.f32 0.2, %v2384_v44  ;;  %v2386_v20 = vmul.f32 %v4761_v12, %v5193_v33  ;;  %v2387_v17 = vmul.f32 %v4761_v12, %v5194_v1 }
 0x247   : > { %v2575_v47 = vsel %vm2447_vm3, %v2383_v28, %v2511_v25  ;;  %vm2449_vm5 = vcmp.ge.f32.partialorder %v2385_v31, 0.0  ;;  %v2513_v52 = vmul.f32 0.2, %v2385_v31  ;;  %v2388_v43 = vmul.f32 %v4761_v12, %v5195_v36 }
 0x248   : > { %v3351_v55 = vpack.c.bf16 %v2575_v47, %v2574_v32  ;;  %v2576_v40 = vsel %vm2448_vm4, %v2384_v44, %v2512_v57  ;;  %vm2450_vm6 = vcmp.ge.f32.partialorder %v2386_v20, 0.0  ;;  %v2514_v56 = vmul.f32 0.2, %v2386_v20 }
 0x249   : > { %v2577_v16 = vsel %vm2449_vm5, %v2385_v31, %v2513_v52  ;;  %v2389_v15 = vmul.f32 %v4761_v12, %v5196_v19  ;;  %vm2451_vm7 = vcmp.ge.f32.partialorder %v2387_v17, 0.0  ;;  %v2515_v50 = vmul.f32 0.2, %v2387_v17 }
 0x24a   : > { %3471 = vst [vmem:[%s5134_s2 + $0x48] sm:$0xff] %v3351_v55   ;;  %v3356_v58 = vpack.c.bf16 %v2577_v16, %v2576_v40  ;;  %vm2452_vm8 = vcmp.ge.f32.partialorder %v2388_v43, 0.0  ;;  %v2578_v46 = vsel %vm2450_vm6, %v2386_v20, %v2514_v56  ;;  %v2516_v54 = vmul.f32 0.2, %v2388_v43 }
 0x24b   : > { %vm2453_vm9 = vcmp.ge.f32.partialorder %v2389_v15, 0.0  ;;  %v2517_v3 = vmul.f32 0.2, %v2389_v15  ;;  %v2579_v38 = vsel %vm2451_vm7, %v2387_v17, %v2515_v50  ;;  %v5197_v34 = vsub.f32 %v4587_v61, %v4519_v27 }
 0x24c   : > { %3472 = vst [vmem:[%s5134_s2 + $0x50] sm:$0xff] %v3356_v58   ;;  %v5198_v41 = vsub.f32 %v4589_v23, %v4519_v27  ;;  %v5199_v45 = vsub.f32 %v4591_v62, %v4519_v27  ;;  %v3361_v35 = vpack.c.bf16 %v2579_v38, %v2578_v46  ;;  %v2580_v48 = vsel %vm2452_vm8, %v2388_v43, %v2516_v54 }
 0x24d   : > { %v2390_v22 = vmul.f32 %v4761_v12, %v5197_v34  ;;  %v2581_v28 = vsel %vm2453_vm9, %v2389_v15, %v2517_v3  ;;  %v5200_v9 = vsub.f32 %v4601_v6, %v4519_v27  ;;  %v5201_v44 = vsub.f32 %v4603_v63, %v4519_v27 }
 0x24e   : > { %v2391_v60 = vmul.f32 %v4761_v12, %v5198_v41  ;;  %v2392_v0 = vmul.f32 %v4761_v12, %v5199_v45  ;;  %v3366_v39 = vpack.c.bf16 %v2581_v28, %v2580_v48  ;;  %3473 = vst [vmem:[%s5134_s2 + $0x58] sm:$0xff] %v3361_v35   ;;  %v5202_v25 = vsub.f32 %v4605_v29, %v4519_v27  ;;  %v5211_v45 = vld [vmem:[#allocation5_spill] sm:$0xff] }
 0x24f   : > { %v2393_v61 = vmul.f32 %v4761_v12, %v5200_v9  ;;  %vm2454_vm10 = vcmp.ge.f32.partialorder %v2390_v22, 0.0  ;;  %v2518_v4 = vmul.f32 0.2, %v2390_v22  ;;  %v2394_v21 = vmul.f32 %v4761_v12, %v5201_v44  ;;  %v5214_v44 = vld [vmem:[#allocation6_spill] sm:$0xff] }
 0x250   : > { %vm2455_vm11 = vcmp.ge.f32.partialorder %v2391_v60, 0.0  ;;  %v2519_v23 = vmul.f32 0.2, %v2391_v60  ;;  %vm2456_vm12 = vcmp.ge.f32.partialorder %v2392_v0, 0.0  ;;  %v2520_v62 = vmul.f32 0.2, %v2392_v0 }
 0x251   : > { %vm2457_vm13 = vcmp.ge.f32.partialorder %v2393_v61, 0.0  ;;  %3474 = vst [vmem:[%s5134_s2 + $0x60] sm:$0xff] %v3366_v39   ;;  %v2582_v5 = vsel %vm2454_vm10, %v2390_v22, %v2518_v4  ;;  %v2521_v6 = vmul.f32 0.2, %v2393_v61  ;;  %v2395_v24 = vmul.f32 %v4761_v12, %v5202_v25 }
 0x252   : > { %v2583_v31 = vsel %vm2455_vm11, %v2391_v60, %v2519_v23  ;;  %v2584_v37 = vsel %vm2456_vm12, %v2392_v0, %v2520_v62  ;;  %v5203_v32 = vsub.f32 %v4607_v30, %v4519_v27  ;;  %v5204_v47 = vsub.f32 %v4617_v26, %v4519_v27 }
 0x253   : > { %v3371_v63 = vpack.c.bf16 %v2583_v31, %v2582_v5  ;;  %v2585_v33 = vsel %vm2457_vm13, %v2393_v61, %v2521_v6  ;;  %vm2458_vm14 = vcmp.ge.f32.partialorder %v2394_v21, 0.0  ;;  %vm2459_vm15 = vcmp.ge.f32.partialorder %v2395_v24, 0.0 }
 0x254   : > { %v2396_v57 = vmul.f32 %v4761_v12, %v5203_v32  ;;  %v2397_v52 = vmul.f32 %v4761_v12, %v5204_v47  ;;  %v3376_v20 = vpack.c.bf16 %v2585_v33, %v2584_v37  ;;  %v2522_v29 = vmul.f32 0.2, %v2394_v21 }
 0x255   : > { %v2523_v55 = vmul.f32 0.2, %v2395_v24  ;;  %3475 = vst [vmem:[%s5134_s2 + $0x68] sm:$0xff] %v3371_v63   ;;  %v5205_v26 = vsub.f32 %v4619_v11, %v4519_v27  ;;  %v5206_v43 = vsub.f32 %v4621_v13, %v4519_v27  ;;  %v5207_v56 = vsub.f32 %v4623_v14, %v4519_v27 }
 0x256   : > { %vm2460_vm0 = vcmp.ge.f32.partialorder %v2396_v57, 0.0  ;;  %vm2461_vm1 = vcmp.ge.f32.partialorder %v2397_v52, 0.0  ;;  %v2524_v30 = vmul.f32 0.2, %v2396_v57  ;;  %v2525_v40 = vmul.f32 0.2, %v2397_v52 }
 0x257   : > { %v2398_v1 = vmul.f32 %v4761_v12, %v5205_v26  ;;  %3476 = vst [vmem:[%s5134_s2 + $0x70] sm:$0xff] %v3376_v20   ;;  %v2586_v17 = vsel %vm2458_vm14, %v2394_v21, %v2522_v29  ;;  %v2587_v36 = vsel %vm2459_vm15, %v2395_v24, %v2523_v55  ;;  %v2399_v16 = vmul.f32 %v4761_v12, %v5206_v43  ;;  %v5220_v29 = vld [vmem:[#allocation9_spill] sm:$0xff] }
 0x258   : > { %v2400_v19 = vmul.f32 %v4761_v12, %v5207_v56  ;;  %v3381_v15 = vpack.c.bf16 %v2587_v36, %v2586_v17  ;;  %v2588_v11 = vsel %vm2460_vm0, %v2396_v57, %v2524_v30  ;;  %v2589_v58 = vsel %vm2461_vm1, %v2397_v52, %v2525_v40  ;;  %v5218_v52 = vld [vmem:[#allocation8_spill] sm:$0xff]  ;;  %v5222_v40 = vld [vmem:[#allocation10_spill] sm:$0xff]  ;;  %v5224_v17 = vld [vmem:[#allocation11_spill] sm:$0xff] }
 0x259   : > { %vm2462_vm2 = vcmp.ge.f32.partialorder %v2398_v1, 0.0  ;;  %v3386_v50 = vpack.c.bf16 %v2589_v58, %v2588_v11  ;;  %vm2463_vm3 = vcmp.ge.f32.partialorder %v2399_v16, 0.0  ;;  %v2526_v46 = vmul.f32 0.2, %v2398_v1 }
 0x25a   : > { %v2527_v54 = vmul.f32 0.2, %v2399_v16  ;;  %3477 = vst [vmem:[%s5134_s2 + $0x78] sm:$0xff] %v3381_v15   ;;  %v5208_v13 = vsub.f32 %v4633_v53, %v4519_v27  ;;  %vm2464_vm4 = vcmp.ge.f32.partialorder %v2400_v19, 0.0  ;;  %v2528_v14 = vmul.f32 0.2, %v2400_v19 }
 0x25b   : > { %v5209_v38 = vsub.f32 %v4635_v51, %v4519_v27  ;;  %3478 = vst [vmem:[%s5134_s2 + $0x80] sm:$0xff] %v3386_v50   ;;  %v2590_v22 = vsel %vm2462_vm2, %v2398_v1, %v2526_v46  ;;  %v5210_v60 = vsub.f32 %v4637_v18, %v4519_v27  ;;  %v5212_v0 = vsub.f32 %v5211_v45, %v4519_v27 }
 0x25c   : > { %v2401_v3 = vmul.f32 %v4761_v12, %v5208_v13  ;;  %v2591_v41 = vsel %vm2463_vm3, %v2399_v16, %v2527_v54  ;;  %v2592_v28 = vsel %vm2464_vm4, %v2400_v19, %v2528_v14  ;;  %v5213_v39 = vsub.f32 %v4649_v7, %v4519_v27  ;;  %v5216_v7 = vld [vmem:[#allocation7_spill] sm:$0xff] }
 0x25d   : > { %v2402_v34 = vmul.f32 %v4761_v12, %v5209_v38  ;;  %v2403_v53 = vmul.f32 %v4761_v12, %v5210_v60  ;;  %v2404_v35 = vmul.f32 %v4761_v12, %v5212_v0  ;;  %v3391_v48 = vpack.c.bf16 %v2591_v41, %v2590_v22  ;;  %v5229_v0 = vld [vmem:[#allocation13_spill] sm:$0xff] }
 0x25e   : > { %vm2465_vm5 = vcmp.ge.f32.partialorder %v2401_v3, 0.0  ;;  %v2529_v51 = vmul.f32 0.2, %v2401_v3  ;;  %v2405_v4 = vmul.f32 %v4761_v12, %v5213_v39  ;;  %v5215_v21 = vsub.f32 %v5214_v44, %v4519_v27 }
 0x25f   : > { %vm2466_vm6 = vcmp.ge.f32.partialorder %v2402_v34, 0.0  ;;  %vm2467_vm7 = vcmp.ge.f32.partialorder %v2403_v53, 0.0  ;;  %v2530_v9 = vmul.f32 0.2, %v2402_v34  ;;  %v2531_v61 = vmul.f32 0.2, %v2403_v53 }
 0x260   : > { %3479 = vst [vmem:[%s5134_s2 + $0x88] sm:$0xff] %v3391_v48   ;;  %v2593_v18 = vsel %vm2465_vm5, %v2401_v3, %v2529_v51  ;;  %vm2468_vm8 = vcmp.ge.f32.partialorder %v2404_v35, 0.0  ;;  %v2532_v23 = vmul.f32 0.2, %v2404_v35  ;;  %v2406_v25 = vmul.f32 %v4761_v12, %v5215_v21  ;;  %v5231_v51 = vld [vmem:[#allocation14_spill] sm:$0xff] }
 0x261   : > { %v3396_v62 = vpack.c.bf16 %v2593_v18, %v2592_v28  ;;  %v2594_v5 = vsel %vm2466_vm6, %v2402_v34, %v2530_v9  ;;  %v2595_v6 = vsel %vm2467_vm7, %v2403_v53, %v2531_v61  ;;  %vm2469_vm9 = vcmp.ge.f32.partialorder %v2405_v4, 0.0  ;;  %v5226_v34 = vld [vmem:[#allocation12_spill] sm:$0xff]  ;;  %v5233_v61 = vld [vmem:[#allocation15_spill] sm:$0xff] }
 0x262   : > { %v3401_v24 = vpack.c.bf16 %v2595_v6, %v2594_v5  ;;  %v2533_v31 = vmul.f32 0.2, %v2405_v4  ;;  %v2596_v37 = vsel %vm2468_vm8, %v2404_v35, %v2532_v23  ;;  %v5217_v32 = vsub.f32 %v5216_v7, %v4519_v27 }
 0x263   : > { %3480 = vst [vmem:[%s5134_s2 + $0x90] sm:$0xff] %v3396_v62   ;;  %vm2470_vm10 = vcmp.ge.f32.partialorder %v2406_v25, 0.0  ;;  %v2534_v47 = vmul.f32 0.2, %v2406_v25  ;;  %v5219_v63 = vsub.f32 %v5218_v52, %v4519_v27  ;;  %v5221_v55 = vsub.f32 %v5220_v29, %v4519_v27 }
 0x264   : > { %v2407_v57 = vmul.f32 %v4761_v12, %v5217_v32  ;;  %3481 = vst [vmem:[%s5134_s2 + $0x98] sm:$0xff] %v3401_v24   ;;  %v2597_v20 = vsel %vm2469_vm9, %v2405_v4, %v2533_v31  ;;  %v5223_v26 = vsub.f32 %v5222_v40, %v4519_v27  ;;  %v5225_v36 = vsub.f32 %v5224_v17, %v4519_v27 }
 0x265   : > { %v2408_v33 = vmul.f32 %v4761_v12, %v5219_v63  ;;  %v2409_v30 = vmul.f32 %v4761_v12, %v5221_v55  ;;  %v3406_v16 = vpack.c.bf16 %v2597_v20, %v2596_v37  ;;  %v2598_v19 = vsel %vm2470_vm10, %v2406_v25, %v2534_v47 }
 0x266   : > { %v2410_v1 = vmul.f32 %v4761_v12, %v5223_v26  ;;  %v2411_v43 = vmul.f32 %v4761_v12, %v5225_v36  ;;  %vm2471_vm11 = vcmp.ge.f32.partialorder %v2407_v57, 0.0  ;;  %v2535_v56 = vmul.f32 0.2, %v2407_v57 }
 0x267   : > { %vm2472_vm12 = vcmp.ge.f32.partialorder %v2408_v33, 0.0  ;;  %vm2473_vm13 = vcmp.ge.f32.partialorder %v2409_v30, 0.0  ;;  %v2536_v15 = vmul.f32 0.2, %v2408_v33  ;;  %v2537_v11 = vmul.f32 0.2, %v2409_v30 }
 0x268   : > { %3482 = vst [vmem:[%s5134_s2 + $0xa0] sm:$0xff] %v3406_v16   ;;  %v2599_v58 = vsel %vm2471_vm11, %v2407_v57, %v2535_v56  ;;  %vm2474_vm14 = vcmp.ge.f32.partialorder %v2410_v1, 0.0  ;;  %vm2475_vm15 = vcmp.ge.f32.partialorder %v2411_v43, 0.0  ;;  %v2538_v50 = vmul.f32 0.2, %v2410_v1  ;;  %v5242_v56 = vld [vmem:[#allocation17_spill] sm:$0xff] }
 0x269   : > { %v3411_v46 = vpack.c.bf16 %v2599_v58, %v2598_v19  ;;  %v2600_v54 = vsel %vm2472_vm12, %v2408_v33, %v2536_v15  ;;  %v2601_v13 = vsel %vm2473_vm13, %v2409_v30, %v2537_v11  ;;  %v2539_v3 = vmul.f32 0.2, %v2411_v43 }
 0x26a   : > { %v3416_v14 = vpack.c.bf16 %v2601_v13, %v2600_v54  ;;  %v2602_v38 = vsel %vm2474_vm14, %v2410_v1, %v2538_v50  ;;  %v5227_v22 = vsub.f32 %v5226_v34, %v4519_v27  ;;  %v5228_v60 = vsub.f32 %v4689_v59, %v4519_v27  ;;  %v5240_v1 = vld [vmem:[#allocation16_spill] sm:$0xff] }
 0x26b   : > { %3483 = vst [vmem:[%s5134_s2 + $0xa8] sm:$0xff] %v3411_v46   ;;  %v2603_v45 = vsel %vm2475_vm15, %v2411_v43, %v2539_v3  ;;  %v5230_v35 = vsub.f32 %v5229_v0, %v4519_v27  ;;  %v5232_v28 = vsub.f32 %v5231_v51, %v4519_v27  ;;  %v5234_v59 = vsub.f32 %v5233_v61, %v4519_v27  ;;  %v5244_v46 = vld [vmem:[#allocation18_spill] sm:$0xff]  ;;  %v5250_v61 = vld [vmem:[#allocation21_spill] sm:$0xff] }
 0x26c   : > { %v2412_v41 = vmul.f32 %v4761_v12, %v5227_v22  ;;  %v2413_v53 = vmul.f32 %v4761_v12, %v5228_v60  ;;  %3484 = vst [vmem:[%s5134_s2 + $0xb0] sm:$0xff] %v3416_v14   ;;  %v3421_v39 = vpack.c.bf16 %v2603_v45, %v2602_v38  ;;  %v5235_v44 = vsub.f32 %v4705_v42, %v4519_v27  ;;  %v5246_v38 = vld [vmem:[#allocation19_spill] sm:$0xff] }
 0x26d   : > { %v2414_v48 = vmul.f32 %v4761_v12, %v5230_v35  ;;  %v2415_v9 = vmul.f32 %v4761_v12, %v5232_v28  ;;  %v2416_v18 = vmul.f32 %v4761_v12, %v5234_v59  ;;  %v5236_v37 = vsub.f32 %v4707_v49, %v4519_v27  ;;  %v5248_v35 = vld [vmem:[#allocation20_spill] sm:$0xff] }
 0x26e   : > { %vm2476_vm0 = vcmp.ge.f32.partialorder %v2412_v41, 0.0  ;;  %vm2477_vm1 = vcmp.ge.f32.partialorder %v2413_v53, 0.0  ;;  %v2540_v4 = vmul.f32 0.2, %v2412_v41  ;;  %v2541_v23 = vmul.f32 0.2, %v2413_v53 }
 0x26f   : > { %vm2478_vm2 = vcmp.ge.f32.partialorder %v2414_v48, 0.0  ;;  %vm2479_vm3 = vcmp.ge.f32.partialorder %v2415_v9, 0.0  ;;  %v2542_v62 = vmul.f32 0.2, %v2414_v48  ;;  %3485 = vst [vmem:[%s5134_s2 + $0xb8] sm:$0xff] %v3421_v39   ;;  %v2417_v21 = vmul.f32 %v4761_v12, %v5235_v44 }
 0x270   : > { %v2604_v5 = vsel %vm2476_vm0, %v2412_v41, %v2540_v4  ;;  %v2543_v6 = vmul.f32 0.2, %v2415_v9  ;;  %vm2480_vm4 = vcmp.ge.f32.partialorder %v2416_v18, 0.0  ;;  %v2605_v25 = vsel %vm2477_vm1, %v2413_v53, %v2541_v23 }
 0x271   : > { %v2606_v24 = vsel %vm2478_vm2, %v2414_v48, %v2542_v62  ;;  %v2544_v31 = vmul.f32 0.2, %v2416_v18  ;;  %v2418_v7 = vmul.f32 %v4761_v12, %v5236_v37  ;;  %v3426_v32 = vpack.c.bf16 %v2605_v25, %v2604_v5 }
 0x272   : > { %v2607_v57 = vsel %vm2479_vm3, %v2415_v9, %v2543_v6  ;;  %vm2481_vm5 = vcmp.ge.f32.partialorder %v2417_v21, 0.0  ;;  %v2545_v47 = vmul.f32 0.2, %v2417_v21  ;;  %v5237_v42 = vsub.f32 %v4717_v2, %v4519_v27 }
 0x273   : > { %v3431_v52 = vpack.c.bf16 %v2607_v57, %v2606_v24  ;;  %v2608_v63 = vsel %vm2480_vm4, %v2416_v18, %v2544_v31  ;;  %vm2482_vm6 = vcmp.ge.f32.partialorder %v2418_v7, 0.0  ;;  %3486 = vst [vmem:[%s5134_s2 + $0xc0] sm:$0xff] %v3426_v32   ;;  %v2546_v49 = vmul.f32 0.2, %v2418_v7 }
 0x274   : > { %v2419_v33 = vmul.f32 %v4761_v12, %v5237_v42  ;;  %v2609_v20 = vsel %vm2481_vm5, %v2417_v21, %v2545_v47  ;;  %v5238_v29 = vsub.f32 %v4719_v8, %v4519_v27  ;;  %v5239_v30 = vsub.f32 %v4721_v10, %v4519_v27 }
 0x275   : > { %3487 = vst [vmem:[%s5134_s2 + $0xc8] sm:$0xff] %v3431_v52   ;;  %v3436_v2 = vpack.c.bf16 %v2609_v20, %v2608_v63  ;;  %v5241_v17 = vsub.f32 %v5240_v1, %v4519_v27  ;;  %v2610_v8 = vsel %vm2482_vm6, %v2418_v7, %v2546_v49  ;;  %v5243_v19 = vsub.f32 %v5242_v56, %v4519_v27 }
 0x276   : > { %v2420_v55 = vmul.f32 %v4761_v12, %v5238_v29  ;;  %v2421_v40 = vmul.f32 %v4761_v12, %v5239_v30  ;;  %vm2483_vm7 = vcmp.ge.f32.partialorder %v2419_v33, 0.0  ;;  %v2547_v26 = vmul.f32 0.2, %v2419_v33 }
 0x277   : > { %v2422_v36 = vmul.f32 %v4761_v12, %v5241_v17  ;;  %3488 = vst [vmem:[%s5134_s2 + $0xd0] sm:$0xff] %v3436_v2   ;;  %v2423_v15 = vmul.f32 %v4761_v12, %v5243_v19  ;;  %v5245_v54 = vsub.f32 %v5244_v46, %v4519_v27  ;;  %v5247_v34 = vsub.f32 %v5246_v38, %v4519_v27 }
 0x278   : > { %vm2484_vm8 = vcmp.ge.f32.partialorder %v2420_v55, 0.0  ;;  %vm2485_vm9 = vcmp.ge.f32.partialorder %v2421_v40, 0.0  ;;  %v2548_v43 = vmul.f32 0.2, %v2420_v55  ;;  %v2611_v10 = vsel %vm2483_vm7, %v2419_v33, %v2547_v26 }
 0x279   : > { %v2549_v16 = vmul.f32 0.2, %v2421_v40  ;;  %vm2486_vm10 = vcmp.ge.f32.partialorder %v2422_v36, 0.0  ;;  %v3441_v11 = vpack.c.bf16 %v2611_v10, %v2610_v8  ;;  %v2550_v50 = vmul.f32 0.2, %v2422_v36 }
 0x27a   : > { %v2612_v58 = vsel %vm2484_vm8, %v2420_v55, %v2548_v43  ;;  %v2424_v13 = vmul.f32 %v4761_v12, %v5245_v54  ;;  %vm2487_vm11 = vcmp.ge.f32.partialorder %v2423_v15, 0.0  ;;  %v2551_v14 = vmul.f32 0.2, %v2423_v15 }
 0x27b   : > { %v2613_v3 = vsel %vm2485_vm9, %v2421_v40, %v2549_v16  ;;  %v2425_v22 = vmul.f32 %v4761_v12, %v5247_v34  ;;  %3489 = vst [vmem:[%s5134_s2 + $0xd8] sm:$0xff] %v3441_v11   ;;  %v2614_v60 = vsel %vm2486_vm10, %v2422_v36, %v2550_v50  ;;  %v5249_v48 = vsub.f32 %v5248_v35, %v4519_v27 }
 0x27c   : > { %v3446_v41 = vpack.c.bf16 %v2613_v3, %v2612_v58  ;;  %vm2488_vm12 = vcmp.ge.f32.partialorder %v2424_v13, 0.0  ;;  %v2552_v53 = vmul.f32 0.2, %v2424_v13  ;;  %v2615_v45 = vsel %vm2487_vm11, %v2423_v15, %v2551_v14 }
 0x27d   : > { %vm2489_vm13 = vcmp.ge.f32.partialorder %v2425_v22, 0.0  ;;  %v2553_v0 = vmul.f32 0.2, %v2425_v22  ;;  %v2426_v51 = vmul.f32 %v4761_v12, %v5249_v48  ;;  %v3451_v28 = vpack.c.bf16 %v2615_v45, %v2614_v60 }
 0x27e   : > { %3490 = vst [vmem:[%s5134_s2 + $0xe0] sm:$0xff] %v3446_v41   ;;  %v2616_v9 = vsel %vm2488_vm12, %v2424_v13, %v2552_v53  ;;  %v5251_v59 = vsub.f32 %v5250_v61, %v4519_v27 }
 0x27f   : > { %v2617_v39 = vsel %vm2489_vm13, %v2425_v22, %v2553_v0  ;;  %vm2490_vm14 = vcmp.ge.f32.partialorder %v2426_v51, 0.0  ;;  %v2554_v4 = vmul.f32 0.2, %v2426_v51  ;;  %3491 = vst [vmem:[%s5134_s2 + $0xe8] sm:$0xff] %v3451_v28  }
 0x280   : > { %v2427_v18 = vmul.f32 %v4761_v12, %v5251_v59  ;;  %v3456_v23 = vpack.c.bf16 %v2617_v39, %v2616_v9 }
 0x281   : > { %v2618_v5 = vsel %vm2490_vm14, %v2426_v51, %v2554_v4 }
 0x282   : > { %vm2491_vm15 = vcmp.ge.f32.partialorder %v2427_v18, 0.0  ;;  %v2555_v62 = vmul.f32 0.2, %v2427_v18  ;;  %3492 = vst [vmem:[%s5134_s2 + $0xf0] sm:$0xff] %v3456_v23  }
 0x284   : > { %v2619_v6 = vsel %vm2491_vm15, %v2427_v18, %v2555_v62 }
 0x285   : > { %v3461_v44 = vpack.c.bf16 %v2619_v6, %v2618_v5 }
 0x287   : > { %3493 = vst [vmem:[%s5134_s2 + $0xf8] sm:$0xff] %v3461_v44  }
 0x288 PF: > { %s12_s9 = sadd.s32 1, %s4023_s9  }
 0x289   : > { %p9_p6 = scmp.ge.s32.totalorder %s12_s9, 4  }
 0x28b   :  { %11 = sbr.rel (!%p9_p6) target bundleno = 1 (0x1), region = 63 }

// kernel: netd_forward.7
= control target key start
LH: loop header
LB: loop body
LE: loop exit
PB: predicated region body
PF: predicated region fallthrough
CT: control target
= control target key end

     0   :  { %s6551_s1 = inlined_call_operand.vmem [shape: bf16[2048,256], index: 1, kind: input, shape index: {}]   ;;  %s6552_s0 = inlined_call_operand.vmem [shape: bf16[128,2048], index: 0, kind: input, shape index: {}]   ;;  %s6553_s2 = inlined_call_operand.vmem [shape: bf16[128,256], index: 2, kind: output, shape index: {}]  }
   0x1   :  { %v4191_v0 = vld [vmem:[%s6551_s1 + $0x74] ss:$8 sps:$4 sm:$0xff]   ;;  %v4195_v2 = vld [vmem:[%s6551_s1 + $0x70] ss:$8 sps:$4 sm:$0xff]   ;;  %v4197_v4 = vld [vmem:[%s6551_s1 + $0x64] ss:$8 sps:$4 sm:$0xff]  }
   0x2   :  { %v4193_v1 = vld [vmem:[%s6551_s1 + $0x174] ss:$8 sps:$4 sm:$0xff]   ;;  %2325 = vmatprep.subr.bf16.mxu0 %v4191_v0  ;;  %v4196_v3 = vld [vmem:[%s6551_s1 + $0x170] ss:$8 sps:$4 sm:$0xff]   ;;  %v4199_v5 = vld [vmem:[%s6551_s1 + $0x164] ss:$8 sps:$4 sm:$0xff]  }
   0x3   :  { %2438 = vmatprep.subr.bf16.mxu1 %v4193_v1  ;;  %2326 = vmatpush1.bf16.msra.mxu0 %v4195_v2  ;;  %v4201_v6 = vld [vmem:[%s6551_s1 + $0x60] ss:$8 sps:$4 sm:$0xff]   ;;  %v4203_v8 = vld [vmem:[%s6551_s1 + $0x54] ss:$8 sps:$4 sm:$0xff]   ;;  %v4207_v10 = vld [vmem:[%s6551_s1 + $0x50] ss:$8 sps:$4 sm:$0xff]  }
   0x4   :  { %2439 = vmatpush1.bf16.msra.mxu1 %v4196_v3  ;;  %2327 = vmatprep.subr.bf16.mxu0 %v4197_v4  ;;  %v4202_v7 = vld [vmem:[%s6551_s1 + $0x160] ss:$8 sps:$4 sm:$0xff]   ;;  %v4205_v9 = vld [vmem:[%s6551_s1 + $0x154] ss:$8 sps:$4 sm:$0xff]   ;;  %v4208_v11 = vld [vmem:[%s6551_s1 + $0x150] ss:$8 sps:$4 sm:$0xff]  }
   0x5   :  { %2440 = vmatprep.subr.bf16.mxu1 %v4199_v5  ;;  %v4209_v12 = vld [vmem:[%s6551_s1 + $0x44] ss:$8 sps:$4 sm:$0xff]   ;;  %v4213_v14 = vld [vmem:[%s6551_s1 + $0x40] ss:$8 sps:$4 sm:$0xff]   ;;  %v4215_v16 = vld [vmem:[%s6551_s1 + $0x34] ss:$8 sps:$4 sm:$0xff]  }
   0x6   :  { %v4211_v13 = vld [vmem:[%s6551_s1 + $0x144] ss:$8 sps:$4 sm:$0xff]   ;;  %v4214_v15 = vld [vmem:[%s6551_s1 + $0x140] ss:$8 sps:$4 sm:$0xff]   ;;  %v4217_v17 = vld [vmem:[%s6551_s1 + $0x134] ss:$8 sps:$4 sm:$0xff]  }
   0x7   :  { %2328 = vmatpush1.bf16.msra.mxu0 %v4201_v6  ;;  %v4219_v18 = vld [vmem:[%s6551_s1 + $0x30] ss:$8 sps:$4 sm:$0xff]   ;;  %v4221_v20 = vld [vmem:[%s6551_s1 + $0x24] ss:$8 sps:$4 sm:$0xff]   ;;  %v4225_v22 = vld [vmem:[%s6551_s1 + $0x20] ss:$8 sps:$4 sm:$0xff]  }
   0x8   :  { %2441 = vmatpush1.bf16.msra.mxu1 %v4202_v7  ;;  %2329 = vmatprep.subr.bf16.mxu0 %v4203_v8  ;;  %v4220_v19 = vld [vmem:[%s6551_s1 + $0x130] ss:$8 sps:$4 sm:$0xff]   ;;  %v4223_v21 = vld [vmem:[%s6551_s1 + $0x124] ss:$8 sps:$4 sm:$0xff]   ;;  %v4226_v23 = vld [vmem:[%s6551_s1 + $0x120] ss:$8 sps:$4 sm:$0xff]  }
   0x9   :  { %2442 = vmatprep.subr.bf16.mxu1 %v4205_v9  ;;  %v4227_v24 = vld [vmem:[%s6551_s1 + $0x14] ss:$8 sps:$4 sm:$0xff]   ;;  %v4231_v26 = vld [vmem:[%s6551_s1 + $0x10] ss:$8 sps:$4 sm:$0xff]   ;;  %v4233_v28 = vld [vmem:[%s6551_s1 + $0x4] ss:$8 sps:$4 sm:$0xff]  }
   0xa   :  { %v4229_v25 = vld [vmem:[%s6551_s1 + $0x114] ss:$8 sps:$4 sm:$0xff]   ;;  %v4232_v27 = vld [vmem:[%s6551_s1 + $0x110] ss:$8 sps:$4 sm:$0xff]   ;;  %v4235_v29 = vld [vmem:[%s6551_s1 + $0x104] ss:$8 sps:$4 sm:$0xff]  }
   0xb   :  { %2330 = vmatpush1.bf16.msra.mxu0 %v4207_v10  ;;  %v4237_v30 = vld [vmem:[%s6551_s1] ss:$8 sps:$4 sm:$0xff]   ;;  %v4239_v32 = vld [vmem:[%s6551_s1 + $0xf4] ss:$8 sps:$4 sm:$0xff]   ;;  %v4243_v34 = vld [vmem:[%s6551_s1 + $0xf0] ss:$8 sps:$4 sm:$0xff]  }
   0xc   :  { %2443 = vmatpush1.bf16.msra.mxu1 %v4208_v11  ;;  %2331 = vmatprep.subr.bf16.mxu0 %v4209_v12  ;;  %v4238_v31 = vld [vmem:[%s6551_s1 + $0x100] ss:$8 sps:$4 sm:$0xff]   ;;  %v4241_v33 = vld [vmem:[%s6551_s1 + $0x1f4] ss:$8 sps:$4 sm:$0xff]   ;;  %v4244_v35 = vld [vmem:[%s6551_s1 + $0x1f0] ss:$8 sps:$4 sm:$0xff]  }
   0xd   :  { %2444 = vmatprep.subr.bf16.mxu1 %v4211_v13  ;;  %v4245_v36 = vld [vmem:[%s6551_s1 + $0xe4] ss:$8 sps:$4 sm:$0xff]   ;;  %v4249_v38 = vld [vmem:[%s6551_s1 + $0xe0] ss:$8 sps:$4 sm:$0xff]   ;;  %v4251_v40 = vld [vmem:[%s6551_s1 + $0xd4] ss:$8 sps:$4 sm:$0xff]  }
   0xe   :  { %v4247_v37 = vld [vmem:[%s6551_s1 + $0x1e4] ss:$8 sps:$4 sm:$0xff]   ;;  %v4250_v39 = vld [vmem:[%s6551_s1 + $0x1e0] ss:$8 sps:$4 sm:$0xff]   ;;  %v4253_v41 = vld [vmem:[%s6551_s1 + $0x1d4] ss:$8 sps:$4 sm:$0xff]  }
   0xf   :  { %2332 = vmatpush1.bf16.msra.mxu0 %v4213_v14  ;;  %v4255_v42 = vld [vmem:[%s6551_s1 + $0xd0] ss:$8 sps:$4 sm:$0xff]   ;;  %v4257_v44 = vld [vmem:[%s6551_s1 + $0xc4] ss:$8 sps:$4 sm:$0xff]   ;;  %v4261_v46 = vld [vmem:[%s6551_s1 + $0xc0] ss:$8 sps:$4 sm:$0xff]  }
  0x10   :  { %2445 = vmatpush1.bf16.msra.mxu1 %v4214_v15  ;;  %2333 = vmatprep.subr.bf16.mxu0 %v4215_v16  ;;  %v4256_v43 = vld [vmem:[%s6551_s1 + $0x1d0] ss:$8 sps:$4 sm:$0xff]   ;;  %v4259_v45 = vld [vmem:[%s6551_s1 + $0x1c4] ss:$8 sps:$4 sm:$0xff]   ;;  %v4262_v47 = vld [vmem:[%s6551_s1 + $0x1c0] ss:$8 sps:$4 sm:$0xff]  }
  0x11   :  { %2446 = vmatprep.subr.bf16.mxu1 %v4217_v17  ;;  %v21_v48 = vld [vmem:[%s6552_s0] sm:$0xff]  ;;  %v22_v50 = vld [vmem:[%s6552_s0 + $0x8] sm:$0xff]  ;;  %v4263_v52 = vld [vmem:[%s6551_s1 + $0xb4] ss:$8 sps:$4 sm:$0xff]  }
  0x12   :  { %v29_v49 = vld [vmem:[%s6552_s0 + $0x40] sm:$0xff]  ;;  %v30_v51 = vld [vmem:[%s6552_s0 + $0x48] sm:$0xff]  ;;  %v4265_v54 = vld [vmem:[%s6551_s1 + $0x1b4] ss:$8 sps:$4 sm:$0xff]  }
  0x13   :  { %2334 = vmatpush1.bf16.msra.mxu0 %v4219_v18  ;;  %v3774_v53 = vcombine.high %v21_v48, %v29_v49  ;;  %v3776_v55 = vcombine.high %v22_v50, %v30_v51  ;;  %v4267_v56 = vld [vmem:[%s6551_s1 + $0xb0] ss:$8 sps:$4 sm:$0xff]   ;;  %v4269_v58 = vld [vmem:[%s6551_s1 + $0xa4] ss:$8 sps:$4 sm:$0xff]   ;;  %v4273_v60 = vld [vmem:[%s6551_s1 + $0xa0] ss:$8 sps:$4 sm:$0xff]   ;;  %v3773_v11 = vcombine.low %v21_v48, %v29_v49  ;;  %v3775_v12 = vcombine.low %v22_v50, %v30_v51 }
  0x14   :  { %2447 = vmatpush1.bf16.msra.mxu1 %v4220_v19  ;;  %2335 = vmatprep.subr.bf16.mxu0 %v4221_v20  ;;  %v4268_v57 = vld [vmem:[%s6551_s1 + $0x1b0] ss:$8 sps:$4 sm:$0xff]   ;;  %v4271_v59 = vld [vmem:[%s6551_s1 + $0x1a4] ss:$8 sps:$4 sm:$0xff]   ;;  %v4274_v61 = vld [vmem:[%s6551_s1 + $0x1a0] ss:$8 sps:$4 sm:$0xff]  }
  0x15   :  { %2448 = vmatprep.subr.bf16.mxu1 %v4223_v21  ;;  %2357 = vmatprep.mubr.bf16.mxu0 %v3774_v53  ;;  %v4275_v62 = vld [vmem:[%s6551_s1 + $0x94] ss:$8 sps:$4 sm:$0xff]   ;;  %v4279_v0 = vld [vmem:[%s6551_s1 + $0x90] ss:$8 sps:$4 sm:$0xff]   ;;  %v4281_v2 = vld [vmem:[%s6551_s1 + $0x84] ss:$8 sps:$4 sm:$0xff]  }
  0x16   :  { %2470 = vmatprep.mubr.bf16.mxu1 %v3776_v55  ;;  %v4277_v63 = vld [vmem:[%s6551_s1 + $0x194] ss:$8 sps:$4 sm:$0xff]   ;;  %v4280_v1 = vld [vmem:[%s6551_s1 + $0x190] ss:$8 sps:$4 sm:$0xff]   ;;  %v4283_v3 = vld [vmem:[%s6551_s1 + $0x184] ss:$8 sps:$4 sm:$0xff]  }
  0x17   :  { %2336 = vmatpush1.bf16.msra.mxu0 %v4225_v22  ;;  %v4285_v4 = vld [vmem:[%s6551_s1 + $0x80] ss:$8 sps:$4 sm:$0xff]   ;;  %v4289_v6 = vld [vmem:[%s6551_s1 + $0x274] ss:$8 sps:$4 sm:$0xff]   ;;  %v4287_v8 = vld [vmem:[%s6551_s1 + $0x270] ss:$8 sps:$4 sm:$0xff]  }
  0x18   :  { %2449 = vmatpush1.bf16.msra.mxu1 %v4226_v23  ;;  %2337 = vmatprep.subr.bf16.mxu0 %v4227_v24  ;;  %v4286_v5 = vld [vmem:[%s6551_s1 + $0x180] ss:$8 sps:$4 sm:$0xff]   ;;  %v4292_v7 = vld [vmem:[%s6551_s1 + $0x374] ss:$8 sps:$4 sm:$0xff]   ;;  %v4290_v9 = vld [vmem:[%s6551_s1 + $0x370] ss:$8 sps:$4 sm:$0xff]  }
  0x19   :  { %2450 = vmatprep.subr.bf16.mxu1 %v4229_v25  ;;  %v37_v10 = vld [vmem:[%s6552_s0 + $0x80] sm:$0xff]  ;;  %v38_v14 = vld [vmem:[%s6552_s0 + $0x88] sm:$0xff]  ;;  %v4301_v22 = vld [vmem:[%s6551_s1 + $0x254] ss:$8 sps:$4 sm:$0xff]  }
  0x1a   :  { %v45_v13 = vld [vmem:[%s6552_s0 + $0xc0] sm:$0xff]  ;;  %v46_v15 = vld [vmem:[%s6552_s0 + $0xc8] sm:$0xff]  ;;  %v4304_v23 = vld [vmem:[%s6551_s1 + $0x354] ss:$8 sps:$4 sm:$0xff]  }
  0x1b   :  { %2338 = vmatpush1.bf16.msra.mxu0 %v4231_v26  ;;  %v4295_v16 = vld [vmem:[%s6551_s1 + $0x264] ss:$8 sps:$4 sm:$0xff]   ;;  %v3790_v18 = vcombine.high %v37_v10, %v45_v13  ;;  %v3792_v19 = vcombine.high %v38_v14, %v46_v15  ;;  %v4293_v20 = vld [vmem:[%s6551_s1 + $0x260] ss:$8 sps:$4 sm:$0xff]   ;;  %v4299_v24 = vld [vmem:[%s6551_s1 + $0x250] ss:$8 sps:$4 sm:$0xff]  }
  0x1c   :  { %2451 = vmatpush1.bf16.msra.mxu1 %v4232_v27  ;;  %2339 = vmatprep.subr.bf16.mxu0 %v4233_v28  ;;  %v4298_v17 = vld [vmem:[%s6551_s1 + $0x364] ss:$8 sps:$4 sm:$0xff]   ;;  %v4296_v21 = vld [vmem:[%s6551_s1 + $0x360] ss:$8 sps:$4 sm:$0xff]   ;;  %v4302_v25 = vld [vmem:[%s6551_s1 + $0x350] ss:$8 sps:$4 sm:$0xff]   ;;  %v3789_v28 = vcombine.low %v37_v10, %v45_v13 }
  0x1d   :  { %2452 = vmatprep.subr.bf16.mxu1 %v4235_v29  ;;  %v53_v26 = vld [vmem:[%s6552_s0 + $0x100] sm:$0xff]  ;;  %v3791_v29 = vcombine.low %v38_v14, %v46_v15  ;;  %v4328_v55 = vld [vmem:[%s6551_s1 + $0x314] ss:$8 sps:$4 sm:$0xff]   ;;  %v110_v13 = vld [vmem:[%s6552_s0 + $0x2c8] sm:$0xff] }
  0x1e   :  { %v61_v27 = vld [vmem:[%s6552_s0 + $0x140] sm:$0xff]  ;;  %v4335_v14 = vld [vmem:[%s6551_s1 + $0x2f0] ss:$8 sps:$4 sm:$0xff]  }
  0x1f   :  { %2340 = vmatpush1.bf16.msra.mxu0 %v4237_v30  ;;  %v54_v30 = vld [vmem:[%s6552_s0 + $0x108] sm:$0xff]  ;;  %v4338_v15 = vld [vmem:[%s6551_s1 + $0x3f0] ss:$8 sps:$4 sm:$0xff]  }
  0x20   :  { %2453 = vmatpush1.bf16.msra.mxu1 %v4238_v31  ;;  %2341 = vmatprep.subr.bf16.mxu0 %v4239_v32  ;;  %v62_v31 = vld [vmem:[%s6552_s0 + $0x148] sm:$0xff] }
  0x21   :  { %2454 = vmatprep.subr.bf16.mxu1 %v4241_v33  ;;  %v4307_v32 = vld [vmem:[%s6551_s1 + $0x244] ss:$8 sps:$4 sm:$0xff]   ;;  %v4320_v53 = vld [vmem:[%s6551_s1 + $0x320] ss:$8 sps:$4 sm:$0xff]  }
  0x22   :  { %v4310_v33 = vld [vmem:[%s6551_s1 + $0x344] ss:$8 sps:$4 sm:$0xff]  }
  0x23   :  { %2342 = vmatpush2.bf16.msra.mxu0 %v4243_v34  ;;  %v3806_v34 = vcombine.high %v53_v26, %v61_v27  ;;  %v4319_v48 = vld [vmem:[%s6551_s1 + $0x224] ss:$8 sps:$4 sm:$0xff]  }
  0x24   :  { %2455 = vmatpush2.bf16.msra.mxu1 %v4244_v35  ;;  %2343 = vmatprep.subr.bf16.mxu0 %v4245_v36  ;;  %v3808_v35 = vcombine.high %v54_v30, %v62_v31  ;;  %v4305_v36 = vld [vmem:[%s6551_s1 + $0x240] ss:$8 sps:$4 sm:$0xff]   ;;  %v4322_v49 = vld [vmem:[%s6551_s1 + $0x324] ss:$8 sps:$4 sm:$0xff]  }
  0x25   :  { %2456 = vmatprep.subr.bf16.mxu1 %v4247_v37  ;;  %v4308_v37 = vld [vmem:[%s6551_s1 + $0x340] ss:$8 sps:$4 sm:$0xff]  }
  0x27   :  { %2344 = vmatpush2.bf16.msra.mxu0 %v4249_v38  ;;  %v4313_v38 = vld [vmem:[%s6551_s1 + $0x234] ss:$8 sps:$4 sm:$0xff]  }
  0x28   :  { %2457 = vmatpush2.bf16.msra.mxu1 %v4250_v39  ;;  %2345 = vmatprep.subr.bf16.mxu0 %v4251_v40  ;;  %v4316_v39 = vld [vmem:[%s6551_s1 + $0x334] ss:$8 sps:$4 sm:$0xff]   ;;  %v4311_v40 = vld [vmem:[%s6551_s1 + $0x230] ss:$8 sps:$4 sm:$0xff]  }
  0x29   :  { %2458 = vmatprep.subr.bf16.mxu1 %v4253_v41  ;;  %v4314_v41 = vld [vmem:[%s6551_s1 + $0x330] ss:$8 sps:$4 sm:$0xff]  }
  0x2b   :  { %2346 = vmatpush2.bf16.msra.mxu0 %v4255_v42  ;;  %v69_v42 = vld [vmem:[%s6552_s0 + $0x180] sm:$0xff] }
  0x2c   :  { %2459 = vmatpush2.bf16.msra.mxu1 %v4256_v43  ;;  %2347 = vmatprep.subr.bf16.mxu0 %v4257_v44  ;;  %v77_v43 = vld [vmem:[%s6552_s0 + $0x1c0] sm:$0xff]  ;;  %v3805_v44 = vcombine.low %v53_v26, %v61_v27 }
  0x2d   :  { %2460 = vmatprep.subr.bf16.mxu1 %v4259_v45  ;;  %v3807_v45 = vcombine.low %v54_v30, %v62_v31  ;;  %v3822_v50 = vcombine.high %v69_v42, %v77_v43  ;;  %v117_v26 = vld [vmem:[%s6552_s0 + $0x300] sm:$0xff]  ;;  %v118_v30 = vld [vmem:[%s6552_s0 + $0x308] sm:$0xff] }
  0x2e   :  { %v126_v31 = vld [vmem:[%s6552_s0 + $0x348] sm:$0xff] }
  0x2f   :  { %2348 = vmatpush2.bf16.msra.mxu0 %v4261_v46  ;;  %v70_v46 = vld [vmem:[%s6552_s0 + $0x188] sm:$0xff] }
  0x30   :  { %2461 = vmatpush2.bf16.msra.mxu1 %v4262_v47  ;;  %2349 = vmatprep.subr.bf16.mxu0 %v4263_v52  ;;  %v78_v47 = vld [vmem:[%s6552_s0 + $0x1c8] sm:$0xff] }
  0x31   :  { %2462 = vmatprep.subr.bf16.mxu1 %v4265_v54  ;;  %v3824_v51 = vcombine.high %v70_v46, %v78_v47  ;;  %v4317_v52 = vld [vmem:[%s6551_s1 + $0x220] ss:$8 sps:$4 sm:$0xff]   ;;  %v4325_v54 = vld [vmem:[%s6551_s1 + $0x214] ss:$8 sps:$4 sm:$0xff]  }
  0x33   :  { %2350 = vmatpush2.bf16.msra.mxu0 %v4267_v56  ;;  %v4323_v56 = vld [vmem:[%s6551_s1 + $0x210] ss:$8 sps:$4 sm:$0xff]  }
  0x34   :  { %2463 = vmatpush2.bf16.msra.mxu1 %v4268_v57  ;;  %2351 = vmatprep.subr.bf16.mxu0 %v4269_v58  ;;  %v85_v57 = vld [vmem:[%s6552_s0 + $0x200] sm:$0xff] }
  0x35   :  { %2464 = vmatprep.subr.bf16.mxu1 %v4271_v59  ;;  %v93_v58 = vld [vmem:[%s6552_s0 + $0x240] sm:$0xff]  ;;  %v3821_v59 = vcombine.low %v69_v42, %v77_v43 }
  0x36   :  { %v3837_v10 = vcombine.low %v85_v57, %v93_v58  ;;  %v133_v42 = vld [vmem:[%s6552_s0 + $0x380] sm:$0xff] }
  0x37   :  { %2352 = vmatpush2.bf16.msra.mxu0 %v4273_v60  ;;  %v3823_v60 = vcombine.low %v70_v46, %v78_v47  ;;  %v141_v43 = vld [vmem:[%s6552_s0 + $0x3c0] sm:$0xff]  ;;  %v134_v46 = vld [vmem:[%s6552_s0 + $0x388] sm:$0xff] }
  0x38   :  { %2465 = vmatpush2.bf16.msra.mxu1 %v4274_v61  ;;  %2353 = vmatprep.subr.bf16.mxu0 %v4275_v62  ;;  %v86_v61 = vld [vmem:[%s6552_s0 + $0x208] sm:$0xff] }
  0x39   :  { %2466 = vmatprep.subr.bf16.mxu1 %v4277_v63  ;;  %v94_v62 = vld [vmem:[%s6552_s0 + $0x248] sm:$0xff]  ;;  %v4326_v63 = vld [vmem:[%s6551_s1 + $0x310] ss:$8 sps:$4 sm:$0xff]  }
  0x3a   :  { %v142_v47 = vld [vmem:[%s6552_s0 + $0x3c8] sm:$0xff] }
  0x3b   :  { %2354 = vmatpush2.bf16.msra.mxu0 %v4279_v0  ;;  %v4331_v0 = vld [vmem:[%s6551_s1 + $0x204] ss:$8 sps:$4 sm:$0xff]  }
  0x3c   :  { %2467 = vmatpush2.bf16.msra.mxu1 %v4280_v1  ;;  %2355 = vmatprep.subr.bf16.mxu0 %v4281_v2  ;;  %v4334_v1 = vld [vmem:[%s6551_s1 + $0x304] ss:$8 sps:$4 sm:$0xff]   ;;  %v3838_v2 = vcombine.high %v85_v57, %v93_v58  ;;  %v4374_v57 = vld [vmem:[%s6551_s1 + $0x390] ss:$8 sps:$4 sm:$0xff]  }
  0x3d   :  { %2468 = vmatprep.subr.bf16.mxu1 %v4283_v3  ;;  %v3840_v3 = vcombine.high %v86_v61, %v94_v62  ;;  %v23_v58 = vld [vmem:[%s6552_s0 + $0x10] sm:$0xff] }
  0x3f   :  { %2356 = vmatpush2.bf16.msra.mxu0 %v4285_v4  ;;  %v4329_v4 = vld [vmem:[%s6551_s1 + $0x200] ss:$8 sps:$4 sm:$0xff]  }
  0x40   :  { %2469 = vmatpush2.bf16.msra.mxu1 %v4286_v5  ;;  %2551 = vmatprep.subr.bf16.mxu0 %v4289_v6  ;;  %v4332_v5 = vld [vmem:[%s6551_s1 + $0x300] ss:$8 sps:$4 sm:$0xff]   ;;  %v4337_v6 = vld [vmem:[%s6551_s1 + $0x2f4] ss:$8 sps:$4 sm:$0xff]  }
  0x41   :  { %2664 = vmatprep.subr.bf16.mxu1 %v4292_v7  ;;  %v4340_v7 = vld [vmem:[%s6551_s1 + $0x3f4] ss:$8 sps:$4 sm:$0xff]  }
  0x42   :  { %2358 = vmatmul.mubr.bf16.vlgmr.msra.gmra.mxu0 %v3773_v11  ;;  %v3839_v11 = vcombine.low %v86_v61, %v94_v62  ;;  %v3887_v61 = vcombine.low %v134_v46, %v142_v47  ;;  %v24_v62 = vld [vmem:[%s6552_s0 + $0x18] sm:$0xff] }
  0x43   :  { %2471 = vmatmul.mubr.bf16.vlgmr.msra.gmra.mxu1 %v3775_v12  ;;  %2552 = vmatpush1.bf16.msra.mxu0 %v4287_v8  ;;  %v101_v8 = vld [vmem:[%s6552_s0 + $0x280] sm:$0xff]  ;;  %v102_v12 = vld [vmem:[%s6552_s0 + $0x288] sm:$0xff] }
  0x44   :  { %2665 = vmatpush1.bf16.msra.mxu1 %v4290_v9  ;;  %2553 = vmatprep.subr.bf16.mxu0 %v4295_v16  ;;  %v109_v9 = vld [vmem:[%s6552_s0 + $0x2c0] sm:$0xff] }
  0x45   :  { %2666 = vmatprep.subr.bf16.mxu1 %v4298_v17  ;;  %2367 = vmatprep.mubr.bf16.mxu0 %v3790_v18  ;;  %v4343_v16 = vld [vmem:[%s6551_s1 + $0x2e4] ss:$8 sps:$4 sm:$0xff]   ;;  %v3854_v18 = vcombine.high %v101_v8, %v109_v9  ;;  %v3853_v27 = vcombine.low %v101_v8, %v109_v9  ;;  %v4383_v8 = vld [vmem:[%s6551_s1 + $0x470] ss:$8 sps:$4 sm:$0xff]  }
  0x46   :  { %2480 = vmatprep.mubr.bf16.mxu1 %v3792_v19  ;;  %v4346_v17 = vld [vmem:[%s6551_s1 + $0x3e4] ss:$8 sps:$4 sm:$0xff]   ;;  %v3856_v19 = vcombine.high %v102_v12, %v110_v13  ;;  %v39_v9 = vld [vmem:[%s6552_s0 + $0x90] sm:$0xff] }
  0x47   :  { %2554 = vmatpush1.bf16.msra.mxu0 %v4293_v20  ;;  %v4341_v20 = vld [vmem:[%s6551_s1 + $0x2e0] ss:$8 sps:$4 sm:$0xff]  }
  0x48   :  { %2667 = vmatpush1.bf16.msra.mxu1 %v4296_v21  ;;  %2555 = vmatprep.subr.bf16.mxu0 %v4301_v22  ;;  %v4344_v21 = vld [vmem:[%s6551_s1 + $0x3e0] ss:$8 sps:$4 sm:$0xff]   ;;  %v4349_v22 = vld [vmem:[%s6551_s1 + $0x2d4] ss:$8 sps:$4 sm:$0xff]  }
  0x49   :  { %2668 = vmatprep.subr.bf16.mxu1 %v4304_v23  ;;  %v4352_v23 = vld [vmem:[%s6551_s1 + $0x3d4] ss:$8 sps:$4 sm:$0xff]  }
  0x4a   :  { %2368 = vmatmul.mubr.bf16.gmra.mxu0 %v3789_v28  ;;  %v3855_v28 = vcombine.low %v102_v12, %v110_v13  ;;  %v40_v13 = vld [vmem:[%s6552_s0 + $0x98] sm:$0xff] }
  0x4b   :  { %2481 = vmatmul.mubr.bf16.gmra.mxu1 %v3791_v29  ;;  %2556 = vmatpush1.bf16.msra.mxu0 %v4299_v24  ;;  %v4347_v24 = vld [vmem:[%s6551_s1 + $0x2d0] ss:$8 sps:$4 sm:$0xff]   ;;  %v125_v29 = vld [vmem:[%s6552_s0 + $0x340] sm:$0xff] }
  0x4c   :  { %2669 = vmatpush1.bf16.msra.mxu1 %v4302_v25  ;;  %2557 = vmatprep.subr.bf16.mxu0 %v4307_v32  ;;  %v4350_v25 = vld [vmem:[%s6551_s1 + $0x3d0] ss:$8 sps:$4 sm:$0xff]   ;;  %v4355_v32 = vld [vmem:[%s6551_s1 + $0x2c4] ss:$8 sps:$4 sm:$0xff]  }
  0x4d   :  { %2670 = vmatprep.subr.bf16.mxu1 %v4310_v33  ;;  %2377 = vmatprep.mubr.bf16.mxu0 %v3806_v34  ;;  %v4358_v33 = vld [vmem:[%s6551_s1 + $0x3c4] ss:$8 sps:$4 sm:$0xff]   ;;  %v3870_v34 = vcombine.high %v117_v26, %v125_v29 }
  0x4e   :  { %2490 = vmatprep.mubr.bf16.mxu1 %v3808_v35  ;;  %v3872_v35 = vcombine.high %v118_v30, %v126_v31 }
  0x4f   :  { %2558 = vmatpush1.bf16.msra.mxu0 %v4305_v36  ;;  %v4353_v36 = vld [vmem:[%s6551_s1 + $0x2c0] ss:$8 sps:$4 sm:$0xff]  }
  0x50   :  { %2671 = vmatpush1.bf16.msra.mxu1 %v4308_v37  ;;  %2559 = vmatprep.subr.bf16.mxu0 %v4313_v38  ;;  %v4356_v37 = vld [vmem:[%s6551_s1 + $0x3c0] ss:$8 sps:$4 sm:$0xff]   ;;  %v4361_v38 = vld [vmem:[%s6551_s1 + $0x2b4] ss:$8 sps:$4 sm:$0xff]  }
  0x51   :  { %2672 = vmatprep.subr.bf16.mxu1 %v4316_v39  ;;  %v4364_v39 = vld [vmem:[%s6551_s1 + $0x3b4] ss:$8 sps:$4 sm:$0xff]  }
  0x52   :  { %2378 = vmatmul.mubr.bf16.gmra.mxu0 %v3805_v44  ;;  %v3869_v44 = vcombine.low %v117_v26, %v125_v29  ;;  %v64_v29 = vld [vmem:[%s6552_s0 + $0x158] sm:$0xff] }
  0x53   :  { %2491 = vmatmul.mubr.bf16.gmra.mxu1 %v3807_v45  ;;  %2560 = vmatpush1.bf16.msra.mxu0 %v4311_v40  ;;  %v4359_v40 = vld [vmem:[%s6551_s1 + $0x2b0] ss:$8 sps:$4 sm:$0xff]   ;;  %v3871_v45 = vcombine.low %v118_v30, %v126_v31 }
  0x54   :  { %2673 = vmatpush1.bf16.msra.mxu1 %v4314_v41  ;;  %2561 = vmatprep.subr.bf16.mxu0 %v4319_v48  ;;  %v4362_v41 = vld [vmem:[%s6551_s1 + $0x3b0] ss:$8 sps:$4 sm:$0xff]   ;;  %v4367_v48 = vld [vmem:[%s6551_s1 + $0x2a4] ss:$8 sps:$4 sm:$0xff]  }
  0x55   :  { %2674 = vmatprep.subr.bf16.mxu1 %v4322_v49  ;;  %2387 = vmatprep.mubr.bf16.mxu0 %v3822_v50  ;;  %v4370_v49 = vld [vmem:[%s6551_s1 + $0x3a4] ss:$8 sps:$4 sm:$0xff]   ;;  %v3886_v50 = vcombine.high %v133_v42, %v141_v43  ;;  %v4395_v30 = vld [vmem:[%s6551_s1 + $0x450] ss:$8 sps:$4 sm:$0xff]  }
  0x56   :  { %2500 = vmatprep.mubr.bf16.mxu1 %v3824_v51  ;;  %v3888_v51 = vcombine.high %v134_v46, %v142_v47  ;;  %v4398_v31 = vld [vmem:[%s6551_s1 + $0x550] ss:$8 sps:$4 sm:$0xff]  }
  0x57   :  { %2562 = vmatpush1.bf16.msra.mxu0 %v4317_v52  ;;  %v4365_v52 = vld [vmem:[%s6551_s1 + $0x2a0] ss:$8 sps:$4 sm:$0xff]   ;;  %v72_v46 = vld [vmem:[%s6552_s0 + $0x198] sm:$0xff] }
  0x58   :  { %2675 = vmatpush1.bf16.msra.mxu1 %v4320_v53  ;;  %2563 = vmatprep.subr.bf16.mxu0 %v4325_v54  ;;  %v4368_v53 = vld [vmem:[%s6551_s1 + $0x3a0] ss:$8 sps:$4 sm:$0xff]   ;;  %v4373_v54 = vld [vmem:[%s6551_s1 + $0x294] ss:$8 sps:$4 sm:$0xff]  }
  0x59   :  { %2676 = vmatprep.subr.bf16.mxu1 %v4328_v55  ;;  %v4376_v55 = vld [vmem:[%s6551_s1 + $0x394] ss:$8 sps:$4 sm:$0xff]  }
  0x5a   :  { %2388 = vmatmul.mubr.bf16.gmra.mxu0 %v3821_v59  ;;  %v31_v59 = vld [vmem:[%s6552_s0 + $0x50] sm:$0xff]  ;;  %v80_v47 = vld [vmem:[%s6552_s0 + $0x1d8] sm:$0xff] }
  0x5b   :  { %2501 = vmatmul.mubr.bf16.gmra.mxu1 %v3823_v60  ;;  %2564 = vmatpush1.bf16.msra.mxu0 %v4323_v56  ;;  %v4371_v56 = vld [vmem:[%s6551_s1 + $0x290] ss:$8 sps:$4 sm:$0xff]   ;;  %v3885_v60 = vcombine.low %v133_v42, %v141_v43 }
  0x5c   :  { %2677 = vmatpush1.bf16.msra.mxu1 %v4326_v63  ;;  %2565 = vmatprep.subr.bf16.mxu0 %v4331_v0  ;;  %v32_v63 = vld [vmem:[%s6552_s0 + $0x58] sm:$0xff]  ;;  %v4379_v0 = vld [vmem:[%s6551_s1 + $0x284] ss:$8 sps:$4 sm:$0xff]   ;;  %v71_v42 = vld [vmem:[%s6552_s0 + $0x190] sm:$0xff] }
  0x5d   :  { %2678 = vmatprep.subr.bf16.mxu1 %v4334_v1  ;;  %2397 = vmatprep.mubr.bf16.mxu0 %v3838_v2  ;;  %v4382_v1 = vld [vmem:[%s6551_s1 + $0x384] ss:$8 sps:$4 sm:$0xff]   ;;  %v3778_v2 = vcombine.high %v23_v58, %v31_v59  ;;  %v3779_v12 = vcombine.low %v24_v62, %v32_v63 }
  0x5e   :  { %2510 = vmatprep.mubr.bf16.mxu1 %v3840_v3  ;;  %v3780_v3 = vcombine.high %v24_v62, %v32_v63  ;;  %v88_v62 = vld [vmem:[%s6552_s0 + $0x218] sm:$0xff] }
  0x5f   :  { %2566 = vmatpush1.bf16.msra.mxu0 %v4329_v4  ;;  %v4377_v4 = vld [vmem:[%s6551_s1 + $0x280] ss:$8 sps:$4 sm:$0xff]   ;;  %v96_v63 = vld [vmem:[%s6552_s0 + $0x258] sm:$0xff] }
  0x60   :  { %2679 = vmatpush1.bf16.msra.mxu1 %v4332_v5  ;;  %2567 = vmatprep.subr.bf16.mxu0 %v4337_v6  ;;  %v4380_v5 = vld [vmem:[%s6551_s1 + $0x380] ss:$8 sps:$4 sm:$0xff]   ;;  %v4385_v6 = vld [vmem:[%s6551_s1 + $0x474] ss:$8 sps:$4 sm:$0xff]  }
  0x61   :  { %2680 = vmatprep.subr.bf16.mxu1 %v4340_v7  ;;  %v4388_v7 = vld [vmem:[%s6551_s1 + $0x574] ss:$8 sps:$4 sm:$0xff]  }
  0x62   :  { %2398 = vmatmul.mubr.bf16.gmra.mxu0 %v3837_v10  ;;  %v47_v10 = vld [vmem:[%s6552_s0 + $0xd0] sm:$0xff] }
  0x63   :  { %2511 = vmatmul.mubr.bf16.gmra.mxu1 %v3839_v11  ;;  %2568 = vmatpush2.bf16.msra.mxu0 %v4335_v14  ;;  %v3777_v11 = vcombine.low %v23_v58, %v31_v59  ;;  %v48_v14 = vld [vmem:[%s6552_s0 + $0xd8] sm:$0xff]  ;;  %v3793_v26 = vcombine.low %v39_v9, %v47_v10  ;;  %v87_v58 = vld [vmem:[%s6552_s0 + $0x210] sm:$0xff] }
  0x64   :  { %2681 = vmatpush2.bf16.msra.mxu1 %v4338_v15  ;;  %2569 = vmatprep.subr.bf16.mxu0 %v4343_v16  ;;  %v4386_v15 = vld [vmem:[%s6551_s1 + $0x570] ss:$8 sps:$4 sm:$0xff]   ;;  %v4391_v16 = vld [vmem:[%s6551_s1 + $0x464] ss:$8 sps:$4 sm:$0xff]  }
  0x65   :  { %2682 = vmatprep.subr.bf16.mxu1 %v4346_v17  ;;  %2407 = vmatprep.mubr.bf16.mxu0 %v3854_v18  ;;  %v4394_v17 = vld [vmem:[%s6551_s1 + $0x564] ss:$8 sps:$4 sm:$0xff]   ;;  %v3794_v18 = vcombine.high %v39_v9, %v47_v10  ;;  %v95_v59 = vld [vmem:[%s6552_s0 + $0x250] sm:$0xff] }
  0x66   :  { %2520 = vmatprep.mubr.bf16.mxu1 %v3856_v19  ;;  %v3796_v19 = vcombine.high %v40_v13, %v48_v14  ;;  %v4434_v9 = vld [vmem:[%s6551_s1 + $0x5f0] ss:$8 sps:$4 sm:$0xff]  }
  0x67   :  { %2570 = vmatpush2.bf16.msra.mxu0 %v4341_v20  ;;  %v4389_v20 = vld [vmem:[%s6551_s1 + $0x460] ss:$8 sps:$4 sm:$0xff]   ;;  %v103_v10 = vld [vmem:[%s6552_s0 + $0x290] sm:$0xff] }
  0x68   :  { %2683 = vmatpush2.bf16.msra.mxu1 %v4344_v21  ;;  %2571 = vmatprep.subr.bf16.mxu0 %v4349_v22  ;;  %v4392_v21 = vld [vmem:[%s6551_s1 + $0x560] ss:$8 sps:$4 sm:$0xff]   ;;  %v4397_v22 = vld [vmem:[%s6551_s1 + $0x454] ss:$8 sps:$4 sm:$0xff]  }
  0x69   :  { %2684 = vmatprep.subr.bf16.mxu1 %v4352_v23  ;;  %v4400_v23 = vld [vmem:[%s6551_s1 + $0x554] ss:$8 sps:$4 sm:$0xff]  }
  0x6a   :  { %2408 = vmatmul.mubr.bf16.gmra.mxu0 %v3853_v27  ;;  %v3795_v27 = vcombine.low %v40_v13, %v48_v14  ;;  %v3843_v13 = vcombine.low %v88_v62, %v96_v63  ;;  %v104_v14 = vld [vmem:[%s6552_s0 + $0x298] sm:$0xff] }
  0x6b   :  { %2521 = vmatmul.mubr.bf16.gmra.mxu1 %v3855_v28  ;;  %2572 = vmatpush2.bf16.msra.mxu0 %v4347_v24  ;;  %v55_v24 = vld [vmem:[%s6552_s0 + $0x110] sm:$0xff]  ;;  %v56_v28 = vld [vmem:[%s6552_s0 + $0x118] sm:$0xff] }
  0x6c   :  { %2685 = vmatpush2.bf16.msra.mxu1 %v4350_v25  ;;  %2573 = vmatprep.subr.bf16.mxu0 %v4355_v32  ;;  %v63_v25 = vld [vmem:[%s6552_s0 + $0x150] sm:$0xff]  ;;  %v4403_v32 = vld [vmem:[%s6551_s1 + $0x444] ss:$8 sps:$4 sm:$0xff]  }
  0x6d   :  { %2686 = vmatprep.subr.bf16.mxu1 %v4358_v33  ;;  %2417 = vmatprep.mubr.bf16.mxu0 %v3870_v34  ;;  %v4406_v33 = vld [vmem:[%s6551_s1 + $0x544] ss:$8 sps:$4 sm:$0xff]   ;;  %v3810_v34 = vcombine.high %v55_v24, %v63_v25  ;;  %v3809_v43 = vcombine.low %v55_v24, %v63_v25  ;;  %v4443_v24 = vld [vmem:[%s6551_s1 + $0x4d0] ss:$8 sps:$4 sm:$0xff]  }
  0x6e   :  { %2530 = vmatprep.mubr.bf16.mxu1 %v3872_v35  ;;  %v3812_v35 = vcombine.high %v56_v28, %v64_v29  ;;  %v119_v25 = vld [vmem:[%s6552_s0 + $0x310] sm:$0xff] }
  0x6f   :  { %2574 = vmatpush2.bf16.msra.mxu0 %v4353_v36  ;;  %v4401_v36 = vld [vmem:[%s6551_s1 + $0x440] ss:$8 sps:$4 sm:$0xff]  }
  0x70   :  { %2687 = vmatpush2.bf16.msra.mxu1 %v4356_v37  ;;  %2575 = vmatprep.subr.bf16.mxu0 %v4361_v38  ;;  %v4404_v37 = vld [vmem:[%s6551_s1 + $0x540] ss:$8 sps:$4 sm:$0xff]   ;;  %v4409_v38 = vld [vmem:[%s6551_s1 + $0x434] ss:$8 sps:$4 sm:$0xff]  }
  0x71   :  { %2688 = vmatprep.subr.bf16.mxu1 %v4364_v39  ;;  %v4412_v39 = vld [vmem:[%s6551_s1 + $0x534] ss:$8 sps:$4 sm:$0xff]  }
  0x72   :  { %2418 = vmatmul.mubr.bf16.gmra.mxu0 %v3869_v44  ;;  %v3811_v44 = vcombine.low %v56_v28, %v64_v29  ;;  %v120_v29 = vld [vmem:[%s6552_s0 + $0x318] sm:$0xff] }
  0x73   :  { %2531 = vmatmul.mubr.bf16.gmra.mxu1 %v3871_v45  ;;  %2576 = vmatpush2.bf16.msra.mxu0 %v4359_v40  ;;  %v4407_v40 = vld [vmem:[%s6551_s1 + $0x430] ss:$8 sps:$4 sm:$0xff]  }
  0x74   :  { %2689 = vmatpush2.bf16.msra.mxu1 %v4362_v41  ;;  %2577 = vmatprep.subr.bf16.mxu0 %v4367_v48  ;;  %v4410_v41 = vld [vmem:[%s6551_s1 + $0x530] ss:$8 sps:$4 sm:$0xff]   ;;  %v4415_v48 = vld [vmem:[%s6551_s1 + $0x424] ss:$8 sps:$4 sm:$0xff]  }
  0x75   :  { %2690 = vmatprep.subr.bf16.mxu1 %v4370_v49  ;;  %2427 = vmatprep.mubr.bf16.mxu0 %v3886_v50  ;;  %v79_v45 = vld [vmem:[%s6552_s0 + $0x1d0] sm:$0xff]  ;;  %v4418_v49 = vld [vmem:[%s6551_s1 + $0x524] ss:$8 sps:$4 sm:$0xff]  }
  0x76   :  { %2540 = vmatprep.mubr.bf16.mxu1 %v3888_v51  ;;  %v3826_v50 = vcombine.high %v71_v42, %v79_v45  ;;  %v3828_v51 = vcombine.high %v72_v46, %v80_v47 }
  0x77   :  { %2578 = vmatpush2.bf16.msra.mxu0 %v4365_v52  ;;  %v4413_v52 = vld [vmem:[%s6551_s1 + $0x420] ss:$8 sps:$4 sm:$0xff]  }
  0x78   :  { %2691 = vmatpush2.bf16.msra.mxu1 %v4368_v53  ;;  %2579 = vmatprep.subr.bf16.mxu0 %v4373_v54  ;;  %v4416_v53 = vld [vmem:[%s6551_s1 + $0x520] ss:$8 sps:$4 sm:$0xff]   ;;  %v4421_v54 = vld [vmem:[%s6551_s1 + $0x414] ss:$8 sps:$4 sm:$0xff]  }
  0x79   :  { %2692 = vmatprep.subr.bf16.mxu1 %v4376_v55  ;;  %v4424_v55 = vld [vmem:[%s6551_s1 + $0x514] ss:$8 sps:$4 sm:$0xff]  }
  0x7a   :  { %2428 = vmatmul.mubr.bf16.gmra.mxu0 %v3885_v60  ;;  %v3825_v60 = vcombine.low %v71_v42, %v79_v45  ;;  %v144_v45 = vld [vmem:[%s6552_s0 + $0x3d8] sm:$0xff] }
  0x7b   :  { %2541 = vmatmul.mubr.bf16.gmra.mxu1 %v3887_v61  ;;  %2580 = vmatpush2.bf16.msra.mxu0 %v4371_v56  ;;  %v4419_v56 = vld [vmem:[%s6551_s1 + $0x410] ss:$8 sps:$4 sm:$0xff]   ;;  %v3827_v61 = vcombine.low %v72_v46, %v80_v47 }
  0x7c   :  { %2693 = vmatpush2.bf16.msra.mxu1 %v4374_v57  ;;  %2581 = vmatprep.subr.bf16.mxu0 %v4379_v0  ;;  %v4422_v57 = vld [vmem:[%s6551_s1 + $0x510] ss:$8 sps:$4 sm:$0xff]   ;;  %v4427_v0 = vld [vmem:[%s6551_s1 + $0x404] ss:$8 sps:$4 sm:$0xff]  }
  0x7d   :  { %2694 = vmatprep.subr.bf16.mxu1 %v4382_v1  ;;  %2583 = vmatprep.mubr.bf16.mxu0 %v3778_v2  ;;  %v4430_v1 = vld [vmem:[%s6551_s1 + $0x504] ss:$8 sps:$4 sm:$0xff]   ;;  %v3842_v2 = vcombine.high %v87_v58, %v95_v59  ;;  %v4455_v46 = vld [vmem:[%s6551_s1 + $0x4b0] ss:$8 sps:$4 sm:$0xff]  }
  0x7e   :  { %2696 = vmatprep.mubr.bf16.mxu1 %v3780_v3  ;;  %v3844_v3 = vcombine.high %v88_v62, %v96_v63  ;;  %v4458_v47 = vld [vmem:[%s6551_s1 + $0x5b0] ss:$8 sps:$4 sm:$0xff]   ;;  %v26_v62 = vld [vmem:[%s6552_s0 + $0x28] sm:$0xff] }
  0x7f   :  { %2582 = vmatpush2.bf16.msra.mxu0 %v4377_v4  ;;  %v4425_v4 = vld [vmem:[%s6551_s1 + $0x400] ss:$8 sps:$4 sm:$0xff]  }
  0x80   :  { %2695 = vmatpush2.bf16.msra.mxu1 %v4380_v5  ;;  %2777 = vmatprep.subr.bf16.mxu0 %v4385_v6  ;;  %v4428_v5 = vld [vmem:[%s6551_s1 + $0x500] ss:$8 sps:$4 sm:$0xff]   ;;  %v4433_v6 = vld [vmem:[%s6551_s1 + $0x4f4] ss:$8 sps:$4 sm:$0xff]  }
  0x81   :  { %2890 = vmatprep.subr.bf16.mxu1 %v4388_v7  ;;  %v4436_v7 = vld [vmem:[%s6551_s1 + $0x5f4] ss:$8 sps:$4 sm:$0xff]   ;;  %v34_v63 = vld [vmem:[%s6552_s0 + $0x68] sm:$0xff] }
  0x82   :  { %2584 = vmatmul.mubr.bf16.vlgmr.msra.gmra.mxu0 %v3777_v11  ;;  %v111_v11 = vld [vmem:[%s6552_s0 + $0x2d0] sm:$0xff] }
  0x83   :  { %2697 = vmatmul.mubr.bf16.vlgmr.msra.gmra.mxu1 %v3779_v12  ;;  %2778 = vmatpush1.bf16.msra.mxu0 %v4383_v8  ;;  %v4431_v8 = vld [vmem:[%s6551_s1 + $0x4f0] ss:$8 sps:$4 sm:$0xff]   ;;  %v3841_v12 = vcombine.low %v87_v58, %v95_v59  ;;  %v25_v58 = vld [vmem:[%s6552_s0 + $0x20] sm:$0xff] }
  0x84   :  { %2891 = vmatpush1.bf16.msra.mxu1 %v4386_v15  ;;  %2779 = vmatprep.subr.bf16.mxu0 %v4391_v16  ;;  %v112_v15 = vld [vmem:[%s6552_s0 + $0x2d8] sm:$0xff]  ;;  %v4439_v16 = vld [vmem:[%s6551_s1 + $0x4e4] ss:$8 sps:$4 sm:$0xff]  }
  0x85   :  { %2892 = vmatprep.subr.bf16.mxu1 %v4394_v17  ;;  %2593 = vmatprep.mubr.bf16.mxu0 %v3794_v18  ;;  %v4442_v17 = vld [vmem:[%s6551_s1 + $0x5e4] ss:$8 sps:$4 sm:$0xff]   ;;  %v3858_v18 = vcombine.high %v103_v10, %v111_v11  ;;  %v3859_v28 = vcombine.low %v104_v14, %v112_v15 }
  0x86   :  { %2706 = vmatprep.mubr.bf16.mxu1 %v3796_v19  ;;  %v3860_v19 = vcombine.high %v104_v14, %v112_v15  ;;  %v42_v14 = vld [vmem:[%s6552_s0 + $0xa8] sm:$0xff] }
  0x87   :  { %2780 = vmatpush1.bf16.msra.mxu0 %v4389_v20  ;;  %v4437_v20 = vld [vmem:[%s6551_s1 + $0x4e0] ss:$8 sps:$4 sm:$0xff]  }
  0x88   :  { %2893 = vmatpush1.bf16.msra.mxu1 %v4392_v21  ;;  %2781 = vmatprep.subr.bf16.mxu0 %v4397_v22  ;;  %v4440_v21 = vld [vmem:[%s6551_s1 + $0x5e0] ss:$8 sps:$4 sm:$0xff]   ;;  %v4445_v22 = vld [vmem:[%s6551_s1 + $0x4d4] ss:$8 sps:$4 sm:$0xff]  }
  0x89   :  { %2894 = vmatprep.subr.bf16.mxu1 %v4400_v23  ;;  %v4448_v23 = vld [vmem:[%s6551_s1 + $0x5d4] ss:$8 sps:$4 sm:$0xff]   ;;  %v50_v15 = vld [vmem:[%s6552_s0 + $0xe8] sm:$0xff] }
  0x8a   :  { %2594 = vmatmul.mubr.bf16.gmra.mxu0 %v3793_v26  ;;  %v127_v26 = vld [vmem:[%s6552_s0 + $0x350] sm:$0xff] }
  0x8b   :  { %2707 = vmatmul.mubr.bf16.gmra.mxu1 %v3795_v27  ;;  %2782 = vmatpush1.bf16.msra.mxu0 %v4395_v30  ;;  %v3857_v27 = vcombine.low %v103_v10, %v111_v11  ;;  %v128_v30 = vld [vmem:[%s6552_s0 + $0x358] sm:$0xff]  ;;  %v3873_v42 = vcombine.low %v119_v25, %v127_v26  ;;  %v41_v10 = vld [vmem:[%s6552_s0 + $0xa0] sm:$0xff] }
  0x8c   :  { %2895 = vmatpush1.bf16.msra.mxu1 %v4398_v31  ;;  %2783 = vmatprep.subr.bf16.mxu0 %v4403_v32  ;;  %v4446_v31 = vld [vmem:[%s6551_s1 + $0x5d0] ss:$8 sps:$4 sm:$0xff]   ;;  %v4451_v32 = vld [vmem:[%s6551_s1 + $0x4c4] ss:$8 sps:$4 sm:$0xff]  }
  0x8d   :  { %2896 = vmatprep.subr.bf16.mxu1 %v4406_v33  ;;  %2603 = vmatprep.mubr.bf16.mxu0 %v3810_v34  ;;  %v4454_v33 = vld [vmem:[%s6551_s1 + $0x5c4] ss:$8 sps:$4 sm:$0xff]   ;;  %v3874_v34 = vcombine.high %v119_v25, %v127_v26  ;;  %v4494_v25 = vld [vmem:[%s6551_s1 + $0x750] ss:$8 sps:$4 sm:$0xff]  }
  0x8e   :  { %2716 = vmatprep.mubr.bf16.mxu1 %v3812_v35  ;;  %v3876_v35 = vcombine.high %v120_v29, %v128_v30  ;;  %v49_v11 = vld [vmem:[%s6552_s0 + $0xe0] sm:$0xff] }
  0x8f   :  { %2784 = vmatpush1.bf16.msra.mxu0 %v4401_v36  ;;  %v4449_v36 = vld [vmem:[%s6551_s1 + $0x4c0] ss:$8 sps:$4 sm:$0xff]  }
  0x90   :  { %2897 = vmatpush1.bf16.msra.mxu1 %v4404_v37  ;;  %2785 = vmatprep.subr.bf16.mxu0 %v4409_v38  ;;  %v4452_v37 = vld [vmem:[%s6551_s1 + $0x5c0] ss:$8 sps:$4 sm:$0xff]   ;;  %v4457_v38 = vld [vmem:[%s6551_s1 + $0x4b4] ss:$8 sps:$4 sm:$0xff]  }
  0x91   :  { %2898 = vmatprep.subr.bf16.mxu1 %v4412_v39  ;;  %v4460_v39 = vld [vmem:[%s6551_s1 + $0x5b4] ss:$8 sps:$4 sm:$0xff]   ;;  %v57_v26 = vld [vmem:[%s6552_s0 + $0x120] sm:$0xff] }
  0x92   :  { %2604 = vmatmul.mubr.bf16.gmra.mxu0 %v3809_v43  ;;  %v3875_v43 = vcombine.low %v120_v29, %v128_v30  ;;  %v3799_v29 = vcombine.low %v42_v14, %v50_v15  ;;  %v58_v30 = vld [vmem:[%s6552_s0 + $0x128] sm:$0xff] }
  0x93   :  { %2717 = vmatmul.mubr.bf16.gmra.mxu1 %v3811_v44  ;;  %2786 = vmatpush1.bf16.msra.mxu0 %v4407_v40  ;;  %v135_v40 = vld [vmem:[%s6552_s0 + $0x390] sm:$0xff]  ;;  %v136_v44 = vld [vmem:[%s6552_s0 + $0x398] sm:$0xff] }
  0x94   :  { %2899 = vmatpush1.bf16.msra.mxu1 %v4410_v41  ;;  %2787 = vmatprep.subr.bf16.mxu0 %v4415_v48  ;;  %v143_v41 = vld [vmem:[%s6552_s0 + $0x3d0] sm:$0xff]  ;;  %v4463_v48 = vld [vmem:[%s6551_s1 + $0x4a4] ss:$8 sps:$4 sm:$0xff]  }
  0x95   :  { %2900 = vmatprep.subr.bf16.mxu1 %v4418_v49  ;;  %2613 = vmatprep.mubr.bf16.mxu0 %v3826_v50  ;;  %v4466_v49 = vld [vmem:[%s6551_s1 + $0x5a4] ss:$8 sps:$4 sm:$0xff]   ;;  %v3890_v50 = vcombine.high %v135_v40, %v143_v41  ;;  %v3889_v59 = vcombine.low %v135_v40, %v143_v41 }
  0x96   :  { %2726 = vmatprep.mubr.bf16.mxu1 %v3828_v51  ;;  %v3892_v51 = vcombine.high %v136_v44, %v144_v45  ;;  %v73_v40 = vld [vmem:[%s6552_s0 + $0x1a0] sm:$0xff] }
  0x97   :  { %2788 = vmatpush1.bf16.msra.mxu0 %v4413_v52  ;;  %v4461_v52 = vld [vmem:[%s6551_s1 + $0x4a0] ss:$8 sps:$4 sm:$0xff]  }
  0x98   :  { %2901 = vmatpush1.bf16.msra.mxu1 %v4416_v53  ;;  %2789 = vmatprep.subr.bf16.mxu0 %v4421_v54  ;;  %v4464_v53 = vld [vmem:[%s6551_s1 + $0x5a0] ss:$8 sps:$4 sm:$0xff]   ;;  %v4469_v54 = vld [vmem:[%s6551_s1 + $0x494] ss:$8 sps:$4 sm:$0xff]  }
  0x99   :  { %2902 = vmatprep.subr.bf16.mxu1 %v4424_v55  ;;  %v4472_v55 = vld [vmem:[%s6551_s1 + $0x594] ss:$8 sps:$4 sm:$0xff]  }
  0x9a   :  { %2614 = vmatmul.mubr.bf16.gmra.mxu0 %v3825_v60  ;;  %v3891_v60 = vcombine.low %v136_v44, %v144_v45  ;;  %v74_v44 = vld [vmem:[%s6552_s0 + $0x1a8] sm:$0xff] }
  0x9b   :  { %2727 = vmatmul.mubr.bf16.gmra.mxu1 %v3827_v61  ;;  %2790 = vmatpush1.bf16.msra.mxu0 %v4419_v56  ;;  %v4467_v56 = vld [vmem:[%s6551_s1 + $0x490] ss:$8 sps:$4 sm:$0xff]   ;;  %v33_v61 = vld [vmem:[%s6552_s0 + $0x60] sm:$0xff]  ;;  %v82_v45 = vld [vmem:[%s6552_s0 + $0x1e8] sm:$0xff] }
  0x9c   :  { %2903 = vmatpush1.bf16.msra.mxu1 %v4422_v57  ;;  %2791 = vmatprep.subr.bf16.mxu0 %v4427_v0  ;;  %v4470_v57 = vld [vmem:[%s6551_s1 + $0x590] ss:$8 sps:$4 sm:$0xff]   ;;  %v4475_v0 = vld [vmem:[%s6551_s1 + $0x484] ss:$8 sps:$4 sm:$0xff]  }
  0x9d   :  { %2904 = vmatprep.subr.bf16.mxu1 %v4430_v1  ;;  %2623 = vmatprep.mubr.bf16.mxu0 %v3842_v2  ;;  %v4478_v1 = vld [vmem:[%s6551_s1 + $0x584] ss:$8 sps:$4 sm:$0xff]   ;;  %v3782_v2 = vcombine.high %v25_v58, %v33_v61 }
  0x9e   :  { %2736 = vmatprep.mubr.bf16.mxu1 %v3844_v3  ;;  %v3784_v3 = vcombine.high %v26_v62, %v34_v63 }
  0x9f   :  { %2792 = vmatpush1.bf16.msra.mxu0 %v4425_v4  ;;  %v4473_v4 = vld [vmem:[%s6551_s1 + $0x480] ss:$8 sps:$4 sm:$0xff]  }
  0xa0   :  { %2905 = vmatpush1.bf16.msra.mxu1 %v4428_v5  ;;  %2793 = vmatprep.subr.bf16.mxu0 %v4433_v6  ;;  %v4476_v5 = vld [vmem:[%s6551_s1 + $0x580] ss:$8 sps:$4 sm:$0xff]   ;;  %v4481_v6 = vld [vmem:[%s6551_s1 + $0x674] ss:$8 sps:$4 sm:$0xff]  }
  0xa1   :  { %2906 = vmatprep.subr.bf16.mxu1 %v4436_v7  ;;  %v4484_v7 = vld [vmem:[%s6551_s1 + $0x774] ss:$8 sps:$4 sm:$0xff]  }
  0xa2   :  { %2624 = vmatmul.mubr.bf16.gmra.mxu0 %v3841_v12  ;;  %v3781_v12 = vcombine.low %v25_v58, %v33_v61  ;;  %v3831_v58 = vcombine.low %v74_v44, %v82_v45  ;;  %v98_v61 = vld [vmem:[%s6552_s0 + $0x268] sm:$0xff] }
  0xa3   :  { %2737 = vmatmul.mubr.bf16.gmra.mxu1 %v3843_v13  ;;  %2794 = vmatpush2.bf16.msra.mxu0 %v4431_v8  ;;  %v4479_v8 = vld [vmem:[%s6551_s1 + $0x670] ss:$8 sps:$4 sm:$0xff]   ;;  %v3783_v13 = vcombine.low %v26_v62, %v34_v63 }
  0xa4   :  { %2907 = vmatpush2.bf16.msra.mxu1 %v4434_v9  ;;  %2795 = vmatprep.subr.bf16.mxu0 %v4439_v16  ;;  %v4482_v9 = vld [vmem:[%s6551_s1 + $0x770] ss:$8 sps:$4 sm:$0xff]   ;;  %v4487_v16 = vld [vmem:[%s6551_s1 + $0x664] ss:$8 sps:$4 sm:$0xff]  }
  0xa5   :  { %2908 = vmatprep.subr.bf16.mxu1 %v4442_v17  ;;  %2633 = vmatprep.mubr.bf16.mxu0 %v3858_v18  ;;  %v4490_v17 = vld [vmem:[%s6551_s1 + $0x764] ss:$8 sps:$4 sm:$0xff]   ;;  %v3798_v18 = vcombine.high %v41_v10, %v49_v11  ;;  %v4515_v62 = vld [vmem:[%s6551_s1 + $0x610] ss:$8 sps:$4 sm:$0xff]  }
  0xa6   :  { %2746 = vmatprep.mubr.bf16.mxu1 %v3860_v19  ;;  %v3800_v19 = vcombine.high %v42_v14, %v50_v15  ;;  %v4518_v63 = vld [vmem:[%s6551_s1 + $0x710] ss:$8 sps:$4 sm:$0xff]  }
  0xa7   :  { %2796 = vmatpush2.bf16.msra.mxu0 %v4437_v20  ;;  %v4485_v20 = vld [vmem:[%s6551_s1 + $0x660] ss:$8 sps:$4 sm:$0xff]   ;;  %v4527_v14 = vld [vmem:[%s6551_s1 + $0x6f0] ss:$8 sps:$4 sm:$0xff]  }
  0xa8   :  { %2909 = vmatpush2.bf16.msra.mxu1 %v4440_v21  ;;  %2797 = vmatprep.subr.bf16.mxu0 %v4445_v22  ;;  %v4488_v21 = vld [vmem:[%s6551_s1 + $0x760] ss:$8 sps:$4 sm:$0xff]   ;;  %v4493_v22 = vld [vmem:[%s6551_s1 + $0x654] ss:$8 sps:$4 sm:$0xff]   ;;  %v4530_v15 = vld [vmem:[%s6551_s1 + $0x7f0] ss:$8 sps:$4 sm:$0xff]  }
  0xa9   :  { %2910 = vmatprep.subr.bf16.mxu1 %v4448_v23  ;;  %v4496_v23 = vld [vmem:[%s6551_s1 + $0x754] ss:$8 sps:$4 sm:$0xff]  }
  0xaa   :  { %2634 = vmatmul.mubr.bf16.gmra.mxu0 %v3857_v27  ;;  %v65_v27 = vld [vmem:[%s6552_s0 + $0x160] sm:$0xff] }
  0xab   :  { %2747 = vmatmul.mubr.bf16.gmra.mxu1 %v3859_v28  ;;  %2798 = vmatpush2.bf16.msra.mxu0 %v4443_v24  ;;  %v4491_v24 = vld [vmem:[%s6551_s1 + $0x650] ss:$8 sps:$4 sm:$0xff]   ;;  %v3797_v28 = vcombine.low %v41_v10, %v49_v11  ;;  %v3813_v41 = vcombine.low %v57_v26, %v65_v27  ;;  %v113_v11 = vld [vmem:[%s6552_s0 + $0x2e0] sm:$0xff] }
  0xac   :  { %2911 = vmatpush2.bf16.msra.mxu1 %v4446_v31  ;;  %2799 = vmatprep.subr.bf16.mxu0 %v4451_v32  ;;  %v66_v31 = vld [vmem:[%s6552_s0 + $0x168] sm:$0xff] }
  0xad   :  { %2912 = vmatprep.subr.bf16.mxu1 %v4454_v33  ;;  %2643 = vmatprep.mubr.bf16.mxu0 %v3874_v34  ;;  %v4499_v32 = vld [vmem:[%s6551_s1 + $0x644] ss:$8 sps:$4 sm:$0xff]   ;;  %v3814_v34 = vcombine.high %v57_v26, %v65_v27 }
  0xae   :  { %2756 = vmatprep.mubr.bf16.mxu1 %v3876_v35  ;;  %v4502_v33 = vld [vmem:[%s6551_s1 + $0x744] ss:$8 sps:$4 sm:$0xff]   ;;  %v3816_v35 = vcombine.high %v58_v30, %v66_v31 }
  0xaf   :  { %2800 = vmatpush2.bf16.msra.mxu0 %v4449_v36  ;;  %v4497_v36 = vld [vmem:[%s6551_s1 + $0x640] ss:$8 sps:$4 sm:$0xff]  }
  0xb0   :  { %2913 = vmatpush2.bf16.msra.mxu1 %v4452_v37  ;;  %2801 = vmatprep.subr.bf16.mxu0 %v4457_v38  ;;  %v4500_v37 = vld [vmem:[%s6551_s1 + $0x740] ss:$8 sps:$4 sm:$0xff]   ;;  %v4505_v38 = vld [vmem:[%s6551_s1 + $0x634] ss:$8 sps:$4 sm:$0xff]  }
  0xb1   :  { %2914 = vmatprep.subr.bf16.mxu1 %v4460_v39  ;;  %v4508_v39 = vld [vmem:[%s6551_s1 + $0x734] ss:$8 sps:$4 sm:$0xff]   ;;  %v129_v27 = vld [vmem:[%s6552_s0 + $0x360] sm:$0xff] }
  0xb2   :  { %2644 = vmatmul.mubr.bf16.gmra.mxu0 %v3873_v42  ;;  %v3815_v42 = vcombine.low %v58_v30, %v66_v31  ;;  %v4539_v30 = vld [vmem:[%s6551_s1 + $0x6d0] ss:$8 sps:$4 sm:$0xff]  }
  0xb3   :  { %2757 = vmatmul.mubr.bf16.gmra.mxu1 %v3875_v43  ;;  %2802 = vmatpush2.bf16.msra.mxu0 %v4455_v46  ;;  %v81_v43 = vld [vmem:[%s6552_s0 + $0x1e0] sm:$0xff]  ;;  %v4503_v46 = vld [vmem:[%s6551_s1 + $0x630] ss:$8 sps:$4 sm:$0xff]  }
  0xb4   :  { %2915 = vmatpush2.bf16.msra.mxu1 %v4458_v47  ;;  %2803 = vmatprep.subr.bf16.mxu0 %v4463_v48  ;;  %v4506_v47 = vld [vmem:[%s6551_s1 + $0x730] ss:$8 sps:$4 sm:$0xff]   ;;  %v4511_v48 = vld [vmem:[%s6551_s1 + $0x624] ss:$8 sps:$4 sm:$0xff]  }
  0xb5   :  { %2916 = vmatprep.subr.bf16.mxu1 %v4466_v49  ;;  %2653 = vmatprep.mubr.bf16.mxu0 %v3890_v50  ;;  %v4514_v49 = vld [vmem:[%s6551_s1 + $0x724] ss:$8 sps:$4 sm:$0xff]   ;;  %v3830_v50 = vcombine.high %v73_v40, %v81_v43  ;;  %v4542_v31 = vld [vmem:[%s6551_s1 + $0x7d0] ss:$8 sps:$4 sm:$0xff]  }
  0xb6   :  { %2766 = vmatprep.mubr.bf16.mxu1 %v3892_v51  ;;  %v3832_v51 = vcombine.high %v74_v44, %v82_v45  ;;  %v138_v44 = vld [vmem:[%s6552_s0 + $0x3a8] sm:$0xff] }
  0xb7   :  { %2804 = vmatpush2.bf16.msra.mxu0 %v4461_v52  ;;  %v4509_v52 = vld [vmem:[%s6551_s1 + $0x620] ss:$8 sps:$4 sm:$0xff]  }
  0xb8   :  { %2917 = vmatpush2.bf16.msra.mxu1 %v4464_v53  ;;  %2805 = vmatprep.subr.bf16.mxu0 %v4469_v54  ;;  %v4512_v53 = vld [vmem:[%s6551_s1 + $0x720] ss:$8 sps:$4 sm:$0xff]   ;;  %v4517_v54 = vld [vmem:[%s6551_s1 + $0x614] ss:$8 sps:$4 sm:$0xff]  }
  0xb9   :  { %2918 = vmatprep.subr.bf16.mxu1 %v4472_v55  ;;  %v4520_v55 = vld [vmem:[%s6551_s1 + $0x714] ss:$8 sps:$4 sm:$0xff]   ;;  %v146_v45 = vld [vmem:[%s6552_s0 + $0x3e8] sm:$0xff] }
  0xba   :  { %2654 = vmatmul.mubr.bf16.gmra.mxu0 %v3889_v59  ;;  %v97_v59 = vld [vmem:[%s6552_s0 + $0x260] sm:$0xff] }
  0xbb   :  { %2767 = vmatmul.mubr.bf16.gmra.mxu1 %v3891_v60  ;;  %2806 = vmatpush2.bf16.msra.mxu0 %v4467_v56  ;;  %v89_v56 = vld [vmem:[%s6552_s0 + $0x220] sm:$0xff]  ;;  %v90_v60 = vld [vmem:[%s6552_s0 + $0x228] sm:$0xff] }
  0xbc   :  { %2919 = vmatpush2.bf16.msra.mxu1 %v4470_v57  ;;  %2807 = vmatprep.subr.bf16.mxu0 %v4475_v0  ;;  %v3829_v57 = vcombine.low %v73_v40, %v81_v43  ;;  %v4523_v0 = vld [vmem:[%s6551_s1 + $0x604] ss:$8 sps:$4 sm:$0xff]   ;;  %v3847_v10 = vcombine.low %v90_v60, %v98_v61 }
  0xbd   :  { %2920 = vmatprep.subr.bf16.mxu1 %v4478_v1  ;;  %2809 = vmatprep.mubr.bf16.mxu0 %v3782_v2  ;;  %v4526_v1 = vld [vmem:[%s6551_s1 + $0x704] ss:$8 sps:$4 sm:$0xff]   ;;  %v3846_v2 = vcombine.high %v89_v56, %v97_v59 }
  0xbe   :  { %2922 = vmatprep.mubr.bf16.mxu1 %v3784_v3  ;;  %v3848_v3 = vcombine.high %v90_v60, %v98_v61  ;;  %v137_v40 = vld [vmem:[%s6552_s0 + $0x3a0] sm:$0xff]  ;;  %v28_v60 = vld [vmem:[%s6552_s0 + $0x38] sm:$0xff] }
  0xbf   :  { %2808 = vmatpush2.bf16.msra.mxu0 %v4473_v4  ;;  %v4521_v4 = vld [vmem:[%s6551_s1 + $0x600] ss:$8 sps:$4 sm:$0xff]   ;;  %v36_v61 = vld [vmem:[%s6552_s0 + $0x78] sm:$0xff] }
  0xc0   :  { %2921 = vmatpush2.bf16.msra.mxu1 %v4476_v5  ;;  %3003 = vmatprep.subr.bf16.mxu0 %v4481_v6  ;;  %v4524_v5 = vld [vmem:[%s6551_s1 + $0x700] ss:$8 sps:$4 sm:$0xff]   ;;  %v4529_v6 = vld [vmem:[%s6551_s1 + $0x6f4] ss:$8 sps:$4 sm:$0xff]  }
  0xc1   :  { %3116 = vmatprep.subr.bf16.mxu1 %v4484_v7  ;;  %v4532_v7 = vld [vmem:[%s6551_s1 + $0x7f4] ss:$8 sps:$4 sm:$0xff]   ;;  %v145_v43 = vld [vmem:[%s6552_s0 + $0x3e0] sm:$0xff] }
  0xc2   :  { %2810 = vmatmul.mubr.bf16.vlgmr.msra.gmra.mxu0 %v3781_v12  ;;  %v106_v12 = vld [vmem:[%s6552_s0 + $0x2a8] sm:$0xff] }
  0xc3   :  { %2923 = vmatmul.mubr.bf16.vlgmr.msra.gmra.mxu1 %v3783_v13  ;;  %3004 = vmatpush1.bf16.msra.mxu0 %v4479_v8  ;;  %v105_v8 = vld [vmem:[%s6552_s0 + $0x2a0] sm:$0xff]  ;;  %v114_v13 = vld [vmem:[%s6552_s0 + $0x2e8] sm:$0xff] }
  0xc4   :  { %3117 = vmatpush1.bf16.msra.mxu1 %v4482_v9  ;;  %3005 = vmatprep.subr.bf16.mxu0 %v4487_v16  ;;  %v3845_v9 = vcombine.low %v89_v56, %v97_v59  ;;  %v4535_v16 = vld [vmem:[%s6551_s1 + $0x6e4] ss:$8 sps:$4 sm:$0xff]   ;;  %v3863_v26 = vcombine.low %v106_v12, %v114_v13  ;;  %v27_v56 = vld [vmem:[%s6552_s0 + $0x30] sm:$0xff] }
  0xc5   :  { %3118 = vmatprep.subr.bf16.mxu1 %v4490_v17  ;;  %2819 = vmatprep.mubr.bf16.mxu0 %v3798_v18  ;;  %v4538_v17 = vld [vmem:[%s6551_s1 + $0x7e4] ss:$8 sps:$4 sm:$0xff]   ;;  %v3862_v18 = vcombine.high %v105_v8, %v113_v11  ;;  %v35_v59 = vld [vmem:[%s6552_s0 + $0x70] sm:$0xff] }
  0xc6   :  { %2932 = vmatprep.mubr.bf16.mxu1 %v3800_v19  ;;  %v3864_v19 = vcombine.high %v106_v12, %v114_v13 }
  0xc7   :  { %3006 = vmatpush1.bf16.msra.mxu0 %v4485_v20  ;;  %v4533_v20 = vld [vmem:[%s6551_s1 + $0x6e0] ss:$8 sps:$4 sm:$0xff]  }
  0xc8   :  { %3119 = vmatpush1.bf16.msra.mxu1 %v4488_v21  ;;  %3007 = vmatprep.subr.bf16.mxu0 %v4493_v22  ;;  %v4536_v21 = vld [vmem:[%s6551_s1 + $0x7e0] ss:$8 sps:$4 sm:$0xff]   ;;  %v4541_v22 = vld [vmem:[%s6551_s1 + $0x6d4] ss:$8 sps:$4 sm:$0xff]  }
  0xc9   :  { %3120 = vmatprep.subr.bf16.mxu1 %v4496_v23  ;;  %v4544_v23 = vld [vmem:[%s6551_s1 + $0x7d4] ss:$8 sps:$4 sm:$0xff]  }
  0xca   :  { %2820 = vmatmul.mubr.bf16.gmra.mxu0 %v3797_v28  ;;  %v122_v28 = vld [vmem:[%s6552_s0 + $0x328] sm:$0xff] }
  0xcb   :  { %2933 = vmatmul.mubr.bf16.gmra.mxu1 %v3799_v29  ;;  %3008 = vmatpush1.bf16.msra.mxu0 %v4491_v24  ;;  %v121_v24 = vld [vmem:[%s6552_s0 + $0x320] sm:$0xff]  ;;  %v130_v29 = vld [vmem:[%s6552_s0 + $0x368] sm:$0xff] }
  0xcc   :  { %3121 = vmatpush1.bf16.msra.mxu1 %v4494_v25  ;;  %3009 = vmatprep.subr.bf16.mxu0 %v4499_v32  ;;  %v3861_v25 = vcombine.low %v105_v8, %v113_v11  ;;  %v4547_v32 = vld [vmem:[%s6551_s1 + $0x6c4] ss:$8 sps:$4 sm:$0xff]   ;;  %v44_v8 = vld [vmem:[%s6552_s0 + $0xb8] sm:$0xff]  ;;  %v3787_v11 = vcombine.low %v28_v60, %v36_v61 }
  0xcd   :  { %3122 = vmatprep.subr.bf16.mxu1 %v4502_v33  ;;  %2829 = vmatprep.mubr.bf16.mxu0 %v3814_v34  ;;  %v4550_v33 = vld [vmem:[%s6551_s1 + $0x7c4] ss:$8 sps:$4 sm:$0xff]   ;;  %v3878_v34 = vcombine.high %v121_v24, %v129_v27 }
  0xce   :  { %2942 = vmatprep.mubr.bf16.mxu1 %v3816_v35  ;;  %v3880_v35 = vcombine.high %v122_v28, %v130_v29 }
  0xcf   :  { %3010 = vmatpush1.bf16.msra.mxu0 %v4497_v36  ;;  %v4545_v36 = vld [vmem:[%s6551_s1 + $0x6c0] ss:$8 sps:$4 sm:$0xff]  }
  0xd0   :  { %3123 = vmatpush1.bf16.msra.mxu1 %v4500_v37  ;;  %3011 = vmatprep.subr.bf16.mxu0 %v4505_v38  ;;  %v4548_v37 = vld [vmem:[%s6551_s1 + $0x7c0] ss:$8 sps:$4 sm:$0xff]   ;;  %v4553_v38 = vld [vmem:[%s6551_s1 + $0x6b4] ss:$8 sps:$4 sm:$0xff]  }
  0xd1   :  { %3124 = vmatprep.subr.bf16.mxu1 %v4508_v39  ;;  %v4556_v39 = vld [vmem:[%s6551_s1 + $0x7b4] ss:$8 sps:$4 sm:$0xff]  }
  0xd2   :  { %2830 = vmatmul.mubr.bf16.gmra.mxu0 %v3813_v41  ;;  %v3877_v41 = vcombine.low %v121_v24, %v129_v27 }
  0xd3   :  { %2943 = vmatmul.mubr.bf16.gmra.mxu1 %v3815_v42  ;;  %3012 = vmatpush1.bf16.msra.mxu0 %v4503_v46  ;;  %v3879_v42 = vcombine.low %v122_v28, %v130_v29  ;;  %v4551_v46 = vld [vmem:[%s6551_s1 + $0x6b0] ss:$8 sps:$4 sm:$0xff]  }
  0xd4   :  { %3125 = vmatpush1.bf16.msra.mxu1 %v4506_v47  ;;  %3013 = vmatprep.subr.bf16.mxu0 %v4511_v48  ;;  %v4554_v47 = vld [vmem:[%s6551_s1 + $0x7b0] ss:$8 sps:$4 sm:$0xff]   ;;  %v4559_v48 = vld [vmem:[%s6551_s1 + $0x6a4] ss:$8 sps:$4 sm:$0xff]  }
  0xd5   :  { %3126 = vmatprep.subr.bf16.mxu1 %v4514_v49  ;;  %2839 = vmatprep.mubr.bf16.mxu0 %v3830_v50  ;;  %v4562_v49 = vld [vmem:[%s6551_s1 + $0x7a4] ss:$8 sps:$4 sm:$0xff]   ;;  %v3894_v50 = vcombine.high %v137_v40, %v145_v43 }
  0xd6   :  { %2952 = vmatprep.mubr.bf16.mxu1 %v3832_v51  ;;  %v3896_v51 = vcombine.high %v138_v44, %v146_v45 }
  0xd7   :  { %3014 = vmatpush1.bf16.msra.mxu0 %v4509_v52  ;;  %v4557_v52 = vld [vmem:[%s6551_s1 + $0x6a0] ss:$8 sps:$4 sm:$0xff]  }
  0xd8   :  { %3127 = vmatpush1.bf16.msra.mxu1 %v4512_v53  ;;  %3015 = vmatprep.subr.bf16.mxu0 %v4517_v54  ;;  %v4560_v53 = vld [vmem:[%s6551_s1 + $0x7a0] ss:$8 sps:$4 sm:$0xff]   ;;  %v4565_v54 = vld [vmem:[%s6551_s1 + $0x694] ss:$8 sps:$4 sm:$0xff]  }
  0xd9   :  { %3128 = vmatprep.subr.bf16.mxu1 %v4520_v55  ;;  %v4568_v55 = vld [vmem:[%s6551_s1 + $0x794] ss:$8 sps:$4 sm:$0xff]  }
  0xda   :  { %2840 = vmatmul.mubr.bf16.gmra.mxu0 %v3829_v57  ;;  %v3893_v57 = vcombine.low %v137_v40, %v145_v43  ;;  %v83_v40 = vld [vmem:[%s6552_s0 + $0x1f0] sm:$0xff] }
  0xdb   :  { %2953 = vmatmul.mubr.bf16.gmra.mxu1 %v3831_v58  ;;  %3016 = vmatpush1.bf16.msra.mxu0 %v4515_v62  ;;  %v3895_v58 = vcombine.low %v138_v44, %v146_v45  ;;  %v4563_v62 = vld [vmem:[%s6551_s1 + $0x690] ss:$8 sps:$4 sm:$0xff]  }
  0xdc   :  { %3129 = vmatpush1.bf16.msra.mxu1 %v4518_v63  ;;  %3017 = vmatprep.subr.bf16.mxu0 %v4523_v0  ;;  %v4566_v63 = vld [vmem:[%s6551_s1 + $0x790] ss:$8 sps:$4 sm:$0xff]   ;;  %v4571_v0 = vld [vmem:[%s6551_s1 + $0x684] ss:$8 sps:$4 sm:$0xff]  }
  0xdd   :  { %3130 = vmatprep.subr.bf16.mxu1 %v4526_v1  ;;  %2849 = vmatprep.mubr.bf16.mxu0 %v3846_v2  ;;  %v4574_v1 = vld [vmem:[%s6551_s1 + $0x784] ss:$8 sps:$4 sm:$0xff]   ;;  %v3786_v2 = vcombine.high %v27_v56, %v35_v59 }
  0xde   :  { %2962 = vmatprep.mubr.bf16.mxu1 %v3848_v3  ;;  %v3788_v3 = vcombine.high %v28_v60, %v36_v61  ;;  %v99_v60 = vld [vmem:[%s6552_s0 + $0x270] sm:$0xff]  ;;  %v92_v61 = vld [vmem:[%s6552_s0 + $0x238] sm:$0xff] }
  0xdf   :  { %3018 = vmatpush1.bf16.msra.mxu0 %v4521_v4  ;;  %v4569_v4 = vld [vmem:[%s6551_s1 + $0x680] ss:$8 sps:$4 sm:$0xff]  }
  0xe0   :  { %3131 = vmatpush1.bf16.msra.mxu1 %v4524_v5  ;;  %3019 = vmatprep.subr.bf16.mxu0 %v4529_v6  ;;  %v4572_v5 = vld [vmem:[%s6551_s1 + $0x780] ss:$8 sps:$4 sm:$0xff]   ;;  %v43_v6 = vld [vmem:[%s6552_s0 + $0xb0] sm:$0xff] }
  0xe1   :  { %3132 = vmatprep.subr.bf16.mxu1 %v4532_v7  ;;  %v51_v7 = vld [vmem:[%s6552_s0 + $0xf0] sm:$0xff] }
  0xe2   :  { %2850 = vmatmul.mubr.bf16.gmra.mxu0 %v3845_v9  ;;  %v52_v9 = vld [vmem:[%s6552_s0 + $0xf8] sm:$0xff]  ;;  %v3802_v12 = vcombine.high %v43_v6, %v51_v7 }
  0xe3   :  { %2963 = vmatmul.mubr.bf16.gmra.mxu1 %v3847_v10  ;;  %3020 = vmatpush2.bf16.msra.mxu0 %v4527_v14  ;;  %v3785_v10 = vcombine.low %v27_v56, %v35_v59  ;;  %v3804_v13 = vcombine.high %v44_v8, %v52_v9  ;;  %v3803_v27 = vcombine.low %v44_v8, %v52_v9 }
  0xe4   :  { %3133 = vmatpush2.bf16.msra.mxu1 %v4530_v15  ;;  %3021 = vmatprep.subr.bf16.mxu0 %v4535_v16 }
  0xe5   :  { %3134 = vmatprep.subr.bf16.mxu1 %v4538_v17  ;;  %2859 = vmatprep.mubr.bf16.mxu0 %v3862_v18  ;;  %v59_v17 = vld [vmem:[%s6552_s0 + $0x130] sm:$0xff] }
  0xe6   :  { %2972 = vmatprep.mubr.bf16.mxu1 %v3864_v19 }
  0xe7   :  { %3022 = vmatpush2.bf16.msra.mxu0 %v4533_v20  ;;  %v67_v20 = vld [vmem:[%s6552_s0 + $0x170] sm:$0xff] }
  0xe8   :  { %3135 = vmatpush2.bf16.msra.mxu1 %v4536_v21  ;;  %3023 = vmatprep.subr.bf16.mxu0 %v4541_v22  ;;  %v60_v21 = vld [vmem:[%s6552_s0 + $0x138] sm:$0xff]  ;;  %v3818_v29 = vcombine.high %v59_v17, %v67_v20 }
  0xe9   :  { %3136 = vmatprep.subr.bf16.mxu1 %v4544_v23  ;;  %v68_v22 = vld [vmem:[%s6552_s0 + $0x178] sm:$0xff] }
  0xea   :  { %2860 = vmatmul.mubr.bf16.gmra.mxu0 %v3861_v25 }
  0xeb   :  { %2973 = vmatmul.mubr.bf16.gmra.mxu1 %v3863_v26  ;;  %3024 = vmatpush2.bf16.msra.mxu0 %v4539_v30  ;;  %v3801_v26 = vcombine.low %v43_v6, %v51_v7  ;;  %v3820_v30 = vcombine.high %v60_v21, %v68_v22 }
  0xec   :  { %3137 = vmatpush2.bf16.msra.mxu1 %v4542_v31  ;;  %3025 = vmatprep.subr.bf16.mxu0 %v4547_v32 }
  0xed   :  { %3138 = vmatprep.subr.bf16.mxu1 %v4550_v33  ;;  %2869 = vmatprep.mubr.bf16.mxu0 %v3878_v34 }
  0xee   :  { %2982 = vmatprep.mubr.bf16.mxu1 %v3880_v35 }
  0xef   :  { %3026 = vmatpush2.bf16.msra.mxu0 %v4545_v36 }
  0xf0   :  { %3139 = vmatpush2.bf16.msra.mxu1 %v4548_v37  ;;  %3027 = vmatprep.subr.bf16.mxu0 %v4553_v38  ;;  %v75_v37 = vld [vmem:[%s6552_s0 + $0x1b0] sm:$0xff] }
  0xf1   :  { %3140 = vmatprep.subr.bf16.mxu1 %v4556_v39 }
  0xf2   :  { %2870 = vmatmul.mubr.bf16.gmra.mxu0 %v3877_v41  ;;  %v76_v41 = vld [vmem:[%s6552_s0 + $0x1b8] sm:$0xff] }
  0xf3   :  { %2983 = vmatmul.mubr.bf16.gmra.mxu1 %v3879_v42  ;;  %3028 = vmatpush2.bf16.msra.mxu0 %v4551_v46  ;;  %v84_v42 = vld [vmem:[%s6552_s0 + $0x1f8] sm:$0xff]  ;;  %v3817_v46 = vcombine.low %v59_v17, %v67_v20  ;;  %v115_v17 = vld [vmem:[%s6552_s0 + $0x2f0] sm:$0xff] }
  0xf4   :  { %3141 = vmatpush2.bf16.msra.mxu1 %v4554_v47  ;;  %3029 = vmatprep.subr.bf16.mxu0 %v4559_v48  ;;  %v3819_v47 = vcombine.low %v60_v21, %v68_v22 }
  0xf5   :  { %3142 = vmatprep.subr.bf16.mxu1 %v4562_v49  ;;  %2879 = vmatprep.mubr.bf16.mxu0 %v3894_v50  ;;  %v3834_v49 = vcombine.high %v75_v37, %v83_v40  ;;  %v3836_v50 = vcombine.high %v76_v41, %v84_v42 }
  0xf6   :  { %2992 = vmatprep.mubr.bf16.mxu1 %v3896_v51 }
  0xf7   :  { %3030 = vmatpush2.bf16.msra.mxu0 %v4557_v52 }
  0xf8   :  { %3143 = vmatpush2.bf16.msra.mxu1 %v4560_v53  ;;  %3031 = vmatprep.subr.bf16.mxu0 %v4565_v54 }
  0xf9   :  { %3144 = vmatprep.subr.bf16.mxu1 %v4568_v55 }
  0xfa   :  { %2880 = vmatmul.mubr.bf16.gmra.mxu0 %v3893_v57  ;;  %v91_v57 = vld [vmem:[%s6552_s0 + $0x230] sm:$0xff] }
  0xfb   :  { %2993 = vmatmul.mubr.bf16.gmra.mxu1 %v3895_v58  ;;  %3032 = vmatpush2.bf16.msra.mxu0 %v4563_v62  ;;  %v100_v62 = vld [vmem:[%s6552_s0 + $0x278] sm:$0xff] }
  0xfc   :  { %3145 = vmatpush2.bf16.msra.mxu1 %v4566_v63  ;;  %3033 = vmatprep.subr.bf16.mxu0 %v4571_v0  ;;  %v3852_v6 = vcombine.high %v92_v61, %v100_v62 }
  0xfd   :  { %3146 = vmatprep.subr.bf16.mxu1 %v4574_v1  ;;  %3035 = vmatprep.mubr.bf16.mxu0 %v3786_v2  ;;  %v3833_v2 = vcombine.low %v75_v37, %v83_v40 }
  0xfe   :  { %3148 = vmatprep.mubr.bf16.mxu1 %v3788_v3  ;;  %v3835_v3 = vcombine.low %v76_v41, %v84_v42  ;;  %v131_v41 = vld [vmem:[%s6552_s0 + $0x370] sm:$0xff]  ;;  %v124_v42 = vld [vmem:[%s6552_s0 + $0x338] sm:$0xff] }
  0xff   :  { %3034 = vmatpush2.bf16.msra.mxu0 %v4569_v4 }
 0x100   :  { %3147 = vmatpush2.bf16.msra.mxu1 %v4572_v5  ;;  %v3850_v5 = vcombine.high %v91_v57, %v99_v60 }
 0x102   :  { %v2359_v14 = vpop.f32.mrf.mxu0  ;;  %3036 = vmatmul.mubr.bf16.vlgmr.msra.gmra.mxu0 %v3785_v10 }
 0x103   :  { %v2472_v15 = vpop.f32.mrf.mxu1  ;;  %3149 = vmatmul.mubr.bf16.vlgmr.msra.gmra.mxu1 %v3787_v11  ;;  %3045 = vmatprep.mubr.bf16.mxu0 %v3802_v12 }
 0x104   :  { %v5674_v16 = vadd.f32 %v2472_v15, %v2359_v14  ;;  %3158 = vmatprep.mubr.bf16.mxu1 %v3804_v13  ;;  %v2361_v18 = vpop.f32.mrf.mxu0  ;;  %v107_v13 = vld [vmem:[%s6552_s0 + $0x2b0] sm:$0xff] }
 0x105   :  { %v2474_v19 = vpop.f32.mrf.mxu1 }
 0x106   :  { %v5688_v23 = vadd.f32 %v2474_v19, %v2361_v18  ;;  %v2363_v24 = vpop.f32.mrf.mxu0  ;;  %v108_v18 = vld [vmem:[%s6552_s0 + $0x2b8] sm:$0xff] }
 0x107   :  { %v2476_v25 = vpop.f32.mrf.mxu1  ;;  %v116_v19 = vld [vmem:[%s6552_s0 + $0x2f8] sm:$0xff] }
 0x108   :  { %v5690_v28 = vadd.f32 %v2476_v25, %v2363_v24  ;;  %v2365_v31 = vpop.f32.mrf.mxu0  ;;  %v3849_v24 = vcombine.low %v91_v57, %v99_v60  ;;  %v3851_v25 = vcombine.low %v92_v61, %v100_v62  ;;  %v139_v62 = vld [vmem:[%s6552_s0 + $0x3b0] sm:$0xff] }
 0x109   :  { %v2478_v32 = vpop.f32.mrf.mxu1 }
 0x10a   :  { %v5692_v33 = vadd.f32 %v2478_v32, %v2365_v31  ;;  %v2369_v34 = vpop.f32.mrf.mxu0  ;;  %3046 = vmatmul.mubr.bf16.gmra.mxu0 %v3801_v26 }
 0x10b   :  { %v2482_v35 = vpop.f32.mrf.mxu1  ;;  %3159 = vmatmul.mubr.bf16.gmra.mxu1 %v3803_v27  ;;  %3055 = vmatprep.mubr.bf16.mxu0 %v3818_v29  ;;  %v3866_v27 = vcombine.high %v107_v13, %v115_v17  ;;  %v3868_v29 = vcombine.high %v108_v18, %v116_v19 }
 0x10c   :  { %v5694_v36 = vadd.f32 %v2482_v35, %v2369_v34  ;;  %3168 = vmatprep.mubr.bf16.mxu1 %v3820_v30  ;;  %v2371_v38 = vpop.f32.mrf.mxu0 }
 0x10d   :  { %v2484_v39 = vpop.f32.mrf.mxu1 }
 0x10e   :  { %v5708_v43 = vadd.f32 %v2484_v39, %v2371_v38  ;;  %v2373_v44 = vpop.f32.mrf.mxu0  ;;  %v123_v38 = vld [vmem:[%s6552_s0 + $0x330] sm:$0xff] }
 0x10f   :  { %v2486_v45 = vpop.f32.mrf.mxu1 }
 0x110   :  { %v5710_v48 = vadd.f32 %v2486_v45, %v2373_v44  ;;  %v2375_v51 = vpop.f32.mrf.mxu0  ;;  %v132_v44 = vld [vmem:[%s6552_s0 + $0x378] sm:$0xff] }
 0x111   :  { %v2488_v52 = vpop.f32.mrf.mxu1 }
 0x112   :  { %v5712_v53 = vadd.f32 %v2488_v52, %v2375_v51  ;;  %v2379_v54 = vpop.f32.mrf.mxu0  ;;  %3056 = vmatmul.mubr.bf16.gmra.mxu0 %v3817_v46  ;;  %v3882_v52 = vcombine.high %v123_v38, %v131_v41 }
 0x113   :  { %v2492_v55 = vpop.f32.mrf.mxu1  ;;  %3169 = vmatmul.mubr.bf16.gmra.mxu1 %v3819_v47  ;;  %3065 = vmatprep.mubr.bf16.mxu0 %v3834_v49  ;;  %v3865_v49 = vcombine.low %v107_v13, %v115_v17 }
 0x114   :  { %v5714_v56 = vadd.f32 %v2492_v55, %v2379_v54  ;;  %3178 = vmatprep.mubr.bf16.mxu1 %v3836_v50  ;;  %v2381_v58 = vpop.f32.mrf.mxu0  ;;  %v3867_v50 = vcombine.low %v108_v18, %v116_v19  ;;  %v3884_v54 = vcombine.high %v124_v42, %v132_v44 }
 0x115   :  { %v2494_v59 = vpop.f32.mrf.mxu1 }
 0x116   :  { %v5728_v63 = vadd.f32 %v2494_v59, %v2381_v58  ;;  %v2383_v0 = vpop.f32.mrf.mxu0 }
 0x117   :  { %v2496_v1 = vpop.f32.mrf.mxu1 }
 0x118   :  { %v5730_v4 = vadd.f32 %v2496_v1, %v2383_v0  ;;  %v2385_v7 = vpop.f32.mrf.mxu0 }
 0x119   :  { %v2498_v8 = vpop.f32.mrf.mxu1 }
 0x11a   :  { %v5732_v9 = vadd.f32 %v2498_v8, %v2385_v7  ;;  %v2389_v10 = vpop.f32.mrf.mxu0  ;;  %3066 = vmatmul.mubr.bf16.gmra.mxu0 %v3833_v2  ;;  %v147_v2 = vld [vmem:[%s6552_s0 + $0x3f0] sm:$0xff] }
 0x11b   :  { %v2502_v11 = vpop.f32.mrf.mxu1  ;;  %3179 = vmatmul.mubr.bf16.gmra.mxu1 %v3835_v3  ;;  %3075 = vmatprep.mubr.bf16.mxu0 %v3850_v5  ;;  %v140_v3 = vld [vmem:[%s6552_s0 + $0x3b8] sm:$0xff] }
 0x11c   :  { %v5734_v12 = vadd.f32 %v2502_v11, %v2389_v10  ;;  %3188 = vmatprep.mubr.bf16.mxu1 %v3852_v6  ;;  %v2391_v14 = vpop.f32.mrf.mxu0  ;;  %v148_v5 = vld [vmem:[%s6552_s0 + $0x3f8] sm:$0xff]  ;;  %v3881_v10 = vcombine.low %v123_v38, %v131_v41  ;;  %v3883_v11 = vcombine.low %v124_v42, %v132_v44 }
 0x11d   :  { %v2504_v15 = vpop.f32.mrf.mxu1 }
 0x11e   :  { %v5748_v20 = vadd.f32 %v2504_v15, %v2391_v14  ;;  %v2393_v21 = vpop.f32.mrf.mxu0  ;;  %v3898_v14 = vcombine.high %v139_v62, %v147_v2  ;;  %v3900_v15 = vcombine.high %v140_v3, %v148_v5 }
 0x11f   :  { %v2506_v22 = vpop.f32.mrf.mxu1 }
 0x120   :  { %v5750_v26 = vadd.f32 %v2506_v22, %v2393_v21  ;;  %v2395_v30 = vpop.f32.mrf.mxu0 }
 0x121   :  { %v2508_v31 = vpop.f32.mrf.mxu1 }
 0x122   :  { %v5752_v32 = vadd.f32 %v2508_v31, %v2395_v30  ;;  %v2399_v34 = vpop.f32.mrf.mxu0  ;;  %3076 = vmatmul.mubr.bf16.gmra.mxu0 %v3849_v24 }
 0x123   :  { %v2512_v35 = vpop.f32.mrf.mxu1  ;;  %3189 = vmatmul.mubr.bf16.gmra.mxu1 %v3851_v25  ;;  %3085 = vmatprep.mubr.bf16.mxu0 %v3866_v27 }
 0x124   :  { %v5754_v37 = vadd.f32 %v2512_v35, %v2399_v34  ;;  %3198 = vmatprep.mubr.bf16.mxu1 %v3868_v29  ;;  %v2401_v39 = vpop.f32.mrf.mxu0  ;;  %v3897_v34 = vcombine.low %v139_v62, %v147_v2  ;;  %v3899_v35 = vcombine.low %v140_v3, %v148_v5 }
 0x125   :  { %v2514_v40 = vpop.f32.mrf.mxu1 }
 0x126   :  { %v5768_v45 = vadd.f32 %v2514_v40, %v2401_v39  ;;  %v2403_v46 = vpop.f32.mrf.mxu0 }
 0x127   :  { %v2516_v47 = vpop.f32.mrf.mxu1 }
 0x128   :  { %v5770_v51 = vadd.f32 %v2516_v47, %v2403_v46  ;;  %v2405_v55 = vpop.f32.mrf.mxu0 }
 0x129   :  { %v2518_v57 = vpop.f32.mrf.mxu1 }
 0x12a   :  { %v5772_v58 = vadd.f32 %v2518_v57, %v2405_v55  ;;  %v2409_v59 = vpop.f32.mrf.mxu0  ;;  %3086 = vmatmul.mubr.bf16.gmra.mxu0 %v3865_v49 }
 0x12b   :  { %v2522_v60 = vpop.f32.mrf.mxu1  ;;  %3199 = vmatmul.mubr.bf16.gmra.mxu1 %v3867_v50  ;;  %3095 = vmatprep.mubr.bf16.mxu0 %v3882_v52 }
 0x12c   :  { %v5774_v61 = vadd.f32 %v2522_v60, %v2409_v59  ;;  %3208 = vmatprep.mubr.bf16.mxu1 %v3884_v54  ;;  %v2411_v0 = vpop.f32.mrf.mxu0 }
 0x12d   :  { %v2524_v1 = vpop.f32.mrf.mxu1 }
 0x12e   :  { %v5788_v6 = vadd.f32 %v2524_v1, %v2411_v0  ;;  %v2413_v7 = vpop.f32.mrf.mxu0 }
 0x12f   :  { %v2526_v8 = vpop.f32.mrf.mxu1 }
 0x130   :  { %v5790_v13 = vadd.f32 %v2526_v8, %v2413_v7  ;;  %v2415_v17 = vpop.f32.mrf.mxu0 }
 0x131   :  { %v2528_v18 = vpop.f32.mrf.mxu1 }
 0x132   :  { %v5792_v19 = vadd.f32 %v2528_v18, %v2415_v17  ;;  %v2419_v21 = vpop.f32.mrf.mxu0  ;;  %3096 = vmatmul.mubr.bf16.gmra.mxu0 %v3881_v10 }
 0x133   :  { %v2532_v22 = vpop.f32.mrf.mxu1  ;;  %3209 = vmatmul.mubr.bf16.gmra.mxu1 %v3883_v11  ;;  %3105 = vmatprep.mubr.bf16.mxu0 %v3898_v14 }
 0x134   :  { %v5794_v24 = vadd.f32 %v2532_v22, %v2419_v21  ;;  %3218 = vmatprep.mubr.bf16.mxu1 %v3900_v15  ;;  %v2421_v25 = vpop.f32.mrf.mxu0 }
 0x135   :  { %v2534_v27 = vpop.f32.mrf.mxu1 }
 0x136   :  { %v5796_v29 = vadd.f32 %v2534_v27, %v2421_v25  ;;  %v2423_v30 = vpop.f32.mrf.mxu0 }
 0x137   :  { %v2536_v31 = vpop.f32.mrf.mxu1 }
 0x138   :  { %v5798_v38 = vadd.f32 %v2536_v31, %v2423_v30  ;;  %v2425_v39 = vpop.f32.mrf.mxu0 }
 0x139   :  { %v2538_v40 = vpop.f32.mrf.mxu1 }
 0x13a   :  { %v5800_v41 = vadd.f32 %v2538_v40, %v2425_v39  ;;  %v2429_v42 = vpop.f32.mrf.mxu0  ;;  %3106 = vmatmul.mubr.bf16.gmra.mxu0 %v3897_v34 }
 0x13b   :  { %v2542_v44 = vpop.f32.mrf.mxu1  ;;  %3219 = vmatmul.mubr.bf16.gmra.mxu1 %v3899_v35 }
 0x13c   :  { %v5802_v46 = vadd.f32 %v2542_v44, %v2429_v42  ;;  %v2431_v47 = vpop.f32.mrf.mxu0 }
 0x13d   :  { %v2544_v49 = vpop.f32.mrf.mxu1 }
 0x13e   :  { %v5804_v50 = vadd.f32 %v2544_v49, %v2431_v47  ;;  %v2433_v52 = vpop.f32.mrf.mxu0 }
 0x13f   :  { %v2546_v54 = vpop.f32.mrf.mxu1 }
 0x140   :  { %v5806_v55 = vadd.f32 %v2546_v54, %v2433_v52  ;;  %v2435_v57 = vpop.f32.mrf.mxu0 }
 0x141   :  { %v2548_v59 = vpop.f32.mrf.mxu1 }
 0x142   :  { %v5808_v60 = vadd.f32 %v2548_v59, %v2435_v57  ;;  %v2585_v62 = vpop.f32.mrf.mxu0 }
 0x143   :  { %v2698_v0 = vpop.f32.mrf.mxu1  ;;  %v2586_v1 = vadd.f32 %v2585_v62, %v5674_v16 }
 0x144   :  { %v2587_v2 = vpop.f32.mrf.mxu0 }
 0x145   :  { %v2700_v3 = vpop.f32.mrf.mxu1  ;;  %v5811_v5 = vadd.f32 %v2698_v0, %v2586_v1  ;;  %v2588_v7 = vadd.f32 %v2587_v2, %v5688_v23 }
 0x146   :  { %v2589_v8 = vpop.f32.mrf.mxu0 }
 0x147   :  { %v2702_v10 = vpop.f32.mrf.mxu1  ;;  %v5814_v11 = vadd.f32 %v2700_v3, %v2588_v7  ;;  %v2590_v14 = vadd.f32 %v2589_v8, %v5690_v28 }
 0x148   :  { %v2591_v15 = vpop.f32.mrf.mxu0 }
 0x149   :  { %v2704_v17 = vpop.f32.mrf.mxu1  ;;  %v5817_v18 = vadd.f32 %v2702_v10, %v2590_v14  ;;  %v2592_v21 = vadd.f32 %v2591_v15, %v5692_v33 }
 0x14a   :  { %v2595_v22 = vpop.f32.mrf.mxu0 }
 0x14b   :  { %v2708_v16 = vpop.f32.mrf.mxu1  ;;  %v5820_v25 = vadd.f32 %v2704_v17, %v2592_v21  ;;  %v2596_v27 = vadd.f32 %v2595_v22, %v5694_v36 }
 0x14c   :  { %v2597_v30 = vpop.f32.mrf.mxu0 }
 0x14d   :  { %v2710_v23 = vpop.f32.mrf.mxu1  ;;  %v5823_v31 = vadd.f32 %v2708_v16, %v2596_v27  ;;  %v2598_v34 = vadd.f32 %v2597_v30, %v5708_v43 }
 0x14e   :  { %v2599_v35 = vpop.f32.mrf.mxu0 }
 0x14f   :  { %v2712_v28 = vpop.f32.mrf.mxu1  ;;  %v5826_v39 = vadd.f32 %v2710_v23, %v2598_v34  ;;  %v2600_v40 = vadd.f32 %v2599_v35, %v5710_v48 }
 0x150   :  { %v2601_v42 = vpop.f32.mrf.mxu0 }
 0x151   :  { %v2714_v33 = vpop.f32.mrf.mxu1  ;;  %v5829_v44 = vadd.f32 %v2712_v28, %v2600_v40  ;;  %v2602_v47 = vadd.f32 %v2601_v42, %v5712_v53 }
 0x152   :  { %v2605_v49 = vpop.f32.mrf.mxu0 }
 0x153   :  { %v2718_v36 = vpop.f32.mrf.mxu1  ;;  %v5832_v52 = vadd.f32 %v2714_v33, %v2602_v47  ;;  %v2606_v54 = vadd.f32 %v2605_v49, %v5714_v56 }
 0x154   :  { %v2607_v57 = vpop.f32.mrf.mxu0 }
 0x155   :  { %v2720_v43 = vpop.f32.mrf.mxu1  ;;  %v5835_v59 = vadd.f32 %v2718_v36, %v2606_v54  ;;  %v2608_v62 = vadd.f32 %v2607_v57, %v5728_v63 }
 0x156   :  { %v2609_v0 = vpop.f32.mrf.mxu0 }
 0x157   :  { %v2722_v48 = vpop.f32.mrf.mxu1  ;;  %v5838_v1 = vadd.f32 %v2720_v43, %v2608_v62  ;;  %v2610_v2 = vadd.f32 %v2609_v0, %v5730_v4 }
 0x158   :  { %v2611_v3 = vpop.f32.mrf.mxu0 }
 0x159   :  { %v2724_v53 = vpop.f32.mrf.mxu1  ;;  %v5841_v7 = vadd.f32 %v2722_v48, %v2610_v2  ;;  %v2612_v8 = vadd.f32 %v2611_v3, %v5732_v9 }
 0x15a   :  { %v2615_v10 = vpop.f32.mrf.mxu0 }
 0x15b   :  { %v2728_v56 = vpop.f32.mrf.mxu1  ;;  %v5844_v14 = vadd.f32 %v2724_v53, %v2612_v8  ;;  %v2616_v15 = vadd.f32 %v2615_v10, %v5734_v12 }
 0x15c   :  { %v2617_v17 = vpop.f32.mrf.mxu0 }
 0x15d   :  { %v2730_v63 = vpop.f32.mrf.mxu1  ;;  %v5847_v21 = vadd.f32 %v2728_v56, %v2616_v15  ;;  %v2618_v22 = vadd.f32 %v2617_v17, %v5748_v20 }
 0x15e   :  { %v2619_v16 = vpop.f32.mrf.mxu0 }
 0x15f   :  { %v2732_v4 = vpop.f32.mrf.mxu1  ;;  %v5850_v27 = vadd.f32 %v2730_v63, %v2618_v22  ;;  %v2620_v30 = vadd.f32 %v2619_v16, %v5750_v26 }
 0x160   :  { %v2621_v23 = vpop.f32.mrf.mxu0 }
 0x161   :  { %v2734_v9 = vpop.f32.mrf.mxu1  ;;  %v5853_v34 = vadd.f32 %v2732_v4, %v2620_v30  ;;  %v2622_v35 = vadd.f32 %v2621_v23, %v5752_v32 }
 0x162   :  { %v2625_v28 = vpop.f32.mrf.mxu0 }
 0x163   :  { %v2738_v12 = vpop.f32.mrf.mxu1  ;;  %v5856_v40 = vadd.f32 %v2734_v9, %v2622_v35  ;;  %v2626_v42 = vadd.f32 %v2625_v28, %v5754_v37 }
 0x164   :  { %v2627_v33 = vpop.f32.mrf.mxu0 }
 0x165   :  { %v2740_v20 = vpop.f32.mrf.mxu1  ;;  %v5859_v47 = vadd.f32 %v2738_v12, %v2626_v42  ;;  %v2628_v49 = vadd.f32 %v2627_v33, %v5768_v45 }
 0x166   :  { %v2629_v36 = vpop.f32.mrf.mxu0 }
 0x167   :  { %v2742_v26 = vpop.f32.mrf.mxu1  ;;  %v5862_v54 = vadd.f32 %v2740_v20, %v2628_v49  ;;  %v2630_v57 = vadd.f32 %v2629_v36, %v5770_v51 }
 0x168   :  { %v2631_v43 = vpop.f32.mrf.mxu0 }
 0x169   :  { %v2744_v32 = vpop.f32.mrf.mxu1  ;;  %v5865_v62 = vadd.f32 %v2742_v26, %v2630_v57  ;;  %v2632_v0 = vadd.f32 %v2631_v43, %v5772_v58 }
 0x16a   :  { %v2635_v48 = vpop.f32.mrf.mxu0 }
 0x16b   :  { %v2748_v37 = vpop.f32.mrf.mxu1  ;;  %v5868_v2 = vadd.f32 %v2744_v32, %v2632_v0  ;;  %v2636_v3 = vadd.f32 %v2635_v48, %v5774_v61 }
 0x16c   :  { %v2637_v53 = vpop.f32.mrf.mxu0 }
 0x16d   :  { %v2750_v45 = vpop.f32.mrf.mxu1  ;;  %v5871_v8 = vadd.f32 %v2748_v37, %v2636_v3  ;;  %v2638_v10 = vadd.f32 %v2637_v53, %v5788_v6 }
 0x16e   :  { %v2639_v56 = vpop.f32.mrf.mxu0 }
 0x16f   :  { %v2752_v51 = vpop.f32.mrf.mxu1  ;;  %v5874_v15 = vadd.f32 %v2750_v45, %v2638_v10  ;;  %v2640_v17 = vadd.f32 %v2639_v56, %v5790_v13 }
 0x170   :  { %v2641_v63 = vpop.f32.mrf.mxu0 }
 0x171   :  { %v2754_v58 = vpop.f32.mrf.mxu1  ;;  %v5877_v22 = vadd.f32 %v2752_v51, %v2640_v17  ;;  %v2642_v16 = vadd.f32 %v2641_v63, %v5792_v19 }
 0x172   :  { %v2645_v4 = vpop.f32.mrf.mxu0 }
 0x173   :  { %v2758_v61 = vpop.f32.mrf.mxu1  ;;  %v5880_v30 = vadd.f32 %v2754_v58, %v2642_v16  ;;  %v2646_v23 = vadd.f32 %v2645_v4, %v5794_v24 }
 0x174   :  { %v2647_v9 = vpop.f32.mrf.mxu0 }
 0x175   :  { %v2760_v6 = vpop.f32.mrf.mxu1  ;;  %v5883_v35 = vadd.f32 %v2758_v61, %v2646_v23  ;;  %v2648_v28 = vadd.f32 %v2647_v9, %v5796_v29 }
 0x176   :  { %v2649_v12 = vpop.f32.mrf.mxu0 }
 0x177   :  { %v2762_v13 = vpop.f32.mrf.mxu1  ;;  %v5886_v42 = vadd.f32 %v2760_v6, %v2648_v28  ;;  %v2650_v33 = vadd.f32 %v2649_v12, %v5798_v38 }
 0x178   :  { %v2651_v20 = vpop.f32.mrf.mxu0 }
 0x179   :  { %v2764_v19 = vpop.f32.mrf.mxu1  ;;  %v5889_v49 = vadd.f32 %v2762_v13, %v2650_v33  ;;  %v2652_v36 = vadd.f32 %v2651_v20, %v5800_v41 }
 0x17a   :  { %v2655_v26 = vpop.f32.mrf.mxu0 }
 0x17b   :  { %v2768_v24 = vpop.f32.mrf.mxu1  ;;  %v5892_v57 = vadd.f32 %v2764_v19, %v2652_v36  ;;  %v2656_v43 = vadd.f32 %v2655_v26, %v5802_v46 }
 0x17c   :  { %v2657_v32 = vpop.f32.mrf.mxu0 }
 0x17d   :  { %v2770_v29 = vpop.f32.mrf.mxu1  ;;  %v5895_v0 = vadd.f32 %v2768_v24, %v2656_v43  ;;  %v2658_v48 = vadd.f32 %v2657_v32, %v5804_v50 }
 0x17e   :  { %v2659_v37 = vpop.f32.mrf.mxu0 }
 0x17f   :  { %v2772_v38 = vpop.f32.mrf.mxu1  ;;  %v5898_v3 = vadd.f32 %v2770_v29, %v2658_v48  ;;  %v2660_v53 = vadd.f32 %v2659_v37, %v5806_v55  ;;  %v6554_v29 = vlaneseq }
 0x180   :  { %v2661_v45 = vpop.f32.mrf.mxu0 }
 0x181   :  { %v2774_v41 = vpop.f32.mrf.mxu1  ;;  %v5901_v10 = vadd.f32 %v2772_v38, %v2660_v53  ;;  %v2662_v56 = vadd.f32 %v2661_v45, %v5808_v60  ;;  %vm5929_vm0 = vcmp.lt.s32.totalorder %v6554_v29, 256  ;;  %v4577_v45 = vmov 0.0  }
 0x182   :  { %v2811_v51 = vpop.f32.mrf.mxu0  ;;  %19 = vst.msk [vmem:[#allocation3] sm:$0x3] %vm5929_vm0, %v4577_v45  ;;  %20 = vst.msk [vmem:[#allocation4] sm:$0x3] %vm5929_vm0, %v4577_v45 }
 0x183   :  { %v2924_v46 = vpop.f32.mrf.mxu1  ;;  %v5904_v17 = vadd.f32 %v2774_v41, %v2662_v56  ;;  %v2812_v63 = vadd.f32 %v2811_v51, %v5811_v5 }
 0x184   :  { %v2813_v58 = vpop.f32.mrf.mxu0 }
 0x185   :  { %v2926_v50 = vpop.f32.mrf.mxu1  ;;  %v5907_v16 = vadd.f32 %v2924_v46, %v2812_v63  ;;  %v2814_v4 = vadd.f32 %v2813_v58, %v5814_v11 }
 0x186   :  { %v2815_v61 = vpop.f32.mrf.mxu0 }
 0x187   :  { %v2928_v55 = vpop.f32.mrf.mxu1  ;;  %v5910_v23 = vadd.f32 %v2926_v50, %v2814_v4  ;;  %v2816_v9 = vadd.f32 %v2815_v61, %v5817_v18 }
 0x188   :  { %v2817_v6 = vpop.f32.mrf.mxu0 }
 0x189   :  { %v2930_v60 = vpop.f32.mrf.mxu1  ;;  %v5913_v28 = vadd.f32 %v2928_v55, %v2816_v9  ;;  %v2818_v12 = vadd.f32 %v2817_v6, %v5820_v25 }
 0x18a   :  { %v2821_v13 = vpop.f32.mrf.mxu0 }
 0x18b   :  { %v2934_v5 = vpop.f32.mrf.mxu1  ;;  %v5916_v33 = vadd.f32 %v2930_v60, %v2818_v12  ;;  %v2822_v20 = vadd.f32 %v2821_v13, %v5823_v31  ;;  %v6557_v31 = vmov 0 }
 0x18c   :  { %v2823_v19 = vpop.f32.mrf.mxu0  ;;  %v6558_v31 = vsel %vm5929_vm0, 4294967295, %v6557_v31 }
 0x18d   :  { %v2936_v11 = vpop.f32.mrf.mxu1  ;;  %v5919_v36 = vadd.f32 %v2934_v5, %v2822_v20  ;;  %v2824_v26 = vadd.f32 %v2823_v19, %v5826_v39  ;;  %6559 = vst [vmem:[#allocation5_spill] sm:$0xff] %v6558_v31 }
 0x18e   :  { %v2825_v24 = vpop.f32.mrf.mxu0 }
 0x18f   :  { %v2938_v18 = vpop.f32.mrf.mxu1  ;;  %v5922_v43 = vadd.f32 %v2936_v11, %v2824_v26  ;;  %v2826_v32 = vadd.f32 %v2825_v24, %v5829_v44 }
 0x190   :  { %v2827_v25 = vpop.f32.mrf.mxu0 }
 0x191   :  { %v2940_v48 = vpop.f32.mrf.mxu1  ;;  %v5925_v37 = vadd.f32 %v2938_v18, %v2826_v32  ;;  %v2828_v38 = vadd.f32 %v2827_v25, %v5832_v52 }
 0x192   :  { %v2831_v53 = vpop.f32.mrf.mxu0 }
 0x193   :  { %v2944_v39 = vpop.f32.mrf.mxu1  ;;  %v5937_v44 = vadd.f32 %v2940_v48, %v2828_v38  ;;  %v2832_v41 = vadd.f32 %v2831_v53, %v5835_v59 }
 0x194   :  { %v2833_v56 = vpop.f32.mrf.mxu0 }
 0x195   :  { %v2946_v52 = vpop.f32.mrf.mxu1  ;;  %v5940_v51 = vadd.f32 %v2944_v39, %v2832_v41  ;;  %v2834_v46 = vadd.f32 %v2833_v56, %v5838_v1 }
 0x196   :  { %v2835_v63 = vpop.f32.mrf.mxu0 }
 0x197   :  { %v2948_v58 = vpop.f32.mrf.mxu1  ;;  %v5943_v50 = vadd.f32 %v2946_v52, %v2834_v46  ;;  %v2836_v4 = vadd.f32 %v2835_v63, %v5841_v7 }
 0x198   :  { %v2837_v61 = vpop.f32.mrf.mxu0 }
 0x199   :  { %v2950_v55 = vpop.f32.mrf.mxu1  ;;  %v5946_v9 = vadd.f32 %v2948_v58, %v2836_v4  ;;  %v2838_v6 = vadd.f32 %v2837_v61, %v5844_v14 }
 0x19a   :  { %v2841_v60 = vpop.f32.mrf.mxu0 }
 0x19b   :  { %v2954_v59 = vpop.f32.mrf.mxu1  ;;  %v5949_v12 = vadd.f32 %v2950_v55, %v2838_v6  ;;  %v2842_v13 = vadd.f32 %v2841_v60, %v5847_v21 }
 0x19c   :  { %v2843_v5 = vpop.f32.mrf.mxu0 }
 0x19d   :  { %v2956_v1 = vpop.f32.mrf.mxu1  ;;  %v5952_v20 = vadd.f32 %v2954_v59, %v2842_v13  ;;  %v2844_v19 = vadd.f32 %v2843_v5, %v5850_v27 }
 0x19e   :  { %v2845_v11 = vpop.f32.mrf.mxu0 }
 0x19f   :  { %v2958_v7 = vpop.f32.mrf.mxu1  ;;  %v5955_v26 = vadd.f32 %v2956_v1, %v2844_v19  ;;  %v2846_v24 = vadd.f32 %v2845_v11, %v5853_v34 }
 0x1a0   :  { %v2847_v18 = vpop.f32.mrf.mxu0 }
 0x1a1   :  { %v2960_v14 = vpop.f32.mrf.mxu1  ;;  %v5958_v32 = vadd.f32 %v2958_v7, %v2846_v24  ;;  %v2848_v25 = vadd.f32 %v2847_v18, %v5856_v40 }
 0x1a2   :  { %v2851_v48 = vpop.f32.mrf.mxu0 }
 0x1a3   :  { %v2964_v21 = vpop.f32.mrf.mxu1  ;;  %v5961_v38 = vadd.f32 %v2960_v14, %v2848_v25  ;;  %v2852_v53 = vadd.f32 %v2851_v48, %v5859_v47 }
 0x1a4   :  { %v2853_v39 = vpop.f32.mrf.mxu0 }
 0x1a5   :  { %v2966_v27 = vpop.f32.mrf.mxu1  ;;  %v5964_v45 = vadd.f32 %v2964_v21, %v2852_v53  ;;  %v2854_v41 = vadd.f32 %v2853_v39, %v5862_v54 }
 0x1a6   :  { %v2855_v56 = vpop.f32.mrf.mxu0 }
 0x1a7   :  { %v2968_v34 = vpop.f32.mrf.mxu1  ;;  %v5967_v52 = vadd.f32 %v2966_v27, %v2854_v41  ;;  %v2856_v46 = vadd.f32 %v2855_v56, %v5865_v62 }
 0x1a8   :  { %v2857_v63 = vpop.f32.mrf.mxu0 }
 0x1a9   :  { %v2970_v40 = vpop.f32.mrf.mxu1  ;;  %v5970_v58 = vadd.f32 %v2968_v34, %v2856_v46  ;;  %v2858_v4 = vadd.f32 %v2857_v63, %v5868_v2 }
 0x1aa   :  { %v2861_v61 = vpop.f32.mrf.mxu0 }
 0x1ab   :  { %v2974_v47 = vpop.f32.mrf.mxu1  ;;  %v5973_v55 = vadd.f32 %v2970_v40, %v2858_v4  ;;  %v2862_v6 = vadd.f32 %v2861_v61, %v5871_v8 }
 0x1ac   :  { %v2863_v60 = vpop.f32.mrf.mxu0 }
 0x1ad   :  { %v2976_v54 = vpop.f32.mrf.mxu1  ;;  %v5976_v59 = vadd.f32 %v2974_v47, %v2862_v6  ;;  %v2864_v13 = vadd.f32 %v2863_v60, %v5874_v15 }
 0x1ae   :  { %v2865_v5 = vpop.f32.mrf.mxu0 }
 0x1af   :  { %v2978_v62 = vpop.f32.mrf.mxu1  ;;  %v5979_v1 = vadd.f32 %v2976_v54, %v2864_v13  ;;  %v2866_v19 = vadd.f32 %v2865_v5, %v5877_v22 }
 0x1b0   :  { %v2867_v11 = vpop.f32.mrf.mxu0 }
 0x1b1   :  { %v2980_v2 = vpop.f32.mrf.mxu1  ;;  %v5982_v7 = vadd.f32 %v2978_v62, %v2866_v19  ;;  %v2868_v24 = vadd.f32 %v2867_v11, %v5880_v30 }
 0x1b2   :  { %v2871_v18 = vpop.f32.mrf.mxu0 }
 0x1b3   :  { %v2984_v8 = vpop.f32.mrf.mxu1  ;;  %v5985_v14 = vadd.f32 %v2980_v2, %v2868_v24  ;;  %v2872_v25 = vadd.f32 %v2871_v18, %v5883_v35 }
 0x1b4   :  { %v2873_v48 = vpop.f32.mrf.mxu0 }
 0x1b5   :  { %v2986_v15 = vpop.f32.mrf.mxu1  ;;  %v5988_v21 = vadd.f32 %v2984_v8, %v2872_v25  ;;  %v2874_v53 = vadd.f32 %v2873_v48, %v5886_v42 }
 0x1b6   :  { %v2875_v39 = vpop.f32.mrf.mxu0 }
 0x1b7   :  { %v2988_v22 = vpop.f32.mrf.mxu1  ;;  %v5991_v27 = vadd.f32 %v2986_v15, %v2874_v53  ;;  %v2876_v41 = vadd.f32 %v2875_v39, %v5889_v49 }
 0x1b8   :  { %v2877_v56 = vpop.f32.mrf.mxu0 }
 0x1b9   :  { %v2990_v30 = vpop.f32.mrf.mxu1  ;;  %v5994_v34 = vadd.f32 %v2988_v22, %v2876_v41  ;;  %v2878_v46 = vadd.f32 %v2877_v56, %v5892_v57 }
 0x1ba   :  { %v2881_v63 = vpop.f32.mrf.mxu0 }
 0x1bb   :  { %v2994_v35 = vpop.f32.mrf.mxu1  ;;  %v5997_v40 = vadd.f32 %v2990_v30, %v2878_v46  ;;  %v2882_v4 = vadd.f32 %v2881_v63, %v5895_v0 }
 0x1bc   :  { %v6000_v61 = vpop.f32.mrf.mxu0 }
 0x1bd   :  { %v6002_v42 = vpop.f32.mrf.mxu1  ;;  %v6004_v47 = vadd.f32 %v2994_v35, %v2882_v4 }
 0x1be   :  { %6560 = vst [vmem:[#allocation6_spill] sm:$0xff] %v6002_v42  ;;  %v6006_v6 = vpop.f32.mrf.mxu0 }
 0x1bf   :  { %6561 = vst [vmem:[#allocation7_spill] sm:$0xff] %v6004_v47  ;;  %v6008_v49 = vpop.f32.mrf.mxu1 }
 0x1c0   :  { %6562 = vst [vmem:[#allocation8_spill] sm:$0xff] %v6008_v49  ;;  %v6010_v60 = vpop.f32.mrf.mxu0 }
 0x1c1   :  { %v6012_v54 = vpop.f32.mrf.mxu1 }
 0x1c2   :  { %6563 = vst [vmem:[#allocation9_spill] sm:$0xff] %v6012_v54  ;;  %v3037_v57 = vpop.f32.mrf.mxu0 }
 0x1c3   :  { %v3150_v13 = vpop.f32.mrf.mxu1  ;;  %v3038_v30 = vadd.f32 %v3037_v57, %v5907_v16 }
 0x1c4   :  { %v3039_v5 = vpop.f32.mrf.mxu0 }
 0x1c5   :  { %v3152_v62 = vpop.f32.mrf.mxu1  ;;  %v3040_v63 = vadd.f32 %v3039_v5, %v5910_v23 }
 0x1c6   :  { %v3041_v19 = vpop.f32.mrf.mxu0 }
 0x1c7   :  { %v3154_v0 = vpop.f32.mrf.mxu1  ;;  %v3042_v22 = vadd.f32 %v3041_v19, %v5913_v28  ;;  %v6023_v19 = vadd.f32 %v3150_v13, %v3038_v30  ;;  %v6027_v16 = vadd.f32 %v3152_v62, %v3040_v63 }
 0x1c8   :  { %v3043_v11 = vpop.f32.mrf.mxu0 }
 0x1c9   :  { %v3156_v2 = vpop.f32.mrf.mxu1  ;;  %v3044_v46 = vadd.f32 %v3043_v11, %v5916_v33  ;;  %v6019_v31 = vadd.f32 %v3154_v0, %v3042_v22 }
 0x1ca   :  { %v3047_v24 = vpop.f32.mrf.mxu0 }
 0x1cb   :  { %v3160_v18 = vpop.f32.mrf.mxu1  ;;  %v3048_v35 = vadd.f32 %v3047_v24, %v5919_v36  ;;  %v6025_v47 = vadd.f32 %v3156_v2, %v3044_v46  ;;  %v3337_v5 = vmul.f32 %v6019_v31, %v6019_v31  ;;  %v3335_v2 = vmul.f32 %v6023_v19, %v6023_v19 }
 0x1cc   :  { %v3049_v8 = vpop.f32.mrf.mxu0 }
 0x1cd   :  { %v3162_v25 = vpop.f32.mrf.mxu1  ;;  %v3050_v54 = vadd.f32 %v3049_v8, %v5922_v43  ;;  %v6029_v33 = vadd.f32 %v3160_v18, %v3048_v35  ;;  %v3336_v18 = vmul.f32 %v6027_v16, %v6027_v16 }
 0x1ce   :  { %v3051_v48 = vpop.f32.mrf.mxu0 }
 0x1cf   :  { %v3164_v15 = vpop.f32.mrf.mxu1  ;;  %v3052_v49 = vadd.f32 %v3051_v48, %v5925_v37  ;;  %v6035_v37 = vadd.f32 %v3162_v25, %v3050_v54  ;;  %v3268_v25 = vadd.f32 %v6019_v31, %v6023_v19  ;;  %v3367_v48 = vadd.f32 %v3337_v5, %v3335_v2 }
 0x1d0   :  { %v3053_v53 = vpop.f32.mrf.mxu0 }
 0x1d1   :  { %v3166_v39 = vpop.f32.mrf.mxu1  ;;  %v3054_v23 = vadd.f32 %v3053_v53, %v5937_v44  ;;  %v6037_v0 = vadd.f32 %v3164_v15, %v3052_v49  ;;  %v3338_v44 = vmul.f32 %v6025_v47, %v6025_v47  ;;  %v3289_v15 = vadd.f32 %v6025_v47, %v6027_v16 }
 0x1d2   :  { %v3057_v41 = vpop.f32.mrf.mxu0  ;;  %v3269_v46 = vadd.f32 %v3268_v25, %v6029_v33 }
 0x1d3   :  { %v3170_v56 = vpop.f32.mrf.mxu1  ;;  %v3058_v43 = vadd.f32 %v3057_v41, %v5940_v51  ;;  %v3339_v51 = vmul.f32 %v6029_v33, %v6029_v33  ;;  %v6049_v49 = vadd.f32 %v3166_v39, %v3054_v23  ;;  %v3341_v53 = vmul.f32 %v6037_v0, %v6037_v0 }
 0x1d4   :  { %v3059_v4 = vpop.f32.mrf.mxu0  ;;  %v3388_v30 = vadd.f32 %v3338_v44, %v3336_v18 }
 0x1d5   :  { %v3172_v29 = vpop.f32.mrf.mxu1  ;;  %v3060_v13 = vadd.f32 %v3059_v4, %v5943_v50  ;;  %v3368_v35 = vadd.f32 %v3367_v48, %v3339_v51  ;;  %v3342_v4 = vmul.f32 %v6049_v49, %v6049_v49 }
 0x1d6   :  { %v3061_v42 = vpop.f32.mrf.mxu0 }
 0x1d7   :  { %v3174_v28 = vpop.f32.mrf.mxu1  ;;  %v3062_v24 = vadd.f32 %v3061_v42, %v5946_v9  ;;  %v6056_v9 = vadd.f32 %v3170_v56, %v3058_v43  ;;  %v3340_v42 = vmul.f32 %v6035_v37, %v6035_v37  ;;  %v6062_v39 = vadd.f32 %v3172_v29, %v3060_v13 }
 0x1d8   :  { %v3063_v36 = vpop.f32.mrf.mxu0  ;;  %v3270_v43 = vadd.f32 %v3269_v46, %v6037_v0 }
 0x1d9   :  { %v3176_v57 = vpop.f32.mrf.mxu1  ;;  %v3064_v50 = vadd.f32 %v3063_v36, %v5949_v12  ;;  %v6066_v63 = vadd.f32 %v3174_v28, %v3062_v24  ;;  %v3343_v28 = vmul.f32 %v6056_v9, %v6056_v9  ;;  %v3344_v2 = vmul.f32 %v6062_v39, %v6062_v39 }
 0x1da   :  { %v3067_v11 = vpop.f32.mrf.mxu0 }
 0x1db   :  { %v3180_v62 = vpop.f32.mrf.mxu1  ;;  %v3068_v12 = vadd.f32 %v3067_v11, %v5952_v20  ;;  %v6071_v23 = vadd.f32 %v3176_v57, %v3064_v50  ;;  %v3290_v20 = vadd.f32 %v3289_v15, %v6035_v37  ;;  %v3369_v11 = vadd.f32 %v3368_v35, %v3341_v53 }
 0x1dc   :  { %v3069_v54 = vpop.f32.mrf.mxu0  ;;  %v3345_v18 = vmul.f32 %v6066_v63, %v6066_v63  ;;  %v3271_v15 = vadd.f32 %v3270_v43, %v6056_v9 }
 0x1dd   :  { %v3182_v8 = vpop.f32.mrf.mxu1  ;;  %v3070_v56 = vadd.f32 %v3069_v54, %v5955_v26  ;;  %v3389_v26 = vadd.f32 %v3388_v30, %v3340_v42  ;;  %v6081_v57 = vadd.f32 %v3180_v62, %v3068_v12  ;;  %v3291_v24 = vadd.f32 %v3290_v20, %v6049_v49 }
 0x1de   :  { %v3071_v22 = vpop.f32.mrf.mxu0  ;;  %v3370_v42 = vadd.f32 %v3369_v11, %v3343_v28 }
 0x1df   :  { %v3184_v41 = vpop.f32.mrf.mxu1  ;;  %v3072_v29 = vadd.f32 %v3071_v22, %v5958_v32  ;;  %v6086_v51 = vadd.f32 %v3182_v8, %v3070_v56  ;;  %v3390_v54 = vadd.f32 %v3389_v26, %v3342_v4  ;;  %v3292_v53 = vadd.f32 %v3291_v24, %v6062_v39 }
 0x1e0   :  { %v3073_v36 = vpop.f32.mrf.mxu0  ;;  %v3347_v8 = vmul.f32 %v6081_v57, %v6081_v57  ;;  %v3272_v56 = vadd.f32 %v3271_v15, %v6066_v63  ;;  %v3371_v35 = vadd.f32 %v3370_v42, %v3345_v18 }
 0x1e1   :  { %v3186_v5 = vpop.f32.mrf.mxu1  ;;  %v3074_v13 = vadd.f32 %v3073_v36, %v5961_v38  ;;  %v3346_v38 = vmul.f32 %v6071_v23, %v6071_v23  ;;  %v6091_v25 = vadd.f32 %v3184_v41, %v3072_v29  ;;  %v3391_v22 = vadd.f32 %v3390_v54, %v3344_v2 }
 0x1e2   :  { %v3077_v44 = vpop.f32.mrf.mxu0  ;;  %v3348_v4 = vmul.f32 %v6086_v51, %v6086_v51  ;;  %v3293_v36 = vadd.f32 %v3292_v53, %v6071_v23 }
 0x1e3   :  { %v3190_v32 = vpop.f32.mrf.mxu1  ;;  %v3078_v50 = vadd.f32 %v3077_v44, %v5964_v45  ;;  %v6095_v12 = vadd.f32 %v3186_v5, %v3074_v13  ;;  %v3392_v5 = vadd.f32 %v3391_v22, %v3346_v38  ;;  %v3349_v20 = vmul.f32 %v6091_v25, %v6091_v25 }
 0x1e4   :  { %v3079_v48 = vpop.f32.mrf.mxu0  ;;  %v3273_v13 = vadd.f32 %v3272_v56, %v6081_v57  ;;  %v3294_v44 = vadd.f32 %v3293_v36, %v6086_v51 }
 0x1e5   :  { %v3192_v62 = vpop.f32.mrf.mxu1  ;;  %v6099_v45 = vadd.f32 %v3190_v32, %v3078_v50  ;;  %v3080_v30 = vadd.f32 %v3079_v48, %v5967_v52  ;;  %v3350_v26 = vmul.f32 %v6095_v12, %v6095_v12  ;;  %v3393_v50 = vadd.f32 %v3392_v5, %v3348_v4 }
 0x1e6   :  { %v3081_v46 = vpop.f32.mrf.mxu0  ;;  %v3274_v54 = vadd.f32 %v3273_v13, %v6091_v25  ;;  %v3295_v15 = vadd.f32 %v3294_v44, %v6095_v12 }
 0x1e7   :  { %v3194_v41 = vpop.f32.mrf.mxu1  ;;  %v3082_v29 = vadd.f32 %v3081_v46, %v5970_v58  ;;  %v6109_v43 = vadd.f32 %v3192_v62, %v3080_v30  ;;  %v3372_v58 = vadd.f32 %v3371_v35, %v3347_v8  ;;  %v3351_v32 = vmul.f32 %v6099_v45, %v6099_v45 }
 0x1e8   :  { %v3083_v28 = vpop.f32.mrf.mxu0  ;;  %v3394_v8 = vadd.f32 %v3393_v50, %v3350_v26  ;;  %v3275_v30 = vadd.f32 %v3274_v54, %v6099_v45 }
 0x1e9   :  { %v3196_v52 = vpop.f32.mrf.mxu1  ;;  %v6114_v11 = vadd.f32 %v3194_v41, %v3082_v29  ;;  %v3084_v2 = vadd.f32 %v3083_v28, %v5973_v55  ;;  %v3373_v62 = vadd.f32 %v3372_v58, %v3349_v20  ;;  %v3352_v55 = vmul.f32 %v6109_v43, %v6109_v43 }
 0x1ea   :  { %v3087_v24 = vpop.f32.mrf.mxu0  ;;  %v3296_v56 = vadd.f32 %v3295_v15, %v6109_v43 }
 0x1eb   :  { %v3200_v18 = vpop.f32.mrf.mxu1  ;;  %v6121_v38 = vadd.f32 %v3196_v52, %v3084_v2  ;;  %v3088_v48 = vadd.f32 %v3087_v24, %v5976_v59  ;;  %v3353_v42 = vmul.f32 %v6114_v11, %v6114_v11  ;;  %v3374_v41 = vadd.f32 %v3373_v62, %v3351_v32 }
 0x1ec   :  { %v3089_v53 = vpop.f32.mrf.mxu0  ;;  %v3276_v36 = vadd.f32 %v3275_v30, %v6114_v11  ;;  %v3395_v28 = vadd.f32 %v3394_v8, %v3352_v55 }
 0x1ed   :  { %v3202_v22 = vpop.f32.mrf.mxu1  ;;  %v6130_v46 = vadd.f32 %v3200_v18, %v3088_v48  ;;  %v3354_v59 = vmul.f32 %v6121_v38, %v6121_v38  ;;  %v3090_v35 = vadd.f32 %v3089_v53, %v5979_v1  ;;  %v3375_v52 = vadd.f32 %v3374_v41, %v3353_v42 }
 0x1ee   :  { %v3091_v4 = vpop.f32.mrf.mxu0  ;;  %v3297_v13 = vadd.f32 %v3296_v56, %v6121_v38 }
 0x1ef   :  { %v3204_v29 = vpop.f32.mrf.mxu1  ;;  %v3355_v5 = vmul.f32 %v6130_v46, %v6130_v46  ;;  %v3092_v20 = vadd.f32 %v3091_v4, %v5982_v7  ;;  %v6141_v26 = vadd.f32 %v3202_v22, %v3090_v35  ;;  %v3277_v44 = vadd.f32 %v3276_v36, %v6130_v46 }
 0x1f0   :  { %v3093_v2 = vpop.f32.mrf.mxu0  ;;  %v3396_v24 = vadd.f32 %v3395_v28, %v3354_v59  ;;  %v2886_v28 = vadd.f32 %v6006_v6, %v5901_v10 }
 0x1f1   :  { %v3206_v58 = vpop.f32.mrf.mxu1  ;;  %v6144_v1 = vadd.f32 %v3204_v29, %v3092_v20  ;;  %v3094_v32 = vadd.f32 %v3093_v2, %v5985_v14  ;;  %v3376_v18 = vadd.f32 %v3375_v52, %v3355_v5  ;;  %v3298_v50 = vadd.f32 %v3297_v13, %v6141_v26 }
 0x1f2   :  { %v3356_v7 = vmul.f32 %v6141_v26, %v6141_v26  ;;  %v3097_v54 = vpop.f32.mrf.mxu0  ;;  %v2884_v20 = vadd.f32 %v6000_v61, %v5898_v3 }
 0x1f3   :  { %v3210_v48 = vpop.f32.mrf.mxu1  ;;  %v3278_v62 = vadd.f32 %v3277_v44, %v6144_v1  ;;  %v3357_v15 = vmul.f32 %v6144_v1, %v6144_v1  ;;  %v6153_v55 = vadd.f32 %v3206_v58, %v3094_v32  ;;  %v3098_v42 = vadd.f32 %v3097_v54, %v5988_v21 }
 0x1f4   :  { %v3397_v53 = vadd.f32 %v3396_v24, %v3356_v7  ;;  %v3099_v14 = vpop.f32.mrf.mxu0  ;;  %v2888_v32 = vadd.f32 %v6010_v60, %v5904_v17 }
 0x1f5   :  { %v3212_v22 = vpop.f32.mrf.mxu1  ;;  %v3377_v8 = vadd.f32 %v3376_v18, %v3357_v15  ;;  %v3299_v30 = vadd.f32 %v3298_v50, %v6153_v55  ;;  %v3358_v41 = vmul.f32 %v6153_v55, %v6153_v55  ;;  %v6159_v56 = vadd.f32 %v3210_v48, %v3098_v42  ;;  %v6564_v50 = vld [vmem:[#allocation7_spill] sm:$0xff]  ;;  %v6566_v48 = vld [vmem:[#allocation8_spill] sm:$0xff] }
 0x1f6   :  { %v3100_v59 = vadd.f32 %v3099_v14, %v5991_v27  ;;  %v3101_v35 = vpop.f32.mrf.mxu0  ;;  %v2999_v17 = vadd.f32 %v6566_v48, %v2886_v28 }
 0x1f7   :  { %v3214_v4 = vpop.f32.mrf.mxu1  ;;  %v3398_v29 = vadd.f32 %v3397_v53, %v3358_v41  ;;  %v3279_v36 = vadd.f32 %v3278_v62, %v6159_v56  ;;  %v3359_v21 = vmul.f32 %v6159_v56, %v6159_v56  ;;  %v3102_v5 = vadd.f32 %v3101_v35, %v5994_v34 }
 0x1f8   :  { %v6170_v52 = vadd.f32 %v3212_v22, %v3100_v59  ;;  %v3103_v13 = vpop.f32.mrf.mxu0 }
 0x1f9   :  { %v3216_v27 = vpop.f32.mrf.mxu1  ;;  %v3378_v2 = vadd.f32 %v3377_v8, %v3359_v21  ;;  %v6172_v58 = vadd.f32 %v3214_v4, %v3102_v5  ;;  %v3104_v44 = vadd.f32 %v3103_v13, %v5997_v40  ;;  %v6565_v40 = vld [vmem:[#allocation6_spill] sm:$0xff]  ;;  %v6567_v8 = vld [vmem:[#allocation9_spill] sm:$0xff] }
 0x1fa   :  { %v3300_v34 = vadd.f32 %v3299_v30, %v6170_v52  ;;  %v3360_v3 = vmul.f32 %v6170_v52, %v6170_v52  ;;  %v3107_v61 = vpop.f32.mrf.mxu0  ;;  %v2997_v54 = vadd.f32 %v6565_v40, %v2884_v20  ;;  %v3001_v30 = vadd.f32 %v6567_v8, %v2888_v32 }
 0x1fb   :  { %v3220_v24 = vpop.f32.mrf.mxu1  ;;  %v3280_v10 = vadd.f32 %v3279_v36, %v6172_v58  ;;  %v3361_v6 = vmul.f32 %v6172_v58, %v6172_v58  ;;  %v6183_v18 = vadd.f32 %v3216_v27, %v3104_v44  ;;  %v3108_v7 = vadd.f32 %v3107_v61, %v6564_v50 }
 0x1fc   :  { %v3399_v60 = vadd.f32 %v3398_v29, %v3360_v3  ;;  %v3109_v62 = vpop.f32.mrf.mxu0 }
 0x1fd   :  { %v3222_v15 = vpop.f32.mrf.mxu1  ;;  %v3379_v42 = vadd.f32 %v3378_v2, %v3361_v6  ;;  %v3301_v53 = vadd.f32 %v3300_v34, %v6183_v18  ;;  %v3362_v14 = vmul.f32 %v6183_v18, %v6183_v18  ;;  %v6191_v22 = vadd.f32 %v3220_v24, %v3108_v7 }
 0x1fe   :  { %v3110_v41 = vadd.f32 %v3109_v62, %v2997_v54  ;;  %v3111_v59 = vpop.f32.mrf.mxu0 }
 0x1ff   :  { %v3224_v35 = vpop.f32.mrf.mxu1  ;;  %v3400_v4 = vadd.f32 %v3399_v60, %v3362_v14  ;;  %v3281_v36 = vadd.f32 %v3280_v10, %v6191_v22  ;;  %v3363_v29 = vmul.f32 %v6191_v22, %v6191_v22  ;;  %v3112_v21 = vadd.f32 %v3111_v59, %v2999_v17 }
 0x200   :  { %v6197_v5 = vadd.f32 %v3222_v15, %v3110_v41  ;;  %v3113_v20 = vpop.f32.mrf.mxu0  ;;  %v4578_v60 = vmov 1966171168  }
 0x201   :  { %v3380_v28 = vadd.f32 %v3379_v42, %v3363_v29  ;;  %v6199_v13 = vadd.f32 %v3224_v35, %v3112_v21  ;;  %v3114_v27 = vadd.f32 %v3113_v20, %v3001_v30  ;;  %v3226_v32 = vpop.f32.mrf.mxu1  ;;  %v3314_v62 = vunpack.c.l.s4 %v4578_v60  ;;  %v3334_v60 = vld [vmem:[#allocation4] sm:$0x3] }
 0x202   :  { %v3302_v2 = vadd.f32 %v3301_v53, %v6197_v5  ;;  %v3364_v44 = vmul.f32 %v6197_v5, %v6197_v5 }
 0x203   :  { %v3282_v34 = vadd.f32 %v3281_v36, %v6199_v13  ;;  %v3365_v3 = vmul.f32 %v6199_v13, %v6199_v13  ;;  %v6207_v61 = vadd.f32 %v3226_v32, %v3114_v27  ;;  %v3315_v35 = vunpack.c.0.s8 %v3314_v62 }
 0x204   :  { %v3401_v24 = vadd.f32 %v3400_v4, %v3364_v44  ;;  %v6568_v4 = vlaneseq }
 0x205   :  { %v3283_v10 = vrot.slane %v3282_v34, 4  ;;  %v3381_v6 = vadd.f32 %v3380_v28, %v3365_v3  ;;  %v3303_v50 = vadd.f32 %v3302_v2, %v6207_v61  ;;  %v3366_v7 = vmul.f32 %v6207_v61, %v6207_v61 }
 0x206   :  { %v3317_v36 = vshrl.u32 %v6568_v4, 7 }
 0x207   :  { %v3284_v40 = vadd.f32 %v3283_v10, %v3282_v34  ;;  %v3382_v54 = vrot.slane %v3381_v6, 4  ;;  %v3304_v48 = vrot.slane %v3303_v50, 4  ;;  %v3402_v17 = vadd.f32 %v3401_v24, %v3366_v7 }
 0x208   :  { %v3318_v3 = vsub.s32 %v3315_v35, %v3317_v36 }
 0x209   :  { %v3285_v15 = vrot.slane %v3284_v40, 2  ;;  %v3383_v42 = vadd.f32 %v3382_v54, %v3381_v6  ;;  %v3305_v53 = vadd.f32 %v3304_v48, %v3303_v50  ;;  %v3403_v14 = vrot.slane %v3402_v17, 4  ;;  %v3267_v54 = vld [vmem:[#allocation3] sm:$0x3] }
 0x20b   :  { %v3286_v8 = vadd.f32 %v3285_v15, %v3284_v40  ;;  %v3384_v30 = vrot.slane %v3383_v42, 2  ;;  %v3306_v41 = vrot.slane %v3305_v53, 2  ;;  %v3404_v59 = vadd.f32 %v3403_v14, %v3402_v17 }
 0x20d   :  { %v3287_v29 = vrot.slane %v3286_v8, 1  ;;  %v3385_v21 = vadd.f32 %v3384_v30, %v3383_v42  ;;  %v3307_v20 = vadd.f32 %v3306_v41, %v3305_v53  ;;  %v3405_v28 = vrot.slane %v3404_v59, 2 }
 0x20e   :  { %v3474_v41 = vsub.s32 0, %v3317_v36 }
 0x20f   :  { %v3386_v27 = vrot.slane %v3385_v21, 1  ;;  %v3308_v2 = vrot.slane %v3307_v20, 1  ;;  %v3406_v44 = vadd.f32 %v3405_v28, %v3404_v59  ;;  %v3288_v32 = vadd.f32 %v3287_v29, %v3286_v8 }
 0x210   :  { %v3478_v59 = vsub.s32 1, %v3317_v36 }
 0x211   :  { %v3309_v34 = vadd.f32 %v3308_v2, %v3307_v20  ;;  %v3407_v24 = vrot.slane %v3406_v44, 1  ;;  %v3387_v10 = vadd.f32 %v3386_v27, %v3385_v21 }
 0x213   :  { %v3312_v6 = vcombine.low %v3288_v32, %v3309_v34  ;;  %v3408_v50 = vadd.f32 %v3407_v24, %v3406_v44 }
 0x215   :  { %v3319_v7 = vrot.slane %v3312_v6, %v3318_v3  ;;  %v3411_v40 = vcombine.low %v3387_v10, %v3408_v50 }
 0x217   :  { %v3326_v48 = vrot.slane %v3319_v7, %v3318_v3  ;;  %v3418_v17 = vrot.slane %v3411_v40, %v3318_v3 }
 0x219   :  { %v3328_v62 = vadd.f32 %v3326_v48, %v3267_v54  ;;  %v3425_v15 = vrot.slane %v3418_v17, %v3318_v3 }
 0x21b   :  { %3333 = vst.msk [vmem:[#allocation3] sm:$0x3] %vm5929_vm0, %v3328_v62  ;;  %v3427_v53 = vadd.f32 %v3425_v15, %v3334_v60 }
 0x21d   :  { %3428 = vst.msk [vmem:[#allocation4] sm:$0x3] %vm5929_vm0, %v3427_v53 }
 0x222   :  { %v3432_v14 = vld [vmem:[#allocation3] sm:$0x3] }
 0x223   :  { %v3433_v8 = vmul.f32 0.0078125, %v3432_v14 }
 0x224   :  { %v3434_v30 = vld [vmem:[#allocation4] sm:$0x3] }
 0x225   :  { %v3435_v35 = vmul.f32 0.0078125, %v3434_v30  ;;  %v3436_v4 = vmul.f32 %v3433_v8, %v3433_v8  ;;  %v6217_v21 = vrot.slane %v3433_v8, %v3474_v41  ;;  %v6219_v20 = vrot.slane %v3433_v8, %v3478_v59 }
 0x227   :  { %v3437_v29 = vsub.f32 %v3435_v35, %v3436_v4  ;;  %v3501_v27 = vsub.f32 %v6121_v38, %v6219_v20  ;;  %v3502_v2 = vsub.f32 %v6130_v46, %v6217_v21  ;;  %v3503_v44 = vsub.f32 %v6141_v26, %v6219_v20 }
 0x228   :  { %v3504_v36 = vsub.f32 %v6144_v1, %v6217_v21  ;;  %v3505_v32 = vsub.f32 %v6153_v55, %v6219_v20  ;;  %v3506_v34 = vsub.f32 %v6159_v56, %v6217_v21  ;;  %v3507_v3 = vsub.f32 %v6170_v52, %v6219_v20 }
 0x229   :  { %v3438_v28 = vmax.f32 %v3437_v29, 0.0  ;;  %v3508_v38 = vsub.f32 %v6172_v58, %v6217_v21  ;;  %v3509_v46 = vsub.f32 %v6183_v18, %v6219_v20  ;;  %v3510_v26 = vsub.f32 %v6191_v22, %v6217_v21 }
 0x22a   :  { %v3511_v1 = vsub.f32 %v6197_v5, %v6219_v20  ;;  %v3512_v55 = vsub.f32 %v6199_v13, %v6217_v21  ;;  %v3513_v56 = vsub.f32 %v6207_v61, %v6219_v20  ;;  %v3482_v58 = vsub.f32 %v6023_v19, %v6217_v21 }
 0x22b   :  { %v3514_v24 = vadd.f32 1e-05, %v3438_v28  ;;  %v3483_v18 = vsub.f32 %v6027_v16, %v6219_v20  ;;  %v3484_v22 = vsub.f32 %v6019_v31, %v6217_v21  ;;  %v3485_v5 = vsub.f32 %v6025_v47, %v6219_v20 }
 0x22c   :  { %v3486_v13 = vsub.f32 %v6029_v33, %v6217_v21  ;;  %v3487_v6 = vsub.f32 %v6035_v37, %v6219_v20  ;;  %v3488_v19 = vsub.f32 %v6037_v0, %v6217_v21  ;;  %v3489_v16 = vsub.f32 %v6049_v49, %v6219_v20 }
 0x22d   :  { %4575 = vrsqrt.f32 %v3514_v24  ;;  %v3490_v50 = vsub.f32 %v6056_v9, %v6217_v21  ;;  %v3491_v31 = vsub.f32 %v6062_v39, %v6219_v20  ;;  %v3492_v47 = vsub.f32 %v6066_v63, %v6217_v21 }
 0x22e   :  { %v3493_v33 = vsub.f32 %v6071_v23, %v6219_v20  ;;  %v3494_v37 = vsub.f32 %v6081_v57, %v6217_v21  ;;  %v3495_v0 = vsub.f32 %v6086_v51, %v6219_v20  ;;  %v3496_v49 = vsub.f32 %v6091_v25, %v6217_v21 }
 0x22f   :  { %v3497_v9 = vsub.f32 %v6095_v12, %v6219_v20  ;;  %v3498_v62 = vsub.f32 %v6099_v45, %v6217_v21  ;;  %v3499_v15 = vsub.f32 %v6109_v43, %v6219_v20  ;;  %v3500_v42 = vsub.f32 %v6114_v11, %v6217_v21 }
 0x23a   :  { %v4576_v52 = vpop.eup %4575 }
 0x23b   :  { %v3524_v10 = vrot.slane %v4576_v52, %v3478_v59  ;;  %v3520_v61 = vrot.slane %v4576_v52, %v3474_v41 }
 0x23d   :  { %v6279_v7 = vmul.f32 %v3524_v10, %v3501_v27  ;;  %v6281_v39 = vmul.f32 %v3520_v61, %v3502_v2  ;;  %v6283_v63 = vmul.f32 %v3524_v10, %v3503_v44  ;;  %v6285_v40 = vmul.f32 %v3520_v61, %v3504_v36 }
 0x23e   :  { %v6287_v23 = vmul.f32 %v3524_v10, %v3505_v32  ;;  %v6289_v57 = vmul.f32 %v3520_v61, %v3506_v34  ;;  %v6291_v54 = vmul.f32 %v3524_v10, %v3507_v3  ;;  %v6293_v51 = vmul.f32 %v3520_v61, %v3508_v38 }
 0x23f   :  { %v6295_v25 = vmul.f32 %v3524_v10, %v3509_v46  ;;  %v6297_v48 = vmul.f32 %v3520_v61, %v3510_v26  ;;  %v6299_v12 = vmul.f32 %v3524_v10, %v3511_v1  ;;  %v6301_v17 = vmul.f32 %v3520_v61, %v3512_v55 }
 0x240   :  { %v6303_v60 = vmul.f32 %v3524_v10, %v3513_v56  ;;  %v3527_v53 = vmul.f32 %v3520_v61, %v3482_v58  ;;  %v3528_v14 = vmul.f32 %v3524_v10, %v3483_v18  ;;  %v6311_v8 = vmul.f32 %v3520_v61, %v3484_v22 }
 0x241   :  { %v6313_v30 = vmul.f32 %v3524_v10, %v3485_v5  ;;  %v6315_v41 = vmul.f32 %v3520_v61, %v3486_v13  ;;  %v6317_v59 = vmul.f32 %v3524_v10, %v3487_v6  ;;  %v6319_v35 = vmul.f32 %v3520_v61, %v3488_v19 }
 0x242   :  { %v6321_v4 = vmul.f32 %v3524_v10, %v3489_v16  ;;  %v6323_v45 = vmul.f32 %v3520_v61, %v3490_v50  ;;  %v6325_v43 = vmul.f32 %v3524_v10, %v3491_v31  ;;  %v6327_v29 = vmul.f32 %v3520_v61, %v3492_v47 }
 0x243   :  { %v6329_v11 = vmul.f32 %v3524_v10, %v3493_v33  ;;  %v6331_v21 = vmul.f32 %v3520_v61, %v3494_v37  ;;  %v6333_v20 = vmul.f32 %v3524_v10, %v3495_v0  ;;  %v6335_v28 = vmul.f32 %v3520_v61, %v3496_v49 }
 0x244   :  { %v6337_v27 = vmul.f32 %v3524_v10, %v3497_v9  ;;  %v6339_v2 = vmul.f32 %v3520_v61, %v3498_v62  ;;  %v6341_v44 = vmul.f32 %v3524_v10, %v3499_v15  ;;  %v6343_v36 = vmul.f32 %v3520_v61, %v3500_v42 }
 0x245   :  { %vm3559_vm1 = vcmp.ge.f32.partialorder %v3527_v53, 0.0  ;;  %vm3560_vm2 = vcmp.ge.f32.partialorder %v3528_v14, 0.0  ;;  %vm3561_vm3 = vcmp.ge.f32.partialorder %v6311_v8, 0.0  ;;  %vm3562_vm4 = vcmp.ge.f32.partialorder %v6313_v30, 0.0 }
 0x246   :  { %vm3563_vm5 = vcmp.ge.f32.partialorder %v6315_v41, 0.0  ;;  %vm3564_vm6 = vcmp.ge.f32.partialorder %v6317_v59, 0.0  ;;  %vm3565_vm7 = vcmp.ge.f32.partialorder %v6319_v35, 0.0  ;;  %vm3566_vm8 = vcmp.ge.f32.partialorder %v6321_v4, 0.0 }
 0x247   :  { %vm3569_vm11 = vcmp.ge.f32.partialorder %v6327_v29, 0.0  ;;  %v3591_v32 = vmul.f32 0.2, %v3527_v53  ;;  %v3592_v34 = vmul.f32 0.2, %v3528_v14  ;;  %vm3574_vm0 = vcmp.ge.f32.partialorder %v6337_v27, 0.0 }
 0x248   :  { %v3593_v3 = vmul.f32 0.2, %v6311_v8  ;;  %v3594_v38 = vmul.f32 0.2, %v6313_v30  ;;  %v3595_v46 = vmul.f32 0.2, %v6315_v41 }
 0x249   :  { %v3596_v26 = vmul.f32 0.2, %v6317_v59  ;;  %vm3579_vm12 = vcmp.ge.f32.partialorder %v6281_v39, 0.0  ;;  %v3597_v1 = vmul.f32 0.2, %v6319_v35  ;;  %v6373_v24 = vsel %vm3559_vm1, %v3527_v53, %v3591_v32 }
 0x24a   :  { %v3598_v55 = vmul.f32 0.2, %v6321_v4  ;;  %v3599_v56 = vmul.f32 0.2, %v6323_v45  ;;  %vm3583_vm14 = vcmp.ge.f32.partialorder %v6289_v57, 0.0  ;;  %vm3584_vm13 = vcmp.ge.f32.partialorder %v6291_v54, 0.0 }
 0x24b   :  { %v3600_v52 = vmul.f32 0.2, %v6325_v43  ;;  %v3601_v58 = vmul.f32 0.2, %v6327_v29  ;;  %v3602_v18 = vmul.f32 0.2, %v6329_v11  ;;  %v6383_v10 = vsel %vm3560_vm2, %v3528_v14, %v3592_v34 }
 0x24c   :  { %vm3586_vm15 = vcmp.ge.f32.partialorder %v6295_v25, 0.0  ;;  %vm3587_vm10 = vcmp.ge.f32.partialorder %v6297_v48, 0.0  ;;  %vm3588_vm9 = vcmp.ge.f32.partialorder %v6299_v12, 0.0  ;;  %v3603_v22 = vmul.f32 0.2, %v6331_v21 }
 0x24d   :  { %v3604_v5 = vmul.f32 0.2, %v6333_v20  ;;  %v3605_v13 = vmul.f32 0.2, %v6335_v28  ;;  %v3625_v61 = vsel %vm3561_vm3, %v6311_v8, %v3593_v3  ;;  %vm3589_vm2 = vcmp.ge.f32.partialorder %v6301_v17, 0.0 }
 0x24e   :  { %vm3590_vm1 = vcmp.ge.f32.partialorder %v6303_v60, 0.0  ;;  %v3606_v6 = vmul.f32 0.2, %v6337_v27  ;;  %v3607_v19 = vmul.f32 0.2, %v6339_v2  ;;  %v3626_v50 = vsel %vm3562_vm4, %v6313_v30, %v3594_v38 }
 0x24f   :  { %v3608_v16 = vmul.f32 0.2, %v6341_v44  ;;  %v3609_v31 = vmul.f32 0.2, %v6343_v36  ;;  %v3610_v47 = vmul.f32 0.2, %v6279_v7  ;;  %v3627_v37 = vsel %vm3563_vm5, %v6315_v41, %v3595_v46 }
 0x250   :  { %v3611_v33 = vmul.f32 0.2, %v6281_v39  ;;  %v3612_v0 = vmul.f32 0.2, %v6283_v63  ;;  %v3613_v49 = vmul.f32 0.2, %v6285_v40  ;;  %v3628_v62 = vsel %vm3564_vm6, %v6317_v59, %v3596_v26 }
 0x251   :  { %v3614_v9 = vmul.f32 0.2, %v6287_v23  ;;  %v3615_v15 = vmul.f32 0.2, %v6289_v57  ;;  %v3616_v42 = vmul.f32 0.2, %v6291_v54  ;;  %v3629_v14 = vsel %vm3565_vm7, %v6319_v35, %v3597_v1 }
 0x252   :  { %v3617_v53 = vmul.f32 0.2, %v6293_v51  ;;  %v3618_v8 = vmul.f32 0.2, %v6295_v25  ;;  %v3619_v30 = vmul.f32 0.2, %v6297_v48  ;;  %v3630_v59 = vsel %vm3566_vm8, %v6321_v4, %v3598_v55 }
 0x253   :  { %v3620_v41 = vmul.f32 0.2, %v6299_v12  ;;  %v3621_v32 = vmul.f32 0.2, %v6301_v17  ;;  %v3622_v34 = vmul.f32 0.2, %v6303_v60  ;;  %v3633_v38 = vsel %vm3569_vm11, %v6327_v29, %v3601_v58 }
 0x254   :  { %vm6570_vm3 = vcmp.ge.f32.partialorder %v6323_v45, 0.0  ;;  %vm6571_vm4 = vcmp.ge.f32.partialorder %v6325_v43, 0.0  ;;  %vm6572_vm5 = vcmp.ge.f32.partialorder %v6329_v11, 0.0  ;;  %vm6573_vm6 = vcmp.ge.f32.partialorder %v6331_v21, 0.0 }
 0x255   :  { %v3631_v3 = vsel %vm6570_vm3, %v6323_v45, %v3599_v56  ;;  %v3632_v35 = vsel %vm6571_vm4, %v6325_v43, %v3600_v52  ;;  %v3634_v4 = vsel %vm6572_vm5, %v6329_v11, %v3602_v18  ;;  %v3635_v46 = vsel %vm6573_vm6, %v6331_v21, %v3603_v22 }
 0x256   :  { %vm6574_vm7 = vcmp.ge.f32.partialorder %v6333_v20, 0.0  ;;  %vm6575_vm8 = vcmp.ge.f32.partialorder %v6335_v28, 0.0  ;;  %v3638_v29 = vsel %vm3574_vm0, %v6337_v27, %v3606_v6  ;;  %vm6576_vm11 = vcmp.ge.f32.partialorder %v6339_v2, 0.0 }
 0x257   :  { %v3636_v45 = vsel %vm6574_vm7, %v6333_v20, %v3604_v5  ;;  %v3637_v43 = vsel %vm6575_vm8, %v6335_v28, %v3605_v13  ;;  %v3639_v11 = vsel %vm6576_vm11, %v6339_v2, %v3607_v19  ;;  %vm6577_vm3 = vcmp.ge.f32.partialorder %v6341_v44, 0.0 }
 0x258   :  { %v3640_v21 = vsel %vm6577_vm3, %v6341_v44, %v3608_v16  ;;  %vm6578_vm4 = vcmp.ge.f32.partialorder %v6343_v36, 0.0  ;;  %vm6579_vm5 = vcmp.ge.f32.partialorder %v6279_v7, 0.0  ;;  %v3643_v27 = vsel %vm3579_vm12, %v6281_v39, %v3611_v33 }
 0x259   :  { %v3641_v20 = vsel %vm6578_vm4, %v6343_v36, %v3609_v31  ;;  %v3642_v28 = vsel %vm6579_vm5, %v6279_v7, %v3610_v47  ;;  %vm6580_vm0 = vcmp.ge.f32.partialorder %v6283_v63, 0.0  ;;  %vm6581_vm6 = vcmp.ge.f32.partialorder %v6285_v40, 0.0 }
 0x25a   :  { %v3644_v2 = vsel %vm6580_vm0, %v6283_v63, %v3612_v0  ;;  %v3645_v44 = vsel %vm6581_vm6, %v6285_v40, %v3613_v49  ;;  %vm6582_vm7 = vcmp.ge.f32.partialorder %v6287_v23, 0.0  ;;  %v3647_v7 = vsel %vm3583_vm14, %v6289_v57, %v3615_v15 }
 0x25b   :  { %v3646_v36 = vsel %vm6582_vm7, %v6287_v23, %v3614_v9  ;;  %v3648_v39 = vsel %vm3584_vm13, %v6291_v54, %v3616_v42  ;;  %vm6583_vm12 = vcmp.ge.f32.partialorder %v6293_v51, 0.0  ;;  %v3650_v40 = vsel %vm3586_vm15, %v6295_v25, %v3618_v8 }
 0x25c   :  { %v3649_v63 = vsel %vm6583_vm12, %v6293_v51, %v3617_v53  ;;  %v3651_v23 = vsel %vm3587_vm10, %v6297_v48, %v3619_v30  ;;  %v3652_v57 = vsel %vm3588_vm9, %v6299_v12, %v3620_v41  ;;  %v3653_v54 = vsel %vm3589_vm2, %v6301_v17, %v3621_v32 }
 0x25d   :  { %v3654_v51 = vsel %vm3590_vm1, %v6303_v60, %v3622_v34  ;;  %v4173_v26 = vpack.c.bf16 %v6383_v10, %v6373_v24  ;;  %v4174_v25 = vpack.c.bf16 %v3626_v50, %v3625_v61  ;;  %v4175_v1 = vpack.c.bf16 %v3628_v62, %v3627_v37 }
 0x25e   :  { %v4176_v55 = vpack.c.bf16 %v3630_v59, %v3629_v14  ;;  %v4177_v56 = vpack.c.bf16 %v3632_v35, %v3631_v3  ;;  %v4178_v48 = vpack.c.bf16 %v3634_v4, %v3633_v38  ;;  %v4179_v52 = vpack.c.bf16 %v3636_v45, %v3635_v46 }
 0x25f   :  { %v4180_v58 = vpack.c.bf16 %v3638_v29, %v3637_v43  ;;  %v4181_v18 = vpack.c.bf16 %v3640_v21, %v3639_v11  ;;  %v4182_v12 = vpack.c.bf16 %v3642_v28, %v3641_v20  ;;  %3751 = vst [vmem:[%s6553_s2] sm:$0xff] %v4173_v26  ;;  %3752 = vst [vmem:[%s6553_s2 + $0x8] sm:$0xff] %v4174_v25 }
 0x260   :  { %v4183_v17 = vpack.c.bf16 %v3644_v2, %v3643_v27  ;;  %v4184_v60 = vpack.c.bf16 %v3646_v36, %v3645_v44  ;;  %v4185_v24 = vpack.c.bf16 %v3648_v39, %v3647_v7  ;;  %v4186_v10 = vpack.c.bf16 %v3650_v40, %v3649_v63  ;;  %3753 = vst [vmem:[%s6553_s2 + $0x10] sm:$0xff] %v4175_v1 }
 0x261   :  { %3754 = vst [vmem:[%s6553_s2 + $0x18] sm:$0xff] %v4176_v55  ;;  %3755 = vst [vmem:[%s6553_s2 + $0x20] sm:$0xff] %v4177_v56  ;;  %v4187_v22 = vpack.c.bf16 %v3652_v57, %v3651_v23  ;;  %v4188_v5 = vpack.c.bf16 %v3654_v51, %v3653_v54 }
 0x262   :  { %3756 = vst [vmem:[%s6553_s2 + $0x28] sm:$0xff] %v4178_v48  ;;  %3757 = vst [vmem:[%s6553_s2 + $0x30] sm:$0xff] %v4179_v52 }
 0x263   :  { %3758 = vst [vmem:[%s6553_s2 + $0x38] sm:$0xff] %v4180_v58  ;;  %3759 = vst [vmem:[%s6553_s2 + $0x40] sm:$0xff] %v4181_v18 }
 0x264   :  { %3760 = vst [vmem:[%s6553_s2 + $0x48] sm:$0xff] %v4182_v12  ;;  %3761 = vst [vmem:[%s6553_s2 + $0x50] sm:$0xff] %v4183_v17 }
 0x265   :  { %3762 = vst [vmem:[%s6553_s2 + $0x58] sm:$0xff] %v4184_v60  ;;  %3763 = vst [vmem:[%s6553_s2 + $0x60] sm:$0xff] %v4185_v24 }
 0x266   :  { %3764 = vst [vmem:[%s6553_s2 + $0x68] sm:$0xff] %v4186_v10  ;;  %3765 = vst [vmem:[%s6553_s2 + $0x70] sm:$0xff] %v4187_v22 }
 0x267   :  { %3766 = vst [vmem:[%s6553_s2 + $0x78] sm:$0xff] %v4188_v5 }

// kernel: netd_forward.9
= control target key start
LH: loop header
LB: loop body
LE: loop exit
PB: predicated region body
PF: predicated region fallthrough
CT: control target
= control target key end

     0   :  { %v43_v0 = vlaneseq  ;;  %v764_v8 = vmov 1983009808   ;;  %vm691_vm0 = vcmask 1041408   ;;  %vm757_vm1 = vcmask 1024   ;;  %s949_s1 = inlined_call_operand.vmem [shape: bf16[1,4096], index: 1, kind: input, shape index: {}]   ;;  %s950_s0 = inlined_call_operand.vmem [shape: bf16[2,4096], index: 0, kind: input, shape index: {}]   ;;  %s951_s2 = inlined_call_operand.vmem [shape: f32[2,1], index: 2, kind: output, shape index: {}]  }
   0x1   :  { %v23_v1 = vld [vmem:[%s949_s1] sm:$0xff]  ;;  %v366_v9 = vunpack.c.l.s4 %v764_v8  ;;  %v24_v16 = vld [vmem:[%s949_s1 + $0x8] sm:$0xff]  ;;  %v25_v52 = vld [vmem:[%s949_s1 + $0x10] sm:$0xff] }
   0x2   :  { %v44_v2 = vshrl.u32 %v43_v0, 7  ;;  %v27_v3 = vunpack.c.l.bf16 %v23_v1  ;;  %v28_v10 = vunpack.c.h.bf16 %v23_v1  ;;  %v29_v25 = vunpack.c.l.bf16 %v24_v16  ;;  %v11_v33 = vld [vmem:[%s950_s0] sm:$0xff]  ;;  %v12_v8 = vld [vmem:[%s950_s0 + $0x8] sm:$0xff] }
   0x3   :  { %v367_v15 = vunpack.c.0.s8 %v366_v9  ;;  %v15_v42 = vunpack.c.l.bf16 %v11_v33  ;;  %v30_v44 = vunpack.c.h.bf16 %v24_v16  ;;  %v16_v51 = vunpack.c.h.bf16 %v11_v33 }
   0x4   :  { %v783_v4 = vsub.s32 0, %v44_v2  ;;  %v785_v5 = vsub.s32 2, %v44_v2  ;;  %v787_v6 = vsub.s32 4, %v44_v2  ;;  %v789_v7 = vsub.s32 6, %v44_v2 }
   0x5   :  { %v806_v26 = vsub.s32 %v367_v15, %v44_v2  ;;  %v31_v62 = vunpack.c.l.bf16 %v25_v52 }
   0x6   :  { %v46_v11 = vrot.slane %v27_v3, %v783_v4  ;;  %v50_v12 = vrot.slane %v27_v3, %v785_v5  ;;  %v54_v13 = vrot.slane %v27_v3, %v787_v6  ;;  %v58_v14 = vrot.slane %v27_v3, %v789_v7 }
   0x7   :  { %v62_v17 = vrot.slane %v28_v10, %v783_v4  ;;  %v66_v18 = vrot.slane %v28_v10, %v785_v5  ;;  %v70_v19 = vrot.slane %v28_v10, %v787_v6  ;;  %v74_v20 = vrot.slane %v28_v10, %v789_v7 }
   0x8   :  { %v206_v21 = vrot.slane %v46_v11, %v783_v4  ;;  %v210_v22 = vrot.slane %v50_v12, %v783_v4  ;;  %v214_v23 = vrot.slane %v54_v13, %v783_v4  ;;  %v218_v24 = vrot.slane %v58_v14, %v783_v4 }
   0x9   :  { %v222_v27 = vrot.slane %v62_v17, %v783_v4  ;;  %v226_v28 = vrot.slane %v66_v18, %v783_v4  ;;  %v230_v29 = vrot.slane %v70_v19, %v783_v4  ;;  %v234_v30 = vrot.slane %v74_v20, %v783_v4 }
   0xa   :  { %v363_v31 = vcombine.low %v206_v21, %v210_v22  ;;  %v364_v32 = vcombine.low %v214_v23, %v218_v24  ;;  %v78_v34 = vrot.slane %v29_v25, %v783_v4  ;;  %v82_v35 = vrot.slane %v29_v25, %v785_v5 }
   0xb   :  { %v86_v38 = vrot.slane %v29_v25, %v787_v6  ;;  %v90_v39 = vrot.slane %v29_v25, %v789_v7  ;;  %v380_v40 = vcombine.low %v222_v27, %v226_v28  ;;  %v381_v41 = vcombine.low %v230_v29, %v234_v30 }
   0xc   :  { %v371_v36 = vrot.slane %v363_v31, %v806_v26  ;;  %v378_v37 = vrot.slane %v364_v32, %v806_v26  ;;  %v238_v45 = vrot.slane %v78_v34, %v783_v4  ;;  %v242_v46 = vrot.slane %v82_v35, %v783_v4 }
   0xd   :  { %v246_v47 = vrot.slane %v86_v38, %v783_v4  ;;  %v250_v48 = vrot.slane %v90_v39, %v783_v4  ;;  %v388_v49 = vrot.slane %v380_v40, %v806_v26  ;;  %v395_v50 = vrot.slane %v381_v41, %v806_v26 }
   0xe   :  { %v379_v43 = vcombine.low %v371_v36, %v378_v37  ;;  %v94_v54 = vrot.slane %v30_v44, %v783_v4  ;;  %v98_v55 = vrot.slane %v30_v44, %v785_v5  ;;  %v102_v56 = vrot.slane %v30_v44, %v787_v6 }
   0xf   :  { %v106_v57 = vrot.slane %v30_v44, %v789_v7  ;;  %v396_v58 = vcombine.low %v388_v49, %v395_v50  ;;  %v397_v59 = vcombine.low %v238_v45, %v242_v46  ;;  %v398_v60 = vcombine.low %v246_v47, %v250_v48  ;;  %v26_v44 = vld [vmem:[%s949_s1 + $0x18] sm:$0xff] }
  0x10   :  { %v507_v53 = vmul.f32 %v379_v43, %v15_v42  ;;  %v254_v0 = vrot.slane %v94_v54, %v783_v4  ;;  %v258_v1 = vrot.slane %v98_v55, %v783_v4  ;;  %v262_v2 = vrot.slane %v102_v56, %v783_v4 }
  0x11   :  { %v266_v3 = vrot.slane %v106_v57, %v783_v4  ;;  %v405_v9 = vrot.slane %v397_v59, %v806_v26  ;;  %v412_v10 = vrot.slane %v398_v60, %v806_v26  ;;  %v508_v11 = vmul.f32 %v396_v58, %v16_v51  ;;  %v874_v59 = vld [vmem:[%s950_s0 + $0x10] sm:$0xff] }
  0x12   :  { %v523_v61 = vcombine.high %v507_v53, %v507_v53  ;;  %v530_v63 = vrot.slane %v507_v53, %v806_v26  ;;  %v110_v13 = vrot.slane %v31_v62, %v783_v4  ;;  %v114_v14 = vrot.slane %v31_v62, %v785_v5 }
  0x13   :  { %v118_v15 = vrot.slane %v31_v62, %v787_v6  ;;  %v17_v17 = vunpack.c.l.bf16 %v12_v8  ;;  %v122_v18 = vrot.slane %v31_v62, %v789_v7  ;;  %v414_v19 = vcombine.low %v254_v0, %v258_v1 }
  0x14   :  { %v537_v12 = vrot.slane %v523_v61, %v806_v26  ;;  %v538_v16 = vcombine.high %v530_v63, %v530_v63  ;;  %v415_v20 = vcombine.low %v262_v2, %v266_v3  ;;  %v413_v21 = vcombine.low %v405_v9, %v412_v10 }
  0x15   :  { %v540_v23 = vcombine.high %v508_v11, %v508_v11  ;;  %v547_v24 = vrot.slane %v508_v11, %v806_v26  ;;  %v32_v25 = vunpack.c.h.bf16 %v25_v52  ;;  %v270_v27 = vrot.slane %v110_v13, %v783_v4 }
  0x16   :  { %v539_v22 = vcombine.high %v537_v12, %v537_v12  ;;  %v692_v28 = vsel %vm691_vm0, %v530_v63, 0.0  ;;  %v274_v29 = vrot.slane %v114_v14, %v783_v4  ;;  %v278_v30 = vrot.slane %v118_v15, %v783_v4 }
  0x17   :  { %v693_v31 = vsel %vm691_vm0, %v538_v16, 0.0  ;;  %v695_v32 = vsel %vm691_vm0, %v537_v12, 0.0  ;;  %v282_v33 = vrot.slane %v122_v18, %v783_v4  ;;  %v422_v34 = vrot.slane %v414_v19, %v806_v26 }
  0x18   :  { %v429_v35 = vrot.slane %v415_v20, %v806_v26  ;;  %v694_v36 = vadd.f32 %v693_v31, %v692_v28  ;;  %v509_v37 = vmul.f32 %v413_v21, %v17_v17  ;;  %v554_v38 = vrot.slane %v540_v23, %v806_v26 }
  0x19   :  { %v555_v39 = vcombine.high %v547_v24, %v547_v24  ;;  %v697_v40 = vsel %vm691_vm0, %v539_v22, 0.0  ;;  %v18_v41 = vunpack.c.h.bf16 %v12_v8  ;;  %v126_v42 = vrot.slane %v32_v25, %v783_v4 }
  0x1a   :  { %v696_v43 = vadd.f32 %v695_v32, %v694_v36  ;;  %v130_v45 = vrot.slane %v32_v25, %v785_v5  ;;  %v134_v46 = vrot.slane %v32_v25, %v787_v6  ;;  %v138_v47 = vrot.slane %v32_v25, %v789_v7 }
  0x1b   :  { %v699_v48 = vsel %vm691_vm0, %v547_v24, 0.0  ;;  %v430_v49 = vcombine.low %v422_v34, %v429_v35  ;;  %v431_v50 = vcombine.low %v270_v27, %v274_v29  ;;  %v432_v51 = vcombine.low %v278_v30, %v282_v33 }
  0x1c   :  { %v698_v52 = vadd.f32 %v697_v40, %v696_v43  ;;  %v556_v53 = vcombine.high %v554_v38, %v554_v38  ;;  %v557_v54 = vcombine.high %v509_v37, %v509_v37  ;;  %v564_v55 = vrot.slane %v509_v37, %v806_v26 }
  0x1d   :  { %v701_v56 = vsel %vm691_vm0, %v555_v39, 0.0  ;;  %v33_v57 = vunpack.c.l.bf16 %v26_v44  ;;  %v286_v60 = vrot.slane %v126_v42, %v783_v4  ;;  %v290_v61 = vrot.slane %v130_v45, %v783_v4 }
  0x1e   :  { %v700_v58 = vadd.f32 %v699_v48, %v698_v52  ;;  %v294_v62 = vrot.slane %v134_v46, %v783_v4  ;;  %v703_v63 = vsel %vm691_vm0, %v554_v38, 0.0  ;;  %v298_v0 = vrot.slane %v138_v47, %v783_v4 }
  0x1f   :  { %v439_v1 = vrot.slane %v431_v50, %v806_v26  ;;  %v446_v2 = vrot.slane %v432_v51, %v806_v26  ;;  %v510_v8 = vmul.f32 %v430_v49, %v18_v41  ;;  %v571_v9 = vrot.slane %v557_v54, %v806_v26 }
  0x20   :  { %v702_v3 = vadd.f32 %v701_v56, %v700_v58  ;;  %v572_v10 = vcombine.high %v564_v55, %v564_v55  ;;  %v705_v11 = vsel %vm691_vm0, %v556_v53, 0.0  ;;  %v19_v12 = vunpack.c.l.bf16 %v874_v59 }
  0x21   :  { %v142_v13 = vrot.slane %v33_v57, %v783_v4  ;;  %v146_v15 = vrot.slane %v33_v57, %v785_v5  ;;  %v150_v16 = vrot.slane %v33_v57, %v787_v6  ;;  %v154_v17 = vrot.slane %v33_v57, %v789_v7 }
  0x22   :  { %v704_v14 = vadd.f32 %v703_v63, %v702_v3  ;;  %v707_v18 = vsel %vm691_vm0, %v564_v55, 0.0  ;;  %v447_v19 = vcombine.low %v439_v1, %v446_v2  ;;  %v448_v20 = vcombine.low %v286_v60, %v290_v61 }
  0x23   :  { %v449_v21 = vcombine.low %v294_v62, %v298_v0  ;;  %v573_v23 = vcombine.high %v571_v9, %v571_v9  ;;  %v574_v24 = vcombine.high %v510_v8, %v510_v8  ;;  %v581_v25 = vrot.slane %v510_v8, %v806_v26 }
  0x24   :  { %v706_v22 = vadd.f32 %v705_v11, %v704_v14  ;;  %v709_v27 = vsel %vm691_vm0, %v572_v10, 0.0  ;;  %v34_v28 = vunpack.c.h.bf16 %v26_v44  ;;  %v302_v30 = vrot.slane %v142_v13, %v783_v4 }
  0x25   :  { %v306_v31 = vrot.slane %v146_v15, %v783_v4  ;;  %v310_v32 = vrot.slane %v150_v16, %v783_v4  ;;  %v711_v33 = vsel %vm691_vm0, %v571_v9, 0.0  ;;  %v314_v34 = vrot.slane %v154_v17, %v783_v4 }
  0x26   :  { %v708_v29 = vadd.f32 %v707_v18, %v706_v22  ;;  %v456_v35 = vrot.slane %v448_v20, %v806_v26  ;;  %v463_v36 = vrot.slane %v449_v21, %v806_v26  ;;  %v511_v38 = vmul.f32 %v447_v19, %v19_v12 }
  0x27   :  { %v588_v39 = vrot.slane %v574_v24, %v806_v26  ;;  %v589_v40 = vcombine.high %v581_v25, %v581_v25  ;;  %v713_v41 = vsel %vm691_vm0, %v573_v23, 0.0  ;;  %v20_v42 = vunpack.c.h.bf16 %v874_v59  ;;  %v14_v59 = vld [vmem:[%s950_s0 + $0x18] sm:$0xff] }
  0x28   :  { %v710_v37 = vadd.f32 %v709_v27, %v708_v29  ;;  %v158_v43 = vrot.slane %v34_v28, %v783_v4  ;;  %v162_v45 = vrot.slane %v34_v28, %v785_v5  ;;  %v166_v46 = vrot.slane %v34_v28, %v787_v6 }
  0x29   :  { %v170_v47 = vrot.slane %v34_v28, %v789_v7  ;;  %v715_v48 = vsel %vm691_vm0, %v581_v25, 0.0  ;;  %v464_v49 = vcombine.low %v456_v35, %v463_v36  ;;  %v465_v50 = vcombine.low %v302_v30, %v306_v31 }
  0x2a   :  { %v712_v44 = vadd.f32 %v711_v33, %v710_v37  ;;  %v466_v51 = vcombine.low %v310_v32, %v314_v34  ;;  %v590_v53 = vcombine.high %v588_v39, %v588_v39  ;;  %v591_v54 = vcombine.high %v511_v38, %v511_v38 }
  0x2b   :  { %v598_v55 = vrot.slane %v511_v38, %v806_v26  ;;  %v717_v56 = vsel %vm691_vm0, %v589_v40, 0.0  ;;  %v318_v58 = vrot.slane %v158_v43, %v783_v4  ;;  %v322_v5 = vrot.slane %v162_v45, %v783_v4 }
  0x2c   :  { %v714_v52 = vadd.f32 %v713_v41, %v712_v44  ;;  %v326_v6 = vrot.slane %v166_v46, %v783_v4  ;;  %v719_v7 = vsel %vm691_vm0, %v588_v39, 0.0  ;;  %v330_v60 = vrot.slane %v170_v47, %v783_v4 }
  0x2d   :  { %v473_v61 = vrot.slane %v465_v50, %v806_v26  ;;  %v480_v62 = vrot.slane %v466_v51, %v806_v26  ;;  %v512_v0 = vmul.f32 %v464_v49, %v20_v42  ;;  %v605_v1 = vrot.slane %v591_v54, %v806_v26 }
  0x2e   :  { %v716_v57 = vadd.f32 %v715_v48, %v714_v52  ;;  %v606_v2 = vcombine.high %v598_v55, %v598_v55  ;;  %v721_v3 = vsel %vm691_vm0, %v590_v53, 0.0  ;;  %v21_v9 = vunpack.c.l.bf16 %v14_v59 }
  0x2f   :  { %v723_v10 = vsel %vm691_vm0, %v598_v55, 0.0  ;;  %v481_v11 = vcombine.low %v473_v61, %v480_v62  ;;  %v482_v12 = vcombine.low %v318_v58, %v322_v5  ;;  %v483_v13 = vcombine.low %v326_v6, %v330_v60 }
  0x30   :  { %v718_v63 = vadd.f32 %v717_v56, %v716_v57  ;;  %v607_v4 = vcombine.high %v605_v1, %v605_v1  ;;  %v608_v15 = vcombine.high %v512_v0, %v512_v0  ;;  %v615_v16 = vrot.slane %v512_v0, %v806_v26 }
  0x31   :  { %v725_v17 = vsel %vm691_vm0, %v606_v2, 0.0  ;;  %v727_v19 = vsel %vm691_vm0, %v605_v1, 0.0  ;;  %v490_v20 = vrot.slane %v482_v12, %v806_v26  ;;  %v497_v21 = vrot.slane %v483_v13, %v806_v26 }
  0x32   :  { %v720_v8 = vadd.f32 %v719_v7, %v718_v63  ;;  %v513_v23 = vmul.f32 %v481_v11, %v21_v9  ;;  %v622_v24 = vrot.slane %v608_v15, %v806_v26  ;;  %v623_v25 = vcombine.high %v615_v16, %v615_v16 }
  0x33   :  { %v729_v27 = vsel %vm691_vm0, %v607_v4, 0.0  ;;  %v731_v29 = vsel %vm691_vm0, %v615_v16, 0.0  ;;  %v22_v30 = vunpack.c.h.bf16 %v14_v59  ;;  %v498_v31 = vcombine.low %v490_v20, %v497_v21 }
  0x34   :  { %v722_v14 = vadd.f32 %v721_v3, %v720_v8  ;;  %v624_v33 = vcombine.high %v622_v24, %v622_v24  ;;  %v625_v34 = vcombine.high %v513_v23, %v513_v23  ;;  %v632_v35 = vrot.slane %v513_v23, %v806_v26 }
  0x35   :  { %v733_v36 = vsel %vm691_vm0, %v623_v25, 0.0  ;;  %v735_v38 = vsel %vm691_vm0, %v622_v24, 0.0  ;;  %v514_v40 = vmul.f32 %v498_v31, %v22_v30 }
  0x36   :  { %v724_v18 = vadd.f32 %v723_v10, %v722_v14  ;;  %v639_v41 = vrot.slane %v625_v34, %v806_v26  ;;  %v640_v42 = vcombine.high %v632_v35, %v632_v35  ;;  %v737_v43 = vsel %vm691_vm0, %v624_v33, 0.0 }
  0x37   :  { %v739_v45 = vsel %vm691_vm0, %v632_v35, 0.0  ;;  %v642_v48 = vcombine.high %v514_v40, %v514_v40  ;;  %v649_v49 = vrot.slane %v514_v40, %v806_v26 }
  0x38   :  { %v726_v22 = vadd.f32 %v725_v17, %v724_v18  ;;  %v641_v47 = vcombine.high %v639_v41, %v639_v41  ;;  %v741_v50 = vsel %vm691_vm0, %v640_v42, 0.0  ;;  %v743_v52 = vsel %vm691_vm0, %v639_v41, 0.0 }
  0x39   :  { %v656_v54 = vrot.slane %v642_v48, %v806_v26  ;;  %v657_v55 = vcombine.high %v649_v49, %v649_v49  ;;  %v747_v58 = vsel %vm691_vm0, %v649_v49, 0.0 }
  0x3a   :  { %v728_v28 = vadd.f32 %v727_v19, %v726_v22  ;;  %v745_v56 = vsel %vm691_vm0, %v641_v47, 0.0 }
  0x3b   :  { %v658_v6 = vcombine.high %v656_v54, %v656_v54  ;;  %v749_v7 = vsel %vm691_vm0, %v657_v55, 0.0  ;;  %v751_v60 = vsel %vm691_vm0, %v656_v54, 0.0 }
  0x3c   :  { %v730_v32 = vadd.f32 %v729_v27, %v728_v28 }
  0x3d   :  { %v753_v62 = vsel %vm691_vm0, %v658_v6, 0.0 }
  0x3e   :  { %v732_v37 = vadd.f32 %v731_v29, %v730_v32 }
  0x40   :  { %v734_v39 = vadd.f32 %v733_v36, %v732_v37 }
  0x42   :  { %v736_v44 = vadd.f32 %v735_v38, %v734_v39 }
  0x44   :  { %v738_v46 = vadd.f32 %v737_v43, %v736_v44 }
  0x46   :  { %v740_v51 = vadd.f32 %v739_v45, %v738_v46 }
  0x48   :  { %v742_v53 = vadd.f32 %v741_v50, %v740_v51 }
  0x4a   :  { %v744_v57 = vadd.f32 %v743_v52, %v742_v53 }
  0x4c   :  { %v746_v5 = vadd.f32 %v745_v56, %v744_v57 }
  0x4e   :  { %v748_v59 = vadd.f32 %v747_v58, %v746_v5 }
  0x50   :  { %v750_v61 = vadd.f32 %v749_v7, %v748_v59 }
  0x52   :  { %v752_v63 = vadd.f32 %v751_v60, %v750_v61 }
  0x54   :  { %v754_v0 = vadd.f32 %v753_v62, %v752_v63 }
  0x56   :  { %755 = vadd.xlane.f32.xlu0 %v754_v0 }
  0xdf   :  { %v756_v26 = vpop.xlane.xlu0 %755 }
  0xe0   :  { %758 = vst.msk [vmem:[%s951_s2] sm:$0x3] %vm757_vm1, %v756_v26 }

// kernel: netd_forward.8
= control target key start
LH: loop header
LB: loop body
LE: loop exit
PB: predicated region body
PF: predicated region fallthrough
CT: control target
= control target key end

     0   :  { %s8035_s1 = inlined_call_operand.vmem [shape: bf16[4096,256], index: 1, kind: input, shape index: {}]   ;;  %s8036_s0 = inlined_call_operand.vmem [shape: bf16[32,4096], index: 0, kind: input, shape index: {}]   ;;  %s8037_s2 = inlined_call_operand.vmem [shape: bf16[32,256], index: 2, kind: output, shape index: {}]  }
   0x1   :  { %v5131_v0 = vld [vmem:[%s8035_s1 + $0x74] ss:$8 sps:$4 sm:$0xff]   ;;  %v5135_v2 = vld [vmem:[%s8035_s1 + $0x70] ss:$8 sps:$4 sm:$0xff]   ;;  %v5137_v4 = vld [vmem:[%s8035_s1 + $0x64] ss:$8 sps:$4 sm:$0xff]  }
   0x2   :  { %v5133_v1 = vld [vmem:[%s8035_s1 + $0x174] ss:$8 sps:$4 sm:$0xff]   ;;  %3477 = vmatprep.subr.bf16.mxu0 %v5131_v0  ;;  %v5136_v3 = vld [vmem:[%s8035_s1 + $0x170] ss:$8 sps:$4 sm:$0xff]   ;;  %v5139_v5 = vld [vmem:[%s8035_s1 + $0x164] ss:$8 sps:$4 sm:$0xff]  }
   0x3   :  { %3530 = vmatprep.subr.bf16.mxu1 %v5133_v1  ;;  %3478 = vmatpush1.bf16.msra.mxu0 %v5135_v2  ;;  %v5141_v6 = vld [vmem:[%s8035_s1 + $0x60] ss:$8 sps:$4 sm:$0xff]   ;;  %v5143_v8 = vld [vmem:[%s8035_s1 + $0x54] ss:$8 sps:$4 sm:$0xff]   ;;  %v5147_v10 = vld [vmem:[%s8035_s1 + $0x50] ss:$8 sps:$4 sm:$0xff]  }
   0x4   :  { %3531 = vmatpush1.bf16.msra.mxu1 %v5136_v3  ;;  %3479 = vmatprep.subr.bf16.mxu0 %v5137_v4  ;;  %v5142_v7 = vld [vmem:[%s8035_s1 + $0x160] ss:$8 sps:$4 sm:$0xff]   ;;  %v5145_v9 = vld [vmem:[%s8035_s1 + $0x154] ss:$8 sps:$4 sm:$0xff]   ;;  %v5148_v11 = vld [vmem:[%s8035_s1 + $0x150] ss:$8 sps:$4 sm:$0xff]  }
   0x5   :  { %3532 = vmatprep.subr.bf16.mxu1 %v5139_v5  ;;  %v5149_v12 = vld [vmem:[%s8035_s1 + $0x44] ss:$8 sps:$4 sm:$0xff]   ;;  %v5153_v14 = vld [vmem:[%s8035_s1 + $0x40] ss:$8 sps:$4 sm:$0xff]   ;;  %v5155_v16 = vld [vmem:[%s8035_s1 + $0x34] ss:$8 sps:$4 sm:$0xff]  }
   0x6   :  { %v5151_v13 = vld [vmem:[%s8035_s1 + $0x144] ss:$8 sps:$4 sm:$0xff]   ;;  %v5154_v15 = vld [vmem:[%s8035_s1 + $0x140] ss:$8 sps:$4 sm:$0xff]   ;;  %v5157_v17 = vld [vmem:[%s8035_s1 + $0x134] ss:$8 sps:$4 sm:$0xff]  }
   0x7   :  { %3480 = vmatpush1.bf16.msra.mxu0 %v5141_v6  ;;  %v5159_v18 = vld [vmem:[%s8035_s1 + $0x30] ss:$8 sps:$4 sm:$0xff]   ;;  %v5161_v20 = vld [vmem:[%s8035_s1 + $0x24] ss:$8 sps:$4 sm:$0xff]   ;;  %v5165_v22 = vld [vmem:[%s8035_s1 + $0x20] ss:$8 sps:$4 sm:$0xff]  }
   0x8   :  { %3533 = vmatpush1.bf16.msra.mxu1 %v5142_v7  ;;  %3481 = vmatprep.subr.bf16.mxu0 %v5143_v8  ;;  %v5160_v19 = vld [vmem:[%s8035_s1 + $0x130] ss:$8 sps:$4 sm:$0xff]   ;;  %v5163_v21 = vld [vmem:[%s8035_s1 + $0x124] ss:$8 sps:$4 sm:$0xff]   ;;  %v5166_v23 = vld [vmem:[%s8035_s1 + $0x120] ss:$8 sps:$4 sm:$0xff]  }
   0x9   :  { %3534 = vmatprep.subr.bf16.mxu1 %v5145_v9  ;;  %v5167_v24 = vld [vmem:[%s8035_s1 + $0x14] ss:$8 sps:$4 sm:$0xff]   ;;  %v5171_v26 = vld [vmem:[%s8035_s1 + $0x10] ss:$8 sps:$4 sm:$0xff]   ;;  %v5173_v28 = vld [vmem:[%s8035_s1 + $0x4] ss:$8 sps:$4 sm:$0xff]  }
   0xa   :  { %v5169_v25 = vld [vmem:[%s8035_s1 + $0x114] ss:$8 sps:$4 sm:$0xff]   ;;  %v5172_v27 = vld [vmem:[%s8035_s1 + $0x110] ss:$8 sps:$4 sm:$0xff]   ;;  %v5175_v29 = vld [vmem:[%s8035_s1 + $0x104] ss:$8 sps:$4 sm:$0xff]  }
   0xb   :  { %3482 = vmatpush1.bf16.msra.mxu0 %v5147_v10  ;;  %v5177_v30 = vld [vmem:[%s8035_s1] ss:$8 sps:$4 sm:$0xff]   ;;  %v5179_v32 = vld [vmem:[%s8035_s1 + $0xf4] ss:$8 sps:$4 sm:$0xff]   ;;  %v5183_v34 = vld [vmem:[%s8035_s1 + $0xf0] ss:$8 sps:$4 sm:$0xff]  }
   0xc   :  { %3535 = vmatpush1.bf16.msra.mxu1 %v5148_v11  ;;  %3483 = vmatprep.subr.bf16.mxu0 %v5149_v12  ;;  %v5178_v31 = vld [vmem:[%s8035_s1 + $0x100] ss:$8 sps:$4 sm:$0xff]   ;;  %v5181_v33 = vld [vmem:[%s8035_s1 + $0x1f4] ss:$8 sps:$4 sm:$0xff]   ;;  %v5184_v35 = vld [vmem:[%s8035_s1 + $0x1f0] ss:$8 sps:$4 sm:$0xff]  }
   0xd   :  { %3536 = vmatprep.subr.bf16.mxu1 %v5151_v13  ;;  %v5185_v36 = vld [vmem:[%s8035_s1 + $0xe4] ss:$8 sps:$4 sm:$0xff]   ;;  %v5189_v38 = vld [vmem:[%s8035_s1 + $0xe0] ss:$8 sps:$4 sm:$0xff]   ;;  %v5191_v40 = vld [vmem:[%s8035_s1 + $0xd4] ss:$8 sps:$4 sm:$0xff]  }
   0xe   :  { %v5187_v37 = vld [vmem:[%s8035_s1 + $0x1e4] ss:$8 sps:$4 sm:$0xff]   ;;  %v5190_v39 = vld [vmem:[%s8035_s1 + $0x1e0] ss:$8 sps:$4 sm:$0xff]   ;;  %v5193_v41 = vld [vmem:[%s8035_s1 + $0x1d4] ss:$8 sps:$4 sm:$0xff]  }
   0xf   :  { %3484 = vmatpush1.bf16.msra.mxu0 %v5153_v14  ;;  %v5195_v42 = vld [vmem:[%s8035_s1 + $0xd0] ss:$8 sps:$4 sm:$0xff]   ;;  %v5197_v44 = vld [vmem:[%s8035_s1 + $0xc4] ss:$8 sps:$4 sm:$0xff]   ;;  %v5201_v46 = vld [vmem:[%s8035_s1 + $0xc0] ss:$8 sps:$4 sm:$0xff]  }
  0x10   :  { %3537 = vmatpush1.bf16.msra.mxu1 %v5154_v15  ;;  %3485 = vmatprep.subr.bf16.mxu0 %v5155_v16  ;;  %v5196_v43 = vld [vmem:[%s8035_s1 + $0x1d0] ss:$8 sps:$4 sm:$0xff]   ;;  %v5199_v45 = vld [vmem:[%s8035_s1 + $0x1c4] ss:$8 sps:$4 sm:$0xff]   ;;  %v5202_v47 = vld [vmem:[%s8035_s1 + $0x1c0] ss:$8 sps:$4 sm:$0xff]  }
  0x11   :  { %3538 = vmatprep.subr.bf16.mxu1 %v5157_v17  ;;  %v21_v48 = vld [vmem:[%s8036_s0] sm:$0xff]  ;;  %v22_v50 = vld [vmem:[%s8036_s0 + $0x8] sm:$0xff]  ;;  %v5203_v52 = vld [vmem:[%s8035_s1 + $0xb4] ss:$8 sps:$4 sm:$0xff]  }
  0x12   :  { %v37_v49 = vld [vmem:[%s8036_s0 + $0x80] sm:$0xff]  ;;  %v38_v51 = vld [vmem:[%s8036_s0 + $0x88] sm:$0xff]  ;;  %v5205_v54 = vld [vmem:[%s8035_s1 + $0x1b4] ss:$8 sps:$4 sm:$0xff]  }
  0x13   :  { %3486 = vmatpush1.bf16.msra.mxu0 %v5159_v18  ;;  %v4546_v53 = vcombine.high %v21_v48, %v37_v49  ;;  %v4548_v55 = vcombine.high %v22_v50, %v38_v51  ;;  %v5207_v56 = vld [vmem:[%s8035_s1 + $0xb0] ss:$8 sps:$4 sm:$0xff]   ;;  %v5209_v58 = vld [vmem:[%s8035_s1 + $0xa4] ss:$8 sps:$4 sm:$0xff]   ;;  %v5213_v60 = vld [vmem:[%s8035_s1 + $0xa0] ss:$8 sps:$4 sm:$0xff]   ;;  %v4545_v8 = vcombine.low %v21_v48, %v37_v49  ;;  %v4547_v9 = vcombine.low %v22_v50, %v38_v51 }
  0x14   :  { %3539 = vmatpush1.bf16.msra.mxu1 %v5160_v19  ;;  %3487 = vmatprep.subr.bf16.mxu0 %v5161_v20  ;;  %v5208_v57 = vld [vmem:[%s8035_s1 + $0x1b0] ss:$8 sps:$4 sm:$0xff]   ;;  %v5211_v59 = vld [vmem:[%s8035_s1 + $0x1a4] ss:$8 sps:$4 sm:$0xff]   ;;  %v5214_v61 = vld [vmem:[%s8035_s1 + $0x1a0] ss:$8 sps:$4 sm:$0xff]  }
  0x15   :  { %3540 = vmatprep.subr.bf16.mxu1 %v5163_v21  ;;  %3509 = vmatprep.mubr.bf16.mxu0 %v4546_v53  ;;  %v5215_v62 = vld [vmem:[%s8035_s1 + $0x94] ss:$8 sps:$4 sm:$0xff]   ;;  %v5219_v0 = vld [vmem:[%s8035_s1 + $0x90] ss:$8 sps:$4 sm:$0xff]   ;;  %v5221_v2 = vld [vmem:[%s8035_s1 + $0x84] ss:$8 sps:$4 sm:$0xff]  }
  0x16   :  { %3562 = vmatprep.mubr.bf16.mxu1 %v4548_v55  ;;  %v5217_v63 = vld [vmem:[%s8035_s1 + $0x194] ss:$8 sps:$4 sm:$0xff]   ;;  %v5220_v1 = vld [vmem:[%s8035_s1 + $0x190] ss:$8 sps:$4 sm:$0xff]   ;;  %v5223_v3 = vld [vmem:[%s8035_s1 + $0x184] ss:$8 sps:$4 sm:$0xff]  }
  0x17   :  { %3488 = vmatpush1.bf16.msra.mxu0 %v5165_v22  ;;  %v5225_v4 = vld [vmem:[%s8035_s1 + $0x80] ss:$8 sps:$4 sm:$0xff]   ;;  %v5229_v6 = vld [vmem:[%s8035_s1 + $0x274] ss:$8 sps:$4 sm:$0xff]   ;;  %v5227_v10 = vld [vmem:[%s8035_s1 + $0x270] ss:$8 sps:$4 sm:$0xff]  }
  0x18   :  { %3541 = vmatpush1.bf16.msra.mxu1 %v5166_v23  ;;  %3489 = vmatprep.subr.bf16.mxu0 %v5167_v24  ;;  %v5226_v5 = vld [vmem:[%s8035_s1 + $0x180] ss:$8 sps:$4 sm:$0xff]   ;;  %v5232_v7 = vld [vmem:[%s8035_s1 + $0x374] ss:$8 sps:$4 sm:$0xff]   ;;  %v5230_v11 = vld [vmem:[%s8035_s1 + $0x370] ss:$8 sps:$4 sm:$0xff]  }
  0x19   :  { %3542 = vmatprep.subr.bf16.mxu1 %v5169_v25  ;;  %v5235_v12 = vld [vmem:[%s8035_s1 + $0x264] ss:$8 sps:$4 sm:$0xff]   ;;  %v5233_v14 = vld [vmem:[%s8035_s1 + $0x260] ss:$8 sps:$4 sm:$0xff]   ;;  %v5241_v16 = vld [vmem:[%s8035_s1 + $0x254] ss:$8 sps:$4 sm:$0xff]  }
  0x1a   :  { %v5238_v13 = vld [vmem:[%s8035_s1 + $0x364] ss:$8 sps:$4 sm:$0xff]   ;;  %v5236_v15 = vld [vmem:[%s8035_s1 + $0x360] ss:$8 sps:$4 sm:$0xff]   ;;  %v5244_v17 = vld [vmem:[%s8035_s1 + $0x354] ss:$8 sps:$4 sm:$0xff]  }
  0x1b   :  { %3490 = vmatpush1.bf16.msra.mxu0 %v5171_v26  ;;  %v5239_v18 = vld [vmem:[%s8035_s1 + $0x250] ss:$8 sps:$4 sm:$0xff]   ;;  %v5247_v20 = vld [vmem:[%s8035_s1 + $0x244] ss:$8 sps:$4 sm:$0xff]   ;;  %v5245_v22 = vld [vmem:[%s8035_s1 + $0x240] ss:$8 sps:$4 sm:$0xff]  }
  0x1c   :  { %3543 = vmatpush1.bf16.msra.mxu1 %v5172_v27  ;;  %3491 = vmatprep.subr.bf16.mxu0 %v5173_v28  ;;  %v5242_v19 = vld [vmem:[%s8035_s1 + $0x350] ss:$8 sps:$4 sm:$0xff]   ;;  %v5250_v21 = vld [vmem:[%s8035_s1 + $0x344] ss:$8 sps:$4 sm:$0xff]   ;;  %v5248_v23 = vld [vmem:[%s8035_s1 + $0x340] ss:$8 sps:$4 sm:$0xff]  }
  0x1d   :  { %3544 = vmatprep.subr.bf16.mxu1 %v5175_v29  ;;  %v5253_v24 = vld [vmem:[%s8035_s1 + $0x234] ss:$8 sps:$4 sm:$0xff]   ;;  %v5251_v26 = vld [vmem:[%s8035_s1 + $0x230] ss:$8 sps:$4 sm:$0xff]   ;;  %v53_v28 = vld [vmem:[%s8036_s0 + $0x100] sm:$0xff] }
  0x1e   :  { %v5256_v25 = vld [vmem:[%s8035_s1 + $0x334] ss:$8 sps:$4 sm:$0xff]   ;;  %v5254_v27 = vld [vmem:[%s8035_s1 + $0x330] ss:$8 sps:$4 sm:$0xff]   ;;  %v69_v29 = vld [vmem:[%s8036_s0 + $0x180] sm:$0xff] }
  0x1f   :  { %3492 = vmatpush1.bf16.msra.mxu0 %v5177_v30  ;;  %v54_v30 = vld [vmem:[%s8036_s0 + $0x108] sm:$0xff]  ;;  %v6237_v48 = vld [vmem:[%s8036_s0 + $0x18] sm:$0xff] }
  0x20   :  { %3545 = vmatpush1.bf16.msra.mxu1 %v5178_v31  ;;  %3493 = vmatprep.subr.bf16.mxu0 %v5179_v32  ;;  %v70_v31 = vld [vmem:[%s8036_s0 + $0x188] sm:$0xff]  ;;  %v6244_v50 = vld [vmem:[%s8036_s0 + $0x98] sm:$0xff] }
  0x21   :  { %3546 = vmatprep.subr.bf16.mxu1 %v5181_v33  ;;  %v5259_v32 = vld [vmem:[%s8035_s1 + $0x224] ss:$8 sps:$4 sm:$0xff]   ;;  %v4578_v33 = vcombine.high %v53_v28, %v69_v29  ;;  %v4552_v51 = vcombine.high %v6237_v48, %v6244_v50  ;;  %v5272_v53 = vld [vmem:[%s8035_s1 + $0x300] ss:$8 sps:$4 sm:$0xff]   ;;  %v5280_v55 = vld [vmem:[%s8035_s1 + $0x3f4] ss:$8 sps:$4 sm:$0xff]  }
  0x23   :  { %3494 = vmatpush2.bf16.msra.mxu0 %v5183_v34  ;;  %v4580_v34 = vcombine.high %v54_v30, %v70_v31 }
  0x24   :  { %3547 = vmatpush2.bf16.msra.mxu1 %v5184_v35  ;;  %3495 = vmatprep.subr.bf16.mxu0 %v5185_v36  ;;  %v4577_v35 = vcombine.low %v53_v28, %v69_v29  ;;  %v5262_v36 = vld [vmem:[%s8035_s1 + $0x324] ss:$8 sps:$4 sm:$0xff]   ;;  %v4551_v29 = vcombine.low %v6237_v48, %v6244_v50 }
  0x25   :  { %3548 = vmatprep.subr.bf16.mxu1 %v5187_v37  ;;  %v4579_v37 = vcombine.low %v54_v30, %v70_v31  ;;  %v56_v30 = vld [vmem:[%s8036_s0 + $0x118] sm:$0xff]  ;;  %v5343_v48 = vld [vmem:[%s8035_s1 + $0x444] ss:$8 sps:$4 sm:$0xff]  }
  0x26   :  { %v72_v31 = vld [vmem:[%s8036_s0 + $0x198] sm:$0xff] }
  0x27   :  { %3496 = vmatpush2.bf16.msra.mxu0 %v5189_v38  ;;  %v5257_v38 = vld [vmem:[%s8035_s1 + $0x220] ss:$8 sps:$4 sm:$0xff]  }
  0x28   :  { %3549 = vmatpush2.bf16.msra.mxu1 %v5190_v39  ;;  %3497 = vmatprep.subr.bf16.mxu0 %v5191_v40  ;;  %v5260_v39 = vld [vmem:[%s8035_s1 + $0x320] ss:$8 sps:$4 sm:$0xff]   ;;  %v5265_v40 = vld [vmem:[%s8035_s1 + $0x214] ss:$8 sps:$4 sm:$0xff]  }
  0x29   :  { %3550 = vmatprep.subr.bf16.mxu1 %v5193_v41  ;;  %v5268_v41 = vld [vmem:[%s8035_s1 + $0x314] ss:$8 sps:$4 sm:$0xff]  }
  0x2b   :  { %3498 = vmatpush2.bf16.msra.mxu0 %v5195_v42  ;;  %v5263_v42 = vld [vmem:[%s8035_s1 + $0x210] ss:$8 sps:$4 sm:$0xff]  }
  0x2c   :  { %3551 = vmatpush2.bf16.msra.mxu1 %v5196_v43  ;;  %3499 = vmatprep.subr.bf16.mxu0 %v5197_v44  ;;  %v5266_v43 = vld [vmem:[%s8035_s1 + $0x310] ss:$8 sps:$4 sm:$0xff]   ;;  %v5271_v44 = vld [vmem:[%s8035_s1 + $0x204] ss:$8 sps:$4 sm:$0xff]  }
  0x2d   :  { %3552 = vmatprep.subr.bf16.mxu1 %v5199_v45  ;;  %v5274_v45 = vld [vmem:[%s8035_s1 + $0x304] ss:$8 sps:$4 sm:$0xff]  }
  0x2f   :  { %3500 = vmatpush2.bf16.msra.mxu0 %v5201_v46  ;;  %v6227_v46 = vld [vmem:[%s8036_s0 + $0x10] sm:$0xff] }
  0x30   :  { %3553 = vmatpush2.bf16.msra.mxu1 %v5202_v47  ;;  %3501 = vmatprep.subr.bf16.mxu0 %v5203_v52  ;;  %v6232_v47 = vld [vmem:[%s8036_s0 + $0x90] sm:$0xff]  ;;  %v5269_v52 = vld [vmem:[%s8035_s1 + $0x200] ss:$8 sps:$4 sm:$0xff]  }
  0x31   :  { %3554 = vmatprep.subr.bf16.mxu1 %v5205_v54  ;;  %v4550_v49 = vcombine.high %v6227_v46, %v6232_v47  ;;  %v5277_v54 = vld [vmem:[%s8035_s1 + $0x2f4] ss:$8 sps:$4 sm:$0xff]   ;;  %v4549_v28 = vcombine.low %v6227_v46, %v6232_v47  ;;  %v6415_v46 = vld [vmem:[%s8036_s0 + $0x28] sm:$0xff] }
  0x32   :  { %v6420_v47 = vld [vmem:[%s8036_s0 + $0xa8] sm:$0xff] }
  0x33   :  { %3502 = vmatpush2.bf16.msra.mxu0 %v5207_v56  ;;  %v5275_v56 = vld [vmem:[%s8035_s1 + $0x2f0] ss:$8 sps:$4 sm:$0xff]  }
  0x34   :  { %3555 = vmatpush2.bf16.msra.mxu1 %v5208_v57  ;;  %3503 = vmatprep.subr.bf16.mxu0 %v5209_v58  ;;  %v5278_v57 = vld [vmem:[%s8035_s1 + $0x3f0] ss:$8 sps:$4 sm:$0xff]   ;;  %v5283_v58 = vld [vmem:[%s8035_s1 + $0x2e4] ss:$8 sps:$4 sm:$0xff]  }
  0x35   :  { %3556 = vmatprep.subr.bf16.mxu1 %v5211_v59  ;;  %v5286_v59 = vld [vmem:[%s8035_s1 + $0x3e4] ss:$8 sps:$4 sm:$0xff]  }
  0x37   :  { %3504 = vmatpush2.bf16.msra.mxu0 %v5213_v60  ;;  %v5281_v60 = vld [vmem:[%s8035_s1 + $0x2e0] ss:$8 sps:$4 sm:$0xff]  }
  0x38   :  { %3557 = vmatpush2.bf16.msra.mxu1 %v5214_v61  ;;  %3505 = vmatprep.subr.bf16.mxu0 %v5215_v62  ;;  %v5284_v61 = vld [vmem:[%s8035_s1 + $0x3e0] ss:$8 sps:$4 sm:$0xff]   ;;  %v5289_v62 = vld [vmem:[%s8035_s1 + $0x2d4] ss:$8 sps:$4 sm:$0xff]  }
  0x39   :  { %3558 = vmatprep.subr.bf16.mxu1 %v5217_v63  ;;  %v5292_v63 = vld [vmem:[%s8035_s1 + $0x3d4] ss:$8 sps:$4 sm:$0xff]  }
  0x3b   :  { %3506 = vmatpush2.bf16.msra.mxu0 %v5219_v0  ;;  %v5287_v0 = vld [vmem:[%s8035_s1 + $0x2d0] ss:$8 sps:$4 sm:$0xff]  }
  0x3c   :  { %3559 = vmatpush2.bf16.msra.mxu1 %v5220_v1  ;;  %3507 = vmatprep.subr.bf16.mxu0 %v5221_v2  ;;  %v5290_v1 = vld [vmem:[%s8035_s1 + $0x3d0] ss:$8 sps:$4 sm:$0xff]   ;;  %v5295_v2 = vld [vmem:[%s8035_s1 + $0x2c4] ss:$8 sps:$4 sm:$0xff]  }
  0x3d   :  { %3560 = vmatprep.subr.bf16.mxu1 %v5223_v3  ;;  %v5298_v3 = vld [vmem:[%s8035_s1 + $0x3c4] ss:$8 sps:$4 sm:$0xff]  }
  0x3f   :  { %3508 = vmatpush2.bf16.msra.mxu0 %v5225_v4  ;;  %v5293_v4 = vld [vmem:[%s8035_s1 + $0x2c0] ss:$8 sps:$4 sm:$0xff]  }
  0x40   :  { %3561 = vmatpush2.bf16.msra.mxu1 %v5226_v5  ;;  %3583 = vmatprep.subr.bf16.mxu0 %v5229_v6  ;;  %v5296_v5 = vld [vmem:[%s8035_s1 + $0x3c0] ss:$8 sps:$4 sm:$0xff]   ;;  %v5301_v6 = vld [vmem:[%s8035_s1 + $0x2b4] ss:$8 sps:$4 sm:$0xff]  }
  0x41   :  { %3636 = vmatprep.subr.bf16.mxu1 %v5232_v7  ;;  %v5304_v7 = vld [vmem:[%s8035_s1 + $0x3b4] ss:$8 sps:$4 sm:$0xff]  }
  0x42   :  { %3510 = vmatmul.mubr.bf16.vlgmr.msra.gmra.mxu0 %v4545_v8  ;;  %v5299_v8 = vld [vmem:[%s8035_s1 + $0x2b0] ss:$8 sps:$4 sm:$0xff]  }
  0x43   :  { %3563 = vmatmul.mubr.bf16.vlgmr.msra.gmra.mxu1 %v4547_v9  ;;  %3584 = vmatpush1.bf16.msra.mxu0 %v5227_v10  ;;  %v5302_v9 = vld [vmem:[%s8035_s1 + $0x3b0] ss:$8 sps:$4 sm:$0xff]   ;;  %v5307_v10 = vld [vmem:[%s8035_s1 + $0x2a4] ss:$8 sps:$4 sm:$0xff]  }
  0x44   :  { %3637 = vmatpush1.bf16.msra.mxu1 %v5230_v11  ;;  %3585 = vmatprep.subr.bf16.mxu0 %v5235_v12  ;;  %v5310_v11 = vld [vmem:[%s8035_s1 + $0x3a4] ss:$8 sps:$4 sm:$0xff]   ;;  %v5305_v12 = vld [vmem:[%s8035_s1 + $0x2a0] ss:$8 sps:$4 sm:$0xff]  }
  0x45   :  { %3638 = vmatprep.subr.bf16.mxu1 %v5238_v13  ;;  %3519 = vmatprep.mubr.bf16.mxu0 %v4578_v33  ;;  %v5308_v13 = vld [vmem:[%s8035_s1 + $0x3a0] ss:$8 sps:$4 sm:$0xff]   ;;  %v5334_v33 = vld [vmem:[%s8035_s1 + $0x564] ss:$8 sps:$4 sm:$0xff]  }
  0x46   :  { %3572 = vmatprep.mubr.bf16.mxu1 %v4580_v34 }
  0x47   :  { %3586 = vmatpush1.bf16.msra.mxu0 %v5233_v14  ;;  %v5313_v14 = vld [vmem:[%s8035_s1 + $0x294] ss:$8 sps:$4 sm:$0xff]  }
  0x48   :  { %3639 = vmatpush1.bf16.msra.mxu1 %v5236_v15  ;;  %3587 = vmatprep.subr.bf16.mxu0 %v5241_v16  ;;  %v5316_v15 = vld [vmem:[%s8035_s1 + $0x394] ss:$8 sps:$4 sm:$0xff]   ;;  %v5311_v16 = vld [vmem:[%s8035_s1 + $0x290] ss:$8 sps:$4 sm:$0xff]  }
  0x49   :  { %3640 = vmatprep.subr.bf16.mxu1 %v5244_v17  ;;  %v5314_v17 = vld [vmem:[%s8035_s1 + $0x390] ss:$8 sps:$4 sm:$0xff]  }
  0x4a   :  { %3520 = vmatmul.mubr.bf16.gmra.mxu0 %v4577_v35  ;;  %v4584_v35 = vcombine.high %v56_v30, %v72_v31 }
  0x4b   :  { %3588 = vmatpush1.bf16.msra.mxu0 %v5239_v18  ;;  %3573 = vmatmul.mubr.bf16.gmra.mxu1 %v4579_v37  ;;  %v5319_v18 = vld [vmem:[%s8035_s1 + $0x284] ss:$8 sps:$4 sm:$0xff]   ;;  %v5332_v37 = vld [vmem:[%s8035_s1 + $0x560] ss:$8 sps:$4 sm:$0xff]  }
  0x4c   :  { %3641 = vmatpush1.bf16.msra.mxu1 %v5242_v19  ;;  %3589 = vmatprep.subr.bf16.mxu0 %v5247_v20  ;;  %v5322_v19 = vld [vmem:[%s8035_s1 + $0x384] ss:$8 sps:$4 sm:$0xff]   ;;  %v5317_v20 = vld [vmem:[%s8035_s1 + $0x280] ss:$8 sps:$4 sm:$0xff]  }
  0x4d   :  { %3642 = vmatprep.subr.bf16.mxu1 %v5250_v21  ;;  %3615 = vmatprep.mubr.bf16.mxu0 %v4550_v49  ;;  %v5320_v21 = vld [vmem:[%s8035_s1 + $0x380] ss:$8 sps:$4 sm:$0xff]   ;;  %v5346_v49 = vld [vmem:[%s8035_s1 + $0x544] ss:$8 sps:$4 sm:$0xff]  }
  0x4e   :  { %3668 = vmatprep.mubr.bf16.mxu1 %v4552_v51  ;;  %v4556_v51 = vcombine.high %v6415_v46, %v6420_v47 }
  0x4f   :  { %3590 = vmatpush1.bf16.msra.mxu0 %v5245_v22  ;;  %v5325_v22 = vld [vmem:[%s8035_s1 + $0x474] ss:$8 sps:$4 sm:$0xff]  }
  0x50   :  { %3643 = vmatpush1.bf16.msra.mxu1 %v5248_v23  ;;  %3591 = vmatprep.subr.bf16.mxu0 %v5253_v24  ;;  %v5328_v23 = vld [vmem:[%s8035_s1 + $0x574] ss:$8 sps:$4 sm:$0xff]   ;;  %v5323_v24 = vld [vmem:[%s8035_s1 + $0x470] ss:$8 sps:$4 sm:$0xff]  }
  0x51   :  { %3644 = vmatprep.subr.bf16.mxu1 %v5256_v25  ;;  %v5326_v25 = vld [vmem:[%s8035_s1 + $0x570] ss:$8 sps:$4 sm:$0xff]  }
  0x53   :  { %3592 = vmatpush1.bf16.msra.mxu0 %v5251_v26  ;;  %v55_v26 = vld [vmem:[%s8036_s0 + $0x110] sm:$0xff] }
  0x54   :  { %3645 = vmatpush1.bf16.msra.mxu1 %v5254_v27  ;;  %3593 = vmatprep.subr.bf16.mxu0 %v5259_v32  ;;  %v71_v27 = vld [vmem:[%s8036_s0 + $0x190] sm:$0xff]  ;;  %v5331_v32 = vld [vmem:[%s8035_s1 + $0x464] ss:$8 sps:$4 sm:$0xff]  }
  0x55   :  { %3646 = vmatprep.subr.bf16.mxu1 %v5262_v36  ;;  %v4582_v34 = vcombine.high %v55_v26, %v71_v27  ;;  %v5329_v36 = vld [vmem:[%s8035_s1 + $0x460] ss:$8 sps:$4 sm:$0xff]  }
  0x57   :  { %3594 = vmatpush1.bf16.msra.mxu0 %v5257_v38  ;;  %v5337_v38 = vld [vmem:[%s8035_s1 + $0x454] ss:$8 sps:$4 sm:$0xff]  }
  0x58   :  { %3647 = vmatpush1.bf16.msra.mxu1 %v5260_v39  ;;  %3595 = vmatprep.subr.bf16.mxu0 %v5265_v40  ;;  %v5340_v39 = vld [vmem:[%s8035_s1 + $0x554] ss:$8 sps:$4 sm:$0xff]   ;;  %v5335_v40 = vld [vmem:[%s8035_s1 + $0x450] ss:$8 sps:$4 sm:$0xff]  }
  0x59   :  { %3648 = vmatprep.subr.bf16.mxu1 %v5268_v41  ;;  %v5338_v41 = vld [vmem:[%s8035_s1 + $0x550] ss:$8 sps:$4 sm:$0xff]  }
  0x5b   :  { %3596 = vmatpush1.bf16.msra.mxu0 %v5263_v42  ;;  %v6405_v42 = vld [vmem:[%s8036_s0 + $0x20] sm:$0xff] }
  0x5c   :  { %3649 = vmatpush1.bf16.msra.mxu1 %v5266_v43  ;;  %3597 = vmatprep.subr.bf16.mxu0 %v5271_v44  ;;  %v6410_v43 = vld [vmem:[%s8036_s0 + $0xa0] sm:$0xff]  ;;  %v4581_v44 = vcombine.low %v55_v26, %v71_v27 }
  0x5d   :  { %3650 = vmatprep.subr.bf16.mxu1 %v5274_v45  ;;  %v4583_v45 = vcombine.low %v56_v30, %v72_v31  ;;  %v4554_v50 = vcombine.high %v6405_v42, %v6410_v43  ;;  %v5403_v26 = vld [vmem:[%s8035_s1 + $0x4a4] ss:$8 sps:$4 sm:$0xff]   ;;  %v5409_v30 = vld [vmem:[%s8035_s1 + $0x494] ss:$8 sps:$4 sm:$0xff]  }
  0x5e   :  { %v5406_v27 = vld [vmem:[%s8035_s1 + $0x5a4] ss:$8 sps:$4 sm:$0xff]   ;;  %v5412_v31 = vld [vmem:[%s8035_s1 + $0x594] ss:$8 sps:$4 sm:$0xff]  }
  0x5f   :  { %3598 = vmatpush1.bf16.msra.mxu0 %v5269_v52  ;;  %v5341_v52 = vld [vmem:[%s8035_s1 + $0x440] ss:$8 sps:$4 sm:$0xff]  }
  0x60   :  { %3651 = vmatpush1.bf16.msra.mxu1 %v5272_v53  ;;  %3599 = vmatprep.subr.bf16.mxu0 %v5277_v54  ;;  %v5344_v53 = vld [vmem:[%s8035_s1 + $0x540] ss:$8 sps:$4 sm:$0xff]   ;;  %v5349_v54 = vld [vmem:[%s8035_s1 + $0x434] ss:$8 sps:$4 sm:$0xff]  }
  0x61   :  { %3652 = vmatprep.subr.bf16.mxu1 %v5280_v55  ;;  %v5352_v55 = vld [vmem:[%s8035_s1 + $0x534] ss:$8 sps:$4 sm:$0xff]  }
  0x63   :  { %3600 = vmatpush2.bf16.msra.mxu0 %v5275_v56  ;;  %v5347_v56 = vld [vmem:[%s8035_s1 + $0x430] ss:$8 sps:$4 sm:$0xff]  }
  0x64   :  { %3653 = vmatpush2.bf16.msra.mxu1 %v5278_v57  ;;  %3601 = vmatprep.subr.bf16.mxu0 %v5283_v58  ;;  %v5350_v57 = vld [vmem:[%s8035_s1 + $0x530] ss:$8 sps:$4 sm:$0xff]   ;;  %v5355_v58 = vld [vmem:[%s8035_s1 + $0x424] ss:$8 sps:$4 sm:$0xff]  }
  0x65   :  { %3654 = vmatprep.subr.bf16.mxu1 %v5286_v59  ;;  %v5358_v59 = vld [vmem:[%s8035_s1 + $0x524] ss:$8 sps:$4 sm:$0xff]  }
  0x67   :  { %3602 = vmatpush2.bf16.msra.mxu0 %v5281_v60  ;;  %v5353_v60 = vld [vmem:[%s8035_s1 + $0x420] ss:$8 sps:$4 sm:$0xff]  }
  0x68   :  { %3655 = vmatpush2.bf16.msra.mxu1 %v5284_v61  ;;  %3603 = vmatprep.subr.bf16.mxu0 %v5289_v62  ;;  %v5356_v61 = vld [vmem:[%s8035_s1 + $0x520] ss:$8 sps:$4 sm:$0xff]   ;;  %v5361_v62 = vld [vmem:[%s8035_s1 + $0x414] ss:$8 sps:$4 sm:$0xff]  }
  0x69   :  { %3656 = vmatprep.subr.bf16.mxu1 %v5292_v63  ;;  %v5364_v63 = vld [vmem:[%s8035_s1 + $0x514] ss:$8 sps:$4 sm:$0xff]  }
  0x6b   :  { %3604 = vmatpush2.bf16.msra.mxu0 %v5287_v0  ;;  %v5359_v0 = vld [vmem:[%s8035_s1 + $0x410] ss:$8 sps:$4 sm:$0xff]  }
  0x6c   :  { %3657 = vmatpush2.bf16.msra.mxu1 %v5290_v1  ;;  %3605 = vmatprep.subr.bf16.mxu0 %v5295_v2  ;;  %v5362_v1 = vld [vmem:[%s8035_s1 + $0x510] ss:$8 sps:$4 sm:$0xff]   ;;  %v5367_v2 = vld [vmem:[%s8035_s1 + $0x404] ss:$8 sps:$4 sm:$0xff]  }
  0x6d   :  { %3658 = vmatprep.subr.bf16.mxu1 %v5298_v3  ;;  %v5370_v3 = vld [vmem:[%s8035_s1 + $0x504] ss:$8 sps:$4 sm:$0xff]  }
  0x6f   :  { %3606 = vmatpush2.bf16.msra.mxu0 %v5293_v4  ;;  %v5365_v4 = vld [vmem:[%s8035_s1 + $0x400] ss:$8 sps:$4 sm:$0xff]  }
  0x70   :  { %3659 = vmatpush2.bf16.msra.mxu1 %v5296_v5  ;;  %3607 = vmatprep.subr.bf16.mxu0 %v5301_v6  ;;  %v5368_v5 = vld [vmem:[%s8035_s1 + $0x500] ss:$8 sps:$4 sm:$0xff]   ;;  %v5373_v6 = vld [vmem:[%s8035_s1 + $0x4f4] ss:$8 sps:$4 sm:$0xff]  }
  0x71   :  { %3660 = vmatprep.subr.bf16.mxu1 %v5304_v7  ;;  %v5376_v7 = vld [vmem:[%s8035_s1 + $0x5f4] ss:$8 sps:$4 sm:$0xff]  }
  0x73   :  { %3608 = vmatpush2.bf16.msra.mxu0 %v5299_v8  ;;  %v5371_v8 = vld [vmem:[%s8035_s1 + $0x4f0] ss:$8 sps:$4 sm:$0xff]  }
  0x74   :  { %3661 = vmatpush2.bf16.msra.mxu1 %v5302_v9  ;;  %3609 = vmatprep.subr.bf16.mxu0 %v5307_v10  ;;  %v5374_v9 = vld [vmem:[%s8035_s1 + $0x5f0] ss:$8 sps:$4 sm:$0xff]   ;;  %v5379_v10 = vld [vmem:[%s8035_s1 + $0x4e4] ss:$8 sps:$4 sm:$0xff]  }
  0x75   :  { %3662 = vmatprep.subr.bf16.mxu1 %v5310_v11  ;;  %v5382_v11 = vld [vmem:[%s8035_s1 + $0x5e4] ss:$8 sps:$4 sm:$0xff]  }
  0x77   :  { %3610 = vmatpush2.bf16.msra.mxu0 %v5305_v12  ;;  %v5377_v12 = vld [vmem:[%s8035_s1 + $0x4e0] ss:$8 sps:$4 sm:$0xff]  }
  0x78   :  { %3663 = vmatpush2.bf16.msra.mxu1 %v5308_v13  ;;  %3611 = vmatprep.subr.bf16.mxu0 %v5313_v14  ;;  %v5380_v13 = vld [vmem:[%s8035_s1 + $0x5e0] ss:$8 sps:$4 sm:$0xff]   ;;  %v5385_v14 = vld [vmem:[%s8035_s1 + $0x4d4] ss:$8 sps:$4 sm:$0xff]  }
  0x79   :  { %3664 = vmatprep.subr.bf16.mxu1 %v5316_v15  ;;  %v5388_v15 = vld [vmem:[%s8035_s1 + $0x5d4] ss:$8 sps:$4 sm:$0xff]  }
  0x7b   :  { %3612 = vmatpush2.bf16.msra.mxu0 %v5311_v16  ;;  %v5383_v16 = vld [vmem:[%s8035_s1 + $0x4d0] ss:$8 sps:$4 sm:$0xff]  }
  0x7c   :  { %3665 = vmatpush2.bf16.msra.mxu1 %v5314_v17  ;;  %3613 = vmatprep.subr.bf16.mxu0 %v5319_v18  ;;  %v5386_v17 = vld [vmem:[%s8035_s1 + $0x5d0] ss:$8 sps:$4 sm:$0xff]   ;;  %v5391_v18 = vld [vmem:[%s8035_s1 + $0x4c4] ss:$8 sps:$4 sm:$0xff]  }
  0x7d   :  { %3666 = vmatprep.subr.bf16.mxu1 %v5322_v19  ;;  %v5394_v19 = vld [vmem:[%s8035_s1 + $0x5c4] ss:$8 sps:$4 sm:$0xff]  }
  0x7f   :  { %3614 = vmatpush2.bf16.msra.mxu0 %v5317_v20  ;;  %v5389_v20 = vld [vmem:[%s8035_s1 + $0x4c0] ss:$8 sps:$4 sm:$0xff]  }
  0x80   :  { %3667 = vmatpush2.bf16.msra.mxu1 %v5320_v21  ;;  %3689 = vmatprep.subr.bf16.mxu0 %v5325_v22  ;;  %v5392_v21 = vld [vmem:[%s8035_s1 + $0x5c0] ss:$8 sps:$4 sm:$0xff]   ;;  %v5397_v22 = vld [vmem:[%s8035_s1 + $0x4b4] ss:$8 sps:$4 sm:$0xff]  }
  0x81   :  { %3742 = vmatprep.subr.bf16.mxu1 %v5328_v23  ;;  %v5400_v23 = vld [vmem:[%s8035_s1 + $0x5b4] ss:$8 sps:$4 sm:$0xff]  }
  0x82   :  { %3616 = vmatmul.mubr.bf16.vlgmr.msra.gmra.mxu0 %v4549_v28  ;;  %v5401_v28 = vld [vmem:[%s8035_s1 + $0x4a0] ss:$8 sps:$4 sm:$0xff]  }
  0x83   :  { %3669 = vmatmul.mubr.bf16.vlgmr.msra.gmra.mxu1 %v4551_v29  ;;  %3690 = vmatpush1.bf16.msra.mxu0 %v5323_v24  ;;  %v5395_v24 = vld [vmem:[%s8035_s1 + $0x4b0] ss:$8 sps:$4 sm:$0xff]   ;;  %v5404_v29 = vld [vmem:[%s8035_s1 + $0x5a0] ss:$8 sps:$4 sm:$0xff]  }
  0x84   :  { %3743 = vmatpush1.bf16.msra.mxu1 %v5326_v25  ;;  %3691 = vmatprep.subr.bf16.mxu0 %v5331_v32  ;;  %v5398_v25 = vld [vmem:[%s8035_s1 + $0x5b0] ss:$8 sps:$4 sm:$0xff]  }
  0x85   :  { %3744 = vmatprep.subr.bf16.mxu1 %v5334_v33  ;;  %3625 = vmatprep.mubr.bf16.mxu0 %v4582_v34  ;;  %v5407_v32 = vld [vmem:[%s8035_s1 + $0x490] ss:$8 sps:$4 sm:$0xff]   ;;  %v5415_v34 = vld [vmem:[%s8035_s1 + $0x484] ss:$8 sps:$4 sm:$0xff]  }
  0x86   :  { %3678 = vmatprep.mubr.bf16.mxu1 %v4584_v35  ;;  %v5410_v33 = vld [vmem:[%s8035_s1 + $0x590] ss:$8 sps:$4 sm:$0xff]   ;;  %v5418_v35 = vld [vmem:[%s8035_s1 + $0x584] ss:$8 sps:$4 sm:$0xff]  }
  0x87   :  { %3692 = vmatpush1.bf16.msra.mxu0 %v5329_v36  ;;  %v5413_v36 = vld [vmem:[%s8035_s1 + $0x480] ss:$8 sps:$4 sm:$0xff]  }
  0x88   :  { %3745 = vmatpush1.bf16.msra.mxu1 %v5332_v37  ;;  %3693 = vmatprep.subr.bf16.mxu0 %v5337_v38  ;;  %v5416_v37 = vld [vmem:[%s8035_s1 + $0x580] ss:$8 sps:$4 sm:$0xff]   ;;  %v5421_v38 = vld [vmem:[%s8035_s1 + $0x674] ss:$8 sps:$4 sm:$0xff]  }
  0x89   :  { %3746 = vmatprep.subr.bf16.mxu1 %v5340_v39  ;;  %v5424_v39 = vld [vmem:[%s8035_s1 + $0x774] ss:$8 sps:$4 sm:$0xff]  }
  0x8a   :  { %3626 = vmatmul.mubr.bf16.gmra.mxu0 %v4581_v44  ;;  %v57_v44 = vld [vmem:[%s8036_s0 + $0x120] sm:$0xff] }
  0x8b   :  { %3679 = vmatmul.mubr.bf16.gmra.mxu1 %v4583_v45  ;;  %3694 = vmatpush1.bf16.msra.mxu0 %v5335_v40  ;;  %v5419_v40 = vld [vmem:[%s8035_s1 + $0x670] ss:$8 sps:$4 sm:$0xff]   ;;  %v73_v45 = vld [vmem:[%s8036_s0 + $0x1a0] sm:$0xff] }
  0x8c   :  { %3747 = vmatpush1.bf16.msra.mxu1 %v5338_v41  ;;  %3695 = vmatprep.subr.bf16.mxu0 %v5343_v48  ;;  %v5422_v41 = vld [vmem:[%s8035_s1 + $0x770] ss:$8 sps:$4 sm:$0xff]   ;;  %v4553_v48 = vcombine.low %v6405_v42, %v6410_v43  ;;  %v5430_v42 = vld [vmem:[%s8035_s1 + $0x764] ss:$8 sps:$4 sm:$0xff]   ;;  %v4586_v43 = vcombine.high %v57_v44, %v73_v45 }
  0x8d   :  { %3748 = vmatprep.subr.bf16.mxu1 %v5346_v49  ;;  %3721 = vmatprep.mubr.bf16.mxu0 %v4554_v50  ;;  %v4555_v49 = vcombine.low %v6415_v46, %v6420_v47  ;;  %v58_v50 = vld [vmem:[%s8036_s0 + $0x128] sm:$0xff] }
  0x8e   :  { %3774 = vmatprep.mubr.bf16.mxu1 %v4556_v51  ;;  %v74_v51 = vld [vmem:[%s8036_s0 + $0x1a8] sm:$0xff] }
  0x8f   :  { %3696 = vmatpush1.bf16.msra.mxu0 %v5341_v52  ;;  %v5427_v52 = vld [vmem:[%s8035_s1 + $0x664] ss:$8 sps:$4 sm:$0xff]   ;;  %v4588_v46 = vcombine.high %v58_v50, %v74_v51  ;;  %v5425_v47 = vld [vmem:[%s8035_s1 + $0x660] ss:$8 sps:$4 sm:$0xff]  }
  0x90   :  { %3749 = vmatpush1.bf16.msra.mxu1 %v5344_v53  ;;  %3697 = vmatprep.subr.bf16.mxu0 %v5349_v54  ;;  %v5428_v53 = vld [vmem:[%s8035_s1 + $0x760] ss:$8 sps:$4 sm:$0xff]   ;;  %v5433_v54 = vld [vmem:[%s8035_s1 + $0x654] ss:$8 sps:$4 sm:$0xff]  }
  0x91   :  { %3750 = vmatprep.subr.bf16.mxu1 %v5352_v55  ;;  %v5436_v55 = vld [vmem:[%s8035_s1 + $0x754] ss:$8 sps:$4 sm:$0xff]  }
  0x93   :  { %3698 = vmatpush1.bf16.msra.mxu0 %v5347_v56  ;;  %v5431_v56 = vld [vmem:[%s8035_s1 + $0x650] ss:$8 sps:$4 sm:$0xff]  }
  0x94   :  { %3751 = vmatpush1.bf16.msra.mxu1 %v5350_v57  ;;  %3699 = vmatprep.subr.bf16.mxu0 %v5355_v58  ;;  %v5434_v57 = vld [vmem:[%s8035_s1 + $0x750] ss:$8 sps:$4 sm:$0xff]  }
  0x95   :  { %3752 = vmatprep.subr.bf16.mxu1 %v5358_v59  ;;  %v6637_v58 = vld [vmem:[%s8036_s0 + $0x30] sm:$0xff] }
  0x96   :  { %v6642_v59 = vld [vmem:[%s8036_s0 + $0xb0] sm:$0xff] }
  0x97   :  { %3700 = vmatpush1.bf16.msra.mxu0 %v5353_v60  ;;  %v4585_v60 = vcombine.low %v57_v44, %v73_v45  ;;  %v5499_v44 = vld [vmem:[%s8035_s1 + $0x6a4] ss:$8 sps:$4 sm:$0xff]  }
  0x98   :  { %3753 = vmatpush1.bf16.msra.mxu1 %v5356_v61  ;;  %3701 = vmatprep.subr.bf16.mxu0 %v5361_v62  ;;  %v4587_v61 = vcombine.low %v58_v50, %v74_v51  ;;  %v6647_v62 = vld [vmem:[%s8036_s0 + $0x38] sm:$0xff]  ;;  %v5502_v45 = vld [vmem:[%s8035_s1 + $0x7a4] ss:$8 sps:$4 sm:$0xff]  }
  0x99   :  { %3754 = vmatprep.subr.bf16.mxu1 %v5364_v63  ;;  %v6652_v63 = vld [vmem:[%s8036_s0 + $0xb8] sm:$0xff] }
  0x9a   :  { %v5505_v50 = vld [vmem:[%s8035_s1 + $0x694] ss:$8 sps:$4 sm:$0xff]  }
  0x9b   :  { %3702 = vmatpush1.bf16.msra.mxu0 %v5359_v0  ;;  %v5439_v0 = vld [vmem:[%s8035_s1 + $0x644] ss:$8 sps:$4 sm:$0xff]   ;;  %v5508_v51 = vld [vmem:[%s8035_s1 + $0x794] ss:$8 sps:$4 sm:$0xff]  }
  0x9c   :  { %3755 = vmatpush1.bf16.msra.mxu1 %v5362_v1  ;;  %3703 = vmatprep.subr.bf16.mxu0 %v5367_v2  ;;  %v5442_v1 = vld [vmem:[%s8035_s1 + $0x744] ss:$8 sps:$4 sm:$0xff]   ;;  %v4558_v2 = vcombine.high %v6637_v58, %v6642_v59 }
  0x9d   :  { %3756 = vmatprep.subr.bf16.mxu1 %v5370_v3  ;;  %v4560_v3 = vcombine.high %v6647_v62, %v6652_v63 }
  0x9f   :  { %3704 = vmatpush1.bf16.msra.mxu0 %v5365_v4  ;;  %v5437_v4 = vld [vmem:[%s8035_s1 + $0x640] ss:$8 sps:$4 sm:$0xff]  }
  0xa0   :  { %3757 = vmatpush1.bf16.msra.mxu1 %v5368_v5  ;;  %3705 = vmatprep.subr.bf16.mxu0 %v5373_v6  ;;  %v5440_v5 = vld [vmem:[%s8035_s1 + $0x740] ss:$8 sps:$4 sm:$0xff]   ;;  %v5445_v6 = vld [vmem:[%s8035_s1 + $0x634] ss:$8 sps:$4 sm:$0xff]  }
  0xa1   :  { %3758 = vmatprep.subr.bf16.mxu1 %v5376_v7  ;;  %v5448_v7 = vld [vmem:[%s8035_s1 + $0x734] ss:$8 sps:$4 sm:$0xff]  }
  0xa3   :  { %3706 = vmatpush2.bf16.msra.mxu0 %v5371_v8  ;;  %v5443_v8 = vld [vmem:[%s8035_s1 + $0x630] ss:$8 sps:$4 sm:$0xff]  }
  0xa4   :  { %3759 = vmatpush2.bf16.msra.mxu1 %v5374_v9  ;;  %3707 = vmatprep.subr.bf16.mxu0 %v5379_v10  ;;  %v5446_v9 = vld [vmem:[%s8035_s1 + $0x730] ss:$8 sps:$4 sm:$0xff]   ;;  %v5451_v10 = vld [vmem:[%s8035_s1 + $0x624] ss:$8 sps:$4 sm:$0xff]  }
  0xa5   :  { %3760 = vmatprep.subr.bf16.mxu1 %v5382_v11  ;;  %v5454_v11 = vld [vmem:[%s8035_s1 + $0x724] ss:$8 sps:$4 sm:$0xff]  }
  0xa7   :  { %3708 = vmatpush2.bf16.msra.mxu0 %v5377_v12  ;;  %v5449_v12 = vld [vmem:[%s8035_s1 + $0x620] ss:$8 sps:$4 sm:$0xff]  }
  0xa8   :  { %3761 = vmatpush2.bf16.msra.mxu1 %v5380_v13  ;;  %3709 = vmatprep.subr.bf16.mxu0 %v5385_v14  ;;  %v5452_v13 = vld [vmem:[%s8035_s1 + $0x720] ss:$8 sps:$4 sm:$0xff]   ;;  %v5457_v14 = vld [vmem:[%s8035_s1 + $0x614] ss:$8 sps:$4 sm:$0xff]  }
  0xa9   :  { %3762 = vmatprep.subr.bf16.mxu1 %v5388_v15  ;;  %v5460_v15 = vld [vmem:[%s8035_s1 + $0x714] ss:$8 sps:$4 sm:$0xff]  }
  0xab   :  { %3710 = vmatpush2.bf16.msra.mxu0 %v5383_v16  ;;  %v5455_v16 = vld [vmem:[%s8035_s1 + $0x610] ss:$8 sps:$4 sm:$0xff]  }
  0xac   :  { %3763 = vmatpush2.bf16.msra.mxu1 %v5386_v17  ;;  %3711 = vmatprep.subr.bf16.mxu0 %v5391_v18  ;;  %v5458_v17 = vld [vmem:[%s8035_s1 + $0x710] ss:$8 sps:$4 sm:$0xff]   ;;  %v5463_v18 = vld [vmem:[%s8035_s1 + $0x604] ss:$8 sps:$4 sm:$0xff]  }
  0xad   :  { %3764 = vmatprep.subr.bf16.mxu1 %v5394_v19  ;;  %v5466_v19 = vld [vmem:[%s8035_s1 + $0x704] ss:$8 sps:$4 sm:$0xff]  }
  0xaf   :  { %3712 = vmatpush2.bf16.msra.mxu0 %v5389_v20  ;;  %v5461_v20 = vld [vmem:[%s8035_s1 + $0x600] ss:$8 sps:$4 sm:$0xff]  }
  0xb0   :  { %3765 = vmatpush2.bf16.msra.mxu1 %v5392_v21  ;;  %3713 = vmatprep.subr.bf16.mxu0 %v5397_v22  ;;  %v5464_v21 = vld [vmem:[%s8035_s1 + $0x700] ss:$8 sps:$4 sm:$0xff]   ;;  %v5469_v22 = vld [vmem:[%s8035_s1 + $0x6f4] ss:$8 sps:$4 sm:$0xff]  }
  0xb1   :  { %3766 = vmatprep.subr.bf16.mxu1 %v5400_v23  ;;  %v5472_v23 = vld [vmem:[%s8035_s1 + $0x7f4] ss:$8 sps:$4 sm:$0xff]  }
  0xb3   :  { %3714 = vmatpush2.bf16.msra.mxu0 %v5395_v24  ;;  %v5467_v24 = vld [vmem:[%s8035_s1 + $0x6f0] ss:$8 sps:$4 sm:$0xff]  }
  0xb4   :  { %3767 = vmatpush2.bf16.msra.mxu1 %v5398_v25  ;;  %3715 = vmatprep.subr.bf16.mxu0 %v5403_v26  ;;  %v5470_v25 = vld [vmem:[%s8035_s1 + $0x7f0] ss:$8 sps:$4 sm:$0xff]   ;;  %v5475_v26 = vld [vmem:[%s8035_s1 + $0x6e4] ss:$8 sps:$4 sm:$0xff]  }
  0xb5   :  { %3768 = vmatprep.subr.bf16.mxu1 %v5406_v27  ;;  %v5478_v27 = vld [vmem:[%s8035_s1 + $0x7e4] ss:$8 sps:$4 sm:$0xff]  }
  0xb7   :  { %3716 = vmatpush2.bf16.msra.mxu0 %v5401_v28  ;;  %v5473_v28 = vld [vmem:[%s8035_s1 + $0x6e0] ss:$8 sps:$4 sm:$0xff]  }
  0xb8   :  { %3769 = vmatpush2.bf16.msra.mxu1 %v5404_v29  ;;  %3717 = vmatprep.subr.bf16.mxu0 %v5409_v30  ;;  %v5476_v29 = vld [vmem:[%s8035_s1 + $0x7e0] ss:$8 sps:$4 sm:$0xff]   ;;  %v5481_v30 = vld [vmem:[%s8035_s1 + $0x6d4] ss:$8 sps:$4 sm:$0xff]  }
  0xb9   :  { %3770 = vmatprep.subr.bf16.mxu1 %v5412_v31  ;;  %v5484_v31 = vld [vmem:[%s8035_s1 + $0x7d4] ss:$8 sps:$4 sm:$0xff]  }
  0xbb   :  { %3718 = vmatpush2.bf16.msra.mxu0 %v5407_v32  ;;  %v5479_v32 = vld [vmem:[%s8035_s1 + $0x6d0] ss:$8 sps:$4 sm:$0xff]  }
  0xbc   :  { %3771 = vmatpush2.bf16.msra.mxu1 %v5410_v33  ;;  %3719 = vmatprep.subr.bf16.mxu0 %v5415_v34  ;;  %v5482_v33 = vld [vmem:[%s8035_s1 + $0x7d0] ss:$8 sps:$4 sm:$0xff]   ;;  %v5487_v34 = vld [vmem:[%s8035_s1 + $0x6c4] ss:$8 sps:$4 sm:$0xff]  }
  0xbd   :  { %3772 = vmatprep.subr.bf16.mxu1 %v5418_v35  ;;  %v5490_v35 = vld [vmem:[%s8035_s1 + $0x7c4] ss:$8 sps:$4 sm:$0xff]  }
  0xbf   :  { %3720 = vmatpush2.bf16.msra.mxu0 %v5413_v36  ;;  %v5485_v36 = vld [vmem:[%s8035_s1 + $0x6c0] ss:$8 sps:$4 sm:$0xff]  }
  0xc0   :  { %3773 = vmatpush2.bf16.msra.mxu1 %v5416_v37  ;;  %3795 = vmatprep.subr.bf16.mxu0 %v5421_v38  ;;  %v5488_v37 = vld [vmem:[%s8035_s1 + $0x7c0] ss:$8 sps:$4 sm:$0xff]   ;;  %v5493_v38 = vld [vmem:[%s8035_s1 + $0x6b4] ss:$8 sps:$4 sm:$0xff]  }
  0xc1   :  { %3848 = vmatprep.subr.bf16.mxu1 %v5424_v39  ;;  %v5496_v39 = vld [vmem:[%s8035_s1 + $0x7b4] ss:$8 sps:$4 sm:$0xff]  }
  0xc2   :  { %3722 = vmatmul.mubr.bf16.vlgmr.msra.gmra.mxu0 %v4553_v48  ;;  %v5497_v48 = vld [vmem:[%s8035_s1 + $0x6a0] ss:$8 sps:$4 sm:$0xff]  }
  0xc3   :  { %3775 = vmatmul.mubr.bf16.vlgmr.msra.gmra.mxu1 %v4555_v49  ;;  %3796 = vmatpush1.bf16.msra.mxu0 %v5419_v40  ;;  %v5491_v40 = vld [vmem:[%s8035_s1 + $0x6b0] ss:$8 sps:$4 sm:$0xff]   ;;  %v5500_v49 = vld [vmem:[%s8035_s1 + $0x7a0] ss:$8 sps:$4 sm:$0xff]  }
  0xc4   :  { %3849 = vmatpush1.bf16.msra.mxu1 %v5422_v41  ;;  %3797 = vmatprep.subr.bf16.mxu0 %v5427_v52  ;;  %v5494_v41 = vld [vmem:[%s8035_s1 + $0x7b0] ss:$8 sps:$4 sm:$0xff]  }
  0xc5   :  { %3850 = vmatprep.subr.bf16.mxu1 %v5430_v42  ;;  %3731 = vmatprep.mubr.bf16.mxu0 %v4586_v43  ;;  %v5503_v52 = vld [vmem:[%s8035_s1 + $0x690] ss:$8 sps:$4 sm:$0xff]   ;;  %v5511_v43 = vld [vmem:[%s8035_s1 + $0x684] ss:$8 sps:$4 sm:$0xff]  }
  0xc6   :  { %3784 = vmatprep.mubr.bf16.mxu1 %v4588_v46  ;;  %v5506_v42 = vld [vmem:[%s8035_s1 + $0x790] ss:$8 sps:$4 sm:$0xff]   ;;  %v5514_v46 = vld [vmem:[%s8035_s1 + $0x784] ss:$8 sps:$4 sm:$0xff]  }
  0xc7   :  { %3798 = vmatpush1.bf16.msra.mxu0 %v5425_v47  ;;  %v5509_v47 = vld [vmem:[%s8035_s1 + $0x680] ss:$8 sps:$4 sm:$0xff]  }
  0xc8   :  { %3851 = vmatpush1.bf16.msra.mxu1 %v5428_v53  ;;  %3799 = vmatprep.subr.bf16.mxu0 %v5433_v54  ;;  %v5512_v53 = vld [vmem:[%s8035_s1 + $0x780] ss:$8 sps:$4 sm:$0xff]   ;;  %v5517_v54 = vld [vmem:[%s8035_s1 + $0x874] ss:$8 sps:$4 sm:$0xff]  }
  0xc9   :  { %3852 = vmatprep.subr.bf16.mxu1 %v5436_v55  ;;  %v5520_v55 = vld [vmem:[%s8035_s1 + $0x974] ss:$8 sps:$4 sm:$0xff]  }
  0xca   :  { %3732 = vmatmul.mubr.bf16.gmra.mxu0 %v4585_v60  ;;  %v59_v60 = vld [vmem:[%s8036_s0 + $0x130] sm:$0xff] }
  0xcb   :  { %3785 = vmatmul.mubr.bf16.gmra.mxu1 %v4587_v61  ;;  %3800 = vmatpush1.bf16.msra.mxu0 %v5431_v56  ;;  %v5515_v56 = vld [vmem:[%s8035_s1 + $0x870] ss:$8 sps:$4 sm:$0xff]  }
  0xcc   :  { %3853 = vmatpush1.bf16.msra.mxu1 %v5434_v57  ;;  %3801 = vmatprep.subr.bf16.mxu0 %v5439_v0  ;;  %v5518_v57 = vld [vmem:[%s8035_s1 + $0x970] ss:$8 sps:$4 sm:$0xff]   ;;  %v4557_v0 = vcombine.low %v6637_v58, %v6642_v59  ;;  %v5526_v58 = vld [vmem:[%s8035_s1 + $0x964] ss:$8 sps:$4 sm:$0xff]  }
  0xcd   :  { %3854 = vmatprep.subr.bf16.mxu1 %v5442_v1  ;;  %3827 = vmatprep.mubr.bf16.mxu0 %v4558_v2  ;;  %v75_v61 = vld [vmem:[%s8036_s0 + $0x1b0] sm:$0xff]  ;;  %v4559_v1 = vcombine.low %v6647_v62, %v6652_v63  ;;  %v60_v2 = vld [vmem:[%s8036_s0 + $0x138] sm:$0xff] }
  0xce   :  { %3880 = vmatprep.mubr.bf16.mxu1 %v4560_v3  ;;  %v76_v3 = vld [vmem:[%s8036_s0 + $0x1b8] sm:$0xff]  ;;  %v4590_v59 = vcombine.high %v59_v60, %v75_v61 }
  0xcf   :  { %3802 = vmatpush1.bf16.msra.mxu0 %v5437_v4  ;;  %v5523_v4 = vld [vmem:[%s8035_s1 + $0x864] ss:$8 sps:$4 sm:$0xff]   ;;  %v4592_v62 = vcombine.high %v60_v2, %v76_v3 }
  0xd0   :  { %3855 = vmatpush1.bf16.msra.mxu1 %v5440_v5  ;;  %3803 = vmatprep.subr.bf16.mxu0 %v5445_v6  ;;  %v5521_v6 = vld [vmem:[%s8035_s1 + $0x860] ss:$8 sps:$4 sm:$0xff]  }
  0xd1   :  { %3856 = vmatprep.subr.bf16.mxu1 %v5448_v7  ;;  %v5524_v7 = vld [vmem:[%s8035_s1 + $0x960] ss:$8 sps:$4 sm:$0xff]  }
  0xd3   :  { %3804 = vmatpush1.bf16.msra.mxu0 %v5443_v8 }
  0xd4   :  { %3857 = vmatpush1.bf16.msra.mxu1 %v5446_v9  ;;  %3805 = vmatprep.subr.bf16.mxu0 %v5451_v10  ;;  %v5529_v9 = vld [vmem:[%s8035_s1 + $0x854] ss:$8 sps:$4 sm:$0xff]  }
  0xd5   :  { %3858 = vmatprep.subr.bf16.mxu1 %v5454_v11 }
  0xd7   :  { %3806 = vmatpush1.bf16.msra.mxu0 %v5449_v12  ;;  %v5532_v12 = vld [vmem:[%s8035_s1 + $0x954] ss:$8 sps:$4 sm:$0xff]  }
  0xd8   :  { %3859 = vmatpush1.bf16.msra.mxu1 %v5452_v13  ;;  %3807 = vmatprep.subr.bf16.mxu0 %v5457_v14  ;;  %v5527_v14 = vld [vmem:[%s8035_s1 + $0x850] ss:$8 sps:$4 sm:$0xff]  }
  0xd9   :  { %3860 = vmatprep.subr.bf16.mxu1 %v5460_v15  ;;  %v5530_v15 = vld [vmem:[%s8035_s1 + $0x950] ss:$8 sps:$4 sm:$0xff]  }
  0xdb   :  { %3808 = vmatpush1.bf16.msra.mxu0 %v5455_v16  ;;  %v6873_v16 = vld [vmem:[%s8036_s0 + $0x40] sm:$0xff] }
  0xdc   :  { %3861 = vmatpush1.bf16.msra.mxu1 %v5458_v17  ;;  %3809 = vmatprep.subr.bf16.mxu0 %v5463_v18  ;;  %v6878_v17 = vld [vmem:[%s8036_s0 + $0xc0] sm:$0xff] }
  0xdd   :  { %3862 = vmatprep.subr.bf16.mxu1 %v5466_v19 }
  0xdf   :  { %3810 = vmatpush1.bf16.msra.mxu0 %v5461_v20  ;;  %v4589_v20 = vcombine.low %v59_v60, %v75_v61 }
  0xe0   :  { %3863 = vmatpush1.bf16.msra.mxu1 %v5464_v21  ;;  %3811 = vmatprep.subr.bf16.mxu0 %v5469_v22  ;;  %v4591_v21 = vcombine.low %v60_v2, %v76_v3  ;;  %v6883_v22 = vld [vmem:[%s8036_s0 + $0x48] sm:$0xff]  ;;  %v5565_v2 = vld [vmem:[%s8035_s1 + $0x8f4] ss:$8 sps:$4 sm:$0xff]  }
  0xe1   :  { %3864 = vmatprep.subr.bf16.mxu1 %v5472_v23  ;;  %v6888_v23 = vld [vmem:[%s8036_s0 + $0xc8] sm:$0xff]  ;;  %v5568_v3 = vld [vmem:[%s8035_s1 + $0x9f4] ss:$8 sps:$4 sm:$0xff]  }
  0xe3   :  { %3812 = vmatpush2.bf16.msra.mxu0 %v5467_v24 }
  0xe4   :  { %3865 = vmatpush2.bf16.msra.mxu1 %v5470_v25  ;;  %3813 = vmatprep.subr.bf16.mxu0 %v5475_v26  ;;  %v5535_v25 = vld [vmem:[%s8035_s1 + $0x844] ss:$8 sps:$4 sm:$0xff]  }
  0xe5   :  { %3866 = vmatprep.subr.bf16.mxu1 %v5478_v27 }
  0xe7   :  { %3814 = vmatpush2.bf16.msra.mxu0 %v5473_v28  ;;  %v5538_v28 = vld [vmem:[%s8035_s1 + $0x944] ss:$8 sps:$4 sm:$0xff]  }
  0xe8   :  { %3867 = vmatpush2.bf16.msra.mxu1 %v5476_v29  ;;  %3815 = vmatprep.subr.bf16.mxu0 %v5481_v30  ;;  %v4562_v30 = vcombine.high %v6873_v16, %v6878_v17 }
  0xe9   :  { %3868 = vmatprep.subr.bf16.mxu1 %v5484_v31  ;;  %v4564_v31 = vcombine.high %v6883_v22, %v6888_v23 }
  0xeb   :  { %3816 = vmatpush2.bf16.msra.mxu0 %v5479_v32  ;;  %v5533_v32 = vld [vmem:[%s8035_s1 + $0x840] ss:$8 sps:$4 sm:$0xff]  }
  0xec   :  { %3869 = vmatpush2.bf16.msra.mxu1 %v5482_v33  ;;  %3817 = vmatprep.subr.bf16.mxu0 %v5487_v34  ;;  %v5536_v33 = vld [vmem:[%s8035_s1 + $0x940] ss:$8 sps:$4 sm:$0xff]   ;;  %v5541_v34 = vld [vmem:[%s8035_s1 + $0x834] ss:$8 sps:$4 sm:$0xff]  }
  0xed   :  { %3870 = vmatprep.subr.bf16.mxu1 %v5490_v35  ;;  %v5544_v35 = vld [vmem:[%s8035_s1 + $0x934] ss:$8 sps:$4 sm:$0xff]  }
  0xef   :  { %3818 = vmatpush2.bf16.msra.mxu0 %v5485_v36  ;;  %v5539_v36 = vld [vmem:[%s8035_s1 + $0x830] ss:$8 sps:$4 sm:$0xff]  }
  0xf0   :  { %3871 = vmatpush2.bf16.msra.mxu1 %v5488_v37  ;;  %3819 = vmatprep.subr.bf16.mxu0 %v5493_v38  ;;  %v5542_v37 = vld [vmem:[%s8035_s1 + $0x930] ss:$8 sps:$4 sm:$0xff]   ;;  %v5547_v38 = vld [vmem:[%s8035_s1 + $0x824] ss:$8 sps:$4 sm:$0xff]  }
  0xf1   :  { %3872 = vmatprep.subr.bf16.mxu1 %v5496_v39  ;;  %v5550_v39 = vld [vmem:[%s8035_s1 + $0x924] ss:$8 sps:$4 sm:$0xff]  }
  0xf3   :  { %3820 = vmatpush2.bf16.msra.mxu0 %v5491_v40 }
  0xf4   :  { %3873 = vmatpush2.bf16.msra.mxu1 %v5494_v41  ;;  %3821 = vmatprep.subr.bf16.mxu0 %v5499_v44  ;;  %v5545_v44 = vld [vmem:[%s8035_s1 + $0x820] ss:$8 sps:$4 sm:$0xff]  }
  0xf5   :  { %3874 = vmatprep.subr.bf16.mxu1 %v5502_v45  ;;  %v5548_v45 = vld [vmem:[%s8035_s1 + $0x920] ss:$8 sps:$4 sm:$0xff]  }
  0xf7   :  { %3822 = vmatpush2.bf16.msra.mxu0 %v5497_v48 }
  0xf8   :  { %3875 = vmatpush2.bf16.msra.mxu1 %v5500_v49  ;;  %3823 = vmatprep.subr.bf16.mxu0 %v5505_v50  ;;  %v5553_v49 = vld [vmem:[%s8035_s1 + $0x814] ss:$8 sps:$4 sm:$0xff]  }
  0xf9   :  { %3876 = vmatprep.subr.bf16.mxu1 %v5508_v51  ;;  %v5556_v50 = vld [vmem:[%s8035_s1 + $0x914] ss:$8 sps:$4 sm:$0xff]  }
  0xfb   :  { %3824 = vmatpush2.bf16.msra.mxu0 %v5503_v52 }
  0xfc   :  { %3877 = vmatpush2.bf16.msra.mxu1 %v5506_v42  ;;  %3825 = vmatprep.subr.bf16.mxu0 %v5511_v43  ;;  %v5551_v43 = vld [vmem:[%s8035_s1 + $0x810] ss:$8 sps:$4 sm:$0xff]  }
  0xfd   :  { %3878 = vmatprep.subr.bf16.mxu1 %v5514_v46  ;;  %v5554_v46 = vld [vmem:[%s8035_s1 + $0x910] ss:$8 sps:$4 sm:$0xff]  }
  0xff   :  { %3826 = vmatpush2.bf16.msra.mxu0 %v5509_v47 }
 0x100   :  { %3879 = vmatpush2.bf16.msra.mxu1 %v5512_v53  ;;  %3901 = vmatprep.subr.bf16.mxu0 %v5517_v54  ;;  %v5559_v54 = vld [vmem:[%s8035_s1 + $0x804] ss:$8 sps:$4 sm:$0xff]  }
 0x101   :  { %3954 = vmatprep.subr.bf16.mxu1 %v5520_v55 }
 0x102   :  { %v3511_v63 = vpop.f32.mrf.mxu0  ;;  %3828 = vmatmul.mubr.bf16.vlgmr.msra.gmra.mxu0 %v4557_v0  ;;  %v5557_v0 = vld [vmem:[%s8035_s1 + $0x800] ss:$8 sps:$4 sm:$0xff]  }
 0x103   :  { %v3564_v5 = vpop.f32.mrf.mxu1  ;;  %3881 = vmatmul.mubr.bf16.vlgmr.msra.gmra.mxu1 %v4559_v1  ;;  %3902 = vmatpush1.bf16.msra.mxu0 %v5515_v56  ;;  %v5562_v56 = vld [vmem:[%s8035_s1 + $0x904] ss:$8 sps:$4 sm:$0xff]   ;;  %v5560_v1 = vld [vmem:[%s8035_s1 + $0x900] ss:$8 sps:$4 sm:$0xff]  }
 0x104   :  { %v6854_v8 = vadd.f32 %v3564_v5, %v3511_v63  ;;  %3955 = vmatpush1.bf16.msra.mxu1 %v5518_v57  ;;  %v3513_v10 = vpop.f32.mrf.mxu0  ;;  %3903 = vmatprep.subr.bf16.mxu0 %v5523_v4  ;;  %v5563_v4 = vld [vmem:[%s8035_s1 + $0x8f0] ss:$8 sps:$4 sm:$0xff]   ;;  %v5569_v63 = vld [vmem:[%s8035_s1 + $0x8e0] ss:$8 sps:$4 sm:$0xff]  }
 0x105   :  { %v3566_v11 = vpop.f32.mrf.mxu1  ;;  %3956 = vmatprep.subr.bf16.mxu1 %v5526_v58  ;;  %3837 = vmatprep.mubr.bf16.mxu0 %v4590_v59  ;;  %v5566_v58 = vld [vmem:[%s8035_s1 + $0x9f0] ss:$8 sps:$4 sm:$0xff]   ;;  %v5571_v59 = vld [vmem:[%s8035_s1 + $0x8e4] ss:$8 sps:$4 sm:$0xff]   ;;  %v5572_v5 = vld [vmem:[%s8035_s1 + $0x9e0] ss:$8 sps:$4 sm:$0xff]  }
 0x106   :  { %v6862_v13 = vadd.f32 %v3566_v11, %v3513_v10  ;;  %3890 = vmatprep.mubr.bf16.mxu1 %v4592_v62  ;;  %v3515_v18 = vpop.f32.mrf.mxu0  ;;  %v5574_v62 = vld [vmem:[%s8035_s1 + $0x9e4] ss:$8 sps:$4 sm:$0xff]   ;;  %v5578_v10 = vld [vmem:[%s8035_s1 + $0x9d0] ss:$8 sps:$4 sm:$0xff]  }
 0x107   :  { %v3568_v19 = vpop.f32.mrf.mxu1  ;;  %3904 = vmatpush1.bf16.msra.mxu0 %v5521_v6  ;;  %v5577_v6 = vld [vmem:[%s8035_s1 + $0x8d4] ss:$8 sps:$4 sm:$0xff]   ;;  %v5583_v11 = vld [vmem:[%s8035_s1 + $0x8c4] ss:$8 sps:$4 sm:$0xff]  }
 0x108   :  { %v6890_v24 = vadd.f32 %v3568_v19, %v3515_v18  ;;  %3957 = vmatpush1.bf16.msra.mxu1 %v5524_v7  ;;  %v3517_v26 = vpop.f32.mrf.mxu0  ;;  %3905 = vmatprep.subr.bf16.mxu0 %v5529_v9  ;;  %v5580_v7 = vld [vmem:[%s8035_s1 + $0x9d4] ss:$8 sps:$4 sm:$0xff]   ;;  %v5575_v9 = vld [vmem:[%s8035_s1 + $0x8d0] ss:$8 sps:$4 sm:$0xff]  }
 0x109   :  { %v3570_v27 = vpop.f32.mrf.mxu1  ;;  %3958 = vmatprep.subr.bf16.mxu1 %v5532_v12  ;;  %v5586_v12 = vld [vmem:[%s8035_s1 + $0x9c4] ss:$8 sps:$4 sm:$0xff]   ;;  %v5589_v18 = vld [vmem:[%s8035_s1 + $0x8b4] ss:$8 sps:$4 sm:$0xff]  }
 0x10a   :  { %v6898_v29 = vadd.f32 %v3570_v27, %v3517_v26  ;;  %3838 = vmatmul.mubr.bf16.gmra.mxu0 %v4589_v20  ;;  %v3521_v40 = vpop.f32.mrf.mxu0  ;;  %v5592_v19 = vld [vmem:[%s8035_s1 + $0x9b4] ss:$8 sps:$4 sm:$0xff]   ;;  %v5587_v20 = vld [vmem:[%s8035_s1 + $0x8b0] ss:$8 sps:$4 sm:$0xff]   ;;  %v5598_v26 = vld [vmem:[%s8035_s1 + $0x9a4] ss:$8 sps:$4 sm:$0xff]  }
 0x10b   :  { %3891 = vmatmul.mubr.bf16.gmra.mxu1 %v4591_v21  ;;  %3906 = vmatpush1.bf16.msra.mxu0 %v5527_v14  ;;  %v3574_v41 = vpop.f32.mrf.mxu1  ;;  %v5581_v14 = vld [vmem:[%s8035_s1 + $0x8c0] ss:$8 sps:$4 sm:$0xff]   ;;  %v5590_v21 = vld [vmem:[%s8035_s1 + $0x9b0] ss:$8 sps:$4 sm:$0xff]  }
 0x10c   :  { %3959 = vmatpush1.bf16.msra.mxu1 %v5530_v15  ;;  %3907 = vmatprep.subr.bf16.mxu0 %v5535_v25  ;;  %v6934_v48 = vadd.f32 %v3574_v41, %v3521_v40  ;;  %v3523_v51 = vpop.f32.mrf.mxu0  ;;  %v5584_v15 = vld [vmem:[%s8035_s1 + $0x9c0] ss:$8 sps:$4 sm:$0xff]   ;;  %v5595_v25 = vld [vmem:[%s8035_s1 + $0x8a4] ss:$8 sps:$4 sm:$0xff]   ;;  %v5611_v41 = vld [vmem:[%s8035_s1 + $0xa70] ss:$8 sps:$4 sm:$0xff]  }
 0x10d   :  { %3960 = vmatprep.subr.bf16.mxu1 %v5538_v28  ;;  %3933 = vmatprep.mubr.bf16.mxu0 %v4562_v30  ;;  %v3576_v52 = vpop.f32.mrf.mxu1  ;;  %v5593_v27 = vld [vmem:[%s8035_s1 + $0x8a0] ss:$8 sps:$4 sm:$0xff]   ;;  %v5601_v30 = vld [vmem:[%s8035_s1 + $0x894] ss:$8 sps:$4 sm:$0xff]  }
 0x10e   :  { %3986 = vmatprep.mubr.bf16.mxu1 %v4564_v31  ;;  %v6942_v42 = vadd.f32 %v3576_v52, %v3523_v51  ;;  %v3525_v47 = vpop.f32.mrf.mxu0  ;;  %v5596_v28 = vld [vmem:[%s8035_s1 + $0x9a0] ss:$8 sps:$4 sm:$0xff]   ;;  %v5604_v31 = vld [vmem:[%s8035_s1 + $0x994] ss:$8 sps:$4 sm:$0xff]  }
 0x10f   :  { %3908 = vmatpush1.bf16.msra.mxu0 %v5533_v32  ;;  %v3578_v53 = vpop.f32.mrf.mxu1  ;;  %v5599_v32 = vld [vmem:[%s8035_s1 + $0x890] ss:$8 sps:$4 sm:$0xff]   ;;  %v61_v40 = vld [vmem:[%s8036_s0 + $0x140] sm:$0xff]  ;;  %v78_v51 = vld [vmem:[%s8036_s0 + $0x1c8] sm:$0xff] }
 0x110   :  { %3961 = vmatpush1.bf16.msra.mxu1 %v5536_v33  ;;  %3909 = vmatprep.subr.bf16.mxu0 %v5541_v34  ;;  %v6953_v55 = vadd.f32 %v3578_v53, %v3525_v47  ;;  %v3527_v57 = vpop.f32.mrf.mxu0  ;;  %v5602_v33 = vld [vmem:[%s8035_s1 + $0x990] ss:$8 sps:$4 sm:$0xff]   ;;  %v5607_v34 = vld [vmem:[%s8035_s1 + $0x884] ss:$8 sps:$4 sm:$0xff]   ;;  %v5620_v52 = vld [vmem:[%s8035_s1 + $0xb60] ss:$8 sps:$4 sm:$0xff]  }
 0x111   :  { %3962 = vmatprep.subr.bf16.mxu1 %v5544_v35  ;;  %v3580_v60 = vpop.f32.mrf.mxu1  ;;  %v5610_v35 = vld [vmem:[%s8035_s1 + $0x984] ss:$8 sps:$4 sm:$0xff]  }
 0x112   :  { %v6958_v61 = vadd.f32 %v3580_v60, %v3527_v57  ;;  %v5625_v60 = vld [vmem:[%s8035_s1 + $0xa54] ss:$8 sps:$4 sm:$0xff]  }
 0x113   :  { %3910 = vmatpush1.bf16.msra.mxu0 %v5539_v36  ;;  %v5605_v36 = vld [vmem:[%s8035_s1 + $0x880] ss:$8 sps:$4 sm:$0xff]  }
 0x114   :  { %3963 = vmatpush1.bf16.msra.mxu1 %v5542_v37  ;;  %3911 = vmatprep.subr.bf16.mxu0 %v5547_v38  ;;  %v5608_v37 = vld [vmem:[%s8035_s1 + $0x980] ss:$8 sps:$4 sm:$0xff]   ;;  %v5613_v38 = vld [vmem:[%s8035_s1 + $0xa74] ss:$8 sps:$4 sm:$0xff]  }
 0x115   :  { %3964 = vmatprep.subr.bf16.mxu1 %v5550_v39  ;;  %v5616_v39 = vld [vmem:[%s8035_s1 + $0xb74] ss:$8 sps:$4 sm:$0xff]  }
 0x117   :  { %3912 = vmatpush1.bf16.msra.mxu0 %v5545_v44  ;;  %v4561_v44 = vcombine.low %v6873_v16, %v6878_v17  ;;  %v5614_v16 = vld [vmem:[%s8035_s1 + $0xb70] ss:$8 sps:$4 sm:$0xff]   ;;  %v5619_v17 = vld [vmem:[%s8035_s1 + $0xa64] ss:$8 sps:$4 sm:$0xff]  }
 0x118   :  { %3965 = vmatpush1.bf16.msra.mxu1 %v5548_v45  ;;  %3913 = vmatprep.subr.bf16.mxu0 %v5553_v49  ;;  %v4563_v45 = vcombine.low %v6883_v22, %v6888_v23  ;;  %v77_v49 = vld [vmem:[%s8036_s0 + $0x1c0] sm:$0xff] }
 0x119   :  { %3966 = vmatprep.subr.bf16.mxu1 %v5556_v50  ;;  %v62_v50 = vld [vmem:[%s8036_s0 + $0x148] sm:$0xff] }
 0x11a   :  { %v5622_v22 = vld [vmem:[%s8035_s1 + $0xb64] ss:$8 sps:$4 sm:$0xff]   ;;  %v5617_v23 = vld [vmem:[%s8035_s1 + $0xa60] ss:$8 sps:$4 sm:$0xff]  }
 0x11b   :  { %3914 = vmatpush1.bf16.msra.mxu0 %v5551_v43  ;;  %v4594_v43 = vcombine.high %v61_v40, %v77_v49 }
 0x11c   :  { %3967 = vmatpush1.bf16.msra.mxu1 %v5554_v46  ;;  %3915 = vmatprep.subr.bf16.mxu0 %v5559_v54  ;;  %v4596_v46 = vcombine.high %v62_v50, %v78_v51 }
 0x11d   :  { %3968 = vmatprep.subr.bf16.mxu1 %v5562_v56 }
 0x11f   :  { %3916 = vmatpush1.bf16.msra.mxu0 %v5557_v0  ;;  %v5628_v0 = vld [vmem:[%s8035_s1 + $0xb54] ss:$8 sps:$4 sm:$0xff]  }
 0x120   :  { %3969 = vmatpush1.bf16.msra.mxu1 %v5560_v1  ;;  %3917 = vmatprep.subr.bf16.mxu0 %v5565_v2 }
 0x121   :  { %3970 = vmatprep.subr.bf16.mxu1 %v5568_v3  ;;  %v5626_v3 = vld [vmem:[%s8035_s1 + $0xb50] ss:$8 sps:$4 sm:$0xff]  }
 0x123   :  { %3918 = vmatpush2.bf16.msra.mxu0 %v5563_v4  ;;  %v7121_v4 = vld [vmem:[%s8036_s0 + $0x50] sm:$0xff] }
 0x124   :  { %3971 = vmatpush2.bf16.msra.mxu1 %v5566_v58  ;;  %3919 = vmatprep.subr.bf16.mxu0 %v5571_v59  ;;  %v7126_v58 = vld [vmem:[%s8036_s0 + $0xd0] sm:$0xff] }
 0x125   :  { %3972 = vmatprep.subr.bf16.mxu1 %v5574_v62  ;;  %v4593_v62 = vcombine.low %v61_v40, %v77_v49 }
 0x127   :  { %3920 = vmatpush2.bf16.msra.mxu0 %v5569_v63  ;;  %v4595_v63 = vcombine.low %v62_v50, %v78_v51  ;;  %v5641_v50 = vld [vmem:[%s8035_s1 + $0xa20] ss:$8 sps:$4 sm:$0xff]  }
 0x128   :  { %3973 = vmatpush2.bf16.msra.mxu1 %v5572_v5  ;;  %3921 = vmatprep.subr.bf16.mxu0 %v5577_v6  ;;  %v7131_v5 = vld [vmem:[%s8036_s0 + $0x58] sm:$0xff]  ;;  %v5644_v51 = vld [vmem:[%s8035_s1 + $0xb20] ss:$8 sps:$4 sm:$0xff]  }
 0x129   :  { %3974 = vmatprep.subr.bf16.mxu1 %v5580_v7  ;;  %v7136_v6 = vld [vmem:[%s8036_s0 + $0xd8] sm:$0xff] }
 0x12b   :  { %3922 = vmatpush2.bf16.msra.mxu0 %v5575_v9 }
 0x12c   :  { %3975 = vmatpush2.bf16.msra.mxu1 %v5578_v10  ;;  %3923 = vmatprep.subr.bf16.mxu0 %v5583_v11 }
 0x12d   :  { %3976 = vmatprep.subr.bf16.mxu1 %v5586_v12  ;;  %v5631_v12 = vld [vmem:[%s8035_s1 + $0xa44] ss:$8 sps:$4 sm:$0xff]  }
 0x12f   :  { %3924 = vmatpush2.bf16.msra.mxu0 %v5581_v14  ;;  %v5634_v14 = vld [vmem:[%s8035_s1 + $0xb44] ss:$8 sps:$4 sm:$0xff]  }
 0x130   :  { %3977 = vmatpush2.bf16.msra.mxu1 %v5584_v15  ;;  %3925 = vmatprep.subr.bf16.mxu0 %v5589_v18 }
 0x131   :  { %3978 = vmatprep.subr.bf16.mxu1 %v5592_v19  ;;  %v5632_v19 = vld [vmem:[%s8035_s1 + $0xb40] ss:$8 sps:$4 sm:$0xff]  }
 0x133   :  { %3926 = vmatpush2.bf16.msra.mxu0 %v5587_v20  ;;  %v4566_v20 = vcombine.high %v7121_v4, %v7126_v58 }
 0x134   :  { %3979 = vmatpush2.bf16.msra.mxu1 %v5590_v21  ;;  %3927 = vmatprep.subr.bf16.mxu0 %v5595_v25  ;;  %v4568_v21 = vcombine.high %v7131_v5, %v7136_v6 }
 0x135   :  { %3980 = vmatprep.subr.bf16.mxu1 %v5598_v26 }
 0x137   :  { %3928 = vmatpush2.bf16.msra.mxu0 %v5593_v27 }
 0x138   :  { %3981 = vmatpush2.bf16.msra.mxu1 %v5596_v28  ;;  %3929 = vmatprep.subr.bf16.mxu0 %v5601_v30 }
 0x139   :  { %3982 = vmatprep.subr.bf16.mxu1 %v5604_v31  ;;  %v5637_v31 = vld [vmem:[%s8035_s1 + $0xa34] ss:$8 sps:$4 sm:$0xff]  }
 0x13b   :  { %3930 = vmatpush2.bf16.msra.mxu0 %v5599_v32  ;;  %v5640_v32 = vld [vmem:[%s8035_s1 + $0xb34] ss:$8 sps:$4 sm:$0xff]  }
 0x13c   :  { %3983 = vmatpush2.bf16.msra.mxu1 %v5602_v33  ;;  %3931 = vmatprep.subr.bf16.mxu0 %v5607_v34 }
 0x13d   :  { %3984 = vmatprep.subr.bf16.mxu1 %v5610_v35  ;;  %v5638_v35 = vld [vmem:[%s8035_s1 + $0xb30] ss:$8 sps:$4 sm:$0xff]  }
 0x13f   :  { %3932 = vmatpush2.bf16.msra.mxu0 %v5605_v36 }
 0x140   :  { %3985 = vmatpush2.bf16.msra.mxu1 %v5608_v37  ;;  %4007 = vmatprep.subr.bf16.mxu0 %v5613_v38 }
 0x141   :  { %4060 = vmatprep.subr.bf16.mxu1 %v5616_v39 }
 0x142   :  { %v3617_v47 = vpop.f32.mrf.mxu0  ;;  %3934 = vmatmul.mubr.bf16.vlgmr.msra.gmra.mxu0 %v4561_v44  ;;  %v5646_v44 = vld [vmem:[%s8035_s1 + $0xb24] ss:$8 sps:$4 sm:$0xff]  }
 0x143   :  { %v3670_v53 = vpop.f32.mrf.mxu1  ;;  %3987 = vmatmul.mubr.bf16.vlgmr.msra.gmra.mxu1 %v4563_v45  ;;  %v3618_v54 = vadd.f32 %v3617_v47, %v6854_v8  ;;  %4008 = vmatpush1.bf16.msra.mxu0 %v5611_v41  ;;  %v5623_v8 = vld [vmem:[%s8035_s1 + $0xa50] ss:$8 sps:$4 sm:$0xff]   ;;  %v5643_v41 = vld [vmem:[%s8035_s1 + $0xa24] ss:$8 sps:$4 sm:$0xff]   ;;  %v5661_v47 = vld [vmem:[%s8035_s1 + $0xaf4] ss:$8 sps:$4 sm:$0xff]  }
 0x144   :  { %4061 = vmatpush1.bf16.msra.mxu1 %v5614_v16  ;;  %v3619_v56 = vpop.f32.mrf.mxu0  ;;  %4009 = vmatprep.subr.bf16.mxu0 %v5619_v17  ;;  %v5652_v16 = vld [vmem:[%s8035_s1 + $0xb14] ss:$8 sps:$4 sm:$0xff]   ;;  %v5647_v17 = vld [vmem:[%s8035_s1 + $0xa10] ss:$8 sps:$4 sm:$0xff]  }
 0x145   :  { %v3672_v57 = vpop.f32.mrf.mxu1  ;;  %4062 = vmatprep.subr.bf16.mxu1 %v5622_v22  ;;  %v7109_v1 = vadd.f32 %v3670_v53, %v3618_v54  ;;  %v3620_v2 = vadd.f32 %v3619_v56, %v6862_v13  ;;  %3943 = vmatprep.mubr.bf16.mxu0 %v4594_v43  ;;  %v5650_v22 = vld [vmem:[%s8035_s1 + $0xb10] ss:$8 sps:$4 sm:$0xff]   ;;  %v5653_v43 = vld [vmem:[%s8035_s1 + $0xa00] ss:$8 sps:$4 sm:$0xff]   ;;  %v5664_v53 = vld [vmem:[%s8035_s1 + $0xbf4] ss:$8 sps:$4 sm:$0xff]  }
 0x146   :  { %3996 = vmatprep.mubr.bf16.mxu1 %v4596_v46  ;;  %v3621_v13 = vpop.f32.mrf.mxu0  ;;  %v5656_v46 = vld [vmem:[%s8035_s1 + $0xb00] ss:$8 sps:$4 sm:$0xff]   ;;  %v5659_v54 = vld [vmem:[%s8035_s1 + $0xaf0] ss:$8 sps:$4 sm:$0xff]  }
 0x147   :  { %v3674_v59 = vpop.f32.mrf.mxu1  ;;  %v7138_v7 = vadd.f32 %v3672_v57, %v3620_v2  ;;  %v3622_v9 = vadd.f32 %v3621_v13, %v6890_v24  ;;  %4010 = vmatpush1.bf16.msra.mxu0 %v5617_v23  ;;  %v5629_v24 = vld [vmem:[%s8035_s1 + $0xa40] ss:$8 sps:$4 sm:$0xff]   ;;  %v5655_v23 = vld [vmem:[%s8035_s1 + $0xa04] ss:$8 sps:$4 sm:$0xff]   ;;  %v5662_v56 = vld [vmem:[%s8035_s1 + $0xbf0] ss:$8 sps:$4 sm:$0xff]  }
 0x148   :  { %4063 = vmatpush1.bf16.msra.mxu1 %v5620_v52  ;;  %v3623_v10 = vpop.f32.mrf.mxu0  ;;  %4011 = vmatprep.subr.bf16.mxu0 %v5625_v60  ;;  %v5658_v52 = vld [vmem:[%s8035_s1 + $0xb04] ss:$8 sps:$4 sm:$0xff]   ;;  %v5668_v2 = vld [vmem:[%s8035_s1 + $0xbe0] ss:$8 sps:$4 sm:$0xff]   ;;  %v5671_v13 = vld [vmem:[%s8035_s1 + $0xad0] ss:$8 sps:$4 sm:$0xff]  }
 0x149   :  { %v3676_v11 = vpop.f32.mrf.mxu1  ;;  %4064 = vmatprep.subr.bf16.mxu1 %v5628_v0  ;;  %v7147_v15 = vadd.f32 %v3674_v59, %v3622_v9  ;;  %v3624_v18 = vadd.f32 %v3623_v10, %v6898_v29  ;;  %v5667_v57 = vld [vmem:[%s8035_s1 + $0xae4] ss:$8 sps:$4 sm:$0xff]   ;;  %v5665_v0 = vld [vmem:[%s8035_s1 + $0xae0] ss:$8 sps:$4 sm:$0xff]   ;;  %v5674_v59 = vld [vmem:[%s8035_s1 + $0xbd0] ss:$8 sps:$4 sm:$0xff]  }
 0x14a   :  { %v3627_v25 = vpop.f32.mrf.mxu0  ;;  %3944 = vmatmul.mubr.bf16.gmra.mxu0 %v4593_v62  ;;  %v5670_v60 = vld [vmem:[%s8035_s1 + $0xbe4] ss:$8 sps:$4 sm:$0xff]   ;;  %v5677_v9 = vld [vmem:[%s8035_s1 + $0xac0] ss:$8 sps:$4 sm:$0xff]  }
 0x14b   :  { %v3680_v26 = vpop.f32.mrf.mxu1  ;;  %3997 = vmatmul.mubr.bf16.gmra.mxu1 %v4595_v63  ;;  %v7160_v27 = vadd.f32 %v3676_v11, %v3624_v18  ;;  %v3628_v29 = vadd.f32 %v3627_v25, %v6934_v48  ;;  %4012 = vmatpush1.bf16.msra.mxu0 %v5623_v8  ;;  %v5635_v48 = vld [vmem:[%s8035_s1 + $0xa30] ss:$8 sps:$4 sm:$0xff]   ;;  %v5673_v8 = vld [vmem:[%s8035_s1 + $0xad4] ss:$8 sps:$4 sm:$0xff]   ;;  %v5679_v62 = vld [vmem:[%s8035_s1 + $0xac4] ss:$8 sps:$4 sm:$0xff]  }
 0x14c   :  { %4065 = vmatpush1.bf16.msra.mxu1 %v5626_v3  ;;  %v3629_v28 = vpop.f32.mrf.mxu0  ;;  %4013 = vmatprep.subr.bf16.mxu0 %v5631_v12  ;;  %v5676_v3 = vld [vmem:[%s8035_s1 + $0xbd4] ss:$8 sps:$4 sm:$0xff]   ;;  %v5682_v63 = vld [vmem:[%s8035_s1 + $0xbc4] ss:$8 sps:$4 sm:$0xff]   ;;  %v5680_v10 = vld [vmem:[%s8035_s1 + $0xbc0] ss:$8 sps:$4 sm:$0xff]  }
 0x14d   :  { %v3682_v30 = vpop.f32.mrf.mxu1  ;;  %4066 = vmatprep.subr.bf16.mxu1 %v5634_v14  ;;  %v3630_v33 = vadd.f32 %v3629_v28, %v6942_v42  ;;  %v7170_v34 = vadd.f32 %v3680_v26, %v3628_v29  ;;  %4039 = vmatprep.mubr.bf16.mxu0 %v4566_v20  ;;  %v5685_v11 = vld [vmem:[%s8035_s1 + $0xab4] ss:$8 sps:$4 sm:$0xff]   ;;  %v5683_v14 = vld [vmem:[%s8035_s1 + $0xab0] ss:$8 sps:$4 sm:$0xff]   ;;  %v5689_v20 = vld [vmem:[%s8035_s1 + $0xaa0] ss:$8 sps:$4 sm:$0xff]  }
 0x14e   :  { %4092 = vmatprep.mubr.bf16.mxu1 %v4568_v21  ;;  %v3631_v36 = vpop.f32.mrf.mxu0  ;;  %v5688_v12 = vld [vmem:[%s8035_s1 + $0xbb4] ss:$8 sps:$4 sm:$0xff]   ;;  %v5686_v18 = vld [vmem:[%s8035_s1 + $0xbb0] ss:$8 sps:$4 sm:$0xff]   ;;  %v5692_v21 = vld [vmem:[%s8035_s1 + $0xba0] ss:$8 sps:$4 sm:$0xff]  }
 0x14f   :  { %v3684_v37 = vpop.f32.mrf.mxu1  ;;  %v3632_v38 = vadd.f32 %v3631_v36, %v6953_v55  ;;  %v7179_v39 = vadd.f32 %v3682_v30, %v3630_v33  ;;  %4014 = vmatpush1.bf16.msra.mxu0 %v5629_v24  ;;  %v5691_v24 = vld [vmem:[%s8035_s1 + $0xaa4] ss:$8 sps:$4 sm:$0xff]   ;;  %v5697_v25 = vld [vmem:[%s8035_s1 + $0xa94] ss:$8 sps:$4 sm:$0xff]   ;;  %v5695_v29 = vld [vmem:[%s8035_s1 + $0xa90] ss:$8 sps:$4 sm:$0xff]  }
 0x150   :  { %4067 = vmatpush1.bf16.msra.mxu1 %v5632_v19  ;;  %v3633_v42 = vpop.f32.mrf.mxu0  ;;  %4015 = vmatprep.subr.bf16.mxu0 %v5637_v31  ;;  %v5694_v19 = vld [vmem:[%s8035_s1 + $0xba4] ss:$8 sps:$4 sm:$0xff]   ;;  %v5700_v26 = vld [vmem:[%s8035_s1 + $0xb94] ss:$8 sps:$4 sm:$0xff]   ;;  %v5698_v28 = vld [vmem:[%s8035_s1 + $0xb90] ss:$8 sps:$4 sm:$0xff]  }
 0x151   :  { %v3686_v40 = vpop.f32.mrf.mxu1  ;;  %4068 = vmatprep.subr.bf16.mxu1 %v5640_v32  ;;  %v3634_v45 = vadd.f32 %v3633_v42, %v6958_v61  ;;  %v7188_v49 = vadd.f32 %v3684_v37, %v3632_v38  ;;  %v5649_v61 = vld [vmem:[%s8035_s1 + $0xa14] ss:$8 sps:$4 sm:$0xff]   ;;  %v5703_v30 = vld [vmem:[%s8035_s1 + $0xa84] ss:$8 sps:$4 sm:$0xff]   ;;  %v5701_v32 = vld [vmem:[%s8035_s1 + $0xa80] ss:$8 sps:$4 sm:$0xff]   ;;  %v4565_v37 = vcombine.low %v7121_v4, %v7126_v58  ;;  %v4567_v38 = vcombine.low %v7131_v5, %v7136_v6 }
 0x152   :  { %v5706_v31 = vld [vmem:[%s8035_s1 + $0xb84] ss:$8 sps:$4 sm:$0xff]   ;;  %v5704_v33 = vld [vmem:[%s8035_s1 + $0xb80] ss:$8 sps:$4 sm:$0xff]   ;;  %v63_v36 = vld [vmem:[%s8036_s0 + $0x150] sm:$0xff] }
 0x153   :  { %v7190_v55 = vadd.f32 %v3686_v40, %v3634_v45  ;;  %4016 = vmatpush1.bf16.msra.mxu0 %v5635_v48  ;;  %v5709_v48 = vld [vmem:[%s8035_s1 + $0xc74] ss:$8 sps:$4 sm:$0xff]   ;;  %v5707_v4 = vld [vmem:[%s8035_s1 + $0xc70] ss:$8 sps:$4 sm:$0xff]   ;;  %v5715_v5 = vld [vmem:[%s8035_s1 + $0xc64] ss:$8 sps:$4 sm:$0xff]  }
 0x154   :  { %4069 = vmatpush1.bf16.msra.mxu1 %v5638_v35  ;;  %4017 = vmatprep.subr.bf16.mxu0 %v5643_v41  ;;  %v5712_v35 = vld [vmem:[%s8035_s1 + $0xd74] ss:$8 sps:$4 sm:$0xff]   ;;  %v5710_v58 = vld [vmem:[%s8035_s1 + $0xd70] ss:$8 sps:$4 sm:$0xff]   ;;  %v5718_v6 = vld [vmem:[%s8035_s1 + $0xd64] ss:$8 sps:$4 sm:$0xff]  }
 0x155   :  { %4070 = vmatprep.subr.bf16.mxu1 %v5646_v44  ;;  %v79_v42 = vld [vmem:[%s8036_s0 + $0x1d0] sm:$0xff]  ;;  %v64_v40 = vld [vmem:[%s8036_s0 + $0x158] sm:$0xff] }
 0x156   :  { %v80_v41 = vld [vmem:[%s8036_s0 + $0x1d8] sm:$0xff]  ;;  %v4598_v44 = vcombine.high %v63_v36, %v79_v42 }
 0x157   :  { %4018 = vmatpush1.bf16.msra.mxu0 %v5641_v50  ;;  %v4600_v45 = vcombine.high %v64_v40, %v80_v41 }
 0x158   :  { %4071 = vmatpush1.bf16.msra.mxu1 %v5644_v51  ;;  %4019 = vmatprep.subr.bf16.mxu0 %v5649_v61 }
 0x159   :  { %4072 = vmatprep.subr.bf16.mxu1 %v5652_v16  ;;  %v5713_v16 = vld [vmem:[%s8035_s1 + $0xc60] ss:$8 sps:$4 sm:$0xff]  }
 0x15b   :  { %4020 = vmatpush1.bf16.msra.mxu0 %v5647_v17  ;;  %v5716_v17 = vld [vmem:[%s8035_s1 + $0xd60] ss:$8 sps:$4 sm:$0xff]  }
 0x15c   :  { %4073 = vmatpush1.bf16.msra.mxu1 %v5650_v22  ;;  %4021 = vmatprep.subr.bf16.mxu0 %v5655_v23 }
 0x15d   :  { %4074 = vmatprep.subr.bf16.mxu1 %v5658_v52  ;;  %v5721_v52 = vld [vmem:[%s8035_s1 + $0xc54] ss:$8 sps:$4 sm:$0xff]  }
 0x15f   :  { %4022 = vmatpush1.bf16.msra.mxu0 %v5653_v43 }
 0x160   :  { %4075 = vmatpush1.bf16.msra.mxu1 %v5656_v46  ;;  %4023 = vmatprep.subr.bf16.mxu0 %v5661_v47  ;;  %v7371_v47 = vld [vmem:[%s8036_s0 + $0x60] sm:$0xff] }
 0x161   :  { %4076 = vmatprep.subr.bf16.mxu1 %v5664_v53 }
 0x163   :  { %4024 = vmatpush2.bf16.msra.mxu0 %v5659_v54 }
 0x164   :  { %4077 = vmatpush2.bf16.msra.mxu1 %v5662_v56  ;;  %4025 = vmatprep.subr.bf16.mxu0 %v5667_v57  ;;  %v4597_v56 = vcombine.low %v63_v36, %v79_v42  ;;  %v4599_v57 = vcombine.low %v64_v40, %v80_v41  ;;  %v5746_v36 = vld [vmem:[%s8035_s1 + $0xd10] ss:$8 sps:$4 sm:$0xff]   ;;  %v5749_v42 = vld [vmem:[%s8035_s1 + $0xc00] ss:$8 sps:$4 sm:$0xff]   ;;  %v5757_v41 = vld [vmem:[%s8035_s1 + $0xcf4] ss:$8 sps:$4 sm:$0xff]  }
 0x165   :  { %4078 = vmatprep.subr.bf16.mxu1 %v5670_v60  ;;  %v7376_v60 = vld [vmem:[%s8036_s0 + $0xe0] sm:$0xff] }
 0x166   :  { %v5752_v40 = vld [vmem:[%s8035_s1 + $0xd00] ss:$8 sps:$4 sm:$0xff]  }
 0x167   :  { %4026 = vmatpush2.bf16.msra.mxu0 %v5665_v0  ;;  %v7386_v0 = vld [vmem:[%s8036_s0 + $0xe8] sm:$0xff] }
 0x168   :  { %4079 = vmatpush2.bf16.msra.mxu1 %v5668_v2  ;;  %4027 = vmatprep.subr.bf16.mxu0 %v5673_v8 }
 0x169   :  { %4080 = vmatprep.subr.bf16.mxu1 %v5676_v3  ;;  %v5719_v3 = vld [vmem:[%s8035_s1 + $0xc50] ss:$8 sps:$4 sm:$0xff]  }
 0x16b   :  { %4028 = vmatpush2.bf16.msra.mxu0 %v5671_v13  ;;  %v5722_v13 = vld [vmem:[%s8035_s1 + $0xd50] ss:$8 sps:$4 sm:$0xff]  }
 0x16c   :  { %4081 = vmatpush2.bf16.msra.mxu1 %v5674_v59  ;;  %4029 = vmatprep.subr.bf16.mxu0 %v5679_v62 }
 0x16d   :  { %4082 = vmatprep.subr.bf16.mxu1 %v5682_v63  ;;  %v5727_v63 = vld [vmem:[%s8035_s1 + $0xc44] ss:$8 sps:$4 sm:$0xff]  }
 0x16f   :  { %4030 = vmatpush2.bf16.msra.mxu0 %v5677_v9 }
 0x170   :  { %4083 = vmatpush2.bf16.msra.mxu1 %v5680_v10  ;;  %4031 = vmatprep.subr.bf16.mxu0 %v5685_v11  ;;  %v4570_v11 = vcombine.high %v7371_v47, %v7376_v60 }
 0x171   :  { %4084 = vmatprep.subr.bf16.mxu1 %v5688_v12 }
 0x173   :  { %4032 = vmatpush2.bf16.msra.mxu0 %v5683_v14 }
 0x174   :  { %4085 = vmatpush2.bf16.msra.mxu1 %v5686_v18  ;;  %4033 = vmatprep.subr.bf16.mxu0 %v5691_v24 }
 0x175   :  { %4086 = vmatprep.subr.bf16.mxu1 %v5694_v19 }
 0x177   :  { %4034 = vmatpush2.bf16.msra.mxu0 %v5689_v20  ;;  %v5728_v20 = vld [vmem:[%s8035_s1 + $0xd40] ss:$8 sps:$4 sm:$0xff]  }
 0x178   :  { %4087 = vmatpush2.bf16.msra.mxu1 %v5692_v21  ;;  %4035 = vmatprep.subr.bf16.mxu0 %v5697_v25  ;;  %v5733_v21 = vld [vmem:[%s8035_s1 + $0xc34] ss:$8 sps:$4 sm:$0xff]  }
 0x179   :  { %4088 = vmatprep.subr.bf16.mxu1 %v5700_v26  ;;  %v5731_v26 = vld [vmem:[%s8035_s1 + $0xc30] ss:$8 sps:$4 sm:$0xff]  }
 0x17b   :  { %4036 = vmatpush2.bf16.msra.mxu0 %v5695_v29  ;;  %v5734_v29 = vld [vmem:[%s8035_s1 + $0xd30] ss:$8 sps:$4 sm:$0xff]  }
 0x17c   :  { %4089 = vmatpush2.bf16.msra.mxu1 %v5698_v28  ;;  %4037 = vmatprep.subr.bf16.mxu0 %v5703_v30  ;;  %v5739_v28 = vld [vmem:[%s8035_s1 + $0xc24] ss:$8 sps:$4 sm:$0xff]  }
 0x17d   :  { %4090 = vmatprep.subr.bf16.mxu1 %v5706_v31  ;;  %v5742_v30 = vld [vmem:[%s8035_s1 + $0xd24] ss:$8 sps:$4 sm:$0xff]   ;;  %v5737_v31 = vld [vmem:[%s8035_s1 + $0xc20] ss:$8 sps:$4 sm:$0xff]  }
 0x17f   :  { %4038 = vmatpush2.bf16.msra.mxu0 %v5701_v32  ;;  %v5740_v32 = vld [vmem:[%s8035_s1 + $0xd20] ss:$8 sps:$4 sm:$0xff]  }
 0x180   :  { %4091 = vmatpush2.bf16.msra.mxu1 %v5704_v33  ;;  %4113 = vmatprep.subr.bf16.mxu0 %v5709_v48  ;;  %v5745_v33 = vld [vmem:[%s8035_s1 + $0xc14] ss:$8 sps:$4 sm:$0xff]  }
 0x181   :  { %4166 = vmatprep.subr.bf16.mxu1 %v5712_v35  ;;  %v5748_v48 = vld [vmem:[%s8035_s1 + $0xd14] ss:$8 sps:$4 sm:$0xff]   ;;  %v5743_v35 = vld [vmem:[%s8035_s1 + $0xc10] ss:$8 sps:$4 sm:$0xff]  }
 0x182   :  { %v3723_v50 = vpop.f32.mrf.mxu0  ;;  %4040 = vmatmul.mubr.bf16.vlgmr.msra.gmra.mxu0 %v4565_v37  ;;  %v5751_v37 = vld [vmem:[%s8035_s1 + $0xc04] ss:$8 sps:$4 sm:$0xff]  }
 0x183   :  { %v3776_v51 = vpop.f32.mrf.mxu1  ;;  %4093 = vmatmul.mubr.bf16.vlgmr.msra.gmra.mxu1 %v4567_v38  ;;  %v3724_v61 = vadd.f32 %v3723_v50, %v7109_v1  ;;  %4114 = vmatpush1.bf16.msra.mxu0 %v5707_v4  ;;  %v5724_v1 = vld [vmem:[%s8035_s1 + $0xd54] ss:$8 sps:$4 sm:$0xff]   ;;  %v5754_v38 = vld [vmem:[%s8035_s1 + $0xd04] ss:$8 sps:$4 sm:$0xff]   ;;  %v5764_v50 = vld [vmem:[%s8035_s1 + $0xde0] ss:$8 sps:$4 sm:$0xff]  }
 0x184   :  { %4167 = vmatpush1.bf16.msra.mxu1 %v5710_v58  ;;  %v3725_v22 = vpop.f32.mrf.mxu0  ;;  %4115 = vmatprep.subr.bf16.mxu0 %v5715_v5  ;;  %v5760_v4 = vld [vmem:[%s8035_s1 + $0xdf4] ss:$8 sps:$4 sm:$0xff]   ;;  %v5755_v58 = vld [vmem:[%s8035_s1 + $0xcf0] ss:$8 sps:$4 sm:$0xff]  }
 0x185   :  { %v3778_v23 = vpop.f32.mrf.mxu1  ;;  %4168 = vmatprep.subr.bf16.mxu1 %v5718_v6  ;;  %v7365_v43 = vadd.f32 %v3776_v51, %v3724_v61  ;;  %v3726_v46 = vadd.f32 %v3725_v22, %v7138_v7  ;;  %4049 = vmatprep.mubr.bf16.mxu0 %v4598_v44  ;;  %v7381_v7 = vld [vmem:[%s8036_s0 + $0x68] sm:$0xff]  ;;  %v5758_v5 = vld [vmem:[%s8035_s1 + $0xdf0] ss:$8 sps:$4 sm:$0xff]   ;;  %v5769_v51 = vld [vmem:[%s8035_s1 + $0xcd4] ss:$8 sps:$4 sm:$0xff]  }
 0x186   :  { %4102 = vmatprep.mubr.bf16.mxu1 %v4600_v45  ;;  %v3727_v53 = vpop.f32.mrf.mxu0  ;;  %v4572_v12 = vcombine.high %v7381_v7, %v7386_v0  ;;  %v5763_v6 = vld [vmem:[%s8035_s1 + $0xce4] ss:$8 sps:$4 sm:$0xff]   ;;  %v5761_v45 = vld [vmem:[%s8035_s1 + $0xce0] ss:$8 sps:$4 sm:$0xff]   ;;  %v5772_v61 = vld [vmem:[%s8035_s1 + $0xdd4] ss:$8 sps:$4 sm:$0xff]  }
 0x187   :  { %v3780_v54 = vpop.f32.mrf.mxu1  ;;  %v7388_v2 = vadd.f32 %v3778_v23, %v3726_v46  ;;  %v3728_v8 = vadd.f32 %v3727_v53, %v7147_v15  ;;  %4116 = vmatpush1.bf16.msra.mxu0 %v5713_v16  ;;  %v5730_v15 = vld [vmem:[%s8035_s1 + $0xd44] ss:$8 sps:$4 sm:$0xff]   ;;  %v5767_v16 = vld [vmem:[%s8035_s1 + $0xcd0] ss:$8 sps:$4 sm:$0xff]   ;;  %v5781_v46 = vld [vmem:[%s8035_s1 + $0xcb4] ss:$8 sps:$4 sm:$0xff]  }
 0x188   :  { %4169 = vmatpush1.bf16.msra.mxu1 %v5716_v17  ;;  %v3729_v59 = vpop.f32.mrf.mxu0  ;;  %4117 = vmatprep.subr.bf16.mxu0 %v5721_v52  ;;  %v5766_v44 = vld [vmem:[%s8035_s1 + $0xde4] ss:$8 sps:$4 sm:$0xff]   ;;  %v5770_v17 = vld [vmem:[%s8035_s1 + $0xdd0] ss:$8 sps:$4 sm:$0xff]   ;;  %v5773_v52 = vld [vmem:[%s8035_s1 + $0xcc0] ss:$8 sps:$4 sm:$0xff]  }
 0x189   :  { %v3782_v62 = vpop.f32.mrf.mxu1  ;;  %4170 = vmatprep.subr.bf16.mxu1 %v5724_v1  ;;  %v7403_v9 = vadd.f32 %v3780_v54, %v3728_v8  ;;  %v3730_v10 = vadd.f32 %v3729_v59, %v7160_v27  ;;  %v5725_v27 = vld [vmem:[%s8035_s1 + $0xc40] ss:$8 sps:$4 sm:$0xff]   ;;  %v5775_v22 = vld [vmem:[%s8035_s1 + $0xcc4] ss:$8 sps:$4 sm:$0xff]   ;;  %v5784_v53 = vld [vmem:[%s8035_s1 + $0xdb4] ss:$8 sps:$4 sm:$0xff]  }
 0x18a   :  { %v3733_v14 = vpop.f32.mrf.mxu0  ;;  %4050 = vmatmul.mubr.bf16.gmra.mxu0 %v4597_v56  ;;  %v5778_v23 = vld [vmem:[%s8035_s1 + $0xdc4] ss:$8 sps:$4 sm:$0xff]   ;;  %v5776_v1 = vld [vmem:[%s8035_s1 + $0xdc0] ss:$8 sps:$4 sm:$0xff]   ;;  %v5779_v54 = vld [vmem:[%s8035_s1 + $0xcb0] ss:$8 sps:$4 sm:$0xff]  }
 0x18b   :  { %v3786_v18 = vpop.f32.mrf.mxu1  ;;  %4103 = vmatmul.mubr.bf16.gmra.mxu1 %v4599_v57  ;;  %v7410_v24 = vadd.f32 %v3782_v62, %v3730_v10  ;;  %v3734_v19 = vadd.f32 %v3733_v14, %v7170_v34  ;;  %4118 = vmatpush1.bf16.msra.mxu0 %v5719_v3  ;;  %v5736_v34 = vld [vmem:[%s8035_s1 + $0xd34] ss:$8 sps:$4 sm:$0xff]   ;;  %v5782_v56 = vld [vmem:[%s8035_s1 + $0xdb0] ss:$8 sps:$4 sm:$0xff]   ;;  %v5787_v57 = vld [vmem:[%s8035_s1 + $0xca4] ss:$8 sps:$4 sm:$0xff]  }
 0x18c   :  { %4171 = vmatpush1.bf16.msra.mxu1 %v5722_v13  ;;  %4119 = vmatprep.subr.bf16.mxu0 %v5727_v63  ;;  %v5790_v8 = vld [vmem:[%s8035_s1 + $0xda4] ss:$8 sps:$4 sm:$0xff]   ;;  %v5785_v3 = vld [vmem:[%s8035_s1 + $0xca0] ss:$8 sps:$4 sm:$0xff]   ;;  %v5793_v59 = vld [vmem:[%s8035_s1 + $0xc94] ss:$8 sps:$4 sm:$0xff]  }
 0x18d   :  { %4172 = vmatprep.subr.bf16.mxu1 %v5730_v15  ;;  %v7425_v25 = vadd.f32 %v3786_v18, %v3734_v19  ;;  %4145 = vmatprep.mubr.bf16.mxu0 %v4570_v11  ;;  %v5788_v13 = vld [vmem:[%s8035_s1 + $0xda0] ss:$8 sps:$4 sm:$0xff]   ;;  %v5796_v62 = vld [vmem:[%s8035_s1 + $0xd94] ss:$8 sps:$4 sm:$0xff]   ;;  %v5791_v63 = vld [vmem:[%s8035_s1 + $0xc90] ss:$8 sps:$4 sm:$0xff]  }
 0x18e   :  { %4198 = vmatprep.mubr.bf16.mxu1 %v4572_v12  ;;  %v5794_v15 = vld [vmem:[%s8035_s1 + $0xd90] ss:$8 sps:$4 sm:$0xff]   ;;  %v5799_v10 = vld [vmem:[%s8035_s1 + $0xc84] ss:$8 sps:$4 sm:$0xff]   ;;  %v5797_v12 = vld [vmem:[%s8035_s1 + $0xc80] ss:$8 sps:$4 sm:$0xff]  }
 0x18f   :  { %4120 = vmatpush1.bf16.msra.mxu0 %v5725_v27  ;;  %v5802_v11 = vld [vmem:[%s8035_s1 + $0xd84] ss:$8 sps:$4 sm:$0xff]   ;;  %v5800_v14 = vld [vmem:[%s8035_s1 + $0xd80] ss:$8 sps:$4 sm:$0xff]   ;;  %v5805_v18 = vld [vmem:[%s8035_s1 + $0xe74] ss:$8 sps:$4 sm:$0xff]  }
 0x190   :  { %4173 = vmatpush1.bf16.msra.mxu1 %v5728_v20  ;;  %4121 = vmatprep.subr.bf16.mxu0 %v5733_v21  ;;  %v5808_v19 = vld [vmem:[%s8035_s1 + $0xf74] ss:$8 sps:$4 sm:$0xff]   ;;  %v65_v27 = vld [vmem:[%s8036_s0 + $0x160] sm:$0xff]  ;;  %v4569_v20 = vcombine.low %v7371_v47, %v7376_v60  ;;  %v4571_v21 = vcombine.low %v7381_v7, %v7386_v0  ;;  %v5803_v47 = vld [vmem:[%s8035_s1 + $0xe70] ss:$8 sps:$4 sm:$0xff]  }
 0x191   :  { %4174 = vmatprep.subr.bf16.mxu1 %v5736_v34  ;;  %v81_v34 = vld [vmem:[%s8036_s0 + $0x1e0] sm:$0xff]  ;;  %v5806_v60 = vld [vmem:[%s8035_s1 + $0xf70] ss:$8 sps:$4 sm:$0xff]  }
 0x192   :  { %v5811_v7 = vld [vmem:[%s8035_s1 + $0xe64] ss:$8 sps:$4 sm:$0xff]  }
 0x193   :  { %4122 = vmatpush1.bf16.msra.mxu0 %v5731_v26  ;;  %v66_v26 = vld [vmem:[%s8036_s0 + $0x168] sm:$0xff] }
 0x194   :  { %4175 = vmatpush1.bf16.msra.mxu1 %v5734_v29  ;;  %4123 = vmatprep.subr.bf16.mxu0 %v5739_v28  ;;  %v82_v29 = vld [vmem:[%s8036_s0 + $0x1e8] sm:$0xff]  ;;  %v4602_v28 = vcombine.high %v65_v27, %v81_v34 }
 0x195   :  { %4176 = vmatprep.subr.bf16.mxu1 %v5742_v30  ;;  %v5814_v0 = vld [vmem:[%s8035_s1 + $0xf64] ss:$8 sps:$4 sm:$0xff]   ;;  %v4604_v30 = vcombine.high %v66_v26, %v82_v29 }
 0x197   :  { %4124 = vmatpush1.bf16.msra.mxu0 %v5737_v31  ;;  %v5809_v31 = vld [vmem:[%s8035_s1 + $0xe60] ss:$8 sps:$4 sm:$0xff]  }
 0x198   :  { %4177 = vmatpush1.bf16.msra.mxu1 %v5740_v32  ;;  %4125 = vmatprep.subr.bf16.mxu0 %v5745_v33  ;;  %v5812_v32 = vld [vmem:[%s8035_s1 + $0xf60] ss:$8 sps:$4 sm:$0xff]   ;;  %v5817_v33 = vld [vmem:[%s8035_s1 + $0xe54] ss:$8 sps:$4 sm:$0xff]  }
 0x199   :  { %4178 = vmatprep.subr.bf16.mxu1 %v5748_v48  ;;  %v5820_v48 = vld [vmem:[%s8035_s1 + $0xf54] ss:$8 sps:$4 sm:$0xff]  }
 0x19b   :  { %4126 = vmatpush1.bf16.msra.mxu0 %v5743_v35  ;;  %v7614_v35 = vld [vmem:[%s8036_s0 + $0x70] sm:$0xff] }
 0x19c   :  { %4179 = vmatpush1.bf16.msra.mxu1 %v5746_v36  ;;  %4127 = vmatprep.subr.bf16.mxu0 %v5751_v37  ;;  %v4601_v36 = vcombine.low %v65_v27, %v81_v34  ;;  %v4603_v37 = vcombine.low %v66_v26, %v82_v29  ;;  %v5863_v27 = vld [vmem:[%s8035_s1 + $0xed0] ss:$8 sps:$4 sm:$0xff]   ;;  %v5874_v34 = vld [vmem:[%s8035_s1 + $0xfc4] ss:$8 sps:$4 sm:$0xff]   ;;  %v5869_v26 = vld [vmem:[%s8035_s1 + $0xec0] ss:$8 sps:$4 sm:$0xff]  }
 0x19d   :  { %4180 = vmatprep.subr.bf16.mxu1 %v5754_v38  ;;  %v7619_v38 = vld [vmem:[%s8036_s0 + $0xf0] sm:$0xff]  ;;  %v5872_v29 = vld [vmem:[%s8035_s1 + $0xfc0] ss:$8 sps:$4 sm:$0xff]  }
 0x19f   :  { %4128 = vmatpush1.bf16.msra.mxu0 %v5749_v42  ;;  %v7624_v42 = vld [vmem:[%s8036_s0 + $0x78] sm:$0xff] }
 0x1a0   :  { %4181 = vmatpush1.bf16.msra.mxu1 %v5752_v40  ;;  %4129 = vmatprep.subr.bf16.mxu0 %v5757_v41  ;;  %v7629_v40 = vld [vmem:[%s8036_s0 + $0xf8] sm:$0xff] }
 0x1a1   :  { %4182 = vmatprep.subr.bf16.mxu1 %v5760_v4  ;;  %v5815_v41 = vld [vmem:[%s8035_s1 + $0xe50] ss:$8 sps:$4 sm:$0xff]  }
 0x1a2   :  { %v5818_v4 = vld [vmem:[%s8035_s1 + $0xf50] ss:$8 sps:$4 sm:$0xff]  }
 0x1a3   :  { %4130 = vmatpush2.bf16.msra.mxu0 %v5755_v58  ;;  %v5823_v58 = vld [vmem:[%s8035_s1 + $0xe44] ss:$8 sps:$4 sm:$0xff]  }
 0x1a4   :  { %4183 = vmatpush2.bf16.msra.mxu1 %v5758_v5  ;;  %4131 = vmatprep.subr.bf16.mxu0 %v5763_v6  ;;  %v5826_v5 = vld [vmem:[%s8035_s1 + $0xf44] ss:$8 sps:$4 sm:$0xff]   ;;  %v4574_v6 = vcombine.high %v7614_v35, %v7619_v38 }
 0x1a5   :  { %4184 = vmatprep.subr.bf16.mxu1 %v5766_v44  ;;  %v4576_v44 = vcombine.high %v7624_v42, %v7629_v40 }
 0x1a7   :  { %4132 = vmatpush2.bf16.msra.mxu0 %v5761_v45  ;;  %v5821_v45 = vld [vmem:[%s8035_s1 + $0xe40] ss:$8 sps:$4 sm:$0xff]  }
 0x1a8   :  { %4185 = vmatpush2.bf16.msra.mxu1 %v5764_v50  ;;  %4133 = vmatprep.subr.bf16.mxu0 %v5769_v51  ;;  %v5824_v50 = vld [vmem:[%s8035_s1 + $0xf40] ss:$8 sps:$4 sm:$0xff]   ;;  %v5829_v51 = vld [vmem:[%s8035_s1 + $0xe34] ss:$8 sps:$4 sm:$0xff]  }
 0x1a9   :  { %4186 = vmatprep.subr.bf16.mxu1 %v5772_v61  ;;  %v5832_v61 = vld [vmem:[%s8035_s1 + $0xf34] ss:$8 sps:$4 sm:$0xff]  }
 0x1ab   :  { %4134 = vmatpush2.bf16.msra.mxu0 %v5767_v16  ;;  %v5827_v16 = vld [vmem:[%s8035_s1 + $0xe30] ss:$8 sps:$4 sm:$0xff]  }
 0x1ac   :  { %4187 = vmatpush2.bf16.msra.mxu1 %v5770_v17  ;;  %4135 = vmatprep.subr.bf16.mxu0 %v5775_v22  ;;  %v5830_v17 = vld [vmem:[%s8035_s1 + $0xf30] ss:$8 sps:$4 sm:$0xff]   ;;  %v5835_v22 = vld [vmem:[%s8035_s1 + $0xe24] ss:$8 sps:$4 sm:$0xff]  }
 0x1ad   :  { %4188 = vmatprep.subr.bf16.mxu1 %v5778_v23  ;;  %v5838_v23 = vld [vmem:[%s8035_s1 + $0xf24] ss:$8 sps:$4 sm:$0xff]  }
 0x1af   :  { %4136 = vmatpush2.bf16.msra.mxu0 %v5773_v52  ;;  %v5833_v52 = vld [vmem:[%s8035_s1 + $0xe20] ss:$8 sps:$4 sm:$0xff]  }
 0x1b0   :  { %4189 = vmatpush2.bf16.msra.mxu1 %v5776_v1  ;;  %4137 = vmatprep.subr.bf16.mxu0 %v5781_v46  ;;  %v5836_v1 = vld [vmem:[%s8035_s1 + $0xf20] ss:$8 sps:$4 sm:$0xff]   ;;  %v5841_v46 = vld [vmem:[%s8035_s1 + $0xe14] ss:$8 sps:$4 sm:$0xff]  }
 0x1b1   :  { %4190 = vmatprep.subr.bf16.mxu1 %v5784_v53  ;;  %v5844_v53 = vld [vmem:[%s8035_s1 + $0xf14] ss:$8 sps:$4 sm:$0xff]  }
 0x1b3   :  { %4138 = vmatpush2.bf16.msra.mxu0 %v5779_v54  ;;  %v5839_v54 = vld [vmem:[%s8035_s1 + $0xe10] ss:$8 sps:$4 sm:$0xff]  }
 0x1b4   :  { %4191 = vmatpush2.bf16.msra.mxu1 %v5782_v56  ;;  %4139 = vmatprep.subr.bf16.mxu0 %v5787_v57  ;;  %v5842_v56 = vld [vmem:[%s8035_s1 + $0xf10] ss:$8 sps:$4 sm:$0xff]   ;;  %v5847_v57 = vld [vmem:[%s8035_s1 + $0xe04] ss:$8 sps:$4 sm:$0xff]  }
 0x1b5   :  { %4192 = vmatprep.subr.bf16.mxu1 %v5790_v8  ;;  %v5850_v8 = vld [vmem:[%s8035_s1 + $0xf04] ss:$8 sps:$4 sm:$0xff]  }
 0x1b7   :  { %4140 = vmatpush2.bf16.msra.mxu0 %v5785_v3  ;;  %v5845_v3 = vld [vmem:[%s8035_s1 + $0xe00] ss:$8 sps:$4 sm:$0xff]  }
 0x1b8   :  { %4193 = vmatpush2.bf16.msra.mxu1 %v5788_v13  ;;  %4141 = vmatprep.subr.bf16.mxu0 %v5793_v59  ;;  %v5848_v13 = vld [vmem:[%s8035_s1 + $0xf00] ss:$8 sps:$4 sm:$0xff]   ;;  %v5853_v59 = vld [vmem:[%s8035_s1 + $0xef4] ss:$8 sps:$4 sm:$0xff]  }
 0x1b9   :  { %4194 = vmatprep.subr.bf16.mxu1 %v5796_v62  ;;  %v5856_v62 = vld [vmem:[%s8035_s1 + $0xff4] ss:$8 sps:$4 sm:$0xff]  }
 0x1bb   :  { %4142 = vmatpush2.bf16.msra.mxu0 %v5791_v63  ;;  %v5851_v63 = vld [vmem:[%s8035_s1 + $0xef0] ss:$8 sps:$4 sm:$0xff]  }
 0x1bc   :  { %4195 = vmatpush2.bf16.msra.mxu1 %v5794_v15  ;;  %4143 = vmatprep.subr.bf16.mxu0 %v5799_v10  ;;  %v5854_v15 = vld [vmem:[%s8035_s1 + $0xff0] ss:$8 sps:$4 sm:$0xff]   ;;  %v5859_v10 = vld [vmem:[%s8035_s1 + $0xee4] ss:$8 sps:$4 sm:$0xff]  }
 0x1bd   :  { %4196 = vmatprep.subr.bf16.mxu1 %v5802_v11  ;;  %v5862_v11 = vld [vmem:[%s8035_s1 + $0xfe4] ss:$8 sps:$4 sm:$0xff]  }
 0x1bf   :  { %4144 = vmatpush2.bf16.msra.mxu0 %v5797_v12  ;;  %v5857_v12 = vld [vmem:[%s8035_s1 + $0xee0] ss:$8 sps:$4 sm:$0xff]  }
 0x1c0   :  { %4197 = vmatpush2.bf16.msra.mxu1 %v5800_v14  ;;  %4219 = vmatprep.subr.bf16.mxu0 %v5805_v18  ;;  %v5860_v14 = vld [vmem:[%s8035_s1 + $0xfe0] ss:$8 sps:$4 sm:$0xff]   ;;  %v5865_v18 = vld [vmem:[%s8035_s1 + $0xed4] ss:$8 sps:$4 sm:$0xff]  }
 0x1c1   :  { %4272 = vmatprep.subr.bf16.mxu1 %v5808_v19  ;;  %v5868_v19 = vld [vmem:[%s8035_s1 + $0xfd4] ss:$8 sps:$4 sm:$0xff]  }
 0x1c2   :  { %4146 = vmatmul.mubr.bf16.vlgmr.msra.gmra.mxu0 %v4569_v20  ;;  %v5866_v20 = vld [vmem:[%s8035_s1 + $0xfd0] ss:$8 sps:$4 sm:$0xff]  }
 0x1c3   :  { %4199 = vmatmul.mubr.bf16.vlgmr.msra.gmra.mxu1 %v4571_v21  ;;  %4220 = vmatpush1.bf16.msra.mxu0 %v5803_v47  ;;  %v5871_v21 = vld [vmem:[%s8035_s1 + $0xec4] ss:$8 sps:$4 sm:$0xff]   ;;  %v5877_v47 = vld [vmem:[%s8035_s1 + $0xeb4] ss:$8 sps:$4 sm:$0xff]  }
 0x1c4   :  { %4273 = vmatpush1.bf16.msra.mxu1 %v5806_v60  ;;  %4221 = vmatprep.subr.bf16.mxu0 %v5811_v7  ;;  %v5880_v60 = vld [vmem:[%s8035_s1 + $0xfb4] ss:$8 sps:$4 sm:$0xff]   ;;  %v5875_v7 = vld [vmem:[%s8035_s1 + $0xeb0] ss:$8 sps:$4 sm:$0xff]  }
 0x1c5   :  { %4274 = vmatprep.subr.bf16.mxu1 %v5814_v0  ;;  %4155 = vmatprep.mubr.bf16.mxu0 %v4602_v28  ;;  %v5878_v0 = vld [vmem:[%s8035_s1 + $0xfb0] ss:$8 sps:$4 sm:$0xff]   ;;  %v5883_v28 = vld [vmem:[%s8035_s1 + $0xea4] ss:$8 sps:$4 sm:$0xff]  }
 0x1c6   :  { %4208 = vmatprep.mubr.bf16.mxu1 %v4604_v30  ;;  %v5886_v30 = vld [vmem:[%s8035_s1 + $0xfa4] ss:$8 sps:$4 sm:$0xff]  }
 0x1c7   :  { %4222 = vmatpush1.bf16.msra.mxu0 %v5809_v31  ;;  %v5881_v31 = vld [vmem:[%s8035_s1 + $0xea0] ss:$8 sps:$4 sm:$0xff]  }
 0x1c8   :  { %4275 = vmatpush1.bf16.msra.mxu1 %v5812_v32  ;;  %4223 = vmatprep.subr.bf16.mxu0 %v5817_v33  ;;  %v5884_v32 = vld [vmem:[%s8035_s1 + $0xfa0] ss:$8 sps:$4 sm:$0xff]   ;;  %v5889_v33 = vld [vmem:[%s8035_s1 + $0xe94] ss:$8 sps:$4 sm:$0xff]  }
 0x1c9   :  { %4276 = vmatprep.subr.bf16.mxu1 %v5820_v48  ;;  %v5892_v48 = vld [vmem:[%s8035_s1 + $0xf94] ss:$8 sps:$4 sm:$0xff]  }
 0x1ca   :  { %4156 = vmatmul.mubr.bf16.gmra.mxu0 %v4601_v36  ;;  %v5887_v36 = vld [vmem:[%s8035_s1 + $0xe90] ss:$8 sps:$4 sm:$0xff]  }
 0x1cb   :  { %4209 = vmatmul.mubr.bf16.gmra.mxu1 %v4603_v37  ;;  %4224 = vmatpush1.bf16.msra.mxu0 %v5815_v41  ;;  %v5890_v37 = vld [vmem:[%s8035_s1 + $0xf90] ss:$8 sps:$4 sm:$0xff]   ;;  %v5895_v41 = vld [vmem:[%s8035_s1 + $0xe84] ss:$8 sps:$4 sm:$0xff]  }
 0x1cc   :  { %4277 = vmatpush1.bf16.msra.mxu1 %v5818_v4  ;;  %4225 = vmatprep.subr.bf16.mxu0 %v5823_v58  ;;  %v5898_v4 = vld [vmem:[%s8035_s1 + $0xf84] ss:$8 sps:$4 sm:$0xff]   ;;  %v5893_v58 = vld [vmem:[%s8035_s1 + $0xe80] ss:$8 sps:$4 sm:$0xff]  }
 0x1cd   :  { %4278 = vmatprep.subr.bf16.mxu1 %v5826_v5  ;;  %4251 = vmatprep.mubr.bf16.mxu0 %v4574_v6  ;;  %v5896_v5 = vld [vmem:[%s8035_s1 + $0xf80] ss:$8 sps:$4 sm:$0xff]   ;;  %v67_v6 = vld [vmem:[%s8036_s0 + $0x170] sm:$0xff] }
 0x1ce   :  { %4304 = vmatprep.mubr.bf16.mxu1 %v4576_v44  ;;  %v83_v44 = vld [vmem:[%s8036_s0 + $0x1f0] sm:$0xff] }
 0x1cf   :  { %4226 = vmatpush1.bf16.msra.mxu0 %v5821_v45  ;;  %v68_v45 = vld [vmem:[%s8036_s0 + $0x178] sm:$0xff] }
 0x1d0   :  { %4279 = vmatpush1.bf16.msra.mxu1 %v5824_v50  ;;  %4227 = vmatprep.subr.bf16.mxu0 %v5829_v51  ;;  %v84_v50 = vld [vmem:[%s8036_s0 + $0x1f8] sm:$0xff]  ;;  %v4573_v51 = vcombine.low %v7614_v35, %v7619_v38  ;;  %v7817_v35 = vpop.f32.mrf.mxu1 }
 0x1d1   :  { %4280 = vmatprep.subr.bf16.mxu1 %v5832_v61  ;;  %v4575_v61 = vcombine.low %v7624_v42, %v7629_v40 }
 0x1d2   :  { %v7821_v40 = vpop.f32.mrf.mxu1 }
 0x1d3   :  { %4228 = vmatpush1.bf16.msra.mxu0 %v5827_v16  ;;  %v4606_v16 = vcombine.high %v67_v6, %v83_v44 }
 0x1d4   :  { %4281 = vmatpush1.bf16.msra.mxu1 %v5830_v17  ;;  %4229 = vmatprep.subr.bf16.mxu0 %v5835_v22  ;;  %v4608_v17 = vcombine.high %v68_v45, %v84_v50  ;;  %v4605_v22 = vcombine.low %v67_v6, %v83_v44 }
 0x1d5   :  { %4282 = vmatprep.subr.bf16.mxu1 %v5838_v23  ;;  %v4607_v23 = vcombine.low %v68_v45, %v84_v50 }
 0x1d7   :  { %4230 = vmatpush1.bf16.msra.mxu0 %v5833_v52  ;;  %v7813_v52 = vpop.f32.mrf.mxu0 }
 0x1d8   :  { %4283 = vmatpush1.bf16.msra.mxu1 %v5836_v1  ;;  %4231 = vmatprep.subr.bf16.mxu0 %v5841_v46 }
 0x1d9   :  { %4284 = vmatprep.subr.bf16.mxu1 %v5844_v53  ;;  %v7815_v1 = vpop.f32.mrf.mxu0  ;;  %v7823_v53 = vpop.f32.mrf.mxu1 }
 0x1db   :  { %4232 = vmatpush1.bf16.msra.mxu0 %v5839_v54  ;;  %v7819_v38 = vpop.f32.mrf.mxu0  ;;  %v3882_v54 = vpop.f32.mrf.mxu1 }
 0x1dc   :  { %4285 = vmatpush1.bf16.msra.mxu1 %v5842_v56  ;;  %4233 = vmatprep.subr.bf16.mxu0 %v5847_v57 }
 0x1dd   :  { %4286 = vmatprep.subr.bf16.mxu1 %v5850_v8  ;;  %v3829_v42 = vpop.f32.mrf.mxu0  ;;  %v3884_v57 = vpop.f32.mrf.mxu1 }
 0x1df   :  { %4234 = vmatpush1.bf16.msra.mxu0 %v5845_v3  ;;  %v3831_v46 = vpop.f32.mrf.mxu0  ;;  %v7825_v3 = vpop.f32.mrf.mxu1 }
 0x1e0   :  { %4287 = vmatpush1.bf16.msra.mxu1 %v5848_v13  ;;  %4235 = vmatprep.subr.bf16.mxu0 %v5853_v59 }
 0x1e1   :  { %4288 = vmatprep.subr.bf16.mxu1 %v5856_v62  ;;  %v3833_v56 = vpop.f32.mrf.mxu0  ;;  %v7829_v59 = vpop.f32.mrf.mxu1 }
 0x1e3   :  { %4236 = vmatpush2.bf16.msra.mxu0 %v5851_v63  ;;  %v3835_v8 = vpop.f32.mrf.mxu0  ;;  %v8038_v63 = vlaneseq }
 0x1e4   :  { %4289 = vmatpush2.bf16.msra.mxu1 %v5854_v15  ;;  %4237 = vmatprep.subr.bf16.mxu0 %v5859_v10  ;;  %v7833_v15 = vpop.f32.mrf.mxu1  ;;  %v8041_v10 = vmov 0 }
 0x1e5   :  { %4290 = vmatprep.subr.bf16.mxu1 %v5862_v11  ;;  %v7827_v13 = vpop.f32.mrf.mxu0  ;;  %vm7836_vm0 = vcmp.lt.s32.totalorder %v8038_v63, 256 }
 0x1e6   :  { %v8042_v10 = vsel %vm7836_vm0, 4294967295, %v8041_v10 }
 0x1e7   :  { %4238 = vmatpush2.bf16.msra.mxu0 %v5857_v12  ;;  %v7831_v62 = vpop.f32.mrf.mxu0  ;;  %8043 = vst [vmem:[#allocation5_spill] sm:$0xff] %v8042_v10  ;;  %v5901_v12 = vmov 0.0  }
 0x1e8   :  { %4291 = vmatpush2.bf16.msra.mxu1 %v5860_v14  ;;  %4239 = vmatprep.subr.bf16.mxu0 %v5865_v18  ;;  %19 = vst.msk [vmem:[#allocation3] sm:$0x3] %vm7836_vm0, %v5901_v12  ;;  %20 = vst.msk [vmem:[#allocation4] sm:$0x3] %vm7836_vm0, %v5901_v12  ;;  %v7846_v14 = vpop.f32.mrf.mxu1 }
 0x1e9   :  { %4292 = vmatprep.subr.bf16.mxu1 %v5868_v19  ;;  %v7840_v11 = vpop.f32.mrf.mxu0 }
 0x1ea   :  { %v7850_v19 = vpop.f32.mrf.mxu1 }
 0x1eb   :  { %4240 = vmatpush2.bf16.msra.mxu0 %v5863_v27  ;;  %v7848_v18 = vpop.f32.mrf.mxu0 }
 0x1ec   :  { %4293 = vmatpush2.bf16.msra.mxu1 %v5866_v20  ;;  %4241 = vmatprep.subr.bf16.mxu0 %v5871_v21  ;;  %v7852_v20 = vpop.f32.mrf.mxu1 }
 0x1ed   :  { %4294 = vmatprep.subr.bf16.mxu1 %v5874_v34 }
 0x1ef   :  { %4242 = vmatpush2.bf16.msra.mxu0 %v5869_v26 }
 0x1f0   :  { %4295 = vmatpush2.bf16.msra.mxu1 %v5872_v29  ;;  %4243 = vmatprep.subr.bf16.mxu0 %v5877_v47 }
 0x1f1   :  { %4296 = vmatprep.subr.bf16.mxu1 %v5880_v60 }
 0x1f3   :  { %4244 = vmatpush2.bf16.msra.mxu0 %v5875_v7 }
 0x1f4   :  { %4297 = vmatpush2.bf16.msra.mxu1 %v5878_v0  ;;  %4245 = vmatprep.subr.bf16.mxu0 %v5883_v28 }
 0x1f5   :  { %4298 = vmatprep.subr.bf16.mxu1 %v5886_v30 }
 0x1f7   :  { %4246 = vmatpush2.bf16.msra.mxu0 %v5881_v31 }
 0x1f8   :  { %4299 = vmatpush2.bf16.msra.mxu1 %v5884_v32  ;;  %4247 = vmatprep.subr.bf16.mxu0 %v5889_v33 }
 0x1f9   :  { %4300 = vmatprep.subr.bf16.mxu1 %v5892_v48 }
 0x1fb   :  { %4248 = vmatpush2.bf16.msra.mxu0 %v5887_v36 }
 0x1fc   :  { %4301 = vmatpush2.bf16.msra.mxu1 %v5890_v37  ;;  %4249 = vmatprep.subr.bf16.mxu0 %v5895_v41 }
 0x1fd   :  { %4302 = vmatprep.subr.bf16.mxu1 %v5898_v4 }
 0x1ff   :  { %4250 = vmatpush2.bf16.msra.mxu0 %v5893_v58 }
 0x200   :  { %4303 = vmatpush2.bf16.msra.mxu1 %v5896_v5 }
 0x202   :  { %4252 = vmatmul.mubr.bf16.vlgmr.msra.gmra.mxu0 %v4573_v51  ;;  %v3935_v27 = vpop.f32.mrf.mxu0 }
 0x203   :  { %4305 = vmatmul.mubr.bf16.vlgmr.msra.gmra.mxu1 %v4575_v61  ;;  %4261 = vmatprep.mubr.bf16.mxu0 %v4606_v16  ;;  %v3988_v34 = vpop.f32.mrf.mxu1 }
 0x204   :  { %4314 = vmatprep.mubr.bf16.mxu1 %v4608_v17  ;;  %v3937_v21 = vpop.f32.mrf.mxu0 }
 0x205   :  { %v3990_v29 = vpop.f32.mrf.mxu1 }
 0x206   :  { %v3939_v26 = vpop.f32.mrf.mxu0 }
 0x207   :  { %v7854_v60 = vpop.f32.mrf.mxu1 }
 0x208   :  { %v3941_v47 = vpop.f32.mrf.mxu0 }
 0x209   :  { %v7858_v0 = vpop.f32.mrf.mxu1 }
 0x20a   :  { %4262 = vmatmul.mubr.bf16.gmra.mxu0 %v4605_v22  ;;  %v7856_v7 = vpop.f32.mrf.mxu0 }
 0x20b   :  { %4315 = vmatmul.mubr.bf16.gmra.mxu1 %v4607_v23  ;;  %v7862_v30 = vpop.f32.mrf.mxu1 }
 0x20c   :  { %v7860_v28 = vpop.f32.mrf.mxu0 }
 0x20d   :  { %v7866_v32 = vpop.f32.mrf.mxu1 }
 0x20e   :  { %v7864_v31 = vpop.f32.mrf.mxu0  ;;  %8044 = vst [vmem:[#allocation6_spill] sm:$0xff] %v7866_v32 }
 0x20f   :  { %v7870_v48 = vpop.f32.mrf.mxu1 }
 0x210   :  { %v7868_v33 = vpop.f32.mrf.mxu0  ;;  %8045 = vst [vmem:[#allocation7_spill] sm:$0xff] %v7870_v48 }
 0x211   :  { %v7872_v37 = vpop.f32.mrf.mxu1 }
 0x212   :  { %8046 = vst [vmem:[#allocation8_spill] sm:$0xff] %v7872_v37 }
 0x242   :  { %v4041_v36 = vpop.f32.mrf.mxu0 }
 0x243   :  { %v4094_v41 = vpop.f32.mrf.mxu1 }
 0x244   :  { %v4043_v4 = vpop.f32.mrf.mxu0 }
 0x245   :  { %v7874_v58 = vpop.f32.mrf.mxu1 }
 0x246   :  { %v4045_v5 = vpop.f32.mrf.mxu0 }
 0x247   :  { %v7876_v6 = vpop.f32.mrf.mxu1 }
 0x248   :  { %v7878_v44 = vpop.f32.mrf.mxu0 }
 0x249   :  { %v7880_v45 = vpop.f32.mrf.mxu1 }
 0x24a   :  { %8047 = vst [vmem:[#allocation9_spill] sm:$0xff] %v7880_v45  ;;  %v7882_v50 = vpop.f32.mrf.mxu0 }
 0x24b   :  { %8048 = vst [vmem:[#allocation10_spill] sm:$0xff] %v7882_v50  ;;  %v7884_v51 = vpop.f32.mrf.mxu1 }
 0x24c   :  { %8049 = vst [vmem:[#allocation11_spill] sm:$0xff] %v7884_v51  ;;  %v7886_v61 = vpop.f32.mrf.mxu0  ;;  %v3830_v51 = vadd.f32 %v3829_v42, %v7365_v43  ;;  %v3740_v43 = vadd.f32 %v7819_v38, %v7190_v55 }
 0x24d   :  { %8050 = vst [vmem:[#allocation12_spill] sm:$0xff] %v7886_v61  ;;  %v7888_v16 = vpop.f32.mrf.mxu1  ;;  %v3832_v61 = vadd.f32 %v3831_v46, %v7388_v2 }
 0x24e   :  { %8051 = vst [vmem:[#allocation13_spill] sm:$0xff] %v7888_v16  ;;  %v7890_v17 = vpop.f32.mrf.mxu0  ;;  %v3793_v55 = vadd.f32 %v7823_v53, %v3740_v43 }
 0x24f   :  { %8052 = vst [vmem:[#allocation14_spill] sm:$0xff] %v7890_v17  ;;  %v7892_v22 = vpop.f32.mrf.mxu1  ;;  %v3883_v17 = vadd.f32 %v3882_v54, %v3830_v51  ;;  %v3885_v32 = vadd.f32 %v3884_v57, %v3832_v61 }
 0x250   :  { %8053 = vst [vmem:[#allocation15_spill] sm:$0xff] %v7892_v22  ;;  %v7894_v23 = vpop.f32.mrf.mxu0  ;;  %v3834_v22 = vadd.f32 %v3833_v56, %v7403_v9  ;;  %v3840_v9 = vadd.f32 %v7827_v13, %v7425_v25 }
 0x251   :  { %8054 = vst [vmem:[#allocation16_spill] sm:$0xff] %v7894_v23  ;;  %v7896_v12 = vpop.f32.mrf.mxu1  ;;  %v3736_v23 = vadd.f32 %v7813_v52, %v7179_v39  ;;  %v3936_v50 = vadd.f32 %v3935_v27, %v3883_v17  ;;  %v3938_v46 = vadd.f32 %v3937_v21, %v3885_v32  ;;  %v8061_v17 = vld [vmem:[#allocation9_spill] sm:$0xff] }
 0x252   :  { %8055 = vst [vmem:[#allocation17_spill] sm:$0xff] %v7896_v12  ;;  %v3738_v12 = vadd.f32 %v7815_v1, %v7188_v49  ;;  %v3887_v42 = vadd.f32 %v7825_v3, %v3834_v22  ;;  %v3893_v25 = vadd.f32 %v7833_v15, %v3840_v9 }
 0x253   :  { %v3789_v39 = vadd.f32 %v7817_v35, %v3736_v23  ;;  %v3989_v54 = vadd.f32 %v3988_v34, %v3936_v50  ;;  %v8060_v50 = vld [vmem:[#allocation7_spill] sm:$0xff] }
 0x254   :  { %v3791_v49 = vadd.f32 %v7821_v40, %v3738_v12  ;;  %v3940_v56 = vadd.f32 %v3939_v26, %v3887_v42  ;;  %v3846_v40 = vadd.f32 %v7848_v18, %v3793_v55  ;;  %v3946_v21 = vadd.f32 %v7856_v7, %v3893_v25  ;;  %v8064_v12 = vld [vmem:[#allocation12_spill] sm:$0xff] }
 0x255   :  { %v3842_v38 = vadd.f32 %v7831_v62, %v3789_v39  ;;  %v4042_v35 = vadd.f32 %v4041_v36, %v3989_v54 }
 0x256   :  { %v3844_v57 = vadd.f32 %v7840_v11, %v3791_v49  ;;  %v8065_v43 = vld [vmem:[#allocation14_spill] sm:$0xff] }
 0x257   :  { %v3895_v53 = vadd.f32 %v7846_v14, %v3842_v38  ;;  %v4095_v15 = vadd.f32 %v4094_v41, %v4042_v35  ;;  %v8058_v41 = vld [vmem:[#allocation10_spill] sm:$0xff] }
 0x258   :  { %v3897_v62 = vadd.f32 %v7850_v19, %v3844_v57 }
 0x259   :  { %v3948_v18 = vadd.f32 %v7860_v28, %v3895_v53 }
 0x282   :  { %v4147_v63 = vpop.f32.mrf.mxu0 }
 0x283   :  { %v7898_v10 = vpop.f32.mrf.mxu1 }
 0x284   :  { %8056 = vst [vmem:[#allocation18_spill] sm:$0xff] %v7898_v10  ;;  %v4149_v37 = vpop.f32.mrf.mxu0 }
 0x285   :  { %v7900_v45 = vpop.f32.mrf.mxu1 }
 0x286   :  { %8057 = vst [vmem:[#allocation19_spill] sm:$0xff] %v7900_v45  ;;  %v4151_v48 = vpop.f32.mrf.mxu0  ;;  %v3836_v45 = vadd.f32 %v3835_v8, %v7410_v24  ;;  %v3991_v8 = vadd.f32 %v3990_v29, %v3938_v46  ;;  %v3899_v29 = vadd.f32 %v7852_v20, %v3846_v40  ;;  %v8070_v40 = vld [vmem:[#allocation15_spill] sm:$0xff] }
 0x287   :  { %v7904_v16 = vpop.f32.mrf.mxu1 }
 0x288   :  { %v4153_v10 = vpop.f32.mrf.mxu0  ;;  %v3889_v24 = vadd.f32 %v7829_v59, %v3836_v45  ;;  %v3993_v59 = vadd.f32 %v7854_v60, %v3940_v56  ;;  %v4044_v34 = vadd.f32 %v4043_v4, %v3991_v8  ;;  %v3999_v60 = vadd.f32 %v7862_v30, %v3946_v21  ;;  %v8059_v45 = vld [vmem:[#allocation6_spill] sm:$0xff]  ;;  %v8068_v56 = vld [vmem:[#allocation16_spill] sm:$0xff] }
 0x289   :  { %v7914_v2 = vpop.f32.mrf.mxu1  ;;  %v4148_v4 = vadd.f32 %v4147_v63, %v4095_v15  ;;  %v3952_v19 = vadd.f32 %v7868_v33, %v3899_v29  ;;  %v4001_v28 = vadd.f32 %v8059_v45, %v3948_v18 }
 0x28a   :  { %v4157_v52 = vpop.f32.mrf.mxu0  ;;  %v3942_v3 = vadd.f32 %v3941_v47, %v3889_v24  ;;  %v4046_v26 = vadd.f32 %v4045_v5, %v3993_v59  ;;  %v3950_v47 = vadd.f32 %v7864_v31, %v3897_v62  ;;  %v4097_v7 = vadd.f32 %v7874_v58, %v4044_v34 }
 0x28b   :  { %v7921_v1 = vpop.f32.mrf.mxu1  ;;  %v4052_v5 = vadd.f32 %v8058_v41, %v3999_v60  ;;  %v8062_v22 = vld [vmem:[#allocation18_spill] sm:$0xff]  ;;  %v4054_v33 = vadd.f32 %v8064_v12, %v4001_v28 }
 0x28c   :  { %v4159_v13 = vpop.f32.mrf.mxu0  ;;  %v3995_v11 = vadd.f32 %v7858_v0, %v3942_v3  ;;  %v4099_v0 = vadd.f32 %v7876_v6, %v4046_v26  ;;  %v4150_v20 = vadd.f32 %v4149_v37, %v4097_v7  ;;  %v4003_v31 = vadd.f32 %v8060_v50, %v3950_v47  ;;  %v8066_v37 = vld [vmem:[#allocation11_spill] sm:$0xff]  ;;  %v8069_v3 = vld [vmem:[#allocation13_spill] sm:$0xff] }
 0x28d   :  { %v7929_v27 = vpop.f32.mrf.mxu1  ;;  %v4201_v58 = vadd.f32 %v8062_v22, %v4148_v4  ;;  %v4105_v46 = vadd.f32 %v8066_v37, %v4052_v5  ;;  %v8067_v39 = vld [vmem:[#allocation19_spill] sm:$0xff]  ;;  %v4107_v35 = vadd.f32 %v8069_v3, %v4054_v33  ;;  %v5902_v3 = vmov 1966171168  }
 0x28e   :  { %v4161_v32 = vpop.f32.mrf.mxu0  ;;  %v4048_v14 = vadd.f32 %v7878_v44, %v3995_v11  ;;  %v4152_v23 = vadd.f32 %v4151_v48, %v4099_v0  ;;  %v8063_v44 = vld [vmem:[#allocation8_spill] sm:$0xff]  ;;  %v4056_v6 = vadd.f32 %v8065_v43, %v4003_v31  ;;  %v4203_v49 = vadd.f32 %v8067_v39, %v4150_v20  ;;  %v8071_v11 = vld [vmem:[#allocation17_spill] sm:$0xff] }
 0x28f   :  { %v4214_v36 = vpop.f32.mrf.mxu1  ;;  %v4005_v63 = vadd.f32 %v8063_v44, %v3952_v19  ;;  %v4158_v25 = vadd.f32 %v4157_v52, %v4105_v46  ;;  %v4160_v26 = vadd.f32 %v4159_v13, %v4107_v35  ;;  %v4362_v35 = vunpack.c.l.s4 %v5902_v3 }
 0x290   :  { %v4163_v51 = vpop.f32.mrf.mxu0  ;;  %v4101_v30 = vadd.f32 %v8061_v17, %v4048_v14  ;;  %v4205_v48 = vadd.f32 %v7904_v16, %v4152_v23  ;;  %v4109_v59 = vadd.f32 %v8070_v40, %v4056_v6 }
 0x291   :  { %v4216_v61 = vpop.f32.mrf.mxu1  ;;  %v4058_v55 = vadd.f32 %v8068_v56, %v4005_v63  ;;  %v4211_v47 = vadd.f32 %v7921_v1, %v4158_v25  ;;  %v4213_v1 = vadd.f32 %v7929_v27, %v4160_v26  ;;  %v4363_v26 = vunpack.c.0.s8 %v4362_v35 }
 0x292   :  { %v4154_v24 = vadd.f32 %v4153_v10, %v4101_v30  ;;  %v4162_v29 = vadd.f32 %v4161_v32, %v4109_v59 }
 0x293   :  { %v4111_v15 = vadd.f32 %v8071_v11, %v4058_v55 }
 0x294   :  { %v4207_v62 = vadd.f32 %v7914_v2, %v4154_v24  ;;  %v4215_v5 = vadd.f32 %v4214_v36, %v4162_v29  ;;  %v8072_v29 = vlaneseq }
 0x295   :  { %v4164_v14 = vadd.f32 %v4163_v51, %v4111_v15 }
 0x297   :  { %v4217_v30 = vadd.f32 %v4216_v61, %v4164_v14 }
 0x2c2   :  { %v4253_v42 = vpop.f32.mrf.mxu0 }
 0x2c3   :  { %v4306_v9 = vpop.f32.mrf.mxu1  ;;  %v4254_v54 = vadd.f32 %v4253_v42, %v4201_v58 }
 0x2c4   :  { %v4255_v38 = vpop.f32.mrf.mxu0 }
 0x2c5   :  { %v4308_v57 = vpop.f32.mrf.mxu1  ;;  %v4256_v8 = vadd.f32 %v4255_v38, %v4203_v49  ;;  %v7958_v21 = vadd.f32 %v4306_v9, %v4254_v54 }
 0x2c6   :  { %v4257_v34 = vpop.f32.mrf.mxu0 }
 0x2c7   :  { %v4310_v53 = vpop.f32.mrf.mxu1  ;;  %v4258_v10 = vadd.f32 %v4257_v34, %v4205_v48  ;;  %v7962_v18 = vadd.f32 %v4308_v57, %v4256_v8  ;;  %v4383_v4 = vmul.f32 %v7958_v21, %v7958_v21 }
 0x2c8   :  { %v4259_v16 = vpop.f32.mrf.mxu0 }
 0x2c9   :  { %v4312_v52 = vpop.f32.mrf.mxu1  ;;  %v7965_v60 = vadd.f32 %v4310_v53, %v4258_v10  ;;  %v4260_v7 = vadd.f32 %v4259_v16, %v4207_v62  ;;  %v4384_v20 = vmul.f32 %v7962_v18, %v7962_v18  ;;  %v4365_v16 = vshrl.u32 %v8072_v29, 7 }
 0x2ca   :  { %v4263_v19 = vpop.f32.mrf.mxu0 }
 0x2cb   :  { %v4316_v2 = vpop.f32.mrf.mxu1  ;;  %v4340_v0 = vadd.f32 %v7965_v60, %v7958_v21  ;;  %v4385_v13 = vmul.f32 %v7965_v60, %v7965_v60  ;;  %v7973_v32 = vadd.f32 %v4312_v52, %v4260_v7  ;;  %v4264_v41 = vadd.f32 %v4263_v19, %v4211_v47 }
 0x2cc   :  { %v4265_v45 = vpop.f32.mrf.mxu0 }
 0x2cd   :  { %v4318_v28 = vpop.f32.mrf.mxu1  ;;  %v4391_v50 = vadd.f32 %v4385_v13, %v4383_v4  ;;  %v4349_v31 = vadd.f32 %v7973_v32, %v7962_v18  ;;  %v4386_v51 = vmul.f32 %v7973_v32, %v7973_v32  ;;  %v7982_v17 = vadd.f32 %v4316_v2, %v4264_v41 }
 0x2ce   :  { %v4266_v22 = vadd.f32 %v4265_v45, %v4213_v1  ;;  %v4267_v58 = vpop.f32.mrf.mxu0  ;;  %v4366_v41 = vsub.s32 %v4363_v26, %v4365_v16 }
 0x2cf   :  { %v4320_v23 = vpop.f32.mrf.mxu1  ;;  %v4400_v27 = vadd.f32 %v4386_v51, %v4384_v20  ;;  %v4341_v36 = vadd.f32 %v4340_v0, %v7982_v17  ;;  %v4387_v44 = vmul.f32 %v7982_v17, %v7982_v17  ;;  %v4268_v63 = vadd.f32 %v4267_v58, %v4215_v5 }
 0x2d0   :  { %v7987_v12 = vadd.f32 %v4318_v28, %v4266_v22  ;;  %v4269_v33 = vpop.f32.mrf.mxu0  ;;  %v4382_v22 = vld [vmem:[#allocation4] sm:$0x3] }
 0x2d1   :  { %v4392_v43 = vadd.f32 %v4391_v50, %v4387_v44  ;;  %v7989_v6 = vadd.f32 %v4320_v23, %v4268_v63  ;;  %v4270_v42 = vadd.f32 %v4269_v33, %v4217_v30  ;;  %v4322_v37 = vpop.f32.mrf.mxu1  ;;  %v4450_v44 = vsub.s32 0, %v4365_v16 }
 0x2d2   :  { %v4350_v9 = vadd.f32 %v4349_v31, %v7987_v12  ;;  %v4388_v61 = vmul.f32 %v7987_v12, %v7987_v12  ;;  %v4339_v31 = vld [vmem:[#allocation3] sm:$0x3]  ;;  %v4454_v63 = vsub.s32 1, %v4365_v16 }
 0x2d3   :  { %v4342_v46 = vadd.f32 %v4341_v36, %v7989_v6  ;;  %v4389_v39 = vmul.f32 %v7989_v6, %v7989_v6  ;;  %v7997_v49 = vadd.f32 %v4322_v37, %v4270_v42 }
 0x2d4   :  { %v4401_v24 = vadd.f32 %v4400_v27, %v4388_v61 }
 0x2d5   :  { %v4343_v54 = vrot.slane %v4342_v46, 4  ;;  %v4393_v56 = vadd.f32 %v4392_v43, %v4389_v39  ;;  %v4351_v55 = vadd.f32 %v4350_v9, %v7997_v49  ;;  %v4390_v38 = vmul.f32 %v7997_v49, %v7997_v49 }
 0x2d7   :  { %v4344_v57 = vadd.f32 %v4343_v54, %v4342_v46  ;;  %v4394_v48 = vrot.slane %v4393_v56, 4  ;;  %v4352_v25 = vrot.slane %v4351_v55, 4  ;;  %v4402_v8 = vadd.f32 %v4401_v24, %v4390_v38 }
 0x2d9   :  { %v4345_v40 = vrot.slane %v4344_v57, 2  ;;  %v4395_v59 = vadd.f32 %v4394_v48, %v4393_v56  ;;  %v4353_v34 = vadd.f32 %v4352_v25, %v4351_v55  ;;  %v4403_v53 = vrot.slane %v4402_v8, 4 }
 0x2db   :  { %v4346_v62 = vadd.f32 %v4345_v40, %v4344_v57  ;;  %v4396_v10 = vrot.slane %v4395_v59, 2  ;;  %v4354_v11 = vrot.slane %v4353_v34, 2  ;;  %v4404_v15 = vadd.f32 %v4403_v53, %v4402_v8 }
 0x2dd   :  { %v4347_v52 = vrot.slane %v4346_v62, 1  ;;  %v4397_v47 = vadd.f32 %v4396_v10, %v4395_v59  ;;  %v4355_v7 = vadd.f32 %v4354_v11, %v4353_v34  ;;  %v4405_v14 = vrot.slane %v4404_v15, 2 }
 0x2df   :  { %v4398_v4 = vrot.slane %v4397_v47, 1  ;;  %v4356_v19 = vrot.slane %v4355_v7, 1  ;;  %v4406_v2 = vadd.f32 %v4405_v14, %v4404_v15  ;;  %v4348_v0 = vadd.f32 %v4347_v52, %v4346_v62 }
 0x2e1   :  { %v4357_v13 = vadd.f32 %v4356_v19, %v4355_v7  ;;  %v4407_v1 = vrot.slane %v4406_v2, 1  ;;  %v4399_v5 = vadd.f32 %v4398_v4, %v4397_v47 }
 0x2e3   :  { %v4360_v20 = vcombine.low %v4348_v0, %v4357_v13  ;;  %v4408_v45 = vadd.f32 %v4407_v1, %v4406_v2 }
 0x2e5   :  { %v4367_v28 = vrot.slane %v4360_v20, %v4366_v41  ;;  %v4411_v50 = vcombine.low %v4399_v5, %v4408_v45 }
 0x2e7   :  { %v4374_v51 = vrot.slane %v4367_v28, %v4366_v41  ;;  %v4418_v30 = vrot.slane %v4411_v50, %v4366_v41 }
 0x2e9   :  { %v4376_v58 = vadd.f32 %v4374_v51, %v4339_v31  ;;  %v4425_v23 = vrot.slane %v4418_v30, %v4366_v41 }
 0x2eb   :  { %4381 = vst.msk [vmem:[#allocation3] sm:$0x3] %vm7836_vm0, %v4376_v58  ;;  %v4427_v36 = vadd.f32 %v4425_v23, %v4382_v22 }
 0x2ed   :  { %4428 = vst.msk [vmem:[#allocation4] sm:$0x3] %vm7836_vm0, %v4427_v36 }
 0x2f2   :  { %v4432_v33 = vld [vmem:[#allocation3] sm:$0x3] }
 0x2f3   :  { %v4433_v43 = vmul.f32 0.03125, %v4432_v33 }
 0x2f4   :  { %v4434_v42 = vld [vmem:[#allocation4] sm:$0x3] }
 0x2f5   :  { %v4435_v9 = vmul.f32 0.03125, %v4434_v42  ;;  %v4436_v61 = vmul.f32 %v4433_v43, %v4433_v43  ;;  %v4451_v37 = vrot.slane %v4433_v43, %v4450_v44  ;;  %v4455_v46 = vrot.slane %v4433_v43, %v4454_v63 }
 0x2f7   :  { %v4437_v39 = vsub.f32 %v4435_v9, %v4436_v61  ;;  %v4458_v24 = vsub.f32 %v7958_v21, %v4451_v37  ;;  %v4459_v54 = vsub.f32 %v7962_v18, %v4455_v46  ;;  %v4460_v56 = vsub.f32 %v7965_v60, %v4451_v37 }
 0x2f8   :  { %v4461_v55 = vsub.f32 %v7973_v32, %v4455_v46  ;;  %v4462_v38 = vsub.f32 %v7982_v17, %v4451_v37  ;;  %v4463_v57 = vsub.f32 %v7987_v12, %v4455_v46  ;;  %v4464_v48 = vsub.f32 %v7989_v6, %v4451_v37 }
 0x2f9   :  { %v4438_v25 = vmax.f32 %v4437_v39, 0.0  ;;  %v4465_v8 = vsub.f32 %v7997_v49, %v4455_v46 }
 0x2fb   :  { %v4466_v3 = vadd.f32 1e-05, %v4438_v25 }
 0x2fd   :  { %5899 = vrsqrt.f32 %v4466_v3 }
 0x30a   :  { %v5900_v35 = vpop.eup %5899 }
 0x30b   :  { %v4472_v40 = vrot.slane %v5900_v35, %v4450_v44  ;;  %v4476_v21 = vrot.slane %v5900_v35, %v4454_v63 }
 0x30d   :  { %v4479_v59 = vmul.f32 %v4472_v40, %v4458_v24  ;;  %v4480_v18 = vmul.f32 %v4476_v21, %v4459_v54  ;;  %v4481_v34 = vmul.f32 %v4472_v40, %v4460_v56  ;;  %v4482_v60 = vmul.f32 %v4476_v21, %v4461_v55 }
 0x30e   :  { %v4483_v53 = vmul.f32 %v4472_v40, %v4462_v38  ;;  %v4484_v32 = vmul.f32 %v4476_v21, %v4463_v57  ;;  %v4485_v62 = vmul.f32 %v4472_v40, %v4464_v48  ;;  %v4486_v17 = vmul.f32 %v4476_v21, %v4465_v8 }
 0x30f   :  { %vm4487_vm1 = vcmp.ge.f32.partialorder %v4479_v59, 0.0  ;;  %vm4488_vm2 = vcmp.ge.f32.partialorder %v4480_v18, 0.0  ;;  %vm4489_vm3 = vcmp.ge.f32.partialorder %v4481_v34, 0.0  ;;  %vm4490_vm4 = vcmp.ge.f32.partialorder %v4482_v60, 0.0 }
 0x310   :  { %vm4491_vm5 = vcmp.ge.f32.partialorder %v4483_v53, 0.0  ;;  %vm4492_vm6 = vcmp.ge.f32.partialorder %v4484_v32, 0.0  ;;  %vm4493_vm7 = vcmp.ge.f32.partialorder %v4485_v62, 0.0  ;;  %vm4494_vm8 = vcmp.ge.f32.partialorder %v4486_v17, 0.0 }
 0x311   :  { %v4495_v12 = vmul.f32 0.2, %v4479_v59  ;;  %v4496_v6 = vmul.f32 0.2, %v4480_v18  ;;  %v4497_v49 = vmul.f32 0.2, %v4481_v34 }
 0x312   :  { %v4498_v10 = vmul.f32 0.2, %v4482_v60  ;;  %v4499_v11 = vmul.f32 0.2, %v4483_v53  ;;  %v4500_v15 = vmul.f32 0.2, %v4484_v32 }
 0x313   :  { %v4501_v26 = vmul.f32 0.2, %v4485_v62  ;;  %v4502_v29 = vmul.f32 0.2, %v4486_v17  ;;  %v4503_v16 = vsel %vm4487_vm1, %v4479_v59, %v4495_v12  ;;  %v4504_v52 = vsel %vm4488_vm2, %v4480_v18, %v4496_v6 }
 0x314   :  { %v4505_v47 = vsel %vm4489_vm3, %v4481_v34, %v4497_v49  ;;  %v4506_v7 = vsel %vm4490_vm4, %v4482_v60, %v4498_v10  ;;  %v4507_v14 = vsel %vm4491_vm5, %v4483_v53, %v4499_v11  ;;  %v4508_v4 = vsel %vm4492_vm6, %v4484_v32, %v4500_v15 }
 0x315   :  { %v4509_v19 = vsel %vm4493_vm7, %v4485_v62, %v4501_v26  ;;  %v4510_v2 = vsel %vm4494_vm8, %v4486_v17, %v4502_v29  ;;  %v5125_v0 = vpack.c.bf16 %v4504_v52, %v4503_v16  ;;  %v5126_v13 = vpack.c.bf16 %v4506_v7, %v4505_v47 }
 0x316   :  { %v5127_v41 = vpack.c.bf16 %v4508_v4, %v4507_v14  ;;  %v5128_v1 = vpack.c.bf16 %v4510_v2, %v4509_v19 }
 0x317   :  { %4535 = vst [vmem:[%s8037_s2] sm:$0xff] %v5125_v0  ;;  %4536 = vst [vmem:[%s8037_s2 + $0x8] sm:$0xff] %v5126_v13 }
 0x318   :  { %4537 = vst [vmem:[%s8037_s2 + $0x10] sm:$0xff] %v5127_v41  ;;  %4538 = vst [vmem:[%s8037_s2 + $0x18] sm:$0xff] %v5128_v1 }

</bundles_post_ra>
